<compile_context>
chip_gen: v7x
topology: tpu7x:2x2x1
jax: 0.10.0
libtpu: 0.0.40
codegen_flags: <defaults>
</compile_context>

<pallas_src>
import functools

import jax
import jax.numpy as jnp
from jax.experimental import pallas as pl
from jax.experimental.pallas import tpu as pltpu

INPUT_DIM = 64
NUM_ACTIONS = 6
LANE = 128
NEG_INF = -1e30
N_K4_CHUNKS = 4          # conv4 K (=4096) streamed in 4 x 1024 chunks

# (C_in, C_out, kernel, stride, pad) -- static, never traced.
CONV_CFG = (
    (2,   64,  4, 2, 1),   # 64 -> 32
    (64,  128, 4, 2, 1),   # 32 -> 16
    (128, 256, 4, 2, 1),   # 16 -> 8
    (256, 512, 4, 2, 1),   # 8  -> 4
    (512, 512, 4, 1, 0),   # 4  -> 1   => 512-d feature
)


def _round_up(x, m):
    return (x + m - 1) // m * m


# -----------------------------------------------------------------------------
# Single-step matmul + bias + ReLU kernel (conv1..conv3 on im2col columns)
# -----------------------------------------------------------------------------
def _mm_bias_relu_kernel(x_ref, w_ref, b_ref, o_ref):
    acc = jnp.dot(x_ref[...], w_ref[...], preferred_element_type=jnp.float32)
    o_ref[...] = jnp.maximum(acc + b_ref[...], 0.0).astype(o_ref.dtype)


def pallas_matmul_bias_relu(cols, w, b):
    """relu(cols @ w + b); cols:(M,K) bf16, w:(K,N) bf16, b:(1,N) f32 -> bf16."""
    m, k = cols.shape
    n = w.shape[1]
    return pl.pallas_call(
        _mm_bias_relu_kernel,
        out_shape=jax.ShapeDtypeStruct((m, n), jnp.bfloat16),
        grid_spec=pltpu.PrefetchScalarGridSpec(
            num_scalar_prefetch=0,
            grid=(1,),
            in_specs=[pl.BlockSpec((m, k), lambda i: (0, 0)),
                      pl.BlockSpec((k, n), lambda i: (0, 0)),
                      pl.BlockSpec((1, n), lambda i: (0, 0))],
            out_specs=pl.BlockSpec((m, n), lambda i: (0, 0)),
        ),
        compiler_params=pltpu.CompilerParams(
            dimension_semantics=("arbitrary",),
            # explicit limit (v5e's scoped default is only 16 MiB); at batch 2
            # the footprint is ~1 MiB.  TODO(synk): re-tile M for batch >> 16.
            vmem_limit_bytes=32 * 1024 * 1024,
        ),
    )(cols, w, b)


# -----------------------------------------------------------------------------
# Fused, pipelined tail kernel:
#   steps 0..n_k4-1      : conv4 K-chunk accumulation (w4 streamed)
#   step  n_k4-1         : h4 = relu(conv4)
#   steps n_k4..n_k4+15  : conv5 position accumulation (w5 streamed)
#   last step            : feat=relu(conv5) -> lin0 -> relu -> out_digit -> softmax
# -----------------------------------------------------------------------------
def _tail_kernel(x4_ref, w4_ref, b4_ref, w5_ref, b5_ref, y_ref,
                 w0f_ref, w0y_ref, b0_ref, w1_ref, b1_ref,
                 prob_ref, logit_ref,
                 acc4_ref, h4_ref, acc5_ref,
                 *, bp, n_k4, n_pos):
    s = pl.program_id(0)

    @pl.when(s == 0)
    def _init():
        acc4_ref[...] = jnp.zeros_like(acc4_ref)
        acc5_ref[...] = jnp.zeros_like(acc5_ref)

    # ---- Phase A: conv4, M = bp*n_pos (=128 at batch 2), K streamed --------
    @pl.when(s < n_k4)
    def _conv4():
        acc4_ref[...] += jnp.dot(x4_ref[...], w4_ref[0],
                                 preferred_element_type=jnp.float32)

    @pl.when(s == n_k4 - 1)
    def _conv4_done():
        # Full-tile f32 store; no packed-dtype / sub-tile writes.
        h4_ref[...] = jnp.maximum(acc4_ref[...] + b4_ref[...], 0.0)

    # ---- Phase B: conv5 = sum over 16 spatial positions, w5 streamed -------
    @pl.when(s >= n_k4)
    def _conv5():
        p = s - n_k4
        start = pl.multiple_of(p * bp, bp)                  # bp is a multiple of 8
        lhs = h4_ref[pl.ds(start, bp), :].astype(jnp.bfloat16)   # (bp, 512) aligned
        acc5_ref[...] += jnp.dot(lhs, w5_ref[0],
                                 preferred_element_type=jnp.float32)

    # ---- Final step: head + softmax (lane-dense (bp, 128) outputs) ---------
    @pl.when(s == n_k4 + n_pos - 1)
    def _head():
        feat = jnp.maximum(acc5_ref[...] + b5_ref[...], 0.0)      # (bp, 512) f32
        h0 = jnp.dot(feat.astype(jnp.bfloat16), w0f_ref[...],
                     preferred_element_type=jnp.float32)
        h0 = h0 + jnp.dot(y_ref[...], w0y_ref[...],
                          preferred_element_type=jnp.float32)
        h0 = jnp.maximum(h0 + b0_ref[...], 0.0)                   # (bp, 64)
        logits = jnp.dot(h0.astype(jnp.bfloat16), w1_ref[...],
                         preferred_element_type=jnp.float32) + b1_ref[...]
        # Explicit lane mask: padded action lanes never contaminate the softmax.
        lane = jax.lax.broadcasted_iota(jnp.int32, logits.shape, 1)
        logits = jnp.where(lane < NUM_ACTIONS, logits, NEG_INF)
        logit_ref[...] = logits
        m = jnp.max(logits, axis=-1, keepdims=True)
        e = jnp.exp(logits - m)
        prob_ref[...] = e / jnp.sum(e, axis=-1, keepdims=True)


def pallas_conv_tail_head(x4_pm, y_pad, w4, b4, w5, b5, w0f, w0y, b0, w1, b1, bp):
    n_k4, k_chunk, c4 = w4.shape            # (4, 1024, 512)
    n_pos, _, c5 = w5.shape                 # (16, 512, 512)
    m4 = x4_pm.shape[0]                     # bp * n_pos
    assert m4 == bp * n_pos
    nstep = n_k4 + n_pos

    kernel = functools.partial(_tail_kernel, bp=bp, n_k4=n_k4, n_pos=n_pos)

    grid_spec = pltpu.PrefetchScalarGridSpec(
        num_scalar_prefetch=0,
        grid=(nstep,),
        in_specs=[
            # x4 patches: chunked alongside w4's K; index clamps after phase A.
            pl.BlockSpec((m4, k_chunk),
                         lambda s: (0, jnp.minimum(s, n_k4 - 1))),
            # conv4 weight: streamed in n_k4 chunks (1 MiB each).
            pl.BlockSpec((1, k_chunk, c4),
                         lambda s: (jnp.minimum(s, n_k4 - 1), 0, 0)),
            pl.BlockSpec((1, c4), lambda s: (0, 0)),              # b4
            # conv5 weight: streamed per spatial position (512 KiB each).
            pl.BlockSpec((1, c4, c5),
                         lambda s: (jnp.maximum(s - n_k4, 0), 0, 0)),
            pl.BlockSpec((1, c5), lambda s: (0, 0)),              # b5
            pl.BlockSpec((bp, LANE), lambda s: (0, 0)),           # y (padded)
            pl.BlockSpec((c5, 64), lambda s: (0, 0)),             # w0_feat
            pl.BlockSpec((LANE, 64), lambda s: (0, 0)),           # w0_y
            pl.BlockSpec((1, 64), lambda s: (0, 0)),              # b0
            pl.BlockSpec((64, LANE), lambda s: (0, 0)),           # w1
            pl.BlockSpec((1, LANE), lambda s: (0, 0)),            # b1
        ],
        out_specs=[
            pl.BlockSpec((bp, LANE), lambda s: (0, 0)),           # action_prob
            pl.BlockSpec((bp, LANE), lambda s: (0, 0)),           # logits
        ],
        scratch_shapes=[
            pltpu.VMEM((m4, c4), jnp.float32),                    # conv4 acc
            pltpu.VMEM((m4, c4), jnp.float32),                    # relu(conv4)
            pltpu.VMEM((bp, c5), jnp.float32),                    # conv5 acc
        ],
    )
    prob, logits = pl.pallas_call(
        kernel,
        out_shape=(jax.ShapeDtypeStruct((bp, LANE), jnp.float32),
                   jax.ShapeDtypeStruct((bp, LANE), jnp.float32)),
        grid_spec=grid_spec,
        compiler_params=pltpu.CompilerParams(
            dimension_semantics=("arbitrary",),
            # peak resident footprint ~5 MiB (double-buffered chunks + scratch);
            # 32 MiB stays well under v7x's 64 MiB physical VMEM.
            vmem_limit_bytes=32 * 1024 * 1024,
        ),
    )(x4_pm, w4, b4, w5, b5, y_pad, w0f, w0y, b0, w1, b1)
    return prob, logits


# -----------------------------------------------------------------------------
# Parameters: arrays only (static config lives in CONV_CFG), pre-shaped at init.
# Conv weight rows follow conv_general_dilated_patches' (channel-major) patch
# feature ordering; w4 is pre-chunked along K, w5 is stored per spatial position.
# -----------------------------------------------------------------------------
def init_params(key):
    params = {"conv_w": [], "conv_b": []}
    for (cin, cout, k, _s, _p) in CONV_CFG[:3]:
        key, kw_, kb_ = jax.random.split(key, 3)
        fan_in = k * k * cin
        w = jax.random.normal(kw_, (fan_in, cout), jnp.float32) / (fan_in ** 0.5)
        params["conv_w"].append(w.astype(jnp.bfloat16))           # bf16 MXU operands
        params["conv_b"].append(0.01 * jax.random.normal(kb_, (1, cout), jnp.float32))

    cin4, cout4, k4, _, _ = CONV_CFG[3]
    key, kw4, kb4 = jax.random.split(key, 3)
    fan4 = k4 * k4 * cin4                                          # 4096
    w4 = jax.random.normal(kw4, (fan4, cout4), jnp.float32) / (fan4 ** 0.5)
    params["w4"] = w4.reshape(N_K4_CHUNKS, fan4 // N_K4_CHUNKS, cout4).astype(jnp.bfloat16)
    params["b4"] = 0.01 * jax.random.normal(kb4, (1, cout4), jnp.float32)

    cin5, cout5, k5, _, _ = CONV_CFG[4]
    key, kw5, kb5 = jax.random.split(key, 3)
    fan5 = k5 * k5 * cin5
    w5 = jax.random.normal(kw5, (k5 * k5, cin5, cout5), jnp.float32) / (fan5 ** 0.5)
    params["w5"] = w5.astype(jnp.bfloat16)                         # (16, 512, 512)
    params["b5"] = 0.01 * jax.random.normal(kb5, (1, cout5), jnp.float32)

    key, k0f, k0y, kb0, k1, kb1 = jax.random.split(key, 6)
    s0 = 1.0 / ((512.0 + NUM_ACTIONS) ** 0.5)
    params["w0_feat"] = (s0 * jax.random.normal(k0f, (512, 64), jnp.float32)).astype(jnp.bfloat16)
    w0y = s0 * jax.random.normal(k0y, (NUM_ACTIONS, 64), jnp.float32)
    params["w0_y"] = jnp.pad(w0y, ((0, LANE - NUM_ACTIONS), (0, 0))).astype(jnp.bfloat16)
    params["b0"] = 0.01 * jax.random.normal(kb0, (1, 64), jnp.float32)
    w1 = jax.random.normal(k1, (64, NUM_ACTIONS), jnp.float32) / 8.0
    params["w1"] = jnp.pad(w1, ((0, 0), (0, LANE - NUM_ACTIONS))).astype(jnp.bfloat16)
    b1 = 0.01 * jax.random.normal(kb1, (1, NUM_ACTIONS), jnp.float32)
    params["b1"] = jnp.pad(b1, ((0, 0), (0, LANE - NUM_ACTIONS)))  # padded lanes masked in-kernel
    return params


# -----------------------------------------------------------------------------
# Actor.forward
# -----------------------------------------------------------------------------
def actor_forward(params, x, y):
    # x.view(-1, 2, input_dim, input_dim); y.view(-1, 6)
    x = x.reshape(-1, 2, INPUT_DIM, INPUT_DIM)
    y = y.reshape(-1, NUM_ACTIONS).astype(jnp.float32)
    batch = x.shape[0]

    h = jnp.transpose(x, (0, 2, 3, 1)).astype(jnp.bfloat16)        # NHWC bf16

    # conv1..conv3: one-HLO patch extraction + single-step fused matmul/bias/
    # ReLU Pallas kernels, bf16 activations end-to-end.
    # TODO(synk): fusing conv1 into conv2 (lane-dense first writeback) needs
    # in-kernel patch extraction; kept separate for lowering robustness.
    for li in range(3):
        cin, cout, k, s, p = CONV_CFG[li]
        pat = jax.lax.conv_general_dilated_patches(
            h, (k, k), (s, s), [(p, p), (p, p)],
            dimension_numbers=("NHWC", "HWIO", "NHWC"))            # (B, Ho, Wo, k*k*cin)
        n, ho, wo, kk = pat.shape
        cols = pat.reshape(n * ho * wo, kk)
        out = pallas_matmul_bias_relu(cols, params["conv_w"][li], params["conv_b"][li])
        h = out.reshape(n, ho, wo, cout)

    # conv4 patches, position-major rows (row = position * BP + b), batch dim
    # zero-padded to a sublane multiple so every in-kernel slice is tile-aligned.
    cin4, cout4, k4, s4, p4 = CONV_CFG[3]
    pat4 = jax.lax.conv_general_dilated_patches(
        h, (k4, k4), (s4, s4), [(p4, p4), (p4, p4)],
        dimension_numbers=("NHWC", "HWIO", "NHWC"))                # (B, 4, 4, 4096)
    n, ho4, wo4, kk4 = pat4.shape
    bp = max(_round_up(batch, 8), 8)
    x4 = jnp.transpose(pat4, (1, 2, 0, 3))                         # (4, 4, B, 4096)
    if bp != batch:
        x4 = jnp.pad(x4, ((0, 0), (0, 0), (0, bp - batch), (0, 0)))
    x4_pm = x4.reshape(ho4 * wo4 * bp, kk4)

    y_pad = jnp.pad(y, ((0, bp - batch), (0, LANE - NUM_ACTIONS))).astype(jnp.bfloat16)

    prob_p, logit_p = pallas_conv_tail_head(
        x4_pm, y_pad,
        params["w4"], params["b4"], params["w5"], params["b5"],
        params["w0_feat"], params["w0_y"], params["b0"],
        params["w1"], params["b1"], bp=bp)

    # Padded batch rows / action lanes are dropped here.
    action_prob = prob_p[:batch, :NUM_ACTIONS]
    logits = logit_p[:batch, :NUM_ACTIONS]
    return action_prob, logits


if __name__ == "__main__":
    key = jax.random.PRNGKey(0)
    kp, kx, ky = jax.random.split(key, 3)
    params = init_params(kp)

    batch = 2
    x = jax.random.normal(kx, (batch, 2, INPUT_DIM, INPUT_DIM), jnp.float32)
    y = jax.random.normal(ky, (batch, NUM_ACTIONS), jnp.float32)

    fwd = jax.jit(actor_forward)
    action_prob, logits = fwd(params, x, y)
    jax.block_until_ready(action_prob)
    jax.block_until_ready(logits)

    assert action_prob.shape == (batch, NUM_ACTIONS)
    assert logits.shape == (batch, NUM_ACTIONS)
    assert bool(jnp.all(jnp.isfinite(logits)))
    assert bool(jnp.allclose(jnp.sum(action_prob, axis=1), 1.0, atol=1e-3))
    print("KERNEL_OK")
</pallas_src>

<mosaic_0001>
module attributes {stable_mosaic.version = 11 : i64} {
  func.func @_mm_bias_relu_kernel(%arg0: i32, %arg1: memref<2048x32xbf16, #tpu.memory_space<vmem>>, %arg2: memref<32x64xbf16, #tpu.memory_space<vmem>>, %arg3: memref<1x64xf32, #tpu.memory_space<vmem>>, %arg4: memref<2048x64xbf16, #tpu.memory_space<vmem>>) attributes {dimension_semantics = [#tpu.dimension_semantics<arbitrary>], iteration_bounds = array<i64: 1>, scalar_prefetch = 0 : i64, scratch_operands = 0 : i64, tpu.core_type = #tpu.core_type<tc>, window_params = [{pipeline_mode = #tpu.pipeline_mode<synchronous>, transform_indices = @transform_0, window_bounds = array<i64: 2048, 32>}, {pipeline_mode = #tpu.pipeline_mode<synchronous>, transform_indices = @transform_1, window_bounds = array<i64: 32, 64>}, {pipeline_mode = #tpu.pipeline_mode<synchronous>, transform_indices = @transform_2, window_bounds = array<i64: 1, 64>}, {pipeline_mode = #tpu.pipeline_mode<synchronous>, transform_indices = @transform_3, window_bounds = array<i64: 2048, 64>}]} {
    %c0 = arith.constant 0 : index
    %c0_0 = arith.constant 0 : index
    %0 = vector.load %arg1[%c0, %c0_0] : memref<2048x32xbf16, #tpu.memory_space<vmem>>, vector<2048x32xbf16>
    %c0_1 = arith.constant 0 : index
    %c0_2 = arith.constant 0 : index
    %1 = vector.load %arg2[%c0_1, %c0_2] : memref<32x64xbf16, #tpu.memory_space<vmem>>, vector<32x64xbf16>
    %cst = arith.constant dense<0.000000e+00> : vector<2048x64xf32>
    %2 = tpu.matmul %0, %1, %cst {dimension_numbers = #tpu.dot_dimension_numbers<[1], [0], [0], [1], [0, 0, 1, 1], [], []>} : vector<2048x32xbf16>, vector<32x64xbf16>, vector<2048x64xf32> -> vector<2048x64xf32>
    %c0_3 = arith.constant 0 : index
    %c0_4 = arith.constant 0 : index
    %3 = vector.load %arg3[%c0_3, %c0_4] : memref<1x64xf32, #tpu.memory_space<vmem>>, vector<1x64xf32>
    %4 = vector.broadcast %3 : vector<1x64xf32> to vector<2048x64xf32>
    %5 = arith.addf %2, %4 : vector<2048x64xf32>
    %cst_5 = arith.constant 0.000000e+00 : f32
    %6 = vector.broadcast %cst_5 : f32 to vector<2048x64xf32>
    %7 = arith.maximumf %5, %6 : vector<2048x64xf32>
    %8 = arith.truncf %7 : vector<2048x64xf32> to vector<2048x64xbf16>
    %c0_6 = arith.constant 0 : index
    %c0_7 = arith.constant 0 : index
    %9 = vector.load %arg4[%c0_6, %c0_7] : memref<2048x64xbf16, #tpu.memory_space<vmem>>, vector<2048x64xbf16>
    tpu.vector_store %arg4[%c0_6, %c0_7], %8 {strides = array<i32>} : memref<2048x64xbf16, #tpu.memory_space<vmem>>, vector<2048x64xbf16>,
    return
  }
  func.func @transform_0(%arg0: i32) -> (i32, i32) {
    %c0_i32 = arith.constant 0 : i32
    %c0_i32_0 = arith.constant 0 : i32
    %c0_i32_1 = arith.constant 0 : i32
    return %c0_i32, %c0_i32_0 : i32, i32
  }
  func.func @transform_1(%arg0: i32) -> (i32, i32) {
    %c0_i32 = arith.constant 0 : i32
    %c0_i32_0 = arith.constant 0 : i32
    %c0_i32_1 = arith.constant 0 : i32
    return %c0_i32, %c0_i32_0 : i32, i32
  }
  func.func @transform_2(%arg0: i32) -> (i32, i32) {
    %c0_i32 = arith.constant 0 : i32
    %c0_i32_0 = arith.constant 0 : i32
    %c0_i32_1 = arith.constant 0 : i32
    return %c0_i32, %c0_i32_0 : i32, i32
  }
  func.func @transform_3(%arg0: i32) -> (i32, i32) {
    %c0_i32 = arith.constant 0 : i32
    %c0_i32_0 = arith.constant 0 : i32
    %c0_i32_1 = arith.constant 0 : i32
    return %c0_i32, %c0_i32_0 : i32, i32
  }
}

module attributes {stable_mosaic.version = 11 : i64} {
  func.func @_mm_bias_relu_kernel(%arg0: i32, %arg1: memref<512x1024xbf16, #tpu.memory_space<vmem>>, %arg2: memref<1024x128xbf16, #tpu.memory_space<vmem>>, %arg3: memref<1x128xf32, #tpu.memory_space<vmem>>, %arg4: memref<512x128xbf16, #tpu.memory_space<vmem>>) attributes {dimension_semantics = [#tpu.dimension_semantics<arbitrary>], iteration_bounds = array<i64: 1>, scalar_prefetch = 0 : i64, scratch_operands = 0 : i64, tpu.core_type = #tpu.core_type<tc>, window_params = [{pipeline_mode = #tpu.pipeline_mode<synchronous>, transform_indices = @transform_0, window_bounds = array<i64: 512, 1024>}, {pipeline_mode = #tpu.pipeline_mode<synchronous>, transform_indices = @transform_1, window_bounds = array<i64: 1024, 128>}, {pipeline_mode = #tpu.pipeline_mode<synchronous>, transform_indices = @transform_2, window_bounds = array<i64: 1, 128>}, {pipeline_mode = #tpu.pipeline_mode<synchronous>, transform_indices = @transform_3, window_bounds = array<i64: 512, 128>}]} {
    %c0 = arith.constant 0 : index
    %c0_0 = arith.constant 0 : index
    %0 = vector.load %arg1[%c0, %c0_0] : memref<512x1024xbf16, #tpu.memory_space<vmem>>, vector<512x1024xbf16>
    %c0_1 = arith.constant 0 : index
    %c0_2 = arith.constant 0 : index
    %1 = vector.load %arg2[%c0_1, %c0_2] : memref<1024x128xbf16, #tpu.memory_space<vmem>>, vector<1024x128xbf16>
    %cst = arith.constant dense<0.000000e+00> : vector<512x128xf32>
    %2 = tpu.matmul %0, %1, %cst {dimension_numbers = #tpu.dot_dimension_numbers<[1], [0], [0], [1], [0, 0, 1, 1], [], []>} : vector<512x1024xbf16>, vector<1024x128xbf16>, vector<512x128xf32> -> vector<512x128xf32>
    %c0_3 = arith.constant 0 : index
    %c0_4 = arith.constant 0 : index
    %3 = vector.load %arg3[%c0_3, %c0_4] : memref<1x128xf32, #tpu.memory_space<vmem>>, vector<1x128xf32>
    %4 = vector.broadcast %3 : vector<1x128xf32> to vector<512x128xf32>
    %5 = arith.addf %2, %4 : vector<512x128xf32>
    %cst_5 = arith.constant 0.000000e+00 : f32
    %6 = vector.broadcast %cst_5 : f32 to vector<512x128xf32>
    %7 = arith.maximumf %5, %6 : vector<512x128xf32>
    %8 = arith.truncf %7 : vector<512x128xf32> to vector<512x128xbf16>
    %c0_6 = arith.constant 0 : index
    %c0_7 = arith.constant 0 : index
    %9 = vector.load %arg4[%c0_6, %c0_7] : memref<512x128xbf16, #tpu.memory_space<vmem>>, vector<512x128xbf16>
    tpu.vector_store %arg4[%c0_6, %c0_7], %8 {strides = array<i32>} : memref<512x128xbf16, #tpu.memory_space<vmem>>, vector<512x128xbf16>,
    return
  }
  func.func @transform_0(%arg0: i32) -> (i32, i32) {
    %c0_i32 = arith.constant 0 : i32
    %c0_i32_0 = arith.constant 0 : i32
    %c0_i32_1 = arith.constant 0 : i32
    return %c0_i32, %c0_i32_0 : i32, i32
  }
  func.func @transform_1(%arg0: i32) -> (i32, i32) {
    %c0_i32 = arith.constant 0 : i32
    %c0_i32_0 = arith.constant 0 : i32
    %c0_i32_1 = arith.constant 0 : i32
    return %c0_i32, %c0_i32_0 : i32, i32
  }
  func.func @transform_2(%arg0: i32) -> (i32, i32) {
    %c0_i32 = arith.constant 0 : i32
    %c0_i32_0 = arith.constant 0 : i32
    %c0_i32_1 = arith.constant 0 : i32
    return %c0_i32, %c0_i32_0 : i32, i32
  }
  func.func @transform_3(%arg0: i32) -> (i32, i32) {
    %c0_i32 = arith.constant 0 : i32
    %c0_i32_0 = arith.constant 0 : i32
    %c0_i32_1 = arith.constant 0 : i32
    return %c0_i32, %c0_i32_0 : i32, i32
  }
}

module attributes {stable_mosaic.version = 11 : i64} {
  func.func @_mm_bias_relu_kernel(%arg0: i32, %arg1: memref<128x2048xbf16, #tpu.memory_space<vmem>>, %arg2: memref<2048x256xbf16, #tpu.memory_space<vmem>>, %arg3: memref<1x256xf32, #tpu.memory_space<vmem>>, %arg4: memref<128x256xbf16, #tpu.memory_space<vmem>>) attributes {dimension_semantics = [#tpu.dimension_semantics<arbitrary>], iteration_bounds = array<i64: 1>, scalar_prefetch = 0 : i64, scratch_operands = 0 : i64, tpu.core_type = #tpu.core_type<tc>, window_params = [{pipeline_mode = #tpu.pipeline_mode<synchronous>, transform_indices = @transform_0, window_bounds = array<i64: 128, 2048>}, {pipeline_mode = #tpu.pipeline_mode<synchronous>, transform_indices = @transform_1, window_bounds = array<i64: 2048, 256>}, {pipeline_mode = #tpu.pipeline_mode<synchronous>, transform_indices = @transform_2, window_bounds = array<i64: 1, 256>}, {pipeline_mode = #tpu.pipeline_mode<synchronous>, transform_indices = @transform_3, window_bounds = array<i64: 128, 256>}]} {
    %c0 = arith.constant 0 : index
    %c0_0 = arith.constant 0 : index
    %0 = vector.load %arg1[%c0, %c0_0] : memref<128x2048xbf16, #tpu.memory_space<vmem>>, vector<128x2048xbf16>
    %c0_1 = arith.constant 0 : index
    %c0_2 = arith.constant 0 : index
    %1 = vector.load %arg2[%c0_1, %c0_2] : memref<2048x256xbf16, #tpu.memory_space<vmem>>, vector<2048x256xbf16>
    %cst = arith.constant dense<0.000000e+00> : vector<128x256xf32>
    %2 = tpu.matmul %0, %1, %cst {dimension_numbers = #tpu.dot_dimension_numbers<[1], [0], [0], [1], [0, 0, 1, 1], [], []>} : vector<128x2048xbf16>, vector<2048x256xbf16>, vector<128x256xf32> -> vector<128x256xf32>
    %c0_3 = arith.constant 0 : index
    %c0_4 = arith.constant 0 : index
    %3 = vector.load %arg3[%c0_3, %c0_4] : memref<1x256xf32, #tpu.memory_space<vmem>>, vector<1x256xf32>
    %4 = vector.broadcast %3 : vector<1x256xf32> to vector<128x256xf32>
    %5 = arith.addf %2, %4 : vector<128x256xf32>
    %cst_5 = arith.constant 0.000000e+00 : f32
    %6 = vector.broadcast %cst_5 : f32 to vector<128x256xf32>
    %7 = arith.maximumf %5, %6 : vector<128x256xf32>
    %8 = arith.truncf %7 : vector<128x256xf32> to vector<128x256xbf16>
    %c0_6 = arith.constant 0 : index
    %c0_7 = arith.constant 0 : index
    %9 = vector.load %arg4[%c0_6, %c0_7] : memref<128x256xbf16, #tpu.memory_space<vmem>>, vector<128x256xbf16>
    tpu.vector_store %arg4[%c0_6, %c0_7], %8 {strides = array<i32>} : memref<128x256xbf16, #tpu.memory_space<vmem>>, vector<128x256xbf16>,
    return
  }
  func.func @transform_0(%arg0: i32) -> (i32, i32) {
    %c0_i32 = arith.constant 0 : i32
    %c0_i32_0 = arith.constant 0 : i32
    %c0_i32_1 = arith.constant 0 : i32
    return %c0_i32, %c0_i32_0 : i32, i32
  }
  func.func @transform_1(%arg0: i32) -> (i32, i32) {
    %c0_i32 = arith.constant 0 : i32
    %c0_i32_0 = arith.constant 0 : i32
    %c0_i32_1 = arith.constant 0 : i32
    return %c0_i32, %c0_i32_0 : i32, i32
  }
  func.func @transform_2(%arg0: i32) -> (i32, i32) {
    %c0_i32 = arith.constant 0 : i32
    %c0_i32_0 = arith.constant 0 : i32
    %c0_i32_1 = arith.constant 0 : i32
    return %c0_i32, %c0_i32_0 : i32, i32
  }
  func.func @transform_3(%arg0: i32) -> (i32, i32) {
    %c0_i32 = arith.constant 0 : i32
    %c0_i32_0 = arith.constant 0 : i32
    %c0_i32_1 = arith.constant 0 : i32
    return %c0_i32, %c0_i32_0 : i32, i32
  }
}

module attributes {stable_mosaic.version = 11 : i64} {
  func.func @_tail_kernel(%arg0: i32, %arg1: memref<128x1024xbf16, #tpu.memory_space<vmem>>, %arg2: memref<1x1024x512xbf16, #tpu.memory_space<vmem>>, %arg3: memref<1x512xf32, #tpu.memory_space<vmem>>, %arg4: memref<1x512x512xbf16, #tpu.memory_space<vmem>>, %arg5: memref<1x512xf32, #tpu.memory_space<vmem>>, %arg6: memref<8x128xbf16, #tpu.memory_space<vmem>>, %arg7: memref<512x64xbf16, #tpu.memory_space<vmem>>, %arg8: memref<128x64xbf16, #tpu.memory_space<vmem>>, %arg9: memref<1x64xf32, #tpu.memory_space<vmem>>, %arg10: memref<64x128xbf16, #tpu.memory_space<vmem>>, %arg11: memref<1x128xf32, #tpu.memory_space<vmem>>, %arg12: memref<8x128xf32, #tpu.memory_space<vmem>>, %arg13: memref<8x128xf32, #tpu.memory_space<vmem>>, %arg14: memref<128x512xf32, #tpu.memory_space<vmem>>, %arg15: memref<128x512xf32, #tpu.memory_space<vmem>>, %arg16: memref<8x512xf32, #tpu.memory_space<vmem>>) attributes {dimension_semantics = [#tpu.dimension_semantics<arbitrary>], iteration_bounds = array<i64: 20>, scalar_prefetch = 0 : i64, scratch_operands = 3 : i64, tpu.core_type = #tpu.core_type<tc>, window_params = [{transform_indices = @transform_0, window_bounds = array<i64: 128, 1024>}, {transform_indices = @transform_1, window_bounds = array<i64: 1, 1024, 512>}, {pipeline_mode = #tpu.pipeline_mode<synchronous>, transform_indices = @transform_2, window_bounds = array<i64: 1, 512>}, {transform_indices = @transform_3, window_bounds = array<i64: 1, 512, 512>}, {pipeline_mode = #tpu.pipeline_mode<synchronous>, transform_indices = @transform_4, window_bounds = array<i64: 1, 512>}, {pipeline_mode = #tpu.pipeline_mode<synchronous>, transform_indices = @transform_5, window_bounds = array<i64: 8, 128>}, {pipeline_mode = #tpu.pipeline_mode<synchronous>, transform_indices = @transform_6, window_bounds = array<i64: 512, 64>}, {pipeline_mode = #tpu.pipeline_mode<synchronous>, transform_indices = @transform_7, window_bounds = array<i64: 128, 64>}, {pipeline_mode = #tpu.pipeline_mode<synchronous>, transform_indices = @transform_8, window_bounds = array<i64: 1, 64>}, {pipeline_mode = #tpu.pipeline_mode<synchronous>, transform_indices = @transform_9, window_bounds = array<i64: 64, 128>}, {pipeline_mode = #tpu.pipeline_mode<synchronous>, transform_indices = @transform_10, window_bounds = array<i64: 1, 128>}, {pipeline_mode = #tpu.pipeline_mode<synchronous>, transform_indices = @transform_11, window_bounds = array<i64: 8, 128>}, {pipeline_mode = #tpu.pipeline_mode<synchronous>, transform_indices = @transform_12, window_bounds = array<i64: 8, 128>}]} {
    %c0_i32 = arith.constant 0 : i32
    %0 = arith.cmpi eq, %arg0, %c0_i32 : i32
    %1 = arith.extui %0 : i1 to i32
    %c0_i32_0 = arith.constant 0 : i32
    %2 = arith.cmpi ne, %1, %c0_i32_0 : i32
    scf.if %2 {
      %cst = arith.constant 0.000000e+00 : f32
      %15 = vector.broadcast %cst : f32 to vector<128x512xf32>
      %c0 = arith.constant 0 : index
      %c0_6 = arith.constant 0 : index
      %16 = vector.load %arg14[%c0, %c0_6] : memref<128x512xf32, #tpu.memory_space<vmem>>, vector<128x512xf32>
      tpu.vector_store %arg14[%c0, %c0_6], %15 {strides = array<i32>} : memref<128x512xf32, #tpu.memory_space<vmem>>, vector<128x512xf32>,
      %cst_7 = arith.constant 0.000000e+00 : f32
      %17 = vector.broadcast %cst_7 : f32 to vector<8x512xf32>
      %c0_8 = arith.constant 0 : index
      %c0_9 = arith.constant 0 : index
      %18 = vector.load %arg16[%c0_8, %c0_9] : memref<8x512xf32, #tpu.memory_space<vmem>>, vector<8x512xf32>
      tpu.vector_store %arg16[%c0_8, %c0_9], %17 {strides = array<i32>} : memref<8x512xf32, #tpu.memory_space<vmem>>, vector<8x512xf32>,
    } else {
    }
    %c4_i32 = arith.constant 4 : i32
    %3 = arith.cmpi slt, %arg0, %c4_i32 : i32
    %4 = arith.extui %3 : i1 to i32
    %c0_i32_1 = arith.constant 0 : i32
    %5 = arith.cmpi ne, %4, %c0_i32_1 : i32
    scf.if %5 {
      %c0 = arith.constant 0 : index
      %c0_6 = arith.constant 0 : index
      %15 = vector.load %arg14[%c0, %c0_6] : memref<128x512xf32, #tpu.memory_space<vmem>>, vector<128x512xf32>
      %c0_7 = arith.constant 0 : index
      %c0_8 = arith.constant 0 : index
      %16 = vector.load %arg1[%c0_7, %c0_8] : memref<128x1024xbf16, #tpu.memory_space<vmem>>, vector<128x1024xbf16>
      %c0_9 = arith.constant 0 : index
      %c0_10 = arith.constant 0 : index
      %c0_11 = arith.constant 0 : index
      %17 = vector.load %arg2[%c0_9, %c0_10, %c0_11] : memref<1x1024x512xbf16, #tpu.memory_space<vmem>>, vector<1x1024x512xbf16>
      %18 = vector.shape_cast %17 : vector<1x1024x512xbf16> to vector<1024x512xbf16>
      %cst = arith.constant dense<0.000000e+00> : vector<128x512xf32>
      %19 = tpu.matmul %16, %18, %cst {dimension_numbers = #tpu.dot_dimension_numbers<[1], [0], [0], [1], [0, 0, 1, 1], [], []>} : vector<128x1024xbf16>, vector<1024x512xbf16>, vector<128x512xf32> -> vector<128x512xf32>
      %20 = arith.addf %15, %19 : vector<128x512xf32>
      %c0_12 = arith.constant 0 : index
      %c0_13 = arith.constant 0 : index
      %21 = vector.load %arg14[%c0_12, %c0_13] : memref<128x512xf32, #tpu.memory_space<vmem>>, vector<128x512xf32>
      tpu.vector_store %arg14[%c0_12, %c0_13], %20 {strides = array<i32>} : memref<128x512xf32, #tpu.memory_space<vmem>>, vector<128x512xf32>,
    } else {
    }
    %c3_i32 = arith.constant 3 : i32
    %6 = arith.cmpi eq, %arg0, %c3_i32 : i32
    %7 = arith.extui %6 : i1 to i32
    %c0_i32_2 = arith.constant 0 : i32
    %8 = arith.cmpi ne, %7, %c0_i32_2 : i32
    scf.if %8 {
      %c0 = arith.constant 0 : index
      %c0_6 = arith.constant 0 : index
      %15 = vector.load %arg14[%c0, %c0_6] : memref<128x512xf32, #tpu.memory_space<vmem>>, vector<128x512xf32>
      %c0_7 = arith.constant 0 : index
      %c0_8 = arith.constant 0 : index
      %16 = vector.load %arg3[%c0_7, %c0_8] : memref<1x512xf32, #tpu.memory_space<vmem>>, vector<1x512xf32>
      %17 = vector.broadcast %16 : vector<1x512xf32> to vector<128x512xf32>
      %18 = arith.addf %15, %17 : vector<128x512xf32>
      %cst = arith.constant 0.000000e+00 : f32
      %19 = vector.broadcast %cst : f32 to vector<128x512xf32>
      %20 = arith.maximumf %18, %19 : vector<128x512xf32>
      %c0_9 = arith.constant 0 : index
      %c0_10 = arith.constant 0 : index
      %21 = vector.load %arg15[%c0_9, %c0_10] : memref<128x512xf32, #tpu.memory_space<vmem>>, vector<128x512xf32>
      tpu.vector_store %arg15[%c0_9, %c0_10], %20 {strides = array<i32>} : memref<128x512xf32, #tpu.memory_space<vmem>>, vector<128x512xf32>,
    } else {
    }
    %c4_i32_3 = arith.constant 4 : i32
    %9 = arith.cmpi sge, %arg0, %c4_i32_3 : i32
    %10 = arith.extui %9 : i1 to i32
    %c0_i32_4 = arith.constant 0 : i32
    %11 = arith.cmpi ne, %10, %c0_i32_4 : i32
    scf.if %11 {
      %c4_i32_6 = arith.constant 4 : i32
      %15 = arith.subi %arg0, %c4_i32_6 : i32
      %c8_i32 = arith.constant 8 : i32
      %16 = arith.muli %15, %c8_i32 : i32
      %17 = tpu.assume_multiple %16, 8 : i32
      %18 = arith.index_cast %17 : i32 to index
      %c0 = arith.constant 0 : index
      %19 = vector.load %arg15[%18, %c0] : memref<128x512xf32, #tpu.memory_space<vmem>>, vector<8x512xf32>
      %20 = arith.truncf %19 : vector<8x512xf32> to vector<8x512xbf16>
      %c0_7 = arith.constant 0 : index
      %c0_8 = arith.constant 0 : index
      %21 = vector.load %arg16[%c0_7, %c0_8] : memref<8x512xf32, #tpu.memory_space<vmem>>, vector<8x512xf32>
      %c0_9 = arith.constant 0 : index
      %c0_10 = arith.constant 0 : index
      %c0_11 = arith.constant 0 : index
      %22 = vector.load %arg4[%c0_9, %c0_10, %c0_11] : memref<1x512x512xbf16, #tpu.memory_space<vmem>>, vector<1x512x512xbf16>
      %23 = vector.shape_cast %22 : vector<1x512x512xbf16> to vector<512x512xbf16>
      %cst = arith.constant dense<0.000000e+00> : vector<8x512xf32>
      %24 = tpu.matmul %20, %23, %cst {dimension_numbers = #tpu.dot_dimension_numbers<[1], [0], [0], [1], [0, 0, 1, 1], [], []>} : vector<8x512xbf16>, vector<512x512xbf16>, vector<8x512xf32> -> vector<8x512xf32>
      %25 = arith.addf %21, %24 : vector<8x512xf32>
      %c0_12 = arith.constant 0 : index
      %c0_13 = arith.constant 0 : index
      %26 = vector.load %arg16[%c0_12, %c0_13] : memref<8x512xf32, #tpu.memory_space<vmem>>, vector<8x512xf32>
      tpu.vector_store %arg16[%c0_12, %c0_13], %25 {strides = array<i32>} : memref<8x512xf32, #tpu.memory_space<vmem>>, vector<8x512xf32>,
    } else {
    }
    %c19_i32 = arith.constant 19 : i32
    %12 = arith.cmpi eq, %arg0, %c19_i32 : i32
    %13 = arith.extui %12 : i1 to i32
    %c0_i32_5 = arith.constant 0 : i32
    %14 = arith.cmpi ne, %13, %c0_i32_5 : i32
    scf.if %14 {
      %c0 = arith.constant 0 : index
      %c0_6 = arith.constant 0 : index
      %15 = vector.load %arg16[%c0, %c0_6] : memref<8x512xf32, #tpu.memory_space<vmem>>, vector<8x512xf32>
      %c0_7 = arith.constant 0 : index
      %c0_8 = arith.constant 0 : index
      %16 = vector.load %arg5[%c0_7, %c0_8] : memref<1x512xf32, #tpu.memory_space<vmem>>, vector<1x512xf32>
      %17 = vector.broadcast %16 : vector<1x512xf32> to vector<8x512xf32>
      %18 = arith.addf %15, %17 : vector<8x512xf32>
      %cst = arith.constant 0.000000e+00 : f32
      %19 = vector.broadcast %cst : f32 to vector<8x512xf32>
      %20 = arith.maximumf %18, %19 : vector<8x512xf32>
      %21 = arith.truncf %20 : vector<8x512xf32> to vector<8x512xbf16>
      %c0_9 = arith.constant 0 : index
      %c0_10 = arith.constant 0 : index
      %22 = vector.load %arg7[%c0_9, %c0_10] : memref<512x64xbf16, #tpu.memory_space<vmem>>, vector<512x64xbf16>
      %cst_11 = arith.constant dense<0.000000e+00> : vector<8x64xf32>
      %23 = tpu.matmul %21, %22, %cst_11 {dimension_numbers = #tpu.dot_dimension_numbers<[1], [0], [0], [1], [0, 0, 1, 1], [], []>} : vector<8x512xbf16>, vector<512x64xbf16>, vector<8x64xf32> -> vector<8x64xf32>
      %c0_12 = arith.constant 0 : index
      %c0_13 = arith.constant 0 : index
      %24 = vector.load %arg6[%c0_12, %c0_13] : memref<8x128xbf16, #tpu.memory_space<vmem>>, vector<8x128xbf16>
      %c0_14 = arith.constant 0 : index
      %c0_15 = arith.constant 0 : index
      %25 = vector.load %arg8[%c0_14, %c0_15] : memref<128x64xbf16, #tpu.memory_space<vmem>>, vector<128x64xbf16>
      %cst_16 = arith.constant dense<0.000000e+00> : vector<8x64xf32>
      %26 = tpu.matmul %24, %25, %cst_16 {dimension_numbers = #tpu.dot_dimension_numbers<[1], [0], [0], [1], [0, 0, 1, 1], [], []>} : vector<8x128xbf16>, vector<128x64xbf16>, vector<8x64xf32> -> vector<8x64xf32>
      %27 = arith.addf %23, %26 : vector<8x64xf32>
      %c0_17 = arith.constant 0 : index
      %c0_18 = arith.constant 0 : index
      %28 = vector.load %arg9[%c0_17, %c0_18] : memref<1x64xf32, #tpu.memory_space<vmem>>, vector<1x64xf32>
      %29 = vector.broadcast %28 : vector<1x64xf32> to vector<8x64xf32>
      %30 = arith.addf %27, %29 : vector<8x64xf32>
      %cst_19 = arith.constant 0.000000e+00 : f32
      %31 = vector.broadcast %cst_19 : f32 to vector<8x64xf32>
      %32 = arith.maximumf %30, %31 : vector<8x64xf32>
      %33 = arith.truncf %32 : vector<8x64xf32> to vector<8x64xbf16>
      %c0_20 = arith.constant 0 : index
      %c0_21 = arith.constant 0 : index
      %34 = vector.load %arg10[%c0_20, %c0_21] : memref<64x128xbf16, #tpu.memory_space<vmem>>, vector<64x128xbf16>
      %cst_22 = arith.constant dense<0.000000e+00> : vector<8x128xf32>
      %35 = tpu.matmul %33, %34, %cst_22 {dimension_numbers = #tpu.dot_dimension_numbers<[1], [0], [0], [1], [0, 0, 1, 1], [], []>} : vector<8x64xbf16>, vector<64x128xbf16>, vector<8x128xf32> -> vector<8x128xf32>
      %c0_23 = arith.constant 0 : index
      %c0_24 = arith.constant 0 : index
      %36 = vector.load %arg11[%c0_23, %c0_24] : memref<1x128xf32, #tpu.memory_space<vmem>>, vector<1x128xf32>
      %37 = vector.broadcast %36 : vector<1x128xf32> to vector<8x128xf32>
      %38 = arith.addf %35, %37 : vector<8x128xf32>
      %39 = tpu.iota {dimensions = array<i32: 1>} : vector<8x128xi32>
      %c6_i32 = arith.constant 6 : i32
      %40 = vector.broadcast %c6_i32 : i32 to vector<8x128xi32>
      %41 = arith.cmpi slt, %39, %40 : vector<8x128xi32>
      %cst_25 = arith.constant -1.000000e+30 : f32
      %42 = vector.broadcast %cst_25 : f32 to vector<8x128xf32>
      %43 = arith.select %41, %38, %42 : vector<8x128xi1>, vector<8x128xf32>
      %c0_26 = arith.constant 0 : index
      %c0_27 = arith.constant 0 : index
      %44 = vector.load %arg13[%c0_26, %c0_27] : memref<8x128xf32, #tpu.memory_space<vmem>>, vector<8x128xf32>
      tpu.vector_store %arg13[%c0_26, %c0_27], %43 {strides = array<i32>} : memref<8x128xf32, #tpu.memory_space<vmem>>, vector<8x128xf32>,
      %cst_28 = arith.constant dense<0xFF800000> : vector<8xf32>
      %45 = vector.multi_reduction <maximumf>, %43, %cst_28 [1] : vector<8x128xf32> to vector<8xf32>
      %46 = vector.shape_cast %45 : vector<8xf32> to vector<8x1xf32>
      %47 = vector.broadcast %46 : vector<8x1xf32> to vector<8x128xf32>
      %48 = arith.subf %43, %47 : vector<8x128xf32>
      %49 = math.exp %48 : vector<8x128xf32>
      %cst_29 = arith.constant dense<0.000000e+00> : vector<8xf32>
      %50 = vector.multi_reduction <add>, %49, %cst_29 [1] : vector<8x128xf32> to vector<8xf32>
      %51 = vector.shape_cast %50 : vector<8xf32> to vector<8x1xf32>
      %52 = vector.broadcast %51 : vector<8x1xf32> to vector<8x128xf32>
      %53 = arith.divf %49, %52 : vector<8x128xf32>
      %c0_30 = arith.constant 0 : index
      %c0_31 = arith.constant 0 : index
      %54 = vector.load %arg12[%c0_30, %c0_31] : memref<8x128xf32, #tpu.memory_space<vmem>>, vector<8x128xf32>
      tpu.vector_store %arg12[%c0_30, %c0_31], %53 {strides = array<i32>} : memref<8x128xf32, #tpu.memory_space<vmem>>, vector<8x128xf32>,
    } else {
    }
    return
  }
  func.func @transform_0(%arg0: i32) -> (i32, i32) {
    %c3_i32 = arith.constant 3 : i32
    %0 = arith.minsi %arg0, %c3_i32 : i32
    %c0_i32 = arith.constant 0 : i32
    %c0_i32_0 = arith.constant 0 : i32
    return %c0_i32, %0 : i32, i32
  }
  func.func @transform_1(%arg0: i32) -> (i32, i32, i32) {
    %c3_i32 = arith.constant 3 : i32
    %0 = arith.minsi %arg0, %c3_i32 : i32
    %c0_i32 = arith.constant 0 : i32
    %c0_i32_0 = arith.constant 0 : i32
    %c0_i32_1 = arith.constant 0 : i32
    return %0, %c0_i32, %c0_i32_0 : i32, i32, i32
  }
  func.func @transform_2(%arg0: i32) -> (i32, i32) {
    %c0_i32 = arith.constant 0 : i32
    %c0_i32_0 = arith.constant 0 : i32
    %c0_i32_1 = arith.constant 0 : i32
    return %c0_i32, %c0_i32_0 : i32, i32
  }
  func.func @transform_3(%arg0: i32) -> (i32, i32, i32) {
    %c4_i32 = arith.constant 4 : i32
    %0 = arith.subi %arg0, %c4_i32 : i32
    %c0_i32 = arith.constant 0 : i32
    %1 = arith.maxsi %0, %c0_i32 : i32
    %c0_i32_0 = arith.constant 0 : i32
    %c0_i32_1 = arith.constant 0 : i32
    %c0_i32_2 = arith.constant 0 : i32
    return %1, %c0_i32_0, %c0_i32_1 : i32, i32, i32
  }
  func.func @transform_4(%arg0: i32) -> (i32, i32) {
    %c0_i32 = arith.constant 0 : i32
    %c0_i32_0 = arith.constant 0 : i32
    %c0_i32_1 = arith.constant 0 : i32
    return %c0_i32, %c0_i32_0 : i32, i32
  }
  func.func @transform_5(%arg0: i32) -> (i32, i32) {
    %c0_i32 = arith.constant 0 : i32
    %c0_i32_0 = arith.constant 0 : i32
    %c0_i32_1 = arith.constant 0 : i32
    return %c0_i32, %c0_i32_0 : i32, i32
  }
  func.func @transform_6(%arg0: i32) -> (i32, i32) {
    %c0_i32 = arith.constant 0 : i32
    %c0_i32_0 = arith.constant 0 : i32
    %c0_i32_1 = arith.constant 0 : i32
    return %c0_i32, %c0_i32_0 : i32, i32
  }
  func.func @transform_7(%arg0: i32) -> (i32, i32) {
    %c0_i32 = arith.constant 0 : i32
    %c0_i32_0 = arith.constant 0 : i32
    %c0_i32_1 = arith.constant 0 : i32
    return %c0_i32, %c0_i32_0 : i32, i32
  }
  func.func @transform_8(%arg0: i32) -> (i32, i32) {
    %c0_i32 = arith.constant 0 : i32
    %c0_i32_0 = arith.constant 0 : i32
    %c0_i32_1 = arith.constant 0 : i32
    return %c0_i32, %c0_i32_0 : i32, i32
  }
  func.func @transform_9(%arg0: i32) -> (i32, i32) {
    %c0_i32 = arith.constant 0 : i32
    %c0_i32_0 = arith.constant 0 : i32
    %c0_i32_1 = arith.constant 0 : i32
    return %c0_i32, %c0_i32_0 : i32, i32
  }
  func.func @transform_10(%arg0: i32) -> (i32, i32) {
    %c0_i32 = arith.constant 0 : i32
    %c0_i32_0 = arith.constant 0 : i32
    %c0_i32_1 = arith.constant 0 : i32
    return %c0_i32, %c0_i32_0 : i32, i32
  }
  func.func @transform_11(%arg0: i32) -> (i32, i32) {
    %c0_i32 = arith.constant 0 : i32
    %c0_i32_0 = arith.constant 0 : i32
    %c0_i32_1 = arith.constant 0 : i32
    return %c0_i32, %c0_i32_0 : i32, i32
  }
  func.func @transform_12(%arg0: i32) -> (i32, i32) {
    %c0_i32 = arith.constant 0 : i32
    %c0_i32_0 = arith.constant 0 : i32
    %c0_i32_1 = arith.constant 0 : i32
    return %c0_i32, %c0_i32_0 : i32, i32
  }
}

</mosaic_0001>

<bundles_post_ra>
// kernel: actor_forward.4
= control target key start
LH: loop header
LB: loop body
LE: loop exit
PB: predicated region body
PF: predicated region fallthrough
CT: control target
= control target key end

     0   :  { %vm934_vm0 = vcmask 261120   ;;  %vm3656_vm1 = vcmask 519168   ;;  %s7047_s1 = inlined_call_operand.vmem [shape: bf16[32,64], index: 1, kind: input, shape index: {}]   ;;  %s7048_s0 = inlined_call_operand.vmem [shape: bf16[2048,32], index: 0, kind: input, shape index: {}]   ;;  %s7049_s2 = inlined_call_operand.vmem [shape: f32[1,64], index: 2, kind: input, shape index: {}]   ;;  %s7050_s3 = inlined_call_operand.vmem [shape: bf16[2048,64], index: 3, kind: output, shape index: {}]  }
   0x1   :  { %v5082_v0 = vld [vmem:[%s7047_s1] sm:$0xff]   ;;  %v5083_v1 = vld [vmem:[%s7047_s1 + $0x8] sm:$0xff]   ;;  %v5088_v6 = vld [vmem:[%s7048_s0 + $0x10] sm:$0xff]  }
   0x2   :  { %4818 = vmatprep.subr.bf16.mxu0 %v5082_v0  ;;  %5078 = vmatprep.subr.bf16.mxu1 %v5082_v0  ;;  %v5084_v2 = vld [vmem:[%s7048_s0] sm:$0xff]   ;;  %v5086_v4 = vld [vmem:[%s7048_s0 + $0x8] sm:$0xff]   ;;  %v5089_v7 = vld [vmem:[%s7048_s0 + $0x210] sm:$0xff]  }
   0x3   :  { %4819 = vmatpush3.bf16.msra.mxu0 %v5082_v0  ;;  %5080 = vmatpush3.bf16.msra.mxu1 %v5082_v0  ;;  %v5085_v3 = vld [vmem:[%s7048_s0 + $0x200] sm:$0xff]   ;;  %v5087_v5 = vld [vmem:[%s7048_s0 + $0x208] sm:$0xff]   ;;  %v5090_v8 = vld [vmem:[%s7048_s0 + $0x18] sm:$0xff]  }
   0x4   :  { %4820 = vmatprep.subr.bf16.mxu0 %v5083_v1  ;;  %5079 = vmatprep.subr.bf16.mxu1 %v5083_v1  ;;  %v5091_v9 = vld [vmem:[%s7048_s0 + $0x218] sm:$0xff]   ;;  %v5092_v10 = vld [vmem:[%s7048_s0 + $0x20] sm:$0xff]   ;;  %v5094_v12 = vld [vmem:[%s7048_s0 + $0x28] sm:$0xff]  }
   0x5   :  { %4822 = vmatprep.mubr.msk.bf16.mxu0 %vm934_vm0, %v5084_v2  ;;  %4950 = vmatprep.mubr.msk.bf16.mxu1 %vm934_vm0, %v5085_v3  ;;  %v5093_v11 = vld [vmem:[%s7048_s0 + $0x220] sm:$0xff]   ;;  %v5095_v13 = vld [vmem:[%s7048_s0 + $0x228] sm:$0xff]   ;;  %v5096_v14 = vld [vmem:[%s7048_s0 + $0x30] sm:$0xff]  }
   0x6   :  { %v5097_v15 = vld [vmem:[%s7048_s0 + $0x230] sm:$0xff]   ;;  %v5098_v16 = vld [vmem:[%s7048_s0 + $0x38] sm:$0xff]   ;;  %v5100_v18 = vld [vmem:[%s7048_s0 + $0x40] sm:$0xff]  }
   0x7   :  { %4821 = vmatpush3.bf16.msra.mxu0 %v5083_v1  ;;  %5081 = vmatpush3.bf16.msra.mxu1 %v5083_v1  ;;  %v5099_v17 = vld [vmem:[%s7048_s0 + $0x238] sm:$0xff]   ;;  %v5101_v19 = vld [vmem:[%s7048_s0 + $0x240] sm:$0xff]   ;;  %v5102_v20 = vld [vmem:[%s7048_s0 + $0x48] sm:$0xff]  }
   0x8   :  { %v5103_v21 = vld [vmem:[%s7048_s0 + $0x248] sm:$0xff]   ;;  %v5104_v22 = vld [vmem:[%s7048_s0 + $0x50] sm:$0xff]   ;;  %v5106_v24 = vld [vmem:[%s7048_s0 + $0x58] sm:$0xff]  }
   0x9   :  { %v5105_v23 = vld [vmem:[%s7048_s0 + $0x250] sm:$0xff]   ;;  %v5107_v25 = vld [vmem:[%s7048_s0 + $0x258] sm:$0xff]   ;;  %v5108_v26 = vld [vmem:[%s7048_s0 + $0x60] sm:$0xff]  }
   0xa   :  { %4823 = vmatmul.mubr.msk.bf16.vlgmr.msra.gmra.mrb[0].mxu0 %vm934_vm0, %v5086_v4  ;;  %4951 = vmatmul.mubr.msk.bf16.vlgmr.msra.gmra.mrb[0].mxu1 %vm934_vm0, %v5087_v5  ;;  %v5109_v27 = vld [vmem:[%s7048_s0 + $0x260] sm:$0xff]   ;;  %v5110_v28 = vld [vmem:[%s7048_s0 + $0x68] sm:$0xff]   ;;  %v5112_v30 = vld [vmem:[%s7048_s0 + $0x70] sm:$0xff]  }
   0xb   :  { %4826 = vmatprep.mubr.msk.bf16.mxu0 %vm934_vm0, %v5088_v6  ;;  %4954 = vmatprep.mubr.msk.bf16.mxu1 %vm934_vm0, %v5089_v7  ;;  %v5111_v29 = vld [vmem:[%s7048_s0 + $0x268] sm:$0xff]   ;;  %v5113_v31 = vld [vmem:[%s7048_s0 + $0x270] sm:$0xff]   ;;  %v5114_v32 = vld [vmem:[%s7048_s0 + $0x78] sm:$0xff]  }
   0xc   :  { %v5115_v33 = vld [vmem:[%s7048_s0 + $0x278] sm:$0xff]   ;;  %v5116_v34 = vld [vmem:[%s7048_s0 + $0x80] sm:$0xff]   ;;  %v5118_v36 = vld [vmem:[%s7048_s0 + $0x88] sm:$0xff]  }
   0xd   :  { %v5117_v35 = vld [vmem:[%s7048_s0 + $0x280] sm:$0xff]   ;;  %v5119_v37 = vld [vmem:[%s7048_s0 + $0x288] sm:$0xff]   ;;  %v5120_v38 = vld [vmem:[%s7048_s0 + $0x90] sm:$0xff]  }
   0xe   :  { %v5121_v39 = vld [vmem:[%s7048_s0 + $0x290] sm:$0xff]   ;;  %v5122_v40 = vld [vmem:[%s7048_s0 + $0x98] sm:$0xff]   ;;  %v5124_v42 = vld [vmem:[%s7048_s0 + $0xa0] sm:$0xff]  }
   0xf   :  { %v5123_v41 = vld [vmem:[%s7048_s0 + $0x298] sm:$0xff]   ;;  %v5125_v43 = vld [vmem:[%s7048_s0 + $0x2a0] sm:$0xff]   ;;  %v5126_v44 = vld [vmem:[%s7048_s0 + $0xa8] sm:$0xff]  }
  0x10   :  { %v5127_v45 = vld [vmem:[%s7048_s0 + $0x2a8] sm:$0xff]   ;;  %v5128_v46 = vld [vmem:[%s7048_s0 + $0xb0] sm:$0xff]   ;;  %v5130_v48 = vld [vmem:[%s7048_s0 + $0xb8] sm:$0xff]  }
  0x11   :  { %v5129_v47 = vld [vmem:[%s7048_s0 + $0x2b0] sm:$0xff]   ;;  %v5131_v49 = vld [vmem:[%s7048_s0 + $0x2b8] sm:$0xff]   ;;  %v5132_v50 = vld [vmem:[%s7048_s0 + $0xc0] sm:$0xff]  }
  0x12   :  { %4827 = vmatmul.mubr.msk.bf16.gmra.mrb[4].mxu0 %vm934_vm0, %v5090_v8  ;;  %4955 = vmatmul.mubr.msk.bf16.gmra.mrb[4].mxu1 %vm934_vm0, %v5091_v9  ;;  %v5133_v51 = vld [vmem:[%s7048_s0 + $0x2c0] sm:$0xff]   ;;  %v5134_v52 = vld [vmem:[%s7048_s0 + $0xc8] sm:$0xff]   ;;  %v5136_v54 = vld [vmem:[%s7048_s0 + $0xd0] sm:$0xff]  }
  0x13   :  { %4830 = vmatprep.mubr.msk.bf16.mxu0 %vm934_vm0, %v5092_v10  ;;  %4958 = vmatprep.mubr.msk.bf16.mxu1 %vm934_vm0, %v5093_v11  ;;  %v5135_v53 = vld [vmem:[%s7048_s0 + $0x2c8] sm:$0xff]   ;;  %v5137_v55 = vld [vmem:[%s7048_s0 + $0x2d0] sm:$0xff]   ;;  %v5138_v56 = vld [vmem:[%s7048_s0 + $0xd8] sm:$0xff]  }
  0x14   :  { %v5139_v57 = vld [vmem:[%s7048_s0 + $0x2d8] sm:$0xff]   ;;  %v5140_v58 = vld [vmem:[%s7048_s0 + $0xe0] sm:$0xff]   ;;  %v5142_v60 = vld [vmem:[%s7048_s0 + $0xe8] sm:$0xff]  }
  0x15   :  { %v5141_v59 = vld [vmem:[%s7048_s0 + $0x2e0] sm:$0xff]   ;;  %v5143_v61 = vld [vmem:[%s7048_s0 + $0x2e8] sm:$0xff]   ;;  %v5144_v62 = vld [vmem:[%s7048_s0 + $0xf0] sm:$0xff]  }
  0x16   :  { %v5145_v63 = vld [vmem:[%s7048_s0 + $0x2f0] sm:$0xff]   ;;  %v5146_v0 = vld [vmem:[%s7048_s0 + $0xf8] sm:$0xff]   ;;  %v5148_v2 = vld [vmem:[%s7048_s0 + $0x100] sm:$0xff]  }
  0x17   :  { %v5147_v1 = vld [vmem:[%s7048_s0 + $0x2f8] sm:$0xff]   ;;  %v5149_v3 = vld [vmem:[%s7048_s0 + $0x300] sm:$0xff]   ;;  %v5150_v4 = vld [vmem:[%s7048_s0 + $0x108] sm:$0xff]  }
  0x18   :  { %v5151_v5 = vld [vmem:[%s7048_s0 + $0x308] sm:$0xff]   ;;  %v5152_v6 = vld [vmem:[%s7048_s0 + $0x110] sm:$0xff]   ;;  %v5154_v8 = vld [vmem:[%s7048_s0 + $0x118] sm:$0xff]  }
  0x19   :  { %v5153_v7 = vld [vmem:[%s7048_s0 + $0x310] sm:$0xff]   ;;  %v5155_v9 = vld [vmem:[%s7048_s0 + $0x318] sm:$0xff]   ;;  %v5156_v10 = vld [vmem:[%s7048_s0 + $0x120] sm:$0xff]  }
  0x1a   :  { %4831 = vmatmul.mubr.msk.bf16.gmra.mrb[8].mxu0 %vm934_vm0, %v5094_v12  ;;  %4959 = vmatmul.mubr.msk.bf16.gmra.mrb[8].mxu1 %vm934_vm0, %v5095_v13  ;;  %v5157_v11 = vld [vmem:[%s7048_s0 + $0x320] sm:$0xff]   ;;  %v5158_v12 = vld [vmem:[%s7048_s0 + $0x128] sm:$0xff]  }
  0x1b   :  { %4834 = vmatprep.mubr.msk.bf16.mxu0 %vm934_vm0, %v5096_v14  ;;  %4962 = vmatprep.mubr.msk.bf16.mxu1 %vm934_vm0, %v5097_v15  ;;  %v5159_v13 = vld [vmem:[%s7048_s0 + $0x328] sm:$0xff]   ;;  %v5160_v14 = vld [vmem:[%s7048_s0 + $0x130] sm:$0xff]  }
  0x1c   :  { %v5161_v15 = vld [vmem:[%s7048_s0 + $0x330] sm:$0xff]  }
  0x22   :  { %4835 = vmatmul.mubr.msk.bf16.gmra.mrb[12].mxu0 %vm934_vm0, %v5098_v16  ;;  %4963 = vmatmul.mubr.msk.bf16.gmra.mrb[12].mxu1 %vm934_vm0, %v5099_v17  ;;  %v5162_v16 = vld [vmem:[%s7048_s0 + $0x138] sm:$0xff]  }
  0x23   :  { %4838 = vmatprep.mubr.msk.bf16.mxu0 %vm934_vm0, %v5100_v18  ;;  %4966 = vmatprep.mubr.msk.bf16.mxu1 %vm934_vm0, %v5101_v19  ;;  %v5163_v17 = vld [vmem:[%s7048_s0 + $0x338] sm:$0xff]   ;;  %v5164_v18 = vld [vmem:[%s7048_s0 + $0x140] sm:$0xff]  }
  0x24   :  { %v5165_v19 = vld [vmem:[%s7048_s0 + $0x340] sm:$0xff]  }
  0x2a   :  { %4839 = vmatmul.mubr.msk.bf16.gmra.mrb[16].mxu0 %vm934_vm0, %v5102_v20  ;;  %4967 = vmatmul.mubr.msk.bf16.gmra.mrb[16].mxu1 %vm934_vm0, %v5103_v21  ;;  %v5166_v20 = vld [vmem:[%s7048_s0 + $0x148] sm:$0xff]  }
  0x2b   :  { %4842 = vmatprep.mubr.msk.bf16.mxu0 %vm934_vm0, %v5104_v22  ;;  %4970 = vmatprep.mubr.msk.bf16.mxu1 %vm934_vm0, %v5105_v23  ;;  %v5167_v21 = vld [vmem:[%s7048_s0 + $0x348] sm:$0xff]   ;;  %v5168_v22 = vld [vmem:[%s7048_s0 + $0x150] sm:$0xff]  }
  0x2c   :  { %v5169_v23 = vld [vmem:[%s7048_s0 + $0x350] sm:$0xff]  }
  0x32   :  { %4843 = vmatmul.mubr.msk.bf16.gmra.mrb[20].mxu0 %vm934_vm0, %v5106_v24  ;;  %4971 = vmatmul.mubr.msk.bf16.gmra.mrb[20].mxu1 %vm934_vm0, %v5107_v25  ;;  %v5170_v24 = vld [vmem:[%s7048_s0 + $0x158] sm:$0xff]  }
  0x33   :  { %4846 = vmatprep.mubr.msk.bf16.mxu0 %vm934_vm0, %v5108_v26  ;;  %4974 = vmatprep.mubr.msk.bf16.mxu1 %vm934_vm0, %v5109_v27  ;;  %v5171_v25 = vld [vmem:[%s7048_s0 + $0x358] sm:$0xff]   ;;  %v5172_v26 = vld [vmem:[%s7048_s0 + $0x160] sm:$0xff]  }
  0x34   :  { %v5173_v27 = vld [vmem:[%s7048_s0 + $0x360] sm:$0xff]  }
  0x3a   :  { %4847 = vmatmul.mubr.msk.bf16.gmra.mrb[24].mxu0 %vm934_vm0, %v5110_v28  ;;  %4975 = vmatmul.mubr.msk.bf16.gmra.mrb[24].mxu1 %vm934_vm0, %v5111_v29  ;;  %v5174_v28 = vld [vmem:[%s7048_s0 + $0x168] sm:$0xff]  }
  0x3b   :  { %4850 = vmatprep.mubr.msk.bf16.mxu0 %vm934_vm0, %v5112_v30  ;;  %4978 = vmatprep.mubr.msk.bf16.mxu1 %vm934_vm0, %v5113_v31  ;;  %v5175_v29 = vld [vmem:[%s7048_s0 + $0x368] sm:$0xff]   ;;  %v5176_v30 = vld [vmem:[%s7048_s0 + $0x170] sm:$0xff]  }
  0x3c   :  { %v5177_v31 = vld [vmem:[%s7048_s0 + $0x370] sm:$0xff]  }
  0x42   :  { %4851 = vmatmul.mubr.msk.bf16.gmra.mrb[28].mxu0 %vm934_vm0, %v5114_v32  ;;  %4979 = vmatmul.mubr.msk.bf16.gmra.mrb[28].mxu1 %vm934_vm0, %v5115_v33  ;;  %v5178_v32 = vld [vmem:[%s7048_s0 + $0x178] sm:$0xff]  }
  0x43   :  { %4854 = vmatprep.mubr.msk.bf16.mxu0 %vm934_vm0, %v5116_v34  ;;  %4982 = vmatprep.mubr.msk.bf16.mxu1 %vm934_vm0, %v5117_v35  ;;  %v5179_v33 = vld [vmem:[%s7048_s0 + $0x378] sm:$0xff]   ;;  %v5180_v34 = vld [vmem:[%s7048_s0 + $0x180] sm:$0xff]  }
  0x44   :  { %v5181_v35 = vld [vmem:[%s7048_s0 + $0x380] sm:$0xff]  }
  0x4a   :  { %4855 = vmatmul.mubr.msk.bf16.gmra.mrb[32].mxu0 %vm934_vm0, %v5118_v36  ;;  %4983 = vmatmul.mubr.msk.bf16.gmra.mrb[32].mxu1 %vm934_vm0, %v5119_v37  ;;  %v5182_v36 = vld [vmem:[%s7048_s0 + $0x188] sm:$0xff]  }
  0x4b   :  { %4858 = vmatprep.mubr.msk.bf16.mxu0 %vm934_vm0, %v5120_v38  ;;  %4986 = vmatprep.mubr.msk.bf16.mxu1 %vm934_vm0, %v5121_v39  ;;  %v5183_v37 = vld [vmem:[%s7048_s0 + $0x388] sm:$0xff]   ;;  %v5184_v38 = vld [vmem:[%s7048_s0 + $0x190] sm:$0xff]  }
  0x4c   :  { %v5185_v39 = vld [vmem:[%s7048_s0 + $0x390] sm:$0xff]  }
  0x52   :  { %4859 = vmatmul.mubr.msk.bf16.gmra.mrb[36].mxu0 %vm934_vm0, %v5122_v40  ;;  %4987 = vmatmul.mubr.msk.bf16.gmra.mrb[36].mxu1 %vm934_vm0, %v5123_v41  ;;  %v5186_v40 = vld [vmem:[%s7048_s0 + $0x198] sm:$0xff]  }
  0x53   :  { %4862 = vmatprep.mubr.msk.bf16.mxu0 %vm934_vm0, %v5124_v42  ;;  %4990 = vmatprep.mubr.msk.bf16.mxu1 %vm934_vm0, %v5125_v43  ;;  %v5187_v41 = vld [vmem:[%s7048_s0 + $0x398] sm:$0xff]   ;;  %v5188_v42 = vld [vmem:[%s7048_s0 + $0x1a0] sm:$0xff]  }
  0x54   :  { %v5189_v43 = vld [vmem:[%s7048_s0 + $0x3a0] sm:$0xff]  }
  0x5a   :  { %4863 = vmatmul.mubr.msk.bf16.gmra.mrb[40].mxu0 %vm934_vm0, %v5126_v44  ;;  %4991 = vmatmul.mubr.msk.bf16.gmra.mrb[40].mxu1 %vm934_vm0, %v5127_v45  ;;  %v5190_v44 = vld [vmem:[%s7048_s0 + $0x1a8] sm:$0xff]  }
  0x5b   :  { %4866 = vmatprep.mubr.msk.bf16.mxu0 %vm934_vm0, %v5128_v46  ;;  %4994 = vmatprep.mubr.msk.bf16.mxu1 %vm934_vm0, %v5129_v47  ;;  %v5191_v45 = vld [vmem:[%s7048_s0 + $0x3a8] sm:$0xff]   ;;  %v5192_v46 = vld [vmem:[%s7048_s0 + $0x1b0] sm:$0xff]  }
  0x5c   :  { %v5193_v47 = vld [vmem:[%s7048_s0 + $0x3b0] sm:$0xff]  }
  0x62   :  { %4867 = vmatmul.mubr.msk.bf16.gmra.mrb[44].mxu0 %vm934_vm0, %v5130_v48  ;;  %4995 = vmatmul.mubr.msk.bf16.gmra.mrb[44].mxu1 %vm934_vm0, %v5131_v49  ;;  %v5681_v48 = vld [vmem:[%s7049_s2] ss:$0 sm:$0xff] }
  0x63   :  { %4870 = vmatprep.mubr.msk.bf16.mxu0 %vm934_vm0, %v5132_v50  ;;  %4998 = vmatprep.mubr.msk.bf16.mxu1 %vm934_vm0, %v5133_v51 }
  0x6a   :  { %4871 = vmatmul.mubr.msk.bf16.gmra.mrb[48].mxu0 %vm934_vm0, %v5134_v52  ;;  %4999 = vmatmul.mubr.msk.bf16.gmra.mrb[48].mxu1 %vm934_vm0, %v5135_v53 }
  0x6b   :  { %4874 = vmatprep.mubr.msk.bf16.mxu0 %vm934_vm0, %v5136_v54  ;;  %5002 = vmatprep.mubr.msk.bf16.mxu1 %vm934_vm0, %v5137_v55  ;;  %v5194_v55 = vld [vmem:[%s7048_s0 + $0x1b8] sm:$0xff]  }
  0x72   :  { %4875 = vmatmul.mubr.msk.bf16.gmra.mrb[52].mxu0 %vm934_vm0, %v5138_v56  ;;  %5003 = vmatmul.mubr.msk.bf16.gmra.mrb[52].mxu1 %vm934_vm0, %v5139_v57  ;;  %v5195_v56 = vld [vmem:[%s7048_s0 + $0x3b8] sm:$0xff]  }
  0x73   :  { %4878 = vmatprep.mubr.msk.bf16.mxu0 %vm934_vm0, %v5140_v58  ;;  %5006 = vmatprep.mubr.msk.bf16.mxu1 %vm934_vm0, %v5141_v59 }
  0x7a   :  { %4879 = vmatmul.mubr.msk.bf16.gmra.mrb[56].mxu0 %vm934_vm0, %v5142_v60  ;;  %5007 = vmatmul.mubr.msk.bf16.gmra.mrb[56].mxu1 %vm934_vm0, %v5143_v61  ;;  %v5196_v61 = vld [vmem:[%s7048_s0 + $0x1c0] sm:$0xff]  }
  0x7b   :  { %4882 = vmatprep.mubr.msk.bf16.mxu0 %vm934_vm0, %v5144_v62  ;;  %5010 = vmatprep.mubr.msk.bf16.mxu1 %vm934_vm0, %v5145_v63  ;;  %v5197_v62 = vld [vmem:[%s7048_s0 + $0x3c0] sm:$0xff]  }
  0x82   :  { %4883 = vmatmul.mubr.msk.bf16.gmra.mrb[60].mxu0 %vm934_vm0, %v5146_v0  ;;  %5011 = vmatmul.mubr.msk.bf16.gmra.mrb[60].mxu1 %vm934_vm0, %v5147_v1 }
  0x83   :  { %4886 = vmatprep.mubr.msk.bf16.mxu0 %vm934_vm0, %v5148_v2  ;;  %5014 = vmatprep.mubr.msk.bf16.mxu1 %vm934_vm0, %v5149_v3 }
  0x8a   :  { %4887 = vmatmul.mubr.msk.bf16.gmra.mrb[64].mxu0 %vm934_vm0, %v5150_v4  ;;  %5015 = vmatmul.mubr.msk.bf16.gmra.mrb[64].mxu1 %vm934_vm0, %v5151_v5 }
  0x8b   :  { %4890 = vmatprep.mubr.msk.bf16.mxu0 %vm934_vm0, %v5152_v6  ;;  %5018 = vmatprep.mubr.msk.bf16.mxu1 %vm934_vm0, %v5153_v7 }
  0x92   :  { %4891 = vmatmul.mubr.msk.bf16.gmra.mrb[68].mxu0 %vm934_vm0, %v5154_v8  ;;  %5019 = vmatmul.mubr.msk.bf16.gmra.mrb[68].mxu1 %vm934_vm0, %v5155_v9 }
  0x93   :  { %4894 = vmatprep.mubr.msk.bf16.mxu0 %vm934_vm0, %v5156_v10  ;;  %5022 = vmatprep.mubr.msk.bf16.mxu1 %vm934_vm0, %v5157_v11 }
  0x9a   :  { %4895 = vmatmul.mubr.msk.bf16.gmra.mrb[72].mxu0 %vm934_vm0, %v5158_v12  ;;  %5023 = vmatmul.mubr.msk.bf16.gmra.mrb[72].mxu1 %vm934_vm0, %v5159_v13 }
  0x9b   :  { %4898 = vmatprep.mubr.msk.bf16.mxu0 %vm934_vm0, %v5160_v14  ;;  %5026 = vmatprep.mubr.msk.bf16.mxu1 %vm934_vm0, %v5161_v15 }
  0xa2   :  { %4899 = vmatmul.mubr.msk.bf16.gmra.mrb[76].mxu0 %vm934_vm0, %v5162_v16  ;;  %5027 = vmatmul.mubr.msk.bf16.gmra.mrb[76].mxu1 %vm934_vm0, %v5163_v17 }
  0xa3   :  { %4902 = vmatprep.mubr.msk.bf16.mxu0 %vm934_vm0, %v5164_v18  ;;  %5030 = vmatprep.mubr.msk.bf16.mxu1 %vm934_vm0, %v5165_v19 }
  0xaa   :  { %4903 = vmatmul.mubr.msk.bf16.gmra.mrb[80].mxu0 %vm934_vm0, %v5166_v20  ;;  %5031 = vmatmul.mubr.msk.bf16.gmra.mrb[80].mxu1 %vm934_vm0, %v5167_v21 }
  0xab   :  { %4906 = vmatprep.mubr.msk.bf16.mxu0 %vm934_vm0, %v5168_v22  ;;  %5034 = vmatprep.mubr.msk.bf16.mxu1 %vm934_vm0, %v5169_v23 }
  0xb2   :  { %4907 = vmatmul.mubr.msk.bf16.gmra.mrb[84].mxu0 %vm934_vm0, %v5170_v24  ;;  %5035 = vmatmul.mubr.msk.bf16.gmra.mrb[84].mxu1 %vm934_vm0, %v5171_v25 }
  0xb3   :  { %4910 = vmatprep.mubr.msk.bf16.mxu0 %vm934_vm0, %v5172_v26  ;;  %5038 = vmatprep.mubr.msk.bf16.mxu1 %vm934_vm0, %v5173_v27  ;;  %v5198_v27 = vld [vmem:[%s7048_s0 + $0x1c8] sm:$0xff]  }
  0xba   :  { %4911 = vmatmul.mubr.msk.bf16.gmra.mrb[88].mxu0 %vm934_vm0, %v5174_v28  ;;  %5039 = vmatmul.mubr.msk.bf16.gmra.mrb[88].mxu1 %vm934_vm0, %v5175_v29  ;;  %v5199_v28 = vld [vmem:[%s7048_s0 + $0x3c8] sm:$0xff]  }
  0xbb   :  { %4914 = vmatprep.mubr.msk.bf16.mxu0 %vm934_vm0, %v5176_v30  ;;  %5042 = vmatprep.mubr.msk.bf16.mxu1 %vm934_vm0, %v5177_v31 }
  0xc2   :  { %4915 = vmatmul.mubr.msk.bf16.gmra.mrb[92].mxu0 %vm934_vm0, %v5178_v32  ;;  %5043 = vmatmul.mubr.msk.bf16.gmra.mrb[92].mxu1 %vm934_vm0, %v5179_v33  ;;  %v5200_v33 = vld [vmem:[%s7048_s0 + $0x1d0] sm:$0xff]  }
  0xc3   :  { %4918 = vmatprep.mubr.msk.bf16.mxu0 %vm934_vm0, %v5180_v34  ;;  %5046 = vmatprep.mubr.msk.bf16.mxu1 %vm934_vm0, %v5181_v35  ;;  %v5201_v34 = vld [vmem:[%s7048_s0 + $0x3d0] sm:$0xff]  }
  0xca   :  { %4919 = vmatmul.mubr.msk.bf16.gmra.mrb[96].mxu0 %vm934_vm0, %v5182_v36  ;;  %5047 = vmatmul.mubr.msk.bf16.gmra.mrb[96].mxu1 %vm934_vm0, %v5183_v37 }
  0xcb   :  { %4922 = vmatprep.mubr.msk.bf16.mxu0 %vm934_vm0, %v5184_v38  ;;  %5050 = vmatprep.mubr.msk.bf16.mxu1 %vm934_vm0, %v5185_v39 }
  0xd2   :  { %4923 = vmatmul.mubr.msk.bf16.gmra.mrb[100].mxu0 %vm934_vm0, %v5186_v40  ;;  %5051 = vmatmul.mubr.msk.bf16.gmra.mrb[100].mxu1 %vm934_vm0, %v5187_v41 }
  0xd3   :  { %4926 = vmatprep.mubr.msk.bf16.mxu0 %vm934_vm0, %v5188_v42  ;;  %5054 = vmatprep.mubr.msk.bf16.mxu1 %vm934_vm0, %v5189_v43 }
  0xda   :  { %4927 = vmatmul.mubr.msk.bf16.gmra.mrb[104].mxu0 %vm934_vm0, %v5190_v44  ;;  %5055 = vmatmul.mubr.msk.bf16.gmra.mrb[104].mxu1 %vm934_vm0, %v5191_v45 }
  0xdb   :  { %4930 = vmatprep.mubr.msk.bf16.mxu0 %vm934_vm0, %v5192_v46  ;;  %5058 = vmatprep.mubr.msk.bf16.mxu1 %vm934_vm0, %v5193_v47 }
  0xdd   :  { %v4824_v49 = vpop.f32.mrb[0].mxu0  ;;  %v4952_v50 = vpop.f32.mrb[0].mxu1 }
  0xde   :  { %v1362_v51 = vadd.f32 %v4824_v49, %v5681_v48  ;;  %v1874_v52 = vadd.f32 %v4952_v50, %v5681_v48  ;;  %v1353_v53 = vpop.f32.mrb[1].mxu0  ;;  %v1865_v54 = vpop.f32.mrb[1].mxu1 }
  0xdf   :  { %v1354_v57 = vadd.f32 %v5681_v48, %v1353_v53  ;;  %v1866_v58 = vadd.f32 %v5681_v48, %v1865_v54  ;;  %v4825_v59 = vpop.f32.mrb[2].mxu0  ;;  %v4953_v60 = vpop.f32.mrb[2].mxu1 }
  0xe0   :  { %v2378_v63 = vmax.f32 %v1362_v51, 0.0  ;;  %v2506_v0 = vmax.f32 %v1874_v52, 0.0  ;;  %v1365_v1 = vadd.f32 %v4825_v59, %v5681_v48  ;;  %v1877_v2 = vadd.f32 %v4953_v60, %v5681_v48  ;;  %v1356_v3 = vpop.f32.mrb[3].mxu0  ;;  %v1868_v4 = vpop.f32.mrb[3].mxu1 }
  0xe1   :  { %v2376_v5 = vmax.f32 %v1354_v57, 0.0  ;;  %v2504_v6 = vmax.f32 %v1866_v58, 0.0  ;;  %v1357_v7 = vadd.f32 %v5681_v48, %v1356_v3  ;;  %v1869_v8 = vadd.f32 %v5681_v48, %v1868_v4 }
  0xe2   :  { %v4434_v9 = vpack.c.bf16 %v2378_v63, %v2378_v63  ;;  %v4562_v10 = vpack.c.bf16 %v2506_v0, %v2506_v0  ;;  %v2379_v11 = vmax.f32 %v1365_v1, 0.0  ;;  %v2507_v12 = vmax.f32 %v1877_v2, 0.0  ;;  %4931 = vmatmul.mubr.msk.bf16.gmra.mrb[108].mxu0 %vm934_vm0, %v5194_v55  ;;  %5059 = vmatmul.mubr.msk.bf16.gmra.mrb[108].mxu1 %vm934_vm0, %v5195_v56  ;;  %v5202_v0 = vld [vmem:[%s7048_s0 + $0x1d8] sm:$0xff]  }
  0xe3   :  { %v4432_v13 = vpack.c.bf16 %v2376_v5, %v2376_v5  ;;  %v4560_v14 = vpack.c.bf16 %v2504_v6, %v2504_v6  ;;  %v2377_v15 = vmax.f32 %v1357_v7, 0.0  ;;  %v2505_v16 = vmax.f32 %v1869_v8, 0.0  ;;  %4934 = vmatprep.mubr.msk.bf16.mxu0 %vm934_vm0, %v5196_v61  ;;  %5062 = vmatprep.mubr.msk.bf16.mxu1 %vm934_vm0, %v5197_v62  ;;  %v5203_v1 = vld [vmem:[%s7048_s0 + $0x3d8] sm:$0xff]   ;;  %v5204_v6 = vld [vmem:[%s7048_s0 + $0x1e0] sm:$0xff]  }
  0xe4   :  { %3659 = vst.msk [vmem:[%s7050_s3 + $0x8] sm:$0xf] %vm3656_vm1, %v4434_v9  ;;  %3787 = vst.msk [vmem:[%s7050_s3 + $0x208] sm:$0xf] %vm3656_vm1, %v4562_v10  ;;  %v4435_v17 = vpack.c.bf16 %v2379_v11, %v2379_v11  ;;  %v4563_v18 = vpack.c.bf16 %v2507_v12, %v2507_v12  ;;  %v5205_v7 = vld [vmem:[%s7048_s0 + $0x3e0] sm:$0xff]  }
  0xe5   :  { %3657 = vst.msk [vmem:[%s7050_s3] sm:$0xf] %vm3656_vm1, %v4432_v13  ;;  %3785 = vst.msk [vmem:[%s7050_s3 + $0x200] sm:$0xf] %vm3656_vm1, %v4560_v14  ;;  %v4433_v19 = vpack.c.bf16 %v2377_v15, %v2377_v15  ;;  %v4561_v20 = vpack.c.bf16 %v2505_v16, %v2505_v16  ;;  %v4828_v21 = vpop.f32.mrb[4].mxu0  ;;  %v4956_v22 = vpop.f32.mrb[4].mxu1 }
  0xe6   :  { %3660 = vst.msk [vmem:[%s7050_s3 + $0xc] sm:$0xf] %vm3656_vm1, %v4435_v17  ;;  %3788 = vst.msk [vmem:[%s7050_s3 + $0x20c] sm:$0xf] %vm3656_vm1, %v4563_v18  ;;  %v1378_v23 = vadd.f32 %v4828_v21, %v5681_v48  ;;  %v1890_v24 = vadd.f32 %v4956_v22, %v5681_v48  ;;  %v1369_v25 = vpop.f32.mrb[5].mxu0  ;;  %v1881_v26 = vpop.f32.mrb[5].mxu1 }
  0xe7   :  { %3658 = vst.msk [vmem:[%s7050_s3 + $0x4] sm:$0xf] %vm3656_vm1, %v4433_v19  ;;  %3786 = vst.msk [vmem:[%s7050_s3 + $0x204] sm:$0xf] %vm3656_vm1, %v4561_v20  ;;  %v1370_v29 = vadd.f32 %v5681_v48, %v1369_v25  ;;  %v1882_v30 = vadd.f32 %v5681_v48, %v1881_v26  ;;  %v4829_v31 = vpop.f32.mrb[6].mxu0  ;;  %v4957_v32 = vpop.f32.mrb[6].mxu1 }
  0xe8   :  { %v2382_v35 = vmax.f32 %v1378_v23, 0.0  ;;  %v2510_v36 = vmax.f32 %v1890_v24, 0.0  ;;  %v1381_v37 = vadd.f32 %v4829_v31, %v5681_v48  ;;  %v1893_v38 = vadd.f32 %v4957_v32, %v5681_v48  ;;  %v1372_v39 = vpop.f32.mrb[7].mxu0  ;;  %v1884_v40 = vpop.f32.mrb[7].mxu1 }
  0xe9   :  { %v2380_v41 = vmax.f32 %v1370_v29, 0.0  ;;  %v2508_v42 = vmax.f32 %v1882_v30, 0.0  ;;  %v1373_v43 = vadd.f32 %v5681_v48, %v1372_v39  ;;  %v1885_v44 = vadd.f32 %v5681_v48, %v1884_v40 }
  0xea   :  { %v4438_v45 = vpack.c.bf16 %v2382_v35, %v2382_v35  ;;  %v4566_v46 = vpack.c.bf16 %v2510_v36, %v2510_v36  ;;  %v2383_v47 = vmax.f32 %v1381_v37, 0.0  ;;  %v2511_v49 = vmax.f32 %v1893_v38, 0.0  ;;  %4935 = vmatmul.mubr.msk.bf16.gmra.mrb[112].mxu0 %vm934_vm0, %v5198_v27  ;;  %5063 = vmatmul.mubr.msk.bf16.gmra.mrb[112].mxu1 %vm934_vm0, %v5199_v28  ;;  %v5206_v36 = vld [vmem:[%s7048_s0 + $0x1e8] sm:$0xff]  }
  0xeb   :  { %v4436_v50 = vpack.c.bf16 %v2380_v41, %v2380_v41  ;;  %v4564_v51 = vpack.c.bf16 %v2508_v42, %v2508_v42  ;;  %v2381_v52 = vmax.f32 %v1373_v43, 0.0  ;;  %v2509_v53 = vmax.f32 %v1885_v44, 0.0  ;;  %4938 = vmatprep.mubr.msk.bf16.mxu0 %vm934_vm0, %v5200_v33  ;;  %5066 = vmatprep.mubr.msk.bf16.mxu1 %vm934_vm0, %v5201_v34  ;;  %v5207_v37 = vld [vmem:[%s7048_s0 + $0x3e8] sm:$0xff]   ;;  %v5208_v42 = vld [vmem:[%s7048_s0 + $0x1f0] sm:$0xff]  }
  0xec   :  { %3663 = vst.msk [vmem:[%s7050_s3 + $0x18] sm:$0xf] %vm3656_vm1, %v4438_v45  ;;  %3791 = vst.msk [vmem:[%s7050_s3 + $0x218] sm:$0xf] %vm3656_vm1, %v4566_v46  ;;  %v4439_v54 = vpack.c.bf16 %v2383_v47, %v2383_v47  ;;  %v4567_v55 = vpack.c.bf16 %v2511_v49, %v2511_v49  ;;  %v5209_v43 = vld [vmem:[%s7048_s0 + $0x3f0] sm:$0xff]  }
  0xed   :  { %3661 = vst.msk [vmem:[%s7050_s3 + $0x10] sm:$0xf] %vm3656_vm1, %v4436_v50  ;;  %3789 = vst.msk [vmem:[%s7050_s3 + $0x210] sm:$0xf] %vm3656_vm1, %v4564_v51  ;;  %v4437_v56 = vpack.c.bf16 %v2381_v52, %v2381_v52  ;;  %v4565_v57 = vpack.c.bf16 %v2509_v53, %v2509_v53  ;;  %v4832_v58 = vpop.f32.mrb[8].mxu0  ;;  %v4960_v59 = vpop.f32.mrb[8].mxu1 }
  0xee   :  { %3664 = vst.msk [vmem:[%s7050_s3 + $0x1c] sm:$0xf] %vm3656_vm1, %v4439_v54  ;;  %3792 = vst.msk [vmem:[%s7050_s3 + $0x21c] sm:$0xf] %vm3656_vm1, %v4567_v55  ;;  %v1394_v60 = vadd.f32 %v4832_v58, %v5681_v48  ;;  %v1906_v61 = vadd.f32 %v4960_v59, %v5681_v48  ;;  %v1385_v62 = vpop.f32.mrb[9].mxu0  ;;  %v1897_v63 = vpop.f32.mrb[9].mxu1 }
  0xef   :  { %3662 = vst.msk [vmem:[%s7050_s3 + $0x14] sm:$0xf] %vm3656_vm1, %v4437_v56  ;;  %3790 = vst.msk [vmem:[%s7050_s3 + $0x214] sm:$0xf] %vm3656_vm1, %v4565_v57  ;;  %v1386_v2 = vadd.f32 %v5681_v48, %v1385_v62  ;;  %v1898_v3 = vadd.f32 %v5681_v48, %v1897_v63  ;;  %v4833_v4 = vpop.f32.mrb[10].mxu0  ;;  %v4961_v5 = vpop.f32.mrb[10].mxu1 }
  0xf0   :  { %v2386_v8 = vmax.f32 %v1394_v60, 0.0  ;;  %v2514_v9 = vmax.f32 %v1906_v61, 0.0  ;;  %v1397_v10 = vadd.f32 %v4833_v4, %v5681_v48  ;;  %v1909_v11 = vadd.f32 %v4961_v5, %v5681_v48  ;;  %v1388_v12 = vpop.f32.mrb[11].mxu0  ;;  %v1900_v13 = vpop.f32.mrb[11].mxu1 }
  0xf1   :  { %v2384_v14 = vmax.f32 %v1386_v2, 0.0  ;;  %v2512_v15 = vmax.f32 %v1898_v3, 0.0  ;;  %v1389_v16 = vadd.f32 %v5681_v48, %v1388_v12  ;;  %v1901_v17 = vadd.f32 %v5681_v48, %v1900_v13 }
  0xf2   :  { %v4442_v18 = vpack.c.bf16 %v2386_v8, %v2386_v8  ;;  %v4570_v19 = vpack.c.bf16 %v2514_v9, %v2514_v9  ;;  %v2387_v20 = vmax.f32 %v1397_v10, 0.0  ;;  %v2515_v21 = vmax.f32 %v1909_v11, 0.0  ;;  %4939 = vmatmul.mubr.msk.bf16.gmra.mrb[116].mxu0 %vm934_vm0, %v5202_v0  ;;  %5067 = vmatmul.mubr.msk.bf16.gmra.mrb[116].mxu1 %vm934_vm0, %v5203_v1  ;;  %v5210_v9 = vld [vmem:[%s7048_s0 + $0x1f8] sm:$0xff]  }
  0xf3   :  { %v4440_v22 = vpack.c.bf16 %v2384_v14, %v2384_v14  ;;  %v4568_v23 = vpack.c.bf16 %v2512_v15, %v2512_v15  ;;  %v2385_v24 = vmax.f32 %v1389_v16, 0.0  ;;  %v2513_v25 = vmax.f32 %v1901_v17, 0.0  ;;  %4942 = vmatprep.mubr.msk.bf16.mxu0 %vm934_vm0, %v5204_v6  ;;  %5070 = vmatprep.mubr.msk.bf16.mxu1 %vm934_vm0, %v5205_v7  ;;  %v5211_v10 = vld [vmem:[%s7048_s0 + $0x3f8] sm:$0xff]  }
  0xf4   :  { %3667 = vst.msk [vmem:[%s7050_s3 + $0x28] sm:$0xf] %vm3656_vm1, %v4442_v18  ;;  %3795 = vst.msk [vmem:[%s7050_s3 + $0x228] sm:$0xf] %vm3656_vm1, %v4570_v19  ;;  %v4443_v26 = vpack.c.bf16 %v2387_v20, %v2387_v20  ;;  %v4571_v27 = vpack.c.bf16 %v2515_v21, %v2515_v21 }
  0xf5   :  { %3665 = vst.msk [vmem:[%s7050_s3 + $0x20] sm:$0xf] %vm3656_vm1, %v4440_v22  ;;  %3793 = vst.msk [vmem:[%s7050_s3 + $0x220] sm:$0xf] %vm3656_vm1, %v4568_v23  ;;  %v4441_v28 = vpack.c.bf16 %v2385_v24, %v2385_v24  ;;  %v4569_v29 = vpack.c.bf16 %v2513_v25, %v2513_v25  ;;  %v4836_v30 = vpop.f32.mrb[12].mxu0  ;;  %v4964_v31 = vpop.f32.mrb[12].mxu1 }
  0xf6   :  { %3668 = vst.msk [vmem:[%s7050_s3 + $0x2c] sm:$0xf] %vm3656_vm1, %v4443_v26  ;;  %3796 = vst.msk [vmem:[%s7050_s3 + $0x22c] sm:$0xf] %vm3656_vm1, %v4571_v27  ;;  %v1410_v32 = vadd.f32 %v4836_v30, %v5681_v48  ;;  %v1922_v33 = vadd.f32 %v4964_v31, %v5681_v48  ;;  %v1401_v34 = vpop.f32.mrb[13].mxu0  ;;  %v1913_v35 = vpop.f32.mrb[13].mxu1 }
  0xf7   :  { %3666 = vst.msk [vmem:[%s7050_s3 + $0x24] sm:$0xf] %vm3656_vm1, %v4441_v28  ;;  %3794 = vst.msk [vmem:[%s7050_s3 + $0x224] sm:$0xf] %vm3656_vm1, %v4569_v29  ;;  %v1402_v38 = vadd.f32 %v5681_v48, %v1401_v34  ;;  %v1914_v39 = vadd.f32 %v5681_v48, %v1913_v35  ;;  %v4837_v40 = vpop.f32.mrb[14].mxu0  ;;  %v4965_v41 = vpop.f32.mrb[14].mxu1 }
  0xf8   :  { %v2390_v44 = vmax.f32 %v1410_v32, 0.0  ;;  %v2518_v45 = vmax.f32 %v1922_v33, 0.0  ;;  %v1413_v46 = vadd.f32 %v4837_v40, %v5681_v48  ;;  %v1925_v47 = vadd.f32 %v4965_v41, %v5681_v48  ;;  %v1404_v49 = vpop.f32.mrb[15].mxu0  ;;  %v1916_v50 = vpop.f32.mrb[15].mxu1 }
  0xf9   :  { %v2388_v51 = vmax.f32 %v1402_v38, 0.0  ;;  %v2516_v52 = vmax.f32 %v1914_v39, 0.0  ;;  %v1405_v53 = vadd.f32 %v5681_v48, %v1404_v49  ;;  %v1917_v54 = vadd.f32 %v5681_v48, %v1916_v50 }
  0xfa   :  { %v4446_v55 = vpack.c.bf16 %v2390_v44, %v2390_v44  ;;  %v4574_v56 = vpack.c.bf16 %v2518_v45, %v2518_v45  ;;  %v2391_v57 = vmax.f32 %v1413_v46, 0.0  ;;  %v2519_v58 = vmax.f32 %v1925_v47, 0.0  ;;  %4943 = vmatmul.mubr.msk.bf16.gmra.mrb[120].mxu0 %vm934_vm0, %v5206_v36  ;;  %5071 = vmatmul.mubr.msk.bf16.gmra.mrb[120].mxu1 %vm934_vm0, %v5207_v37 }
  0xfb   :  { %v4444_v59 = vpack.c.bf16 %v2388_v51, %v2388_v51  ;;  %v4572_v60 = vpack.c.bf16 %v2516_v52, %v2516_v52  ;;  %v2389_v61 = vmax.f32 %v1405_v53, 0.0  ;;  %v2517_v62 = vmax.f32 %v1917_v54, 0.0  ;;  %4946 = vmatprep.mubr.msk.bf16.mxu0 %vm934_vm0, %v5208_v42  ;;  %5074 = vmatprep.mubr.msk.bf16.mxu1 %vm934_vm0, %v5209_v43 }
  0xfc   :  { %3671 = vst.msk [vmem:[%s7050_s3 + $0x38] sm:$0xf] %vm3656_vm1, %v4446_v55  ;;  %3799 = vst.msk [vmem:[%s7050_s3 + $0x238] sm:$0xf] %vm3656_vm1, %v4574_v56  ;;  %v4447_v63 = vpack.c.bf16 %v2391_v57, %v2391_v57  ;;  %v4575_v0 = vpack.c.bf16 %v2519_v58, %v2519_v58 }
  0xfd   :  { %3669 = vst.msk [vmem:[%s7050_s3 + $0x30] sm:$0xf] %vm3656_vm1, %v4444_v59  ;;  %3797 = vst.msk [vmem:[%s7050_s3 + $0x230] sm:$0xf] %vm3656_vm1, %v4572_v60  ;;  %v4445_v1 = vpack.c.bf16 %v2389_v61, %v2389_v61  ;;  %v4573_v2 = vpack.c.bf16 %v2517_v62, %v2517_v62  ;;  %v4840_v3 = vpop.f32.mrb[16].mxu0  ;;  %v4968_v4 = vpop.f32.mrb[16].mxu1 }
  0xfe   :  { %3672 = vst.msk [vmem:[%s7050_s3 + $0x3c] sm:$0xf] %vm3656_vm1, %v4447_v63  ;;  %3800 = vst.msk [vmem:[%s7050_s3 + $0x23c] sm:$0xf] %vm3656_vm1, %v4575_v0  ;;  %v1426_v5 = vadd.f32 %v4840_v3, %v5681_v48  ;;  %v1938_v6 = vadd.f32 %v4968_v4, %v5681_v48  ;;  %v1417_v7 = vpop.f32.mrb[17].mxu0  ;;  %v1929_v8 = vpop.f32.mrb[17].mxu1 }
  0xff   :  { %3670 = vst.msk [vmem:[%s7050_s3 + $0x34] sm:$0xf] %vm3656_vm1, %v4445_v1  ;;  %3798 = vst.msk [vmem:[%s7050_s3 + $0x234] sm:$0xf] %vm3656_vm1, %v4573_v2  ;;  %v1418_v11 = vadd.f32 %v5681_v48, %v1417_v7  ;;  %v1930_v12 = vadd.f32 %v5681_v48, %v1929_v8  ;;  %v4841_v13 = vpop.f32.mrb[18].mxu0  ;;  %v4969_v14 = vpop.f32.mrb[18].mxu1 }
 0x100   :  { %v2394_v15 = vmax.f32 %v1426_v5, 0.0  ;;  %v2522_v16 = vmax.f32 %v1938_v6, 0.0  ;;  %v1429_v17 = vadd.f32 %v4841_v13, %v5681_v48  ;;  %v1941_v18 = vadd.f32 %v4969_v14, %v5681_v48  ;;  %v1420_v19 = vpop.f32.mrb[19].mxu0  ;;  %v1932_v20 = vpop.f32.mrb[19].mxu1 }
 0x101   :  { %v2392_v21 = vmax.f32 %v1418_v11, 0.0  ;;  %v2520_v22 = vmax.f32 %v1930_v12, 0.0  ;;  %v1421_v23 = vadd.f32 %v5681_v48, %v1420_v19  ;;  %v1933_v24 = vadd.f32 %v5681_v48, %v1932_v20 }
 0x102   :  { %v4450_v25 = vpack.c.bf16 %v2394_v15, %v2394_v15  ;;  %v4578_v26 = vpack.c.bf16 %v2522_v16, %v2522_v16  ;;  %v2395_v27 = vmax.f32 %v1429_v17, 0.0  ;;  %v2523_v28 = vmax.f32 %v1941_v18, 0.0  ;;  %4947 = vmatmul.mubr.msk.bf16.gmra.mrb[124].mxu0 %vm934_vm0, %v5210_v9  ;;  %5075 = vmatmul.mubr.msk.bf16.gmra.mrb[124].mxu1 %vm934_vm0, %v5211_v10 }
 0x103   :  { %v4448_v29 = vpack.c.bf16 %v2392_v21, %v2392_v21  ;;  %v4576_v30 = vpack.c.bf16 %v2520_v22, %v2520_v22  ;;  %v2393_v31 = vmax.f32 %v1421_v23, 0.0  ;;  %v2521_v32 = vmax.f32 %v1933_v24, 0.0 }
 0x104   :  { %3675 = vst.msk [vmem:[%s7050_s3 + $0x48] sm:$0xf] %vm3656_vm1, %v4450_v25  ;;  %3803 = vst.msk [vmem:[%s7050_s3 + $0x248] sm:$0xf] %vm3656_vm1, %v4578_v26  ;;  %v4451_v33 = vpack.c.bf16 %v2395_v27, %v2395_v27  ;;  %v4579_v34 = vpack.c.bf16 %v2523_v28, %v2523_v28 }
 0x105   :  { %3673 = vst.msk [vmem:[%s7050_s3 + $0x40] sm:$0xf] %vm3656_vm1, %v4448_v29  ;;  %3801 = vst.msk [vmem:[%s7050_s3 + $0x240] sm:$0xf] %vm3656_vm1, %v4576_v30  ;;  %v4449_v35 = vpack.c.bf16 %v2393_v31, %v2393_v31  ;;  %v4577_v36 = vpack.c.bf16 %v2521_v32, %v2521_v32  ;;  %v4844_v37 = vpop.f32.mrb[20].mxu0  ;;  %v4972_v38 = vpop.f32.mrb[20].mxu1 }
 0x106   :  { %3676 = vst.msk [vmem:[%s7050_s3 + $0x4c] sm:$0xf] %vm3656_vm1, %v4451_v33  ;;  %3804 = vst.msk [vmem:[%s7050_s3 + $0x24c] sm:$0xf] %vm3656_vm1, %v4579_v34  ;;  %v1442_v39 = vadd.f32 %v4844_v37, %v5681_v48  ;;  %v1954_v40 = vadd.f32 %v4972_v38, %v5681_v48  ;;  %v1433_v41 = vpop.f32.mrb[21].mxu0  ;;  %v1945_v42 = vpop.f32.mrb[21].mxu1 }
 0x107   :  { %3674 = vst.msk [vmem:[%s7050_s3 + $0x44] sm:$0xf] %vm3656_vm1, %v4449_v35  ;;  %3802 = vst.msk [vmem:[%s7050_s3 + $0x244] sm:$0xf] %vm3656_vm1, %v4577_v36  ;;  %v1434_v43 = vadd.f32 %v5681_v48, %v1433_v41  ;;  %v1946_v44 = vadd.f32 %v5681_v48, %v1945_v42  ;;  %v4845_v45 = vpop.f32.mrb[22].mxu0  ;;  %v4973_v46 = vpop.f32.mrb[22].mxu1 }
 0x108   :  { %v2398_v47 = vmax.f32 %v1442_v39, 0.0  ;;  %v2526_v49 = vmax.f32 %v1954_v40, 0.0  ;;  %v1445_v50 = vadd.f32 %v4845_v45, %v5681_v48  ;;  %v1957_v51 = vadd.f32 %v4973_v46, %v5681_v48  ;;  %v1436_v52 = vpop.f32.mrb[23].mxu0  ;;  %v1948_v53 = vpop.f32.mrb[23].mxu1 }
 0x109   :  { %v2396_v54 = vmax.f32 %v1434_v43, 0.0  ;;  %v2524_v55 = vmax.f32 %v1946_v44, 0.0  ;;  %v1437_v56 = vadd.f32 %v5681_v48, %v1436_v52  ;;  %v1949_v57 = vadd.f32 %v5681_v48, %v1948_v53 }
 0x10a   :  { %v4454_v58 = vpack.c.bf16 %v2398_v47, %v2398_v47  ;;  %v4582_v59 = vpack.c.bf16 %v2526_v49, %v2526_v49  ;;  %v2399_v60 = vmax.f32 %v1445_v50, 0.0  ;;  %v2527_v61 = vmax.f32 %v1957_v51, 0.0 }
 0x10b   :  { %v4452_v62 = vpack.c.bf16 %v2396_v54, %v2396_v54  ;;  %v4580_v63 = vpack.c.bf16 %v2524_v55, %v2524_v55  ;;  %v2397_v0 = vmax.f32 %v1437_v56, 0.0  ;;  %v2525_v1 = vmax.f32 %v1949_v57, 0.0 }
 0x10c   :  { %3679 = vst.msk [vmem:[%s7050_s3 + $0x58] sm:$0xf] %vm3656_vm1, %v4454_v58  ;;  %3807 = vst.msk [vmem:[%s7050_s3 + $0x258] sm:$0xf] %vm3656_vm1, %v4582_v59  ;;  %v4455_v2 = vpack.c.bf16 %v2399_v60, %v2399_v60  ;;  %v4583_v3 = vpack.c.bf16 %v2527_v61, %v2527_v61 }
 0x10d   :  { %3677 = vst.msk [vmem:[%s7050_s3 + $0x50] sm:$0xf] %vm3656_vm1, %v4452_v62  ;;  %3805 = vst.msk [vmem:[%s7050_s3 + $0x250] sm:$0xf] %vm3656_vm1, %v4580_v63  ;;  %v4453_v4 = vpack.c.bf16 %v2397_v0, %v2397_v0  ;;  %v4581_v5 = vpack.c.bf16 %v2525_v1, %v2525_v1  ;;  %v4848_v6 = vpop.f32.mrb[24].mxu0  ;;  %v4976_v7 = vpop.f32.mrb[24].mxu1 }
 0x10e   :  { %3680 = vst.msk [vmem:[%s7050_s3 + $0x5c] sm:$0xf] %vm3656_vm1, %v4455_v2  ;;  %3808 = vst.msk [vmem:[%s7050_s3 + $0x25c] sm:$0xf] %vm3656_vm1, %v4583_v3  ;;  %v1458_v8 = vadd.f32 %v4848_v6, %v5681_v48  ;;  %v1970_v9 = vadd.f32 %v4976_v7, %v5681_v48  ;;  %v1449_v10 = vpop.f32.mrb[25].mxu0  ;;  %v1961_v11 = vpop.f32.mrb[25].mxu1 }
 0x10f   :  { %3678 = vst.msk [vmem:[%s7050_s3 + $0x54] sm:$0xf] %vm3656_vm1, %v4453_v4  ;;  %3806 = vst.msk [vmem:[%s7050_s3 + $0x254] sm:$0xf] %vm3656_vm1, %v4581_v5  ;;  %v1450_v12 = vadd.f32 %v5681_v48, %v1449_v10  ;;  %v1962_v13 = vadd.f32 %v5681_v48, %v1961_v11  ;;  %v4849_v14 = vpop.f32.mrb[26].mxu0  ;;  %v4977_v15 = vpop.f32.mrb[26].mxu1 }
 0x110   :  { %v2402_v16 = vmax.f32 %v1458_v8, 0.0  ;;  %v2530_v17 = vmax.f32 %v1970_v9, 0.0  ;;  %v1461_v18 = vadd.f32 %v4849_v14, %v5681_v48  ;;  %v1973_v19 = vadd.f32 %v4977_v15, %v5681_v48  ;;  %v1452_v20 = vpop.f32.mrb[27].mxu0  ;;  %v1964_v21 = vpop.f32.mrb[27].mxu1 }
 0x111   :  { %v2400_v22 = vmax.f32 %v1450_v12, 0.0  ;;  %v2528_v23 = vmax.f32 %v1962_v13, 0.0  ;;  %v1453_v24 = vadd.f32 %v5681_v48, %v1452_v20  ;;  %v1965_v25 = vadd.f32 %v5681_v48, %v1964_v21 }
 0x112   :  { %v4458_v26 = vpack.c.bf16 %v2402_v16, %v2402_v16  ;;  %v4586_v27 = vpack.c.bf16 %v2530_v17, %v2530_v17  ;;  %v2403_v28 = vmax.f32 %v1461_v18, 0.0  ;;  %v2531_v29 = vmax.f32 %v1973_v19, 0.0 }
 0x113   :  { %v4456_v30 = vpack.c.bf16 %v2400_v22, %v2400_v22  ;;  %v4584_v31 = vpack.c.bf16 %v2528_v23, %v2528_v23  ;;  %v2401_v32 = vmax.f32 %v1453_v24, 0.0  ;;  %v2529_v33 = vmax.f32 %v1965_v25, 0.0 }
 0x114   :  { %3683 = vst.msk [vmem:[%s7050_s3 + $0x68] sm:$0xf] %vm3656_vm1, %v4458_v26  ;;  %3811 = vst.msk [vmem:[%s7050_s3 + $0x268] sm:$0xf] %vm3656_vm1, %v4586_v27  ;;  %v4459_v34 = vpack.c.bf16 %v2403_v28, %v2403_v28  ;;  %v4587_v35 = vpack.c.bf16 %v2531_v29, %v2531_v29 }
 0x115   :  { %3681 = vst.msk [vmem:[%s7050_s3 + $0x60] sm:$0xf] %vm3656_vm1, %v4456_v30  ;;  %3809 = vst.msk [vmem:[%s7050_s3 + $0x260] sm:$0xf] %vm3656_vm1, %v4584_v31  ;;  %v4457_v36 = vpack.c.bf16 %v2401_v32, %v2401_v32  ;;  %v4585_v37 = vpack.c.bf16 %v2529_v33, %v2529_v33  ;;  %v4852_v38 = vpop.f32.mrb[28].mxu0  ;;  %v4980_v39 = vpop.f32.mrb[28].mxu1 }
 0x116   :  { %3684 = vst.msk [vmem:[%s7050_s3 + $0x6c] sm:$0xf] %vm3656_vm1, %v4459_v34  ;;  %3812 = vst.msk [vmem:[%s7050_s3 + $0x26c] sm:$0xf] %vm3656_vm1, %v4587_v35  ;;  %v1474_v40 = vadd.f32 %v4852_v38, %v5681_v48  ;;  %v1986_v41 = vadd.f32 %v4980_v39, %v5681_v48  ;;  %v1465_v42 = vpop.f32.mrb[29].mxu0  ;;  %v1977_v43 = vpop.f32.mrb[29].mxu1 }
 0x117   :  { %3682 = vst.msk [vmem:[%s7050_s3 + $0x64] sm:$0xf] %vm3656_vm1, %v4457_v36  ;;  %3810 = vst.msk [vmem:[%s7050_s3 + $0x264] sm:$0xf] %vm3656_vm1, %v4585_v37  ;;  %v1466_v44 = vadd.f32 %v5681_v48, %v1465_v42  ;;  %v1978_v45 = vadd.f32 %v5681_v48, %v1977_v43  ;;  %v4853_v46 = vpop.f32.mrb[30].mxu0  ;;  %v4981_v47 = vpop.f32.mrb[30].mxu1 }
 0x118   :  { %v2406_v49 = vmax.f32 %v1474_v40, 0.0  ;;  %v2534_v50 = vmax.f32 %v1986_v41, 0.0  ;;  %v1477_v51 = vadd.f32 %v4853_v46, %v5681_v48  ;;  %v1989_v52 = vadd.f32 %v4981_v47, %v5681_v48  ;;  %v1468_v53 = vpop.f32.mrb[31].mxu0  ;;  %v1980_v54 = vpop.f32.mrb[31].mxu1 }
 0x119   :  { %v2404_v55 = vmax.f32 %v1466_v44, 0.0  ;;  %v2532_v56 = vmax.f32 %v1978_v45, 0.0  ;;  %v1469_v57 = vadd.f32 %v5681_v48, %v1468_v53  ;;  %v1981_v58 = vadd.f32 %v5681_v48, %v1980_v54 }
 0x11a   :  { %v4462_v59 = vpack.c.bf16 %v2406_v49, %v2406_v49  ;;  %v4590_v60 = vpack.c.bf16 %v2534_v50, %v2534_v50  ;;  %v2407_v61 = vmax.f32 %v1477_v51, 0.0  ;;  %v2535_v62 = vmax.f32 %v1989_v52, 0.0 }
 0x11b   :  { %v4460_v63 = vpack.c.bf16 %v2404_v55, %v2404_v55  ;;  %v4588_v0 = vpack.c.bf16 %v2532_v56, %v2532_v56  ;;  %v2405_v1 = vmax.f32 %v1469_v57, 0.0  ;;  %v2533_v2 = vmax.f32 %v1981_v58, 0.0 }
 0x11c   :  { %3687 = vst.msk [vmem:[%s7050_s3 + $0x78] sm:$0xf] %vm3656_vm1, %v4462_v59  ;;  %3815 = vst.msk [vmem:[%s7050_s3 + $0x278] sm:$0xf] %vm3656_vm1, %v4590_v60  ;;  %v4463_v3 = vpack.c.bf16 %v2407_v61, %v2407_v61  ;;  %v4591_v4 = vpack.c.bf16 %v2535_v62, %v2535_v62 }
 0x11d   :  { %3685 = vst.msk [vmem:[%s7050_s3 + $0x70] sm:$0xf] %vm3656_vm1, %v4460_v63  ;;  %3813 = vst.msk [vmem:[%s7050_s3 + $0x270] sm:$0xf] %vm3656_vm1, %v4588_v0  ;;  %v4461_v5 = vpack.c.bf16 %v2405_v1, %v2405_v1  ;;  %v4589_v6 = vpack.c.bf16 %v2533_v2, %v2533_v2  ;;  %v4856_v7 = vpop.f32.mrb[32].mxu0  ;;  %v4984_v8 = vpop.f32.mrb[32].mxu1 }
 0x11e   :  { %3688 = vst.msk [vmem:[%s7050_s3 + $0x7c] sm:$0xf] %vm3656_vm1, %v4463_v3  ;;  %3816 = vst.msk [vmem:[%s7050_s3 + $0x27c] sm:$0xf] %vm3656_vm1, %v4591_v4  ;;  %v1490_v9 = vadd.f32 %v4856_v7, %v5681_v48  ;;  %v2002_v10 = vadd.f32 %v4984_v8, %v5681_v48  ;;  %v1481_v11 = vpop.f32.mrb[33].mxu0  ;;  %v1993_v12 = vpop.f32.mrb[33].mxu1 }
 0x11f   :  { %3686 = vst.msk [vmem:[%s7050_s3 + $0x74] sm:$0xf] %vm3656_vm1, %v4461_v5  ;;  %3814 = vst.msk [vmem:[%s7050_s3 + $0x274] sm:$0xf] %vm3656_vm1, %v4589_v6  ;;  %v1482_v13 = vadd.f32 %v5681_v48, %v1481_v11  ;;  %v1994_v14 = vadd.f32 %v5681_v48, %v1993_v12  ;;  %v4857_v15 = vpop.f32.mrb[34].mxu0  ;;  %v4985_v16 = vpop.f32.mrb[34].mxu1 }
 0x120   :  { %v2410_v17 = vmax.f32 %v1490_v9, 0.0  ;;  %v2538_v18 = vmax.f32 %v2002_v10, 0.0  ;;  %v1493_v19 = vadd.f32 %v4857_v15, %v5681_v48  ;;  %v2005_v20 = vadd.f32 %v4985_v16, %v5681_v48  ;;  %v1484_v21 = vpop.f32.mrb[35].mxu0  ;;  %v1996_v22 = vpop.f32.mrb[35].mxu1 }
 0x121   :  { %v2408_v23 = vmax.f32 %v1482_v13, 0.0  ;;  %v2536_v24 = vmax.f32 %v1994_v14, 0.0  ;;  %v1485_v25 = vadd.f32 %v5681_v48, %v1484_v21  ;;  %v1997_v26 = vadd.f32 %v5681_v48, %v1996_v22 }
 0x122   :  { %v4466_v27 = vpack.c.bf16 %v2410_v17, %v2410_v17  ;;  %v4594_v28 = vpack.c.bf16 %v2538_v18, %v2538_v18  ;;  %v2411_v29 = vmax.f32 %v1493_v19, 0.0  ;;  %v2539_v30 = vmax.f32 %v2005_v20, 0.0 }
 0x123   :  { %v4464_v31 = vpack.c.bf16 %v2408_v23, %v2408_v23  ;;  %v4592_v32 = vpack.c.bf16 %v2536_v24, %v2536_v24  ;;  %v2409_v33 = vmax.f32 %v1485_v25, 0.0  ;;  %v2537_v34 = vmax.f32 %v1997_v26, 0.0 }
 0x124   :  { %3691 = vst.msk [vmem:[%s7050_s3 + $0x88] sm:$0xf] %vm3656_vm1, %v4466_v27  ;;  %3819 = vst.msk [vmem:[%s7050_s3 + $0x288] sm:$0xf] %vm3656_vm1, %v4594_v28  ;;  %v4467_v35 = vpack.c.bf16 %v2411_v29, %v2411_v29  ;;  %v4595_v36 = vpack.c.bf16 %v2539_v30, %v2539_v30 }
 0x125   :  { %3689 = vst.msk [vmem:[%s7050_s3 + $0x80] sm:$0xf] %vm3656_vm1, %v4464_v31  ;;  %3817 = vst.msk [vmem:[%s7050_s3 + $0x280] sm:$0xf] %vm3656_vm1, %v4592_v32  ;;  %v4465_v37 = vpack.c.bf16 %v2409_v33, %v2409_v33  ;;  %v4593_v38 = vpack.c.bf16 %v2537_v34, %v2537_v34  ;;  %v4860_v39 = vpop.f32.mrb[36].mxu0  ;;  %v4988_v40 = vpop.f32.mrb[36].mxu1 }
 0x126   :  { %3692 = vst.msk [vmem:[%s7050_s3 + $0x8c] sm:$0xf] %vm3656_vm1, %v4467_v35  ;;  %3820 = vst.msk [vmem:[%s7050_s3 + $0x28c] sm:$0xf] %vm3656_vm1, %v4595_v36  ;;  %v1506_v41 = vadd.f32 %v4860_v39, %v5681_v48  ;;  %v2018_v42 = vadd.f32 %v4988_v40, %v5681_v48  ;;  %v1497_v43 = vpop.f32.mrb[37].mxu0  ;;  %v2009_v44 = vpop.f32.mrb[37].mxu1 }
 0x127   :  { %3690 = vst.msk [vmem:[%s7050_s3 + $0x84] sm:$0xf] %vm3656_vm1, %v4465_v37  ;;  %3818 = vst.msk [vmem:[%s7050_s3 + $0x284] sm:$0xf] %vm3656_vm1, %v4593_v38  ;;  %v1498_v45 = vadd.f32 %v5681_v48, %v1497_v43  ;;  %v2010_v46 = vadd.f32 %v5681_v48, %v2009_v44  ;;  %v4861_v47 = vpop.f32.mrb[38].mxu0  ;;  %v4989_v49 = vpop.f32.mrb[38].mxu1 }
 0x128   :  { %v2414_v50 = vmax.f32 %v1506_v41, 0.0  ;;  %v2542_v51 = vmax.f32 %v2018_v42, 0.0  ;;  %v1509_v52 = vadd.f32 %v4861_v47, %v5681_v48  ;;  %v2021_v53 = vadd.f32 %v4989_v49, %v5681_v48  ;;  %v1500_v54 = vpop.f32.mrb[39].mxu0  ;;  %v2012_v55 = vpop.f32.mrb[39].mxu1 }
 0x129   :  { %v2412_v56 = vmax.f32 %v1498_v45, 0.0  ;;  %v2540_v57 = vmax.f32 %v2010_v46, 0.0  ;;  %v1501_v58 = vadd.f32 %v5681_v48, %v1500_v54  ;;  %v2013_v59 = vadd.f32 %v5681_v48, %v2012_v55 }
 0x12a   :  { %v4470_v60 = vpack.c.bf16 %v2414_v50, %v2414_v50  ;;  %v4598_v61 = vpack.c.bf16 %v2542_v51, %v2542_v51  ;;  %v2415_v62 = vmax.f32 %v1509_v52, 0.0  ;;  %v2543_v63 = vmax.f32 %v2021_v53, 0.0 }
 0x12b   :  { %v4468_v0 = vpack.c.bf16 %v2412_v56, %v2412_v56  ;;  %v4596_v1 = vpack.c.bf16 %v2540_v57, %v2540_v57  ;;  %v2413_v2 = vmax.f32 %v1501_v58, 0.0  ;;  %v2541_v3 = vmax.f32 %v2013_v59, 0.0 }
 0x12c   :  { %3695 = vst.msk [vmem:[%s7050_s3 + $0x98] sm:$0xf] %vm3656_vm1, %v4470_v60  ;;  %3823 = vst.msk [vmem:[%s7050_s3 + $0x298] sm:$0xf] %vm3656_vm1, %v4598_v61  ;;  %v4471_v4 = vpack.c.bf16 %v2415_v62, %v2415_v62  ;;  %v4599_v5 = vpack.c.bf16 %v2543_v63, %v2543_v63 }
 0x12d   :  { %3693 = vst.msk [vmem:[%s7050_s3 + $0x90] sm:$0xf] %vm3656_vm1, %v4468_v0  ;;  %3821 = vst.msk [vmem:[%s7050_s3 + $0x290] sm:$0xf] %vm3656_vm1, %v4596_v1  ;;  %v4469_v6 = vpack.c.bf16 %v2413_v2, %v2413_v2  ;;  %v4597_v7 = vpack.c.bf16 %v2541_v3, %v2541_v3  ;;  %v4864_v8 = vpop.f32.mrb[40].mxu0  ;;  %v4992_v9 = vpop.f32.mrb[40].mxu1 }
 0x12e   :  { %3696 = vst.msk [vmem:[%s7050_s3 + $0x9c] sm:$0xf] %vm3656_vm1, %v4471_v4  ;;  %3824 = vst.msk [vmem:[%s7050_s3 + $0x29c] sm:$0xf] %vm3656_vm1, %v4599_v5  ;;  %v1522_v10 = vadd.f32 %v4864_v8, %v5681_v48  ;;  %v2034_v11 = vadd.f32 %v4992_v9, %v5681_v48  ;;  %v1513_v12 = vpop.f32.mrb[41].mxu0  ;;  %v2025_v13 = vpop.f32.mrb[41].mxu1 }
 0x12f   :  { %3694 = vst.msk [vmem:[%s7050_s3 + $0x94] sm:$0xf] %vm3656_vm1, %v4469_v6  ;;  %3822 = vst.msk [vmem:[%s7050_s3 + $0x294] sm:$0xf] %vm3656_vm1, %v4597_v7  ;;  %v1514_v14 = vadd.f32 %v5681_v48, %v1513_v12  ;;  %v2026_v15 = vadd.f32 %v5681_v48, %v2025_v13  ;;  %v4865_v16 = vpop.f32.mrb[42].mxu0  ;;  %v4993_v17 = vpop.f32.mrb[42].mxu1 }
 0x130   :  { %v2418_v18 = vmax.f32 %v1522_v10, 0.0  ;;  %v2546_v19 = vmax.f32 %v2034_v11, 0.0  ;;  %v1525_v20 = vadd.f32 %v4865_v16, %v5681_v48  ;;  %v2037_v21 = vadd.f32 %v4993_v17, %v5681_v48  ;;  %v1516_v22 = vpop.f32.mrb[43].mxu0  ;;  %v2028_v23 = vpop.f32.mrb[43].mxu1  ;;  %v6232_v10 = vld [vmem:[%s7049_s2] ss:$0 sm:$0xff] }
 0x131   :  { %v2416_v24 = vmax.f32 %v1514_v14, 0.0  ;;  %v2544_v25 = vmax.f32 %v2026_v15, 0.0  ;;  %v1517_v26 = vadd.f32 %v5681_v48, %v1516_v22  ;;  %v2029_v27 = vadd.f32 %v5681_v48, %v2028_v23 }
 0x132   :  { %v4474_v28 = vpack.c.bf16 %v2418_v18, %v2418_v18  ;;  %v4602_v29 = vpack.c.bf16 %v2546_v19, %v2546_v19  ;;  %v2419_v30 = vmax.f32 %v1525_v20, 0.0  ;;  %v2547_v31 = vmax.f32 %v2037_v21, 0.0 }
 0x133   :  { %v4472_v32 = vpack.c.bf16 %v2416_v24, %v2416_v24  ;;  %v4600_v33 = vpack.c.bf16 %v2544_v25, %v2544_v25  ;;  %v2417_v34 = vmax.f32 %v1517_v26, 0.0  ;;  %v2545_v35 = vmax.f32 %v2029_v27, 0.0 }
 0x134   :  { %3699 = vst.msk [vmem:[%s7050_s3 + $0xa8] sm:$0xf] %vm3656_vm1, %v4474_v28  ;;  %3827 = vst.msk [vmem:[%s7050_s3 + $0x2a8] sm:$0xf] %vm3656_vm1, %v4602_v29  ;;  %v4475_v36 = vpack.c.bf16 %v2419_v30, %v2419_v30  ;;  %v4603_v37 = vpack.c.bf16 %v2547_v31, %v2547_v31 }
 0x135   :  { %3697 = vst.msk [vmem:[%s7050_s3 + $0xa0] sm:$0xf] %vm3656_vm1, %v4472_v32  ;;  %3825 = vst.msk [vmem:[%s7050_s3 + $0x2a0] sm:$0xf] %vm3656_vm1, %v4600_v33  ;;  %v4473_v38 = vpack.c.bf16 %v2417_v34, %v2417_v34  ;;  %v4601_v39 = vpack.c.bf16 %v2545_v35, %v2545_v35  ;;  %v4868_v40 = vpop.f32.mrb[44].mxu0  ;;  %v4996_v41 = vpop.f32.mrb[44].mxu1 }
 0x136   :  { %3700 = vst.msk [vmem:[%s7050_s3 + $0xac] sm:$0xf] %vm3656_vm1, %v4475_v36  ;;  %3828 = vst.msk [vmem:[%s7050_s3 + $0x2ac] sm:$0xf] %vm3656_vm1, %v4603_v37  ;;  %v1538_v42 = vadd.f32 %v4868_v40, %v5681_v48  ;;  %v2050_v43 = vadd.f32 %v4996_v41, %v5681_v48  ;;  %v1529_v44 = vpop.f32.mrb[45].mxu0  ;;  %v2041_v45 = vpop.f32.mrb[45].mxu1 }
 0x137   :  { %3698 = vst.msk [vmem:[%s7050_s3 + $0xa4] sm:$0xf] %vm3656_vm1, %v4473_v38  ;;  %3826 = vst.msk [vmem:[%s7050_s3 + $0x2a4] sm:$0xf] %vm3656_vm1, %v4601_v39  ;;  %v1530_v46 = vadd.f32 %v5681_v48, %v1529_v44  ;;  %v2042_v47 = vadd.f32 %v5681_v48, %v2041_v45  ;;  %v4869_v49 = vpop.f32.mrb[46].mxu0  ;;  %v4997_v50 = vpop.f32.mrb[46].mxu1 }
 0x138   :  { %v2422_v51 = vmax.f32 %v1538_v42, 0.0  ;;  %v2550_v52 = vmax.f32 %v2050_v43, 0.0  ;;  %v1541_v53 = vadd.f32 %v4869_v49, %v5681_v48  ;;  %v2053_v54 = vadd.f32 %v4997_v50, %v5681_v48  ;;  %v1532_v55 = vpop.f32.mrb[47].mxu0  ;;  %v2044_v56 = vpop.f32.mrb[47].mxu1 }
 0x139   :  { %v2420_v57 = vmax.f32 %v1530_v46, 0.0  ;;  %v2548_v58 = vmax.f32 %v2042_v47, 0.0  ;;  %v1533_v59 = vadd.f32 %v5681_v48, %v1532_v55  ;;  %v2045_v60 = vadd.f32 %v5681_v48, %v2044_v56 }
 0x13a   :  { %v4478_v61 = vpack.c.bf16 %v2422_v51, %v2422_v51  ;;  %v4606_v62 = vpack.c.bf16 %v2550_v52, %v2550_v52  ;;  %v2423_v63 = vmax.f32 %v1541_v53, 0.0  ;;  %v2551_v0 = vmax.f32 %v2053_v54, 0.0 }
 0x13b   :  { %v4476_v1 = vpack.c.bf16 %v2420_v57, %v2420_v57  ;;  %v4604_v2 = vpack.c.bf16 %v2548_v58, %v2548_v58  ;;  %v2421_v3 = vmax.f32 %v1533_v59, 0.0  ;;  %v2549_v4 = vmax.f32 %v2045_v60, 0.0 }
 0x13c   :  { %3703 = vst.msk [vmem:[%s7050_s3 + $0xb8] sm:$0xf] %vm3656_vm1, %v4478_v61  ;;  %3831 = vst.msk [vmem:[%s7050_s3 + $0x2b8] sm:$0xf] %vm3656_vm1, %v4606_v62  ;;  %v4479_v5 = vpack.c.bf16 %v2423_v63, %v2423_v63  ;;  %v4607_v48 = vpack.c.bf16 %v2551_v0, %v2551_v0 }
 0x13d   :  { %3701 = vst.msk [vmem:[%s7050_s3 + $0xb0] sm:$0xf] %vm3656_vm1, %v4476_v1  ;;  %3829 = vst.msk [vmem:[%s7050_s3 + $0x2b0] sm:$0xf] %vm3656_vm1, %v4604_v2  ;;  %v4477_v6 = vpack.c.bf16 %v2421_v3, %v2421_v3  ;;  %v4605_v7 = vpack.c.bf16 %v2549_v4, %v2549_v4  ;;  %v4872_v8 = vpop.f32.mrb[48].mxu0  ;;  %v5000_v9 = vpop.f32.mrb[48].mxu1 }
 0x13e   :  { %3704 = vst.msk [vmem:[%s7050_s3 + $0xbc] sm:$0xf] %vm3656_vm1, %v4479_v5  ;;  %3832 = vst.msk [vmem:[%s7050_s3 + $0x2bc] sm:$0xf] %vm3656_vm1, %v4607_v48  ;;  %v1554_v11 = vadd.f32 %v6232_v10, %v4872_v8  ;;  %v2066_v12 = vadd.f32 %v6232_v10, %v5000_v9  ;;  %v1545_v13 = vpop.f32.mrb[49].mxu0  ;;  %v2057_v14 = vpop.f32.mrb[49].mxu1 }
 0x13f   :  { %3702 = vst.msk [vmem:[%s7050_s3 + $0xb4] sm:$0xf] %vm3656_vm1, %v4477_v6  ;;  %3830 = vst.msk [vmem:[%s7050_s3 + $0x2b4] sm:$0xf] %vm3656_vm1, %v4605_v7  ;;  %v1546_v15 = vadd.f32 %v6232_v10, %v1545_v13  ;;  %v2058_v16 = vadd.f32 %v6232_v10, %v2057_v14  ;;  %v4873_v17 = vpop.f32.mrb[50].mxu0  ;;  %v5001_v18 = vpop.f32.mrb[50].mxu1 }
 0x140   :  { %v2426_v19 = vmax.f32 %v1554_v11, 0.0  ;;  %v2554_v20 = vmax.f32 %v2066_v12, 0.0  ;;  %v1557_v21 = vadd.f32 %v6232_v10, %v4873_v17  ;;  %v2069_v22 = vadd.f32 %v6232_v10, %v5001_v18  ;;  %v1548_v23 = vpop.f32.mrb[51].mxu0  ;;  %v2060_v24 = vpop.f32.mrb[51].mxu1 }
 0x141   :  { %v2424_v25 = vmax.f32 %v1546_v15, 0.0  ;;  %v2552_v26 = vmax.f32 %v2058_v16, 0.0  ;;  %v1549_v27 = vadd.f32 %v6232_v10, %v1548_v23  ;;  %v2061_v28 = vadd.f32 %v6232_v10, %v2060_v24 }
 0x142   :  { %v4482_v29 = vpack.c.bf16 %v2426_v19, %v2426_v19  ;;  %v4610_v30 = vpack.c.bf16 %v2554_v20, %v2554_v20  ;;  %v2427_v31 = vmax.f32 %v1557_v21, 0.0  ;;  %v2555_v32 = vmax.f32 %v2069_v22, 0.0 }
 0x143   :  { %v4480_v33 = vpack.c.bf16 %v2424_v25, %v2424_v25  ;;  %v4608_v34 = vpack.c.bf16 %v2552_v26, %v2552_v26  ;;  %v2425_v35 = vmax.f32 %v1549_v27, 0.0  ;;  %v2553_v36 = vmax.f32 %v2061_v28, 0.0 }
 0x144   :  { %3707 = vst.msk [vmem:[%s7050_s3 + $0xc8] sm:$0xf] %vm3656_vm1, %v4482_v29  ;;  %3835 = vst.msk [vmem:[%s7050_s3 + $0x2c8] sm:$0xf] %vm3656_vm1, %v4610_v30  ;;  %v4483_v37 = vpack.c.bf16 %v2427_v31, %v2427_v31  ;;  %v4611_v38 = vpack.c.bf16 %v2555_v32, %v2555_v32 }
 0x145   :  { %3705 = vst.msk [vmem:[%s7050_s3 + $0xc0] sm:$0xf] %vm3656_vm1, %v4480_v33  ;;  %3833 = vst.msk [vmem:[%s7050_s3 + $0x2c0] sm:$0xf] %vm3656_vm1, %v4608_v34  ;;  %v4481_v39 = vpack.c.bf16 %v2425_v35, %v2425_v35  ;;  %v4609_v40 = vpack.c.bf16 %v2553_v36, %v2553_v36  ;;  %v4876_v41 = vpop.f32.mrb[52].mxu0  ;;  %v5004_v42 = vpop.f32.mrb[52].mxu1 }
 0x146   :  { %3708 = vst.msk [vmem:[%s7050_s3 + $0xcc] sm:$0xf] %vm3656_vm1, %v4483_v37  ;;  %3836 = vst.msk [vmem:[%s7050_s3 + $0x2cc] sm:$0xf] %vm3656_vm1, %v4611_v38  ;;  %v1570_v43 = vadd.f32 %v6232_v10, %v4876_v41  ;;  %v2082_v44 = vadd.f32 %v6232_v10, %v5004_v42  ;;  %v1561_v45 = vpop.f32.mrb[53].mxu0  ;;  %v2073_v46 = vpop.f32.mrb[53].mxu1 }
 0x147   :  { %3706 = vst.msk [vmem:[%s7050_s3 + $0xc4] sm:$0xf] %vm3656_vm1, %v4481_v39  ;;  %3834 = vst.msk [vmem:[%s7050_s3 + $0x2c4] sm:$0xf] %vm3656_vm1, %v4609_v40  ;;  %v1562_v47 = vadd.f32 %v6232_v10, %v1561_v45  ;;  %v2074_v49 = vadd.f32 %v6232_v10, %v2073_v46  ;;  %v4877_v50 = vpop.f32.mrb[54].mxu0  ;;  %v5005_v51 = vpop.f32.mrb[54].mxu1 }
 0x148   :  { %v2430_v52 = vmax.f32 %v1570_v43, 0.0  ;;  %v2558_v53 = vmax.f32 %v2082_v44, 0.0  ;;  %v1573_v54 = vadd.f32 %v6232_v10, %v4877_v50  ;;  %v2085_v55 = vadd.f32 %v6232_v10, %v5005_v51  ;;  %v1564_v56 = vpop.f32.mrb[55].mxu0  ;;  %v2076_v57 = vpop.f32.mrb[55].mxu1 }
 0x149   :  { %v2428_v58 = vmax.f32 %v1562_v47, 0.0  ;;  %v2556_v59 = vmax.f32 %v2074_v49, 0.0  ;;  %v1565_v60 = vadd.f32 %v6232_v10, %v1564_v56  ;;  %v2077_v61 = vadd.f32 %v6232_v10, %v2076_v57 }
 0x14a   :  { %v4486_v62 = vpack.c.bf16 %v2430_v52, %v2430_v52  ;;  %v4614_v63 = vpack.c.bf16 %v2558_v53, %v2558_v53  ;;  %v2431_v0 = vmax.f32 %v1573_v54, 0.0  ;;  %v2559_v1 = vmax.f32 %v2085_v55, 0.0 }
 0x14b   :  { %v4484_v2 = vpack.c.bf16 %v2428_v58, %v2428_v58  ;;  %v4612_v3 = vpack.c.bf16 %v2556_v59, %v2556_v59  ;;  %v2429_v4 = vmax.f32 %v1565_v60, 0.0  ;;  %v2557_v5 = vmax.f32 %v2077_v61, 0.0 }
 0x14c   :  { %3711 = vst.msk [vmem:[%s7050_s3 + $0xd8] sm:$0xf] %vm3656_vm1, %v4486_v62  ;;  %3839 = vst.msk [vmem:[%s7050_s3 + $0x2d8] sm:$0xf] %vm3656_vm1, %v4614_v63  ;;  %v4487_v48 = vpack.c.bf16 %v2431_v0, %v2431_v0  ;;  %v4615_v6 = vpack.c.bf16 %v2559_v1, %v2559_v1 }
 0x14d   :  { %3709 = vst.msk [vmem:[%s7050_s3 + $0xd0] sm:$0xf] %vm3656_vm1, %v4484_v2  ;;  %3837 = vst.msk [vmem:[%s7050_s3 + $0x2d0] sm:$0xf] %vm3656_vm1, %v4612_v3  ;;  %v4485_v7 = vpack.c.bf16 %v2429_v4, %v2429_v4  ;;  %v4613_v8 = vpack.c.bf16 %v2557_v5, %v2557_v5  ;;  %v4880_v9 = vpop.f32.mrb[56].mxu0  ;;  %v5008_v11 = vpop.f32.mrb[56].mxu1 }
 0x14e   :  { %3712 = vst.msk [vmem:[%s7050_s3 + $0xdc] sm:$0xf] %vm3656_vm1, %v4487_v48  ;;  %3840 = vst.msk [vmem:[%s7050_s3 + $0x2dc] sm:$0xf] %vm3656_vm1, %v4615_v6  ;;  %v1586_v12 = vadd.f32 %v6232_v10, %v4880_v9  ;;  %v2098_v13 = vadd.f32 %v6232_v10, %v5008_v11  ;;  %v1577_v14 = vpop.f32.mrb[57].mxu0  ;;  %v2089_v15 = vpop.f32.mrb[57].mxu1 }
 0x14f   :  { %3710 = vst.msk [vmem:[%s7050_s3 + $0xd4] sm:$0xf] %vm3656_vm1, %v4485_v7  ;;  %3838 = vst.msk [vmem:[%s7050_s3 + $0x2d4] sm:$0xf] %vm3656_vm1, %v4613_v8  ;;  %v1578_v16 = vadd.f32 %v6232_v10, %v1577_v14  ;;  %v2090_v17 = vadd.f32 %v6232_v10, %v2089_v15  ;;  %v4881_v18 = vpop.f32.mrb[58].mxu0  ;;  %v5009_v19 = vpop.f32.mrb[58].mxu1 }
 0x150   :  { %v2434_v20 = vmax.f32 %v1586_v12, 0.0  ;;  %v2562_v21 = vmax.f32 %v2098_v13, 0.0  ;;  %v1589_v22 = vadd.f32 %v6232_v10, %v4881_v18  ;;  %v2101_v23 = vadd.f32 %v6232_v10, %v5009_v19  ;;  %v1580_v24 = vpop.f32.mrb[59].mxu0  ;;  %v2092_v25 = vpop.f32.mrb[59].mxu1 }
 0x151   :  { %v2432_v26 = vmax.f32 %v1578_v16, 0.0  ;;  %v2560_v27 = vmax.f32 %v2090_v17, 0.0  ;;  %v1581_v28 = vadd.f32 %v6232_v10, %v1580_v24  ;;  %v2093_v29 = vadd.f32 %v6232_v10, %v2092_v25 }
 0x152   :  { %v4490_v30 = vpack.c.bf16 %v2434_v20, %v2434_v20  ;;  %v4618_v31 = vpack.c.bf16 %v2562_v21, %v2562_v21  ;;  %v2435_v32 = vmax.f32 %v1589_v22, 0.0  ;;  %v2563_v33 = vmax.f32 %v2101_v23, 0.0 }
 0x153   :  { %v4488_v34 = vpack.c.bf16 %v2432_v26, %v2432_v26  ;;  %v4616_v35 = vpack.c.bf16 %v2560_v27, %v2560_v27  ;;  %v2433_v36 = vmax.f32 %v1581_v28, 0.0  ;;  %v2561_v37 = vmax.f32 %v2093_v29, 0.0 }
 0x154   :  { %3715 = vst.msk [vmem:[%s7050_s3 + $0xe8] sm:$0xf] %vm3656_vm1, %v4490_v30  ;;  %3843 = vst.msk [vmem:[%s7050_s3 + $0x2e8] sm:$0xf] %vm3656_vm1, %v4618_v31  ;;  %v4491_v38 = vpack.c.bf16 %v2435_v32, %v2435_v32  ;;  %v4619_v39 = vpack.c.bf16 %v2563_v33, %v2563_v33 }
 0x155   :  { %3713 = vst.msk [vmem:[%s7050_s3 + $0xe0] sm:$0xf] %vm3656_vm1, %v4488_v34  ;;  %3841 = vst.msk [vmem:[%s7050_s3 + $0x2e0] sm:$0xf] %vm3656_vm1, %v4616_v35  ;;  %v4489_v40 = vpack.c.bf16 %v2433_v36, %v2433_v36  ;;  %v4617_v41 = vpack.c.bf16 %v2561_v37, %v2561_v37  ;;  %v4884_v42 = vpop.f32.mrb[60].mxu0  ;;  %v5012_v43 = vpop.f32.mrb[60].mxu1 }
 0x156   :  { %3716 = vst.msk [vmem:[%s7050_s3 + $0xec] sm:$0xf] %vm3656_vm1, %v4491_v38  ;;  %3844 = vst.msk [vmem:[%s7050_s3 + $0x2ec] sm:$0xf] %vm3656_vm1, %v4619_v39  ;;  %v1602_v44 = vadd.f32 %v6232_v10, %v4884_v42  ;;  %v2114_v45 = vadd.f32 %v6232_v10, %v5012_v43  ;;  %v1593_v46 = vpop.f32.mrb[61].mxu0  ;;  %v2105_v47 = vpop.f32.mrb[61].mxu1 }
 0x157   :  { %3714 = vst.msk [vmem:[%s7050_s3 + $0xe4] sm:$0xf] %vm3656_vm1, %v4489_v40  ;;  %3842 = vst.msk [vmem:[%s7050_s3 + $0x2e4] sm:$0xf] %vm3656_vm1, %v4617_v41  ;;  %v1594_v49 = vadd.f32 %v6232_v10, %v1593_v46  ;;  %v2106_v50 = vadd.f32 %v6232_v10, %v2105_v47  ;;  %v4885_v51 = vpop.f32.mrb[62].mxu0  ;;  %v5013_v52 = vpop.f32.mrb[62].mxu1 }
 0x158   :  { %v2438_v53 = vmax.f32 %v1602_v44, 0.0  ;;  %v2566_v54 = vmax.f32 %v2114_v45, 0.0  ;;  %v1605_v55 = vadd.f32 %v6232_v10, %v4885_v51  ;;  %v2117_v56 = vadd.f32 %v6232_v10, %v5013_v52  ;;  %v1596_v57 = vpop.f32.mrb[63].mxu0  ;;  %v2108_v58 = vpop.f32.mrb[63].mxu1 }
 0x159   :  { %v2436_v59 = vmax.f32 %v1594_v49, 0.0  ;;  %v2564_v60 = vmax.f32 %v2106_v50, 0.0  ;;  %v1597_v61 = vadd.f32 %v6232_v10, %v1596_v57  ;;  %v2109_v62 = vadd.f32 %v6232_v10, %v2108_v58 }
 0x15a   :  { %v4494_v63 = vpack.c.bf16 %v2438_v53, %v2438_v53  ;;  %v4622_v0 = vpack.c.bf16 %v2566_v54, %v2566_v54  ;;  %v2439_v1 = vmax.f32 %v1605_v55, 0.0  ;;  %v2567_v2 = vmax.f32 %v2117_v56, 0.0 }
 0x15b   :  { %v4492_v3 = vpack.c.bf16 %v2436_v59, %v2436_v59  ;;  %v4620_v4 = vpack.c.bf16 %v2564_v60, %v2564_v60  ;;  %v2437_v5 = vmax.f32 %v1597_v61, 0.0  ;;  %v2565_v48 = vmax.f32 %v2109_v62, 0.0 }
 0x15c   :  { %3719 = vst.msk [vmem:[%s7050_s3 + $0xf8] sm:$0xf] %vm3656_vm1, %v4494_v63  ;;  %3847 = vst.msk [vmem:[%s7050_s3 + $0x2f8] sm:$0xf] %vm3656_vm1, %v4622_v0  ;;  %v4495_v6 = vpack.c.bf16 %v2439_v1, %v2439_v1  ;;  %v4623_v7 = vpack.c.bf16 %v2567_v2, %v2567_v2 }
 0x15d   :  { %3717 = vst.msk [vmem:[%s7050_s3 + $0xf0] sm:$0xf] %vm3656_vm1, %v4492_v3  ;;  %3845 = vst.msk [vmem:[%s7050_s3 + $0x2f0] sm:$0xf] %vm3656_vm1, %v4620_v4  ;;  %v4493_v8 = vpack.c.bf16 %v2437_v5, %v2437_v5  ;;  %v4621_v9 = vpack.c.bf16 %v2565_v48, %v2565_v48  ;;  %v4888_v11 = vpop.f32.mrb[64].mxu0  ;;  %v5016_v12 = vpop.f32.mrb[64].mxu1 }
 0x15e   :  { %3720 = vst.msk [vmem:[%s7050_s3 + $0xfc] sm:$0xf] %vm3656_vm1, %v4495_v6  ;;  %3848 = vst.msk [vmem:[%s7050_s3 + $0x2fc] sm:$0xf] %vm3656_vm1, %v4623_v7  ;;  %v1618_v13 = vadd.f32 %v6232_v10, %v4888_v11  ;;  %v2130_v14 = vadd.f32 %v6232_v10, %v5016_v12  ;;  %v1609_v15 = vpop.f32.mrb[65].mxu0  ;;  %v2121_v16 = vpop.f32.mrb[65].mxu1 }
 0x15f   :  { %3718 = vst.msk [vmem:[%s7050_s3 + $0xf4] sm:$0xf] %vm3656_vm1, %v4493_v8  ;;  %3846 = vst.msk [vmem:[%s7050_s3 + $0x2f4] sm:$0xf] %vm3656_vm1, %v4621_v9  ;;  %v1610_v17 = vadd.f32 %v6232_v10, %v1609_v15  ;;  %v2122_v18 = vadd.f32 %v6232_v10, %v2121_v16  ;;  %v4889_v19 = vpop.f32.mrb[66].mxu0  ;;  %v5017_v20 = vpop.f32.mrb[66].mxu1 }
 0x160   :  { %v2442_v21 = vmax.f32 %v1618_v13, 0.0  ;;  %v2570_v22 = vmax.f32 %v2130_v14, 0.0  ;;  %v1621_v23 = vadd.f32 %v6232_v10, %v4889_v19  ;;  %v2133_v24 = vadd.f32 %v6232_v10, %v5017_v20  ;;  %v1612_v25 = vpop.f32.mrb[67].mxu0  ;;  %v2124_v26 = vpop.f32.mrb[67].mxu1 }
 0x161   :  { %v2440_v27 = vmax.f32 %v1610_v17, 0.0  ;;  %v2568_v28 = vmax.f32 %v2122_v18, 0.0  ;;  %v1613_v29 = vadd.f32 %v6232_v10, %v1612_v25  ;;  %v2125_v30 = vadd.f32 %v6232_v10, %v2124_v26 }
 0x162   :  { %v4498_v31 = vpack.c.bf16 %v2442_v21, %v2442_v21  ;;  %v4626_v32 = vpack.c.bf16 %v2570_v22, %v2570_v22  ;;  %v2443_v33 = vmax.f32 %v1621_v23, 0.0  ;;  %v2571_v34 = vmax.f32 %v2133_v24, 0.0 }
 0x163   :  { %v4496_v35 = vpack.c.bf16 %v2440_v27, %v2440_v27  ;;  %v4624_v36 = vpack.c.bf16 %v2568_v28, %v2568_v28  ;;  %v2441_v37 = vmax.f32 %v1613_v29, 0.0  ;;  %v2569_v38 = vmax.f32 %v2125_v30, 0.0 }
 0x164   :  { %3723 = vst.msk [vmem:[%s7050_s3 + $0x108] sm:$0xf] %vm3656_vm1, %v4498_v31  ;;  %3851 = vst.msk [vmem:[%s7050_s3 + $0x308] sm:$0xf] %vm3656_vm1, %v4626_v32  ;;  %v4499_v39 = vpack.c.bf16 %v2443_v33, %v2443_v33  ;;  %v4627_v40 = vpack.c.bf16 %v2571_v34, %v2571_v34 }
 0x165   :  { %3721 = vst.msk [vmem:[%s7050_s3 + $0x100] sm:$0xf] %vm3656_vm1, %v4496_v35  ;;  %3849 = vst.msk [vmem:[%s7050_s3 + $0x300] sm:$0xf] %vm3656_vm1, %v4624_v36  ;;  %v4497_v41 = vpack.c.bf16 %v2441_v37, %v2441_v37  ;;  %v4625_v42 = vpack.c.bf16 %v2569_v38, %v2569_v38  ;;  %v4892_v43 = vpop.f32.mrb[68].mxu0  ;;  %v5020_v44 = vpop.f32.mrb[68].mxu1 }
 0x166   :  { %3724 = vst.msk [vmem:[%s7050_s3 + $0x10c] sm:$0xf] %vm3656_vm1, %v4499_v39  ;;  %3852 = vst.msk [vmem:[%s7050_s3 + $0x30c] sm:$0xf] %vm3656_vm1, %v4627_v40  ;;  %v1634_v45 = vadd.f32 %v6232_v10, %v4892_v43  ;;  %v2146_v46 = vadd.f32 %v6232_v10, %v5020_v44  ;;  %v1625_v47 = vpop.f32.mrb[69].mxu0  ;;  %v2137_v49 = vpop.f32.mrb[69].mxu1 }
 0x167   :  { %3722 = vst.msk [vmem:[%s7050_s3 + $0x104] sm:$0xf] %vm3656_vm1, %v4497_v41  ;;  %3850 = vst.msk [vmem:[%s7050_s3 + $0x304] sm:$0xf] %vm3656_vm1, %v4625_v42  ;;  %v1626_v50 = vadd.f32 %v6232_v10, %v1625_v47  ;;  %v2138_v51 = vadd.f32 %v6232_v10, %v2137_v49  ;;  %v4893_v52 = vpop.f32.mrb[70].mxu0  ;;  %v5021_v53 = vpop.f32.mrb[70].mxu1 }
 0x168   :  { %v2446_v54 = vmax.f32 %v1634_v45, 0.0  ;;  %v2574_v55 = vmax.f32 %v2146_v46, 0.0  ;;  %v1637_v56 = vadd.f32 %v6232_v10, %v4893_v52  ;;  %v2149_v57 = vadd.f32 %v6232_v10, %v5021_v53  ;;  %v1628_v58 = vpop.f32.mrb[71].mxu0  ;;  %v2140_v59 = vpop.f32.mrb[71].mxu1 }
 0x169   :  { %v2444_v60 = vmax.f32 %v1626_v50, 0.0  ;;  %v2572_v61 = vmax.f32 %v2138_v51, 0.0  ;;  %v1629_v62 = vadd.f32 %v6232_v10, %v1628_v58  ;;  %v2141_v63 = vadd.f32 %v6232_v10, %v2140_v59 }
 0x16a   :  { %v4502_v0 = vpack.c.bf16 %v2446_v54, %v2446_v54  ;;  %v4630_v1 = vpack.c.bf16 %v2574_v55, %v2574_v55  ;;  %v2447_v2 = vmax.f32 %v1637_v56, 0.0  ;;  %v2575_v3 = vmax.f32 %v2149_v57, 0.0 }
 0x16b   :  { %v4500_v4 = vpack.c.bf16 %v2444_v60, %v2444_v60  ;;  %v4628_v5 = vpack.c.bf16 %v2572_v61, %v2572_v61  ;;  %v2445_v48 = vmax.f32 %v1629_v62, 0.0  ;;  %v2573_v6 = vmax.f32 %v2141_v63, 0.0 }
 0x16c   :  { %3727 = vst.msk [vmem:[%s7050_s3 + $0x118] sm:$0xf] %vm3656_vm1, %v4502_v0  ;;  %3855 = vst.msk [vmem:[%s7050_s3 + $0x318] sm:$0xf] %vm3656_vm1, %v4630_v1  ;;  %v4503_v7 = vpack.c.bf16 %v2447_v2, %v2447_v2  ;;  %v4631_v8 = vpack.c.bf16 %v2575_v3, %v2575_v3 }
 0x16d   :  { %3725 = vst.msk [vmem:[%s7050_s3 + $0x110] sm:$0xf] %vm3656_vm1, %v4500_v4  ;;  %3853 = vst.msk [vmem:[%s7050_s3 + $0x310] sm:$0xf] %vm3656_vm1, %v4628_v5  ;;  %v4501_v9 = vpack.c.bf16 %v2445_v48, %v2445_v48  ;;  %v4629_v11 = vpack.c.bf16 %v2573_v6, %v2573_v6  ;;  %v4896_v12 = vpop.f32.mrb[72].mxu0  ;;  %v5024_v13 = vpop.f32.mrb[72].mxu1 }
 0x16e   :  { %3728 = vst.msk [vmem:[%s7050_s3 + $0x11c] sm:$0xf] %vm3656_vm1, %v4503_v7  ;;  %3856 = vst.msk [vmem:[%s7050_s3 + $0x31c] sm:$0xf] %vm3656_vm1, %v4631_v8  ;;  %v1650_v14 = vadd.f32 %v6232_v10, %v4896_v12  ;;  %v2162_v15 = vadd.f32 %v6232_v10, %v5024_v13  ;;  %v1641_v16 = vpop.f32.mrb[73].mxu0  ;;  %v2153_v17 = vpop.f32.mrb[73].mxu1 }
 0x16f   :  { %3726 = vst.msk [vmem:[%s7050_s3 + $0x114] sm:$0xf] %vm3656_vm1, %v4501_v9  ;;  %3854 = vst.msk [vmem:[%s7050_s3 + $0x314] sm:$0xf] %vm3656_vm1, %v4629_v11  ;;  %v1642_v18 = vadd.f32 %v6232_v10, %v1641_v16  ;;  %v2154_v19 = vadd.f32 %v6232_v10, %v2153_v17  ;;  %v4897_v20 = vpop.f32.mrb[74].mxu0  ;;  %v5025_v21 = vpop.f32.mrb[74].mxu1 }
 0x170   :  { %v2450_v22 = vmax.f32 %v1650_v14, 0.0  ;;  %v2578_v23 = vmax.f32 %v2162_v15, 0.0  ;;  %v1653_v24 = vadd.f32 %v6232_v10, %v4897_v20  ;;  %v2165_v25 = vadd.f32 %v6232_v10, %v5025_v21  ;;  %v1644_v26 = vpop.f32.mrb[75].mxu0  ;;  %v2156_v27 = vpop.f32.mrb[75].mxu1 }
 0x171   :  { %v2448_v28 = vmax.f32 %v1642_v18, 0.0  ;;  %v2576_v29 = vmax.f32 %v2154_v19, 0.0  ;;  %v1645_v30 = vadd.f32 %v6232_v10, %v1644_v26  ;;  %v2157_v31 = vadd.f32 %v6232_v10, %v2156_v27 }
 0x172   :  { %v4506_v32 = vpack.c.bf16 %v2450_v22, %v2450_v22  ;;  %v4634_v33 = vpack.c.bf16 %v2578_v23, %v2578_v23  ;;  %v2451_v34 = vmax.f32 %v1653_v24, 0.0  ;;  %v2579_v35 = vmax.f32 %v2165_v25, 0.0 }
 0x173   :  { %v4504_v36 = vpack.c.bf16 %v2448_v28, %v2448_v28  ;;  %v4632_v37 = vpack.c.bf16 %v2576_v29, %v2576_v29  ;;  %v2449_v38 = vmax.f32 %v1645_v30, 0.0  ;;  %v2577_v39 = vmax.f32 %v2157_v31, 0.0 }
 0x174   :  { %3731 = vst.msk [vmem:[%s7050_s3 + $0x128] sm:$0xf] %vm3656_vm1, %v4506_v32  ;;  %3859 = vst.msk [vmem:[%s7050_s3 + $0x328] sm:$0xf] %vm3656_vm1, %v4634_v33  ;;  %v4507_v40 = vpack.c.bf16 %v2451_v34, %v2451_v34  ;;  %v4635_v41 = vpack.c.bf16 %v2579_v35, %v2579_v35 }
 0x175   :  { %3729 = vst.msk [vmem:[%s7050_s3 + $0x120] sm:$0xf] %vm3656_vm1, %v4504_v36  ;;  %3857 = vst.msk [vmem:[%s7050_s3 + $0x320] sm:$0xf] %vm3656_vm1, %v4632_v37  ;;  %v4505_v42 = vpack.c.bf16 %v2449_v38, %v2449_v38  ;;  %v4633_v43 = vpack.c.bf16 %v2577_v39, %v2577_v39  ;;  %v4900_v44 = vpop.f32.mrb[76].mxu0  ;;  %v5028_v45 = vpop.f32.mrb[76].mxu1 }
 0x176   :  { %3732 = vst.msk [vmem:[%s7050_s3 + $0x12c] sm:$0xf] %vm3656_vm1, %v4507_v40  ;;  %3860 = vst.msk [vmem:[%s7050_s3 + $0x32c] sm:$0xf] %vm3656_vm1, %v4635_v41  ;;  %v1666_v46 = vadd.f32 %v6232_v10, %v4900_v44  ;;  %v2178_v47 = vadd.f32 %v6232_v10, %v5028_v45  ;;  %v1657_v49 = vpop.f32.mrb[77].mxu0  ;;  %v2169_v50 = vpop.f32.mrb[77].mxu1 }
 0x177   :  { %3730 = vst.msk [vmem:[%s7050_s3 + $0x124] sm:$0xf] %vm3656_vm1, %v4505_v42  ;;  %3858 = vst.msk [vmem:[%s7050_s3 + $0x324] sm:$0xf] %vm3656_vm1, %v4633_v43  ;;  %v1658_v51 = vadd.f32 %v6232_v10, %v1657_v49  ;;  %v2170_v52 = vadd.f32 %v6232_v10, %v2169_v50  ;;  %v4901_v53 = vpop.f32.mrb[78].mxu0  ;;  %v5029_v54 = vpop.f32.mrb[78].mxu1 }
 0x178   :  { %v2454_v55 = vmax.f32 %v1666_v46, 0.0  ;;  %v2582_v56 = vmax.f32 %v2178_v47, 0.0  ;;  %v1669_v57 = vadd.f32 %v6232_v10, %v4901_v53  ;;  %v2181_v58 = vadd.f32 %v6232_v10, %v5029_v54  ;;  %v1660_v59 = vpop.f32.mrb[79].mxu0  ;;  %v2172_v60 = vpop.f32.mrb[79].mxu1 }
 0x179   :  { %v2452_v61 = vmax.f32 %v1658_v51, 0.0  ;;  %v2580_v62 = vmax.f32 %v2170_v52, 0.0  ;;  %v1661_v63 = vadd.f32 %v6232_v10, %v1660_v59  ;;  %v2173_v0 = vadd.f32 %v6232_v10, %v2172_v60 }
 0x17a   :  { %v4510_v1 = vpack.c.bf16 %v2454_v55, %v2454_v55  ;;  %v4638_v2 = vpack.c.bf16 %v2582_v56, %v2582_v56  ;;  %v2455_v3 = vmax.f32 %v1669_v57, 0.0  ;;  %v2583_v4 = vmax.f32 %v2181_v58, 0.0 }
 0x17b   :  { %v4508_v5 = vpack.c.bf16 %v2452_v61, %v2452_v61  ;;  %v4636_v48 = vpack.c.bf16 %v2580_v62, %v2580_v62  ;;  %v2453_v6 = vmax.f32 %v1661_v63, 0.0  ;;  %v2581_v7 = vmax.f32 %v2173_v0, 0.0 }
 0x17c   :  { %3735 = vst.msk [vmem:[%s7050_s3 + $0x138] sm:$0xf] %vm3656_vm1, %v4510_v1  ;;  %3863 = vst.msk [vmem:[%s7050_s3 + $0x338] sm:$0xf] %vm3656_vm1, %v4638_v2  ;;  %v4511_v8 = vpack.c.bf16 %v2455_v3, %v2455_v3  ;;  %v4639_v9 = vpack.c.bf16 %v2583_v4, %v2583_v4 }
 0x17d   :  { %3733 = vst.msk [vmem:[%s7050_s3 + $0x130] sm:$0xf] %vm3656_vm1, %v4508_v5  ;;  %3861 = vst.msk [vmem:[%s7050_s3 + $0x330] sm:$0xf] %vm3656_vm1, %v4636_v48  ;;  %v4509_v11 = vpack.c.bf16 %v2453_v6, %v2453_v6  ;;  %v4637_v12 = vpack.c.bf16 %v2581_v7, %v2581_v7  ;;  %v4904_v13 = vpop.f32.mrb[80].mxu0  ;;  %v5032_v14 = vpop.f32.mrb[80].mxu1 }
 0x17e   :  { %3736 = vst.msk [vmem:[%s7050_s3 + $0x13c] sm:$0xf] %vm3656_vm1, %v4511_v8  ;;  %3864 = vst.msk [vmem:[%s7050_s3 + $0x33c] sm:$0xf] %vm3656_vm1, %v4639_v9  ;;  %v1682_v15 = vadd.f32 %v6232_v10, %v4904_v13  ;;  %v2194_v16 = vadd.f32 %v6232_v10, %v5032_v14  ;;  %v1673_v17 = vpop.f32.mrb[81].mxu0  ;;  %v2185_v18 = vpop.f32.mrb[81].mxu1 }
 0x17f   :  { %3734 = vst.msk [vmem:[%s7050_s3 + $0x134] sm:$0xf] %vm3656_vm1, %v4509_v11  ;;  %3862 = vst.msk [vmem:[%s7050_s3 + $0x334] sm:$0xf] %vm3656_vm1, %v4637_v12  ;;  %v1674_v19 = vadd.f32 %v6232_v10, %v1673_v17  ;;  %v2186_v20 = vadd.f32 %v6232_v10, %v2185_v18  ;;  %v4905_v21 = vpop.f32.mrb[82].mxu0  ;;  %v5033_v22 = vpop.f32.mrb[82].mxu1 }
 0x180   :  { %v2458_v23 = vmax.f32 %v1682_v15, 0.0  ;;  %v2586_v24 = vmax.f32 %v2194_v16, 0.0  ;;  %v1685_v25 = vadd.f32 %v6232_v10, %v4905_v21  ;;  %v2197_v26 = vadd.f32 %v6232_v10, %v5033_v22  ;;  %v1676_v27 = vpop.f32.mrb[83].mxu0  ;;  %v2188_v28 = vpop.f32.mrb[83].mxu1 }
 0x181   :  { %v2456_v29 = vmax.f32 %v1674_v19, 0.0  ;;  %v2584_v30 = vmax.f32 %v2186_v20, 0.0  ;;  %v1677_v31 = vadd.f32 %v6232_v10, %v1676_v27  ;;  %v2189_v32 = vadd.f32 %v6232_v10, %v2188_v28 }
 0x182   :  { %v4514_v33 = vpack.c.bf16 %v2458_v23, %v2458_v23  ;;  %v4642_v34 = vpack.c.bf16 %v2586_v24, %v2586_v24  ;;  %v2459_v35 = vmax.f32 %v1685_v25, 0.0  ;;  %v2587_v36 = vmax.f32 %v2197_v26, 0.0 }
 0x183   :  { %v4512_v37 = vpack.c.bf16 %v2456_v29, %v2456_v29  ;;  %v4640_v38 = vpack.c.bf16 %v2584_v30, %v2584_v30  ;;  %v2457_v39 = vmax.f32 %v1677_v31, 0.0  ;;  %v2585_v40 = vmax.f32 %v2189_v32, 0.0 }
 0x184   :  { %3739 = vst.msk [vmem:[%s7050_s3 + $0x148] sm:$0xf] %vm3656_vm1, %v4514_v33  ;;  %3867 = vst.msk [vmem:[%s7050_s3 + $0x348] sm:$0xf] %vm3656_vm1, %v4642_v34  ;;  %v4515_v41 = vpack.c.bf16 %v2459_v35, %v2459_v35  ;;  %v4643_v42 = vpack.c.bf16 %v2587_v36, %v2587_v36 }
 0x185   :  { %3737 = vst.msk [vmem:[%s7050_s3 + $0x140] sm:$0xf] %vm3656_vm1, %v4512_v37  ;;  %3865 = vst.msk [vmem:[%s7050_s3 + $0x340] sm:$0xf] %vm3656_vm1, %v4640_v38  ;;  %v4513_v43 = vpack.c.bf16 %v2457_v39, %v2457_v39  ;;  %v4641_v44 = vpack.c.bf16 %v2585_v40, %v2585_v40  ;;  %v4908_v45 = vpop.f32.mrb[84].mxu0  ;;  %v5036_v46 = vpop.f32.mrb[84].mxu1 }
 0x186   :  { %3740 = vst.msk [vmem:[%s7050_s3 + $0x14c] sm:$0xf] %vm3656_vm1, %v4515_v41  ;;  %3868 = vst.msk [vmem:[%s7050_s3 + $0x34c] sm:$0xf] %vm3656_vm1, %v4643_v42  ;;  %v1698_v47 = vadd.f32 %v6232_v10, %v4908_v45  ;;  %v2210_v49 = vadd.f32 %v6232_v10, %v5036_v46  ;;  %v1689_v50 = vpop.f32.mrb[85].mxu0  ;;  %v2201_v51 = vpop.f32.mrb[85].mxu1 }
 0x187   :  { %3738 = vst.msk [vmem:[%s7050_s3 + $0x144] sm:$0xf] %vm3656_vm1, %v4513_v43  ;;  %3866 = vst.msk [vmem:[%s7050_s3 + $0x344] sm:$0xf] %vm3656_vm1, %v4641_v44  ;;  %v1690_v52 = vadd.f32 %v6232_v10, %v1689_v50  ;;  %v2202_v53 = vadd.f32 %v6232_v10, %v2201_v51  ;;  %v4909_v54 = vpop.f32.mrb[86].mxu0  ;;  %v5037_v55 = vpop.f32.mrb[86].mxu1 }
 0x188   :  { %v2462_v56 = vmax.f32 %v1698_v47, 0.0  ;;  %v2590_v57 = vmax.f32 %v2210_v49, 0.0  ;;  %v1701_v58 = vadd.f32 %v6232_v10, %v4909_v54  ;;  %v2213_v59 = vadd.f32 %v6232_v10, %v5037_v55  ;;  %v1692_v60 = vpop.f32.mrb[87].mxu0  ;;  %v2204_v61 = vpop.f32.mrb[87].mxu1 }
 0x189   :  { %v2460_v62 = vmax.f32 %v1690_v52, 0.0  ;;  %v2588_v63 = vmax.f32 %v2202_v53, 0.0  ;;  %v1693_v0 = vadd.f32 %v6232_v10, %v1692_v60  ;;  %v2205_v1 = vadd.f32 %v6232_v10, %v2204_v61 }
 0x18a   :  { %v4518_v2 = vpack.c.bf16 %v2462_v56, %v2462_v56  ;;  %v4646_v3 = vpack.c.bf16 %v2590_v57, %v2590_v57  ;;  %v2463_v4 = vmax.f32 %v1701_v58, 0.0  ;;  %v2591_v5 = vmax.f32 %v2213_v59, 0.0 }
 0x18b   :  { %v4516_v48 = vpack.c.bf16 %v2460_v62, %v2460_v62  ;;  %v4644_v6 = vpack.c.bf16 %v2588_v63, %v2588_v63  ;;  %v2461_v7 = vmax.f32 %v1693_v0, 0.0  ;;  %v2589_v8 = vmax.f32 %v2205_v1, 0.0 }
 0x18c   :  { %3743 = vst.msk [vmem:[%s7050_s3 + $0x158] sm:$0xf] %vm3656_vm1, %v4518_v2  ;;  %3871 = vst.msk [vmem:[%s7050_s3 + $0x358] sm:$0xf] %vm3656_vm1, %v4646_v3  ;;  %v4519_v9 = vpack.c.bf16 %v2463_v4, %v2463_v4  ;;  %v4647_v11 = vpack.c.bf16 %v2591_v5, %v2591_v5 }
 0x18d   :  { %3741 = vst.msk [vmem:[%s7050_s3 + $0x150] sm:$0xf] %vm3656_vm1, %v4516_v48  ;;  %3869 = vst.msk [vmem:[%s7050_s3 + $0x350] sm:$0xf] %vm3656_vm1, %v4644_v6  ;;  %v4517_v12 = vpack.c.bf16 %v2461_v7, %v2461_v7  ;;  %v4645_v13 = vpack.c.bf16 %v2589_v8, %v2589_v8  ;;  %v4912_v14 = vpop.f32.mrb[88].mxu0  ;;  %v5040_v15 = vpop.f32.mrb[88].mxu1 }
 0x18e   :  { %3744 = vst.msk [vmem:[%s7050_s3 + $0x15c] sm:$0xf] %vm3656_vm1, %v4519_v9  ;;  %3872 = vst.msk [vmem:[%s7050_s3 + $0x35c] sm:$0xf] %vm3656_vm1, %v4647_v11  ;;  %v1714_v16 = vadd.f32 %v6232_v10, %v4912_v14  ;;  %v2226_v17 = vadd.f32 %v6232_v10, %v5040_v15  ;;  %v1705_v18 = vpop.f32.mrb[89].mxu0  ;;  %v2217_v19 = vpop.f32.mrb[89].mxu1 }
 0x18f   :  { %3742 = vst.msk [vmem:[%s7050_s3 + $0x154] sm:$0xf] %vm3656_vm1, %v4517_v12  ;;  %3870 = vst.msk [vmem:[%s7050_s3 + $0x354] sm:$0xf] %vm3656_vm1, %v4645_v13  ;;  %v1706_v20 = vadd.f32 %v6232_v10, %v1705_v18  ;;  %v2218_v21 = vadd.f32 %v6232_v10, %v2217_v19  ;;  %v4913_v22 = vpop.f32.mrb[90].mxu0  ;;  %v5041_v23 = vpop.f32.mrb[90].mxu1 }
 0x190   :  { %v2466_v24 = vmax.f32 %v1714_v16, 0.0  ;;  %v2594_v25 = vmax.f32 %v2226_v17, 0.0  ;;  %v1717_v26 = vadd.f32 %v6232_v10, %v4913_v22  ;;  %v2229_v27 = vadd.f32 %v6232_v10, %v5041_v23  ;;  %v1708_v28 = vpop.f32.mrb[91].mxu0  ;;  %v2220_v29 = vpop.f32.mrb[91].mxu1 }
 0x191   :  { %v2464_v30 = vmax.f32 %v1706_v20, 0.0  ;;  %v2592_v31 = vmax.f32 %v2218_v21, 0.0  ;;  %v1709_v32 = vadd.f32 %v6232_v10, %v1708_v28  ;;  %v2221_v33 = vadd.f32 %v6232_v10, %v2220_v29 }
 0x192   :  { %v4522_v34 = vpack.c.bf16 %v2466_v24, %v2466_v24  ;;  %v4650_v35 = vpack.c.bf16 %v2594_v25, %v2594_v25  ;;  %v2467_v36 = vmax.f32 %v1717_v26, 0.0  ;;  %v2595_v37 = vmax.f32 %v2229_v27, 0.0 }
 0x193   :  { %v4520_v38 = vpack.c.bf16 %v2464_v30, %v2464_v30  ;;  %v4648_v39 = vpack.c.bf16 %v2592_v31, %v2592_v31  ;;  %v2465_v40 = vmax.f32 %v1709_v32, 0.0  ;;  %v2593_v41 = vmax.f32 %v2221_v33, 0.0 }
 0x194   :  { %3747 = vst.msk [vmem:[%s7050_s3 + $0x168] sm:$0xf] %vm3656_vm1, %v4522_v34  ;;  %3875 = vst.msk [vmem:[%s7050_s3 + $0x368] sm:$0xf] %vm3656_vm1, %v4650_v35  ;;  %v4523_v42 = vpack.c.bf16 %v2467_v36, %v2467_v36  ;;  %v4651_v43 = vpack.c.bf16 %v2595_v37, %v2595_v37 }
 0x195   :  { %3745 = vst.msk [vmem:[%s7050_s3 + $0x160] sm:$0xf] %vm3656_vm1, %v4520_v38  ;;  %3873 = vst.msk [vmem:[%s7050_s3 + $0x360] sm:$0xf] %vm3656_vm1, %v4648_v39  ;;  %v4521_v44 = vpack.c.bf16 %v2465_v40, %v2465_v40  ;;  %v4649_v45 = vpack.c.bf16 %v2593_v41, %v2593_v41  ;;  %v4916_v46 = vpop.f32.mrb[92].mxu0  ;;  %v5044_v47 = vpop.f32.mrb[92].mxu1 }
 0x196   :  { %3748 = vst.msk [vmem:[%s7050_s3 + $0x16c] sm:$0xf] %vm3656_vm1, %v4523_v42  ;;  %3876 = vst.msk [vmem:[%s7050_s3 + $0x36c] sm:$0xf] %vm3656_vm1, %v4651_v43  ;;  %v1730_v49 = vadd.f32 %v6232_v10, %v4916_v46  ;;  %v2242_v50 = vadd.f32 %v6232_v10, %v5044_v47  ;;  %v1721_v51 = vpop.f32.mrb[93].mxu0  ;;  %v2233_v52 = vpop.f32.mrb[93].mxu1 }
 0x197   :  { %3746 = vst.msk [vmem:[%s7050_s3 + $0x164] sm:$0xf] %vm3656_vm1, %v4521_v44  ;;  %3874 = vst.msk [vmem:[%s7050_s3 + $0x364] sm:$0xf] %vm3656_vm1, %v4649_v45  ;;  %v1722_v53 = vadd.f32 %v6232_v10, %v1721_v51  ;;  %v2234_v54 = vadd.f32 %v6232_v10, %v2233_v52  ;;  %v4917_v55 = vpop.f32.mrb[94].mxu0  ;;  %v5045_v56 = vpop.f32.mrb[94].mxu1 }
 0x198   :  { %v2470_v57 = vmax.f32 %v1730_v49, 0.0  ;;  %v2598_v58 = vmax.f32 %v2242_v50, 0.0  ;;  %v1733_v59 = vadd.f32 %v6232_v10, %v4917_v55  ;;  %v2245_v60 = vadd.f32 %v6232_v10, %v5045_v56  ;;  %v1724_v61 = vpop.f32.mrb[95].mxu0  ;;  %v2236_v62 = vpop.f32.mrb[95].mxu1  ;;  %v6757_v49 = vld [vmem:[%s7049_s2] ss:$0 sm:$0xff] }
 0x199   :  { %v2468_v63 = vmax.f32 %v1722_v53, 0.0  ;;  %v2596_v0 = vmax.f32 %v2234_v54, 0.0  ;;  %v1725_v1 = vadd.f32 %v6232_v10, %v1724_v61  ;;  %v2237_v2 = vadd.f32 %v6232_v10, %v2236_v62 }
 0x19a   :  { %v4526_v3 = vpack.c.bf16 %v2470_v57, %v2470_v57  ;;  %v4654_v4 = vpack.c.bf16 %v2598_v58, %v2598_v58  ;;  %v2471_v5 = vmax.f32 %v1733_v59, 0.0  ;;  %v2599_v48 = vmax.f32 %v2245_v60, 0.0 }
 0x19b   :  { %v4524_v6 = vpack.c.bf16 %v2468_v63, %v2468_v63  ;;  %v4652_v7 = vpack.c.bf16 %v2596_v0, %v2596_v0  ;;  %v2469_v8 = vmax.f32 %v1725_v1, 0.0  ;;  %v2597_v9 = vmax.f32 %v2237_v2, 0.0 }
 0x19c   :  { %3751 = vst.msk [vmem:[%s7050_s3 + $0x178] sm:$0xf] %vm3656_vm1, %v4526_v3  ;;  %3879 = vst.msk [vmem:[%s7050_s3 + $0x378] sm:$0xf] %vm3656_vm1, %v4654_v4  ;;  %v4527_v11 = vpack.c.bf16 %v2471_v5, %v2471_v5  ;;  %v4655_v12 = vpack.c.bf16 %v2599_v48, %v2599_v48 }
 0x19d   :  { %3749 = vst.msk [vmem:[%s7050_s3 + $0x170] sm:$0xf] %vm3656_vm1, %v4524_v6  ;;  %3877 = vst.msk [vmem:[%s7050_s3 + $0x370] sm:$0xf] %vm3656_vm1, %v4652_v7  ;;  %v4525_v13 = vpack.c.bf16 %v2469_v8, %v2469_v8  ;;  %v4653_v14 = vpack.c.bf16 %v2597_v9, %v2597_v9  ;;  %v4920_v15 = vpop.f32.mrb[96].mxu0  ;;  %v5048_v16 = vpop.f32.mrb[96].mxu1 }
 0x19e   :  { %3752 = vst.msk [vmem:[%s7050_s3 + $0x17c] sm:$0xf] %vm3656_vm1, %v4527_v11  ;;  %3880 = vst.msk [vmem:[%s7050_s3 + $0x37c] sm:$0xf] %vm3656_vm1, %v4655_v12  ;;  %v1746_v17 = vadd.f32 %v6232_v10, %v4920_v15  ;;  %v2258_v18 = vadd.f32 %v6232_v10, %v5048_v16  ;;  %v1737_v19 = vpop.f32.mrb[97].mxu0  ;;  %v2249_v20 = vpop.f32.mrb[97].mxu1 }
 0x19f   :  { %3750 = vst.msk [vmem:[%s7050_s3 + $0x174] sm:$0xf] %vm3656_vm1, %v4525_v13  ;;  %3878 = vst.msk [vmem:[%s7050_s3 + $0x374] sm:$0xf] %vm3656_vm1, %v4653_v14  ;;  %v1738_v21 = vadd.f32 %v6232_v10, %v1737_v19  ;;  %v2250_v22 = vadd.f32 %v6232_v10, %v2249_v20  ;;  %v4921_v23 = vpop.f32.mrb[98].mxu0  ;;  %v5049_v24 = vpop.f32.mrb[98].mxu1 }
 0x1a0   :  { %v2474_v25 = vmax.f32 %v1746_v17, 0.0  ;;  %v2602_v26 = vmax.f32 %v2258_v18, 0.0  ;;  %v1749_v27 = vadd.f32 %v6232_v10, %v4921_v23  ;;  %v2261_v28 = vadd.f32 %v6232_v10, %v5049_v24  ;;  %v1740_v29 = vpop.f32.mrb[99].mxu0  ;;  %v2252_v30 = vpop.f32.mrb[99].mxu1 }
 0x1a1   :  { %v2472_v31 = vmax.f32 %v1738_v21, 0.0  ;;  %v2600_v32 = vmax.f32 %v2250_v22, 0.0  ;;  %v1741_v33 = vadd.f32 %v6232_v10, %v1740_v29  ;;  %v2253_v34 = vadd.f32 %v6232_v10, %v2252_v30 }
 0x1a2   :  { %v4530_v35 = vpack.c.bf16 %v2474_v25, %v2474_v25  ;;  %v4658_v36 = vpack.c.bf16 %v2602_v26, %v2602_v26  ;;  %v2475_v37 = vmax.f32 %v1749_v27, 0.0  ;;  %v2603_v38 = vmax.f32 %v2261_v28, 0.0 }
 0x1a3   :  { %v4528_v39 = vpack.c.bf16 %v2472_v31, %v2472_v31  ;;  %v4656_v40 = vpack.c.bf16 %v2600_v32, %v2600_v32  ;;  %v2473_v41 = vmax.f32 %v1741_v33, 0.0  ;;  %v2601_v42 = vmax.f32 %v2253_v34, 0.0 }
 0x1a4   :  { %3755 = vst.msk [vmem:[%s7050_s3 + $0x188] sm:$0xf] %vm3656_vm1, %v4530_v35  ;;  %3883 = vst.msk [vmem:[%s7050_s3 + $0x388] sm:$0xf] %vm3656_vm1, %v4658_v36  ;;  %v4531_v43 = vpack.c.bf16 %v2475_v37, %v2475_v37  ;;  %v4659_v10 = vpack.c.bf16 %v2603_v38, %v2603_v38 }
 0x1a5   :  { %3753 = vst.msk [vmem:[%s7050_s3 + $0x180] sm:$0xf] %vm3656_vm1, %v4528_v39  ;;  %3881 = vst.msk [vmem:[%s7050_s3 + $0x380] sm:$0xf] %vm3656_vm1, %v4656_v40  ;;  %v4529_v44 = vpack.c.bf16 %v2473_v41, %v2473_v41  ;;  %v4657_v45 = vpack.c.bf16 %v2601_v42, %v2601_v42  ;;  %v4924_v46 = vpop.f32.mrb[100].mxu0  ;;  %v5052_v47 = vpop.f32.mrb[100].mxu1 }
 0x1a6   :  { %3756 = vst.msk [vmem:[%s7050_s3 + $0x18c] sm:$0xf] %vm3656_vm1, %v4531_v43  ;;  %3884 = vst.msk [vmem:[%s7050_s3 + $0x38c] sm:$0xf] %vm3656_vm1, %v4659_v10  ;;  %v1762_v50 = vadd.f32 %v6757_v49, %v4924_v46  ;;  %v2274_v51 = vadd.f32 %v6757_v49, %v5052_v47  ;;  %v1753_v52 = vpop.f32.mrb[101].mxu0  ;;  %v2265_v53 = vpop.f32.mrb[101].mxu1 }
 0x1a7   :  { %3754 = vst.msk [vmem:[%s7050_s3 + $0x184] sm:$0xf] %vm3656_vm1, %v4529_v44  ;;  %3882 = vst.msk [vmem:[%s7050_s3 + $0x384] sm:$0xf] %vm3656_vm1, %v4657_v45  ;;  %v1754_v54 = vadd.f32 %v6757_v49, %v1753_v52  ;;  %v2266_v55 = vadd.f32 %v6757_v49, %v2265_v53  ;;  %v4925_v56 = vpop.f32.mrb[102].mxu0  ;;  %v5053_v57 = vpop.f32.mrb[102].mxu1 }
 0x1a8   :  { %v2478_v58 = vmax.f32 %v1762_v50, 0.0  ;;  %v2606_v59 = vmax.f32 %v2274_v51, 0.0  ;;  %v1765_v60 = vadd.f32 %v6757_v49, %v4925_v56  ;;  %v2277_v61 = vadd.f32 %v6757_v49, %v5053_v57  ;;  %v1756_v62 = vpop.f32.mrb[103].mxu0  ;;  %v2268_v63 = vpop.f32.mrb[103].mxu1 }
 0x1a9   :  { %v2476_v0 = vmax.f32 %v1754_v54, 0.0  ;;  %v2604_v1 = vmax.f32 %v2266_v55, 0.0  ;;  %v1757_v2 = vadd.f32 %v6757_v49, %v1756_v62  ;;  %v2269_v3 = vadd.f32 %v6757_v49, %v2268_v63 }
 0x1aa   :  { %v4534_v4 = vpack.c.bf16 %v2478_v58, %v2478_v58  ;;  %v4662_v5 = vpack.c.bf16 %v2606_v59, %v2606_v59  ;;  %v2479_v48 = vmax.f32 %v1765_v60, 0.0  ;;  %v2607_v6 = vmax.f32 %v2277_v61, 0.0 }
 0x1ab   :  { %v4532_v7 = vpack.c.bf16 %v2476_v0, %v2476_v0  ;;  %v4660_v8 = vpack.c.bf16 %v2604_v1, %v2604_v1  ;;  %v2477_v9 = vmax.f32 %v1757_v2, 0.0  ;;  %v2605_v11 = vmax.f32 %v2269_v3, 0.0 }
 0x1ac   :  { %3759 = vst.msk [vmem:[%s7050_s3 + $0x198] sm:$0xf] %vm3656_vm1, %v4534_v4  ;;  %3887 = vst.msk [vmem:[%s7050_s3 + $0x398] sm:$0xf] %vm3656_vm1, %v4662_v5  ;;  %v4535_v12 = vpack.c.bf16 %v2479_v48, %v2479_v48  ;;  %v4663_v13 = vpack.c.bf16 %v2607_v6, %v2607_v6 }
 0x1ad   :  { %3757 = vst.msk [vmem:[%s7050_s3 + $0x190] sm:$0xf] %vm3656_vm1, %v4532_v7  ;;  %3885 = vst.msk [vmem:[%s7050_s3 + $0x390] sm:$0xf] %vm3656_vm1, %v4660_v8  ;;  %v4533_v14 = vpack.c.bf16 %v2477_v9, %v2477_v9  ;;  %v4661_v15 = vpack.c.bf16 %v2605_v11, %v2605_v11  ;;  %v4928_v16 = vpop.f32.mrb[104].mxu0  ;;  %v5056_v17 = vpop.f32.mrb[104].mxu1 }
 0x1ae   :  { %3760 = vst.msk [vmem:[%s7050_s3 + $0x19c] sm:$0xf] %vm3656_vm1, %v4535_v12  ;;  %3888 = vst.msk [vmem:[%s7050_s3 + $0x39c] sm:$0xf] %vm3656_vm1, %v4663_v13  ;;  %v1778_v18 = vadd.f32 %v6757_v49, %v4928_v16  ;;  %v2290_v19 = vadd.f32 %v6757_v49, %v5056_v17  ;;  %v1769_v20 = vpop.f32.mrb[105].mxu0  ;;  %v2281_v21 = vpop.f32.mrb[105].mxu1 }
 0x1af   :  { %3758 = vst.msk [vmem:[%s7050_s3 + $0x194] sm:$0xf] %vm3656_vm1, %v4533_v14  ;;  %3886 = vst.msk [vmem:[%s7050_s3 + $0x394] sm:$0xf] %vm3656_vm1, %v4661_v15  ;;  %v1770_v22 = vadd.f32 %v6757_v49, %v1769_v20  ;;  %v2282_v23 = vadd.f32 %v6757_v49, %v2281_v21  ;;  %v4929_v24 = vpop.f32.mrb[106].mxu0  ;;  %v5057_v25 = vpop.f32.mrb[106].mxu1 }
 0x1b0   :  { %v2482_v26 = vmax.f32 %v1778_v18, 0.0  ;;  %v2610_v27 = vmax.f32 %v2290_v19, 0.0  ;;  %v1781_v28 = vadd.f32 %v6757_v49, %v4929_v24  ;;  %v2293_v29 = vadd.f32 %v6757_v49, %v5057_v25  ;;  %v1772_v30 = vpop.f32.mrb[107].mxu0  ;;  %v2284_v31 = vpop.f32.mrb[107].mxu1 }
 0x1b1   :  { %v2480_v32 = vmax.f32 %v1770_v22, 0.0  ;;  %v2608_v33 = vmax.f32 %v2282_v23, 0.0  ;;  %v1773_v34 = vadd.f32 %v6757_v49, %v1772_v30  ;;  %v2285_v35 = vadd.f32 %v6757_v49, %v2284_v31 }
 0x1b2   :  { %v4538_v36 = vpack.c.bf16 %v2482_v26, %v2482_v26  ;;  %v4666_v37 = vpack.c.bf16 %v2610_v27, %v2610_v27  ;;  %v2483_v38 = vmax.f32 %v1781_v28, 0.0  ;;  %v2611_v39 = vmax.f32 %v2293_v29, 0.0 }
 0x1b3   :  { %v4536_v40 = vpack.c.bf16 %v2480_v32, %v2480_v32  ;;  %v4664_v41 = vpack.c.bf16 %v2608_v33, %v2608_v33  ;;  %v2481_v42 = vmax.f32 %v1773_v34, 0.0  ;;  %v2609_v43 = vmax.f32 %v2285_v35, 0.0 }
 0x1b4   :  { %3763 = vst.msk [vmem:[%s7050_s3 + $0x1a8] sm:$0xf] %vm3656_vm1, %v4538_v36  ;;  %3891 = vst.msk [vmem:[%s7050_s3 + $0x3a8] sm:$0xf] %vm3656_vm1, %v4666_v37  ;;  %v4539_v10 = vpack.c.bf16 %v2483_v38, %v2483_v38  ;;  %v4667_v44 = vpack.c.bf16 %v2611_v39, %v2611_v39 }
 0x1b5   :  { %3761 = vst.msk [vmem:[%s7050_s3 + $0x1a0] sm:$0xf] %vm3656_vm1, %v4536_v40  ;;  %3889 = vst.msk [vmem:[%s7050_s3 + $0x3a0] sm:$0xf] %vm3656_vm1, %v4664_v41  ;;  %v4537_v45 = vpack.c.bf16 %v2481_v42, %v2481_v42  ;;  %v4665_v46 = vpack.c.bf16 %v2609_v43, %v2609_v43  ;;  %v4932_v47 = vpop.f32.mrb[108].mxu0  ;;  %v5060_v50 = vpop.f32.mrb[108].mxu1 }
 0x1b6   :  { %3764 = vst.msk [vmem:[%s7050_s3 + $0x1ac] sm:$0xf] %vm3656_vm1, %v4539_v10  ;;  %3892 = vst.msk [vmem:[%s7050_s3 + $0x3ac] sm:$0xf] %vm3656_vm1, %v4667_v44  ;;  %v1794_v51 = vadd.f32 %v6757_v49, %v4932_v47  ;;  %v2306_v52 = vadd.f32 %v6757_v49, %v5060_v50  ;;  %v1785_v53 = vpop.f32.mrb[109].mxu0  ;;  %v2297_v54 = vpop.f32.mrb[109].mxu1 }
 0x1b7   :  { %3762 = vst.msk [vmem:[%s7050_s3 + $0x1a4] sm:$0xf] %vm3656_vm1, %v4537_v45  ;;  %3890 = vst.msk [vmem:[%s7050_s3 + $0x3a4] sm:$0xf] %vm3656_vm1, %v4665_v46  ;;  %v1786_v55 = vadd.f32 %v6757_v49, %v1785_v53  ;;  %v2298_v56 = vadd.f32 %v6757_v49, %v2297_v54  ;;  %v4933_v57 = vpop.f32.mrb[110].mxu0  ;;  %v5061_v58 = vpop.f32.mrb[110].mxu1 }
 0x1b8   :  { %v2486_v59 = vmax.f32 %v1794_v51, 0.0  ;;  %v2614_v60 = vmax.f32 %v2306_v52, 0.0  ;;  %v1797_v61 = vadd.f32 %v6757_v49, %v4933_v57  ;;  %v2309_v62 = vadd.f32 %v6757_v49, %v5061_v58  ;;  %v1788_v63 = vpop.f32.mrb[111].mxu0  ;;  %v2300_v0 = vpop.f32.mrb[111].mxu1 }
 0x1b9   :  { %v2484_v1 = vmax.f32 %v1786_v55, 0.0  ;;  %v2612_v2 = vmax.f32 %v2298_v56, 0.0  ;;  %v1789_v3 = vadd.f32 %v6757_v49, %v1788_v63  ;;  %v2301_v4 = vadd.f32 %v6757_v49, %v2300_v0 }
 0x1ba   :  { %v4542_v5 = vpack.c.bf16 %v2486_v59, %v2486_v59  ;;  %v4670_v48 = vpack.c.bf16 %v2614_v60, %v2614_v60  ;;  %v2487_v6 = vmax.f32 %v1797_v61, 0.0  ;;  %v2615_v7 = vmax.f32 %v2309_v62, 0.0 }
 0x1bb   :  { %v4540_v8 = vpack.c.bf16 %v2484_v1, %v2484_v1  ;;  %v4668_v9 = vpack.c.bf16 %v2612_v2, %v2612_v2  ;;  %v2485_v11 = vmax.f32 %v1789_v3, 0.0  ;;  %v2613_v12 = vmax.f32 %v2301_v4, 0.0 }
 0x1bc   :  { %3767 = vst.msk [vmem:[%s7050_s3 + $0x1b8] sm:$0xf] %vm3656_vm1, %v4542_v5  ;;  %3895 = vst.msk [vmem:[%s7050_s3 + $0x3b8] sm:$0xf] %vm3656_vm1, %v4670_v48  ;;  %v4543_v13 = vpack.c.bf16 %v2487_v6, %v2487_v6  ;;  %v4671_v14 = vpack.c.bf16 %v2615_v7, %v2615_v7 }
 0x1bd   :  { %3765 = vst.msk [vmem:[%s7050_s3 + $0x1b0] sm:$0xf] %vm3656_vm1, %v4540_v8  ;;  %3893 = vst.msk [vmem:[%s7050_s3 + $0x3b0] sm:$0xf] %vm3656_vm1, %v4668_v9  ;;  %v4541_v15 = vpack.c.bf16 %v2485_v11, %v2485_v11  ;;  %v4669_v16 = vpack.c.bf16 %v2613_v12, %v2613_v12  ;;  %v4936_v17 = vpop.f32.mrb[112].mxu0  ;;  %v5064_v18 = vpop.f32.mrb[112].mxu1 }
 0x1be   :  { %3768 = vst.msk [vmem:[%s7050_s3 + $0x1bc] sm:$0xf] %vm3656_vm1, %v4543_v13  ;;  %3896 = vst.msk [vmem:[%s7050_s3 + $0x3bc] sm:$0xf] %vm3656_vm1, %v4671_v14  ;;  %v1810_v19 = vadd.f32 %v6757_v49, %v4936_v17  ;;  %v2322_v20 = vadd.f32 %v6757_v49, %v5064_v18  ;;  %v1801_v21 = vpop.f32.mrb[113].mxu0  ;;  %v2313_v22 = vpop.f32.mrb[113].mxu1 }
 0x1bf   :  { %3766 = vst.msk [vmem:[%s7050_s3 + $0x1b4] sm:$0xf] %vm3656_vm1, %v4541_v15  ;;  %3894 = vst.msk [vmem:[%s7050_s3 + $0x3b4] sm:$0xf] %vm3656_vm1, %v4669_v16  ;;  %v1802_v23 = vadd.f32 %v6757_v49, %v1801_v21  ;;  %v2314_v24 = vadd.f32 %v6757_v49, %v2313_v22  ;;  %v4937_v25 = vpop.f32.mrb[114].mxu0  ;;  %v5065_v26 = vpop.f32.mrb[114].mxu1 }
 0x1c0   :  { %v2490_v27 = vmax.f32 %v1810_v19, 0.0  ;;  %v2618_v28 = vmax.f32 %v2322_v20, 0.0  ;;  %v1813_v29 = vadd.f32 %v6757_v49, %v4937_v25  ;;  %v2325_v30 = vadd.f32 %v6757_v49, %v5065_v26  ;;  %v1804_v31 = vpop.f32.mrb[115].mxu0  ;;  %v2316_v32 = vpop.f32.mrb[115].mxu1 }
 0x1c1   :  { %v2488_v33 = vmax.f32 %v1802_v23, 0.0  ;;  %v2616_v34 = vmax.f32 %v2314_v24, 0.0  ;;  %v1805_v35 = vadd.f32 %v6757_v49, %v1804_v31  ;;  %v2317_v36 = vadd.f32 %v6757_v49, %v2316_v32 }
 0x1c2   :  { %v4546_v37 = vpack.c.bf16 %v2490_v27, %v2490_v27  ;;  %v4674_v38 = vpack.c.bf16 %v2618_v28, %v2618_v28  ;;  %v2491_v39 = vmax.f32 %v1813_v29, 0.0  ;;  %v2619_v40 = vmax.f32 %v2325_v30, 0.0 }
 0x1c3   :  { %v4544_v41 = vpack.c.bf16 %v2488_v33, %v2488_v33  ;;  %v4672_v42 = vpack.c.bf16 %v2616_v34, %v2616_v34  ;;  %v2489_v43 = vmax.f32 %v1805_v35, 0.0  ;;  %v2617_v10 = vmax.f32 %v2317_v36, 0.0 }
 0x1c4   :  { %3771 = vst.msk [vmem:[%s7050_s3 + $0x1c8] sm:$0xf] %vm3656_vm1, %v4546_v37  ;;  %3899 = vst.msk [vmem:[%s7050_s3 + $0x3c8] sm:$0xf] %vm3656_vm1, %v4674_v38  ;;  %v4547_v44 = vpack.c.bf16 %v2491_v39, %v2491_v39  ;;  %v4675_v45 = vpack.c.bf16 %v2619_v40, %v2619_v40 }
 0x1c5   :  { %3769 = vst.msk [vmem:[%s7050_s3 + $0x1c0] sm:$0xf] %vm3656_vm1, %v4544_v41  ;;  %3897 = vst.msk [vmem:[%s7050_s3 + $0x3c0] sm:$0xf] %vm3656_vm1, %v4672_v42  ;;  %v4545_v46 = vpack.c.bf16 %v2489_v43, %v2489_v43  ;;  %v4673_v47 = vpack.c.bf16 %v2617_v10, %v2617_v10  ;;  %v4940_v50 = vpop.f32.mrb[116].mxu0  ;;  %v5068_v51 = vpop.f32.mrb[116].mxu1 }
 0x1c6   :  { %3772 = vst.msk [vmem:[%s7050_s3 + $0x1cc] sm:$0xf] %vm3656_vm1, %v4547_v44  ;;  %3900 = vst.msk [vmem:[%s7050_s3 + $0x3cc] sm:$0xf] %vm3656_vm1, %v4675_v45  ;;  %v1826_v52 = vadd.f32 %v6757_v49, %v4940_v50  ;;  %v2338_v53 = vadd.f32 %v6757_v49, %v5068_v51  ;;  %v1817_v54 = vpop.f32.mrb[117].mxu0  ;;  %v2329_v55 = vpop.f32.mrb[117].mxu1 }
 0x1c7   :  { %3770 = vst.msk [vmem:[%s7050_s3 + $0x1c4] sm:$0xf] %vm3656_vm1, %v4545_v46  ;;  %3898 = vst.msk [vmem:[%s7050_s3 + $0x3c4] sm:$0xf] %vm3656_vm1, %v4673_v47  ;;  %v1818_v56 = vadd.f32 %v6757_v49, %v1817_v54  ;;  %v2330_v57 = vadd.f32 %v6757_v49, %v2329_v55  ;;  %v4941_v58 = vpop.f32.mrb[118].mxu0  ;;  %v5069_v59 = vpop.f32.mrb[118].mxu1 }
 0x1c8   :  { %v2494_v60 = vmax.f32 %v1826_v52, 0.0  ;;  %v2622_v61 = vmax.f32 %v2338_v53, 0.0  ;;  %v1829_v62 = vadd.f32 %v6757_v49, %v4941_v58  ;;  %v2341_v63 = vadd.f32 %v6757_v49, %v5069_v59  ;;  %v1820_v0 = vpop.f32.mrb[119].mxu0  ;;  %v2332_v1 = vpop.f32.mrb[119].mxu1 }
 0x1c9   :  { %v2492_v2 = vmax.f32 %v1818_v56, 0.0  ;;  %v2620_v3 = vmax.f32 %v2330_v57, 0.0  ;;  %v1821_v4 = vadd.f32 %v6757_v49, %v1820_v0  ;;  %v2333_v5 = vadd.f32 %v6757_v49, %v2332_v1 }
 0x1ca   :  { %v4550_v48 = vpack.c.bf16 %v2494_v60, %v2494_v60  ;;  %v4678_v6 = vpack.c.bf16 %v2622_v61, %v2622_v61  ;;  %v2495_v7 = vmax.f32 %v1829_v62, 0.0  ;;  %v2623_v8 = vmax.f32 %v2341_v63, 0.0 }
 0x1cb   :  { %v4548_v9 = vpack.c.bf16 %v2492_v2, %v2492_v2  ;;  %v4676_v11 = vpack.c.bf16 %v2620_v3, %v2620_v3  ;;  %v2493_v12 = vmax.f32 %v1821_v4, 0.0  ;;  %v2621_v13 = vmax.f32 %v2333_v5, 0.0 }
 0x1cc   :  { %3775 = vst.msk [vmem:[%s7050_s3 + $0x1d8] sm:$0xf] %vm3656_vm1, %v4550_v48  ;;  %3903 = vst.msk [vmem:[%s7050_s3 + $0x3d8] sm:$0xf] %vm3656_vm1, %v4678_v6  ;;  %v4551_v14 = vpack.c.bf16 %v2495_v7, %v2495_v7  ;;  %v4679_v15 = vpack.c.bf16 %v2623_v8, %v2623_v8 }
 0x1cd   :  { %3773 = vst.msk [vmem:[%s7050_s3 + $0x1d0] sm:$0xf] %vm3656_vm1, %v4548_v9  ;;  %3901 = vst.msk [vmem:[%s7050_s3 + $0x3d0] sm:$0xf] %vm3656_vm1, %v4676_v11  ;;  %v4549_v16 = vpack.c.bf16 %v2493_v12, %v2493_v12  ;;  %v4677_v17 = vpack.c.bf16 %v2621_v13, %v2621_v13  ;;  %v4944_v18 = vpop.f32.mrb[120].mxu0  ;;  %v5072_v19 = vpop.f32.mrb[120].mxu1 }
 0x1ce   :  { %3776 = vst.msk [vmem:[%s7050_s3 + $0x1dc] sm:$0xf] %vm3656_vm1, %v4551_v14  ;;  %3904 = vst.msk [vmem:[%s7050_s3 + $0x3dc] sm:$0xf] %vm3656_vm1, %v4679_v15  ;;  %v1842_v20 = vadd.f32 %v6757_v49, %v4944_v18  ;;  %v2354_v21 = vadd.f32 %v6757_v49, %v5072_v19  ;;  %v1833_v22 = vpop.f32.mrb[121].mxu0  ;;  %v2345_v23 = vpop.f32.mrb[121].mxu1 }
 0x1cf   :  { %3774 = vst.msk [vmem:[%s7050_s3 + $0x1d4] sm:$0xf] %vm3656_vm1, %v4549_v16  ;;  %3902 = vst.msk [vmem:[%s7050_s3 + $0x3d4] sm:$0xf] %vm3656_vm1, %v4677_v17  ;;  %v1834_v24 = vadd.f32 %v6757_v49, %v1833_v22  ;;  %v2346_v25 = vadd.f32 %v6757_v49, %v2345_v23  ;;  %v4945_v26 = vpop.f32.mrb[122].mxu0  ;;  %v5073_v27 = vpop.f32.mrb[122].mxu1 }
 0x1d0   :  { %v2498_v28 = vmax.f32 %v1842_v20, 0.0  ;;  %v2626_v29 = vmax.f32 %v2354_v21, 0.0  ;;  %v1845_v30 = vadd.f32 %v6757_v49, %v4945_v26  ;;  %v2357_v31 = vadd.f32 %v6757_v49, %v5073_v27  ;;  %v1836_v32 = vpop.f32.mrb[123].mxu0  ;;  %v2348_v33 = vpop.f32.mrb[123].mxu1 }
 0x1d1   :  { %v2496_v34 = vmax.f32 %v1834_v24, 0.0  ;;  %v2624_v35 = vmax.f32 %v2346_v25, 0.0  ;;  %v1837_v36 = vadd.f32 %v6757_v49, %v1836_v32  ;;  %v2349_v37 = vadd.f32 %v6757_v49, %v2348_v33 }
 0x1d2   :  { %v4554_v38 = vpack.c.bf16 %v2498_v28, %v2498_v28  ;;  %v4682_v39 = vpack.c.bf16 %v2626_v29, %v2626_v29  ;;  %v2499_v40 = vmax.f32 %v1845_v30, 0.0  ;;  %v2627_v41 = vmax.f32 %v2357_v31, 0.0 }
 0x1d3   :  { %v4552_v42 = vpack.c.bf16 %v2496_v34, %v2496_v34  ;;  %v4680_v43 = vpack.c.bf16 %v2624_v35, %v2624_v35  ;;  %v2497_v10 = vmax.f32 %v1837_v36, 0.0  ;;  %v2625_v44 = vmax.f32 %v2349_v37, 0.0 }
 0x1d4   :  { %3779 = vst.msk [vmem:[%s7050_s3 + $0x1e8] sm:$0xf] %vm3656_vm1, %v4554_v38  ;;  %3907 = vst.msk [vmem:[%s7050_s3 + $0x3e8] sm:$0xf] %vm3656_vm1, %v4682_v39  ;;  %v4555_v45 = vpack.c.bf16 %v2499_v40, %v2499_v40  ;;  %v4683_v46 = vpack.c.bf16 %v2627_v41, %v2627_v41 }
 0x1d5   :  { %3777 = vst.msk [vmem:[%s7050_s3 + $0x1e0] sm:$0xf] %vm3656_vm1, %v4552_v42  ;;  %3905 = vst.msk [vmem:[%s7050_s3 + $0x3e0] sm:$0xf] %vm3656_vm1, %v4680_v43  ;;  %v4553_v47 = vpack.c.bf16 %v2497_v10, %v2497_v10  ;;  %v4681_v50 = vpack.c.bf16 %v2625_v44, %v2625_v44  ;;  %v4948_v51 = vpop.f32.mrb[124].mxu0  ;;  %v5076_v52 = vpop.f32.mrb[124].mxu1 }
 0x1d6   :  { %3780 = vst.msk [vmem:[%s7050_s3 + $0x1ec] sm:$0xf] %vm3656_vm1, %v4555_v45  ;;  %3908 = vst.msk [vmem:[%s7050_s3 + $0x3ec] sm:$0xf] %vm3656_vm1, %v4683_v46  ;;  %v1858_v53 = vadd.f32 %v6757_v49, %v4948_v51  ;;  %v2370_v54 = vadd.f32 %v6757_v49, %v5076_v52  ;;  %v1849_v55 = vpop.f32.mrb[125].mxu0  ;;  %v2361_v56 = vpop.f32.mrb[125].mxu1 }
 0x1d7   :  { %3778 = vst.msk [vmem:[%s7050_s3 + $0x1e4] sm:$0xf] %vm3656_vm1, %v4553_v47  ;;  %3906 = vst.msk [vmem:[%s7050_s3 + $0x3e4] sm:$0xf] %vm3656_vm1, %v4681_v50  ;;  %v1850_v57 = vadd.f32 %v6757_v49, %v1849_v55  ;;  %v2362_v58 = vadd.f32 %v6757_v49, %v2361_v56  ;;  %v4949_v59 = vpop.f32.mrb[126].mxu0  ;;  %v5077_v60 = vpop.f32.mrb[126].mxu1 }
 0x1d8   :  { %v2502_v61 = vmax.f32 %v1858_v53, 0.0  ;;  %v2630_v62 = vmax.f32 %v2370_v54, 0.0  ;;  %v1861_v63 = vadd.f32 %v6757_v49, %v4949_v59  ;;  %v2373_v0 = vadd.f32 %v6757_v49, %v5077_v60  ;;  %v1852_v1 = vpop.f32.mrb[127].mxu0  ;;  %v2364_v2 = vpop.f32.mrb[127].mxu1 }
 0x1d9   :  { %v2500_v3 = vmax.f32 %v1850_v57, 0.0  ;;  %v2628_v4 = vmax.f32 %v2362_v58, 0.0  ;;  %v1853_v5 = vadd.f32 %v6757_v49, %v1852_v1  ;;  %v2365_v48 = vadd.f32 %v6757_v49, %v2364_v2 }
 0x1da   :  { %v4558_v6 = vpack.c.bf16 %v2502_v61, %v2502_v61  ;;  %v4686_v7 = vpack.c.bf16 %v2630_v62, %v2630_v62  ;;  %v2503_v8 = vmax.f32 %v1861_v63, 0.0  ;;  %v2631_v9 = vmax.f32 %v2373_v0, 0.0 }
 0x1db   :  { %v4556_v11 = vpack.c.bf16 %v2500_v3, %v2500_v3  ;;  %v4684_v12 = vpack.c.bf16 %v2628_v4, %v2628_v4  ;;  %v2501_v13 = vmax.f32 %v1853_v5, 0.0  ;;  %v2629_v14 = vmax.f32 %v2365_v48, 0.0 }
 0x1dc   :  { %3783 = vst.msk [vmem:[%s7050_s3 + $0x1f8] sm:$0xf] %vm3656_vm1, %v4558_v6  ;;  %3911 = vst.msk [vmem:[%s7050_s3 + $0x3f8] sm:$0xf] %vm3656_vm1, %v4686_v7  ;;  %v4559_v15 = vpack.c.bf16 %v2503_v8, %v2503_v8  ;;  %v4687_v49 = vpack.c.bf16 %v2631_v9, %v2631_v9 }
 0x1dd   :  { %3781 = vst.msk [vmem:[%s7050_s3 + $0x1f0] sm:$0xf] %vm3656_vm1, %v4556_v11  ;;  %3909 = vst.msk [vmem:[%s7050_s3 + $0x3f0] sm:$0xf] %vm3656_vm1, %v4684_v12  ;;  %v4557_v16 = vpack.c.bf16 %v2501_v13, %v2501_v13  ;;  %v4685_v17 = vpack.c.bf16 %v2629_v14, %v2629_v14 }
 0x1de   :  { %3784 = vst.msk [vmem:[%s7050_s3 + $0x1fc] sm:$0xf] %vm3656_vm1, %v4559_v15  ;;  %3912 = vst.msk [vmem:[%s7050_s3 + $0x3fc] sm:$0xf] %vm3656_vm1, %v4687_v49 }
 0x1df   :  { %3782 = vst.msk [vmem:[%s7050_s3 + $0x1f4] sm:$0xf] %vm3656_vm1, %v4557_v16  ;;  %3910 = vst.msk [vmem:[%s7050_s3 + $0x3f4] sm:$0xf] %vm3656_vm1, %v4685_v17 }

// kernel: actor_forward.5
= control target key start
LH: loop header
LB: loop body
LE: loop exit
PB: predicated region body
PF: predicated region fallthrough
CT: control target
= control target key end

     0   :  { %v4704_v0 = vmov 0   ;;  %s5927_s1 = inlined_call_operand.vmem [shape: bf16[1024,128], index: 1, kind: input, shape index: {}]   ;;  %s5928_s0 = inlined_call_operand.vmem [shape: bf16[512,1024], index: 0, kind: input, shape index: {}]   ;;  %s5929_s2 = inlined_call_operand.vmem [shape: f32[1,128], index: 2, kind: input, shape index: {}]   ;;  %s5930_s3 = inlined_call_operand.vmem [shape: bf16[512,128], index: 3, kind: output, shape index: {}]  }
   0x1   :  { %2070 = vmatprep.subr.bf16.mxu1 %v4704_v0  ;;  %2648 = vmatprep.subr.bf16.mxu0 %v4704_v0  ;;  %v4639_v1 = vld [vmem:[%s5927_s1] sm:$0xff]   ;;  %v4641_v3 = vld [vmem:[%s5927_s1 + $0x8] sm:$0xff]   ;;  %v4643_v5 = vld [vmem:[%s5927_s1 + $0x10] sm:$0xff]  }
   0x2   :  { %v4640_v2 = vld [vmem:[%s5927_s1 + $0x100] sm:$0xff]   ;;  %2071 = vmatpush1.bf16.msra.mxu1 %v4639_v1  ;;  %v4642_v4 = vld [vmem:[%s5927_s1 + $0x108] sm:$0xff]   ;;  %v4644_v6 = vld [vmem:[%s5927_s1 + $0x110] sm:$0xff]  }
   0x3   :  { %2649 = vmatpush1.bf16.msra.mxu0 %v4640_v2  ;;  %2072 = vmatprep.subr.bf16.mxu1 %v4704_v0  ;;  %v4645_v7 = vld [vmem:[%s5927_s1 + $0x18] sm:$0xff]   ;;  %v4647_v9 = vld [vmem:[%s5927_s1 + $0x20] sm:$0xff]   ;;  %v4649_v11 = vld [vmem:[%s5927_s1 + $0x28] sm:$0xff]  }
   0x4   :  { %2650 = vmatprep.subr.bf16.mxu0 %v4704_v0  ;;  %v4646_v8 = vld [vmem:[%s5927_s1 + $0x118] sm:$0xff]   ;;  %v4648_v10 = vld [vmem:[%s5927_s1 + $0x120] sm:$0xff]   ;;  %v4650_v12 = vld [vmem:[%s5927_s1 + $0x128] sm:$0xff]  }
   0x5   :  { %v4651_v13 = vld [vmem:[%s5927_s1 + $0x30] sm:$0xff]   ;;  %v4653_v15 = vld [vmem:[%s5927_s1 + $0x38] sm:$0xff]   ;;  %v4655_v17 = vld [vmem:[%s5927_s1 + $0x40] sm:$0xff]  }
   0x6   :  { %2073 = vmatpush1.bf16.msra.mxu1 %v4641_v3  ;;  %v4652_v14 = vld [vmem:[%s5927_s1 + $0x130] sm:$0xff]   ;;  %v4654_v16 = vld [vmem:[%s5927_s1 + $0x138] sm:$0xff]   ;;  %v4656_v18 = vld [vmem:[%s5927_s1 + $0x140] sm:$0xff]  }
   0x7   :  { %2651 = vmatpush1.bf16.msra.mxu0 %v4642_v4  ;;  %2074 = vmatprep.subr.bf16.mxu1 %v4704_v0  ;;  %v4800_v19 = vld [vmem:[%s5928_s0] sm:$0xff]  ;;  %v4810_v21 = vld [vmem:[%s5928_s0 + $0x10] sm:$0xff]  ;;  %v4657_v24 = vld [vmem:[%s5927_s1 + $0x48] sm:$0xff]  }
   0x8   :  { %2652 = vmatprep.subr.bf16.mxu0 %v4704_v0  ;;  %v4805_v20 = vld [vmem:[%s5928_s0 + $0x20] sm:$0xff]  ;;  %v4817_v23 = vld [vmem:[%s5928_s0 + $0x30] sm:$0xff]  ;;  %v4658_v26 = vld [vmem:[%s5927_s1 + $0x148] sm:$0xff]  }
   0x9   :  { %v3616_v22 = vcombine.high %v4800_v19, %v4805_v20  ;;  %v3620_v25 = vcombine.high %v4810_v21, %v4817_v23  ;;  %v4659_v27 = vld [vmem:[%s5927_s1 + $0x50] sm:$0xff]   ;;  %v4661_v29 = vld [vmem:[%s5927_s1 + $0x58] sm:$0xff]   ;;  %v4663_v31 = vld [vmem:[%s5927_s1 + $0x60] sm:$0xff]   ;;  %v3615_v42 = vcombine.low %v4800_v19, %v4805_v20  ;;  %v3619_v44 = vcombine.low %v4810_v21, %v4817_v23 }
   0xa   :  { %2075 = vmatpush1.bf16.msra.mxu1 %v4643_v5  ;;  %v4660_v28 = vld [vmem:[%s5927_s1 + $0x150] sm:$0xff]   ;;  %v4662_v30 = vld [vmem:[%s5927_s1 + $0x158] sm:$0xff]   ;;  %v4664_v32 = vld [vmem:[%s5927_s1 + $0x160] sm:$0xff]  }
   0xb   :  { %2653 = vmatpush1.bf16.msra.mxu0 %v4644_v6  ;;  %2076 = vmatprep.subr.bf16.mxu1 %v4704_v0  ;;  %v4665_v33 = vld [vmem:[%s5927_s1 + $0x68] sm:$0xff]   ;;  %v4667_v35 = vld [vmem:[%s5927_s1 + $0x70] sm:$0xff]   ;;  %v4669_v37 = vld [vmem:[%s5927_s1 + $0x78] sm:$0xff]  }
   0xc   :  { %2654 = vmatprep.subr.bf16.mxu0 %v4704_v0  ;;  %2102 = vmatprep.mubr.bf16.mxu1 %v3616_v22  ;;  %v4666_v34 = vld [vmem:[%s5927_s1 + $0x168] sm:$0xff]   ;;  %v4668_v36 = vld [vmem:[%s5927_s1 + $0x170] sm:$0xff]   ;;  %v4670_v38 = vld [vmem:[%s5927_s1 + $0x178] sm:$0xff]  }
   0xd   :  { %2680 = vmatprep.mubr.bf16.mxu0 %v3620_v25  ;;  %v23_v39 = vld [vmem:[%s5928_s0 + $0x40] sm:$0xff]  ;;  %v25_v41 = vld [vmem:[%s5928_s0 + $0x50] sm:$0xff]  ;;  %v4673_v51 = vld [vmem:[%s5927_s1 + $0x88] sm:$0xff]  }
   0xe   :  { %2077 = vmatpush1.bf16.msra.mxu1 %v4645_v7  ;;  %v27_v40 = vld [vmem:[%s5928_s0 + $0x60] sm:$0xff]  ;;  %v29_v43 = vld [vmem:[%s5928_s0 + $0x70] sm:$0xff]  ;;  %v4674_v52 = vld [vmem:[%s5927_s1 + $0x188] sm:$0xff]  }
   0xf   :  { %2655 = vmatpush1.bf16.msra.mxu0 %v4646_v8  ;;  %2078 = vmatprep.subr.bf16.mxu1 %v4704_v0  ;;  %v4671_v45 = vld [vmem:[%s5927_s1 + $0x80] sm:$0xff]   ;;  %v3624_v47 = vcombine.high %v23_v39, %v27_v40  ;;  %v3628_v48 = vcombine.high %v25_v41, %v29_v43  ;;  %v33_v53 = vld [vmem:[%s5928_s0 + $0x90] sm:$0xff]  ;;  %v3623_v55 = vcombine.low %v23_v39, %v27_v40  ;;  %v4677_v2 = vld [vmem:[%s5927_s1 + $0x98] sm:$0xff]  }
  0x10   :  { %2656 = vmatprep.subr.bf16.mxu0 %v4704_v0  ;;  %v4672_v46 = vld [vmem:[%s5927_s1 + $0x180] sm:$0xff]   ;;  %v37_v54 = vld [vmem:[%s5928_s0 + $0xb0] sm:$0xff]  ;;  %v3627_v56 = vcombine.low %v25_v41, %v29_v43  ;;  %v4678_v3 = vld [vmem:[%s5927_s1 + $0x198] sm:$0xff]  }
  0x11   :  { %v31_v49 = vld [vmem:[%s5928_s0 + $0x80] sm:$0xff]  ;;  %v3636_v58 = vcombine.high %v33_v53, %v37_v54  ;;  %v4675_v59 = vld [vmem:[%s5927_s1 + $0x90] sm:$0xff]   ;;  %v3635_v6 = vcombine.low %v33_v53, %v37_v54  ;;  %v4690_v39 = vld [vmem:[%s5927_s1 + $0x1c8] sm:$0xff]  }
  0x12   :  { %2079 = vmatpush1.bf16.msra.mxu1 %v4647_v9  ;;  %v35_v50 = vld [vmem:[%s5928_s0 + $0xa0] sm:$0xff]  ;;  %v4676_v60 = vld [vmem:[%s5927_s1 + $0x190] sm:$0xff]   ;;  %v4693_v54 = vld [vmem:[%s5927_s1 + $0xd8] sm:$0xff]  }
  0x13   :  { %2657 = vmatpush1.bf16.msra.mxu0 %v4648_v10  ;;  %2080 = vmatprep.subr.bf16.mxu1 %v4704_v0  ;;  %v3632_v57 = vcombine.high %v31_v49, %v35_v50  ;;  %v39_v61 = vld [vmem:[%s5928_s0 + $0xc0] sm:$0xff]  ;;  %v41_v63 = vld [vmem:[%s5928_s0 + $0xd0] sm:$0xff]  ;;  %v3631_v4 = vcombine.low %v31_v49, %v35_v50 }
  0x14   :  { %2658 = vmatprep.subr.bf16.mxu0 %v4704_v0  ;;  %v43_v62 = vld [vmem:[%s5928_s0 + $0xe0] sm:$0xff]  ;;  %v45_v1 = vld [vmem:[%s5928_s0 + $0xf0] sm:$0xff] }
  0x15   :  { %v4679_v5 = vld [vmem:[%s5927_s1 + $0xa0] sm:$0xff]   ;;  %v3640_v7 = vcombine.high %v39_v61, %v43_v62  ;;  %v3644_v9 = vcombine.high %v41_v63, %v45_v1  ;;  %v4683_v20 = vld [vmem:[%s5927_s1 + $0xb0] sm:$0xff]  }
  0x16   :  { %2081 = vmatpush1.bf16.msra.mxu1 %v4649_v11  ;;  %v4680_v8 = vld [vmem:[%s5927_s1 + $0x1a0] sm:$0xff]   ;;  %v4684_v21 = vld [vmem:[%s5927_s1 + $0x1b0] sm:$0xff]  }
  0x17   :  { %2659 = vmatpush1.bf16.msra.mxu0 %v4650_v12  ;;  %2082 = vmatprep.subr.bf16.mxu1 %v4704_v0  ;;  %v47_v10 = vld [vmem:[%s5928_s0 + $0x100] sm:$0xff]  ;;  %v49_v12 = vld [vmem:[%s5928_s0 + $0x110] sm:$0xff] }
  0x18   :  { %2660 = vmatprep.subr.bf16.mxu0 %v4704_v0  ;;  %v51_v11 = vld [vmem:[%s5928_s0 + $0x120] sm:$0xff]  ;;  %v57_v25 = vld [vmem:[%s5928_s0 + $0x150] sm:$0xff] }
  0x19   :  { %v55_v22 = vld [vmem:[%s5928_s0 + $0x140] sm:$0xff]  ;;  %v77_v49 = vld [vmem:[%s5928_s0 + $0x1f0] sm:$0xff] }
  0x1a   :  { %2083 = vmatpush1.bf16.msra.mxu1 %v4651_v13  ;;  %v53_v13 = vld [vmem:[%s5928_s0 + $0x130] sm:$0xff]  ;;  %v59_v23 = vld [vmem:[%s5928_s0 + $0x160] sm:$0xff] }
  0x1b   :  { %2661 = vmatpush1.bf16.msra.mxu0 %v4652_v14  ;;  %2084 = vmatprep.subr.bf16.mxu1 %v4704_v0  ;;  %v4681_v14 = vld [vmem:[%s5927_s1 + $0xa8] sm:$0xff]   ;;  %v3652_v19 = vcombine.high %v49_v12, %v53_v13  ;;  %v3655_v40 = vcombine.low %v55_v22, %v59_v23 }
  0x1c   :  { %2662 = vmatprep.subr.bf16.mxu0 %v4704_v0 }
  0x1e   :  { %2085 = vmatpush1.bf16.msra.mxu1 %v4653_v15  ;;  %v4682_v15 = vld [vmem:[%s5927_s1 + $0x1a8] sm:$0xff]  }
  0x1f   :  { %2663 = vmatpush1.bf16.msra.mxu0 %v4654_v16  ;;  %2086 = vmatprep.subr.bf16.mxu1 %v4704_v0  ;;  %v3639_v16 = vcombine.low %v39_v61, %v43_v62 }
  0x20   :  { %2664 = vmatprep.subr.bf16.mxu0 %v4704_v0 }
  0x22   :  { %2087 = vmatpush1.bf16.msra.mxu1 %v4655_v17  ;;  %v3643_v17 = vcombine.low %v41_v63, %v45_v1  ;;  %v87_v1 = vld [vmem:[%s5928_s0 + $0x240] sm:$0xff] }
  0x23   :  { %2665 = vmatpush1.bf16.msra.mxu0 %v4656_v18  ;;  %2088 = vmatprep.subr.bf16.mxu1 %v4704_v0  ;;  %v3648_v18 = vcombine.high %v47_v10, %v51_v11 }
  0x24   :  { %2666 = vmatprep.subr.bf16.mxu0 %v4704_v0 }
  0x26   :  { %2089 = vmatpush1.bf16.msra.mxu1 %v4657_v24  ;;  %v4685_v24 = vld [vmem:[%s5927_s1 + $0xb8] sm:$0xff]  }
  0x27   :  { %2667 = vmatpush1.bf16.msra.mxu0 %v4658_v26  ;;  %2090 = vmatprep.subr.bf16.mxu1 %v4704_v0  ;;  %v61_v26 = vld [vmem:[%s5928_s0 + $0x170] sm:$0xff] }
  0x28   :  { %2668 = vmatprep.subr.bf16.mxu0 %v4704_v0  ;;  %v3659_v41 = vcombine.low %v57_v25, %v61_v26 }
  0x2a   :  { %2091 = vmatpush1.bf16.msra.mxu1 %v4659_v27  ;;  %v4686_v27 = vld [vmem:[%s5927_s1 + $0x1b8] sm:$0xff]  }
  0x2b   :  { %2669 = vmatpush1.bf16.msra.mxu0 %v4660_v28  ;;  %2092 = vmatprep.subr.bf16.mxu1 %v4704_v0  ;;  %v3647_v28 = vcombine.low %v47_v10, %v51_v11  ;;  %v4696_v10 = vld [vmem:[%s5927_s1 + $0x1e0] sm:$0xff]  }
  0x2c   :  { %2670 = vmatprep.subr.bf16.mxu0 %v4704_v0  ;;  %v95_v11 = vld [vmem:[%s5928_s0 + $0x280] sm:$0xff] }
  0x2e   :  { %2093 = vmatpush1.bf16.msra.mxu1 %v4661_v29  ;;  %v3651_v29 = vcombine.low %v49_v12, %v53_v13  ;;  %v99_v12 = vld [vmem:[%s5928_s0 + $0x2a0] sm:$0xff]  ;;  %v97_v13 = vld [vmem:[%s5928_s0 + $0x290] sm:$0xff] }
  0x2f   :  { %2671 = vmatpush1.bf16.msra.mxu0 %v4662_v30  ;;  %2094 = vmatprep.subr.bf16.mxu1 %v4704_v0  ;;  %v3656_v30 = vcombine.high %v55_v22, %v59_v23  ;;  %v109_v22 = vld [vmem:[%s5928_s0 + $0x2f0] sm:$0xff]  ;;  %v3695_v23 = vcombine.low %v95_v11, %v99_v12 }
  0x30   :  { %2672 = vmatprep.subr.bf16.mxu0 %v4704_v0 }
  0x32   :  { %2095 = vmatpush1.bf16.msra.mxu1 %v4663_v31  ;;  %v3660_v31 = vcombine.high %v57_v25, %v61_v26 }
  0x33   :  { %2673 = vmatpush1.bf16.msra.mxu0 %v4664_v32  ;;  %2096 = vmatprep.subr.bf16.mxu1 %v4704_v0  ;;  %v4687_v32 = vld [vmem:[%s5927_s1 + $0xc0] sm:$0xff]  }
  0x34   :  { %2674 = vmatprep.subr.bf16.mxu0 %v4704_v0 }
  0x36   :  { %2097 = vmatpush1.bf16.msra.mxu1 %v4665_v33  ;;  %v4688_v33 = vld [vmem:[%s5927_s1 + $0x1c0] sm:$0xff]  }
  0x37   :  { %2675 = vmatpush1.bf16.msra.mxu0 %v4666_v34  ;;  %2098 = vmatprep.subr.bf16.mxu1 %v4704_v0  ;;  %v63_v34 = vld [vmem:[%s5928_s0 + $0x180] sm:$0xff] }
  0x38   :  { %2676 = vmatprep.subr.bf16.mxu0 %v4704_v0 }
  0x3a   :  { %2099 = vmatpush1.bf16.msra.mxu1 %v4667_v35  ;;  %v67_v35 = vld [vmem:[%s5928_s0 + $0x1a0] sm:$0xff] }
  0x3b   :  { %2677 = vmatpush1.bf16.msra.mxu0 %v4668_v36  ;;  %2100 = vmatprep.subr.bf16.mxu1 %v4704_v0  ;;  %v4689_v36 = vld [vmem:[%s5927_s1 + $0xc8] sm:$0xff]   ;;  %v3663_v50 = vcombine.low %v63_v34, %v67_v35 }
  0x3c   :  { %2678 = vmatprep.subr.bf16.mxu0 %v4704_v0 }
  0x3e   :  { %2101 = vmatpush1.bf16.msra.mxu1 %v4669_v37  ;;  %v65_v37 = vld [vmem:[%s5928_s0 + $0x190] sm:$0xff] }
  0x3f   :  { %2679 = vmatpush1.bf16.msra.mxu0 %v4670_v38  ;;  %2359 = vmatprep.subr.bf16.mxu1 %v4704_v0  ;;  %v69_v38 = vld [vmem:[%s5928_s0 + $0x1b0] sm:$0xff] }
  0x40   :  { %2937 = vmatprep.subr.bf16.mxu0 %v4704_v0  ;;  %v3668_v43 = vcombine.high %v65_v37, %v69_v38 }
  0x41   :  { %2103 = vmatmul.mubr.bf16.vlgmr.msra.gmra.mrb[0].mxu1 %v3615_v42  ;;  %v3664_v42 = vcombine.high %v63_v34, %v67_v35 }
  0x42   :  { %2681 = vmatmul.mubr.bf16.vlgmr.msra.gmra.mrb[0].mxu0 %v3619_v44  ;;  %2360 = vmatpush1.bf16.msra.mxu1 %v4671_v45  ;;  %v4691_v44 = vld [vmem:[%s5927_s1 + $0xd0] sm:$0xff]  }
  0x43   :  { %2938 = vmatpush1.bf16.msra.mxu0 %v4672_v46  ;;  %2110 = vmatprep.mubr.bf16.mxu1 %v3624_v47  ;;  %v4692_v45 = vld [vmem:[%s5927_s1 + $0x1d0] sm:$0xff]   ;;  %v71_v46 = vld [vmem:[%s5928_s0 + $0x1c0] sm:$0xff] }
  0x44   :  { %2688 = vmatprep.mubr.bf16.mxu0 %v3628_v48  ;;  %2361 = vmatprep.subr.bf16.mxu1 %v4704_v0  ;;  %v75_v47 = vld [vmem:[%s5928_s0 + $0x1e0] sm:$0xff]  ;;  %v73_v48 = vld [vmem:[%s5928_s0 + $0x1d0] sm:$0xff] }
  0x45   :  { %2939 = vmatprep.subr.bf16.mxu0 %v4704_v0  ;;  %v3676_v53 = vcombine.high %v73_v48, %v77_v49  ;;  %v3675_v61 = vcombine.low %v73_v48, %v77_v49  ;;  %v131_v48 = vld [vmem:[%s5928_s0 + $0x3a0] sm:$0xff]  ;;  %v129_v49 = vld [vmem:[%s5928_s0 + $0x390] sm:$0xff] }
  0x46   :  { %2362 = vmatpush1.bf16.msra.mxu1 %v4673_v51  ;;  %v3667_v51 = vcombine.low %v65_v37, %v69_v38  ;;  %v119_v37 = vld [vmem:[%s5928_s0 + $0x340] sm:$0xff] }
  0x47   :  { %2940 = vmatpush1.bf16.msra.mxu0 %v4674_v52  ;;  %2363 = vmatprep.subr.bf16.mxu1 %v4704_v0  ;;  %v3672_v52 = vcombine.high %v71_v46, %v75_v47  ;;  %v123_v38 = vld [vmem:[%s5928_s0 + $0x360] sm:$0xff] }
  0x48   :  { %2941 = vmatprep.subr.bf16.mxu0 %v4704_v0 }
  0x49   :  { %2111 = vmatmul.mubr.bf16.gmra.mrb[4].mxu1 %v3623_v55  ;;  %v4694_v55 = vld [vmem:[%s5927_s1 + $0x1d8] sm:$0xff]  }
  0x4a   :  { %2689 = vmatmul.mubr.bf16.gmra.mrb[4].mxu0 %v3627_v56  ;;  %2118 = vmatprep.mubr.bf16.mxu1 %v3632_v57  ;;  %v79_v56 = vld [vmem:[%s5928_s0 + $0x200] sm:$0xff] }
  0x4b   :  { %2696 = vmatprep.mubr.bf16.mxu0 %v3636_v58  ;;  %2364 = vmatpush1.bf16.msra.mxu1 %v4675_v59  ;;  %v83_v57 = vld [vmem:[%s5928_s0 + $0x220] sm:$0xff]  ;;  %v81_v58 = vld [vmem:[%s5928_s0 + $0x210] sm:$0xff] }
  0x4c   :  { %2942 = vmatpush1.bf16.msra.mxu0 %v4676_v60  ;;  %2365 = vmatprep.subr.bf16.mxu1 %v4704_v0  ;;  %v85_v59 = vld [vmem:[%s5928_s0 + $0x230] sm:$0xff]  ;;  %v3671_v60 = vcombine.low %v71_v46, %v75_v47  ;;  %v3680_v62 = vcombine.high %v79_v56, %v83_v57  ;;  %v127_v47 = vld [vmem:[%s5928_s0 + $0x380] sm:$0xff] }
  0x4d   :  { %2943 = vmatprep.subr.bf16.mxu0 %v4704_v0  ;;  %v3684_v63 = vcombine.high %v81_v58, %v85_v59  ;;  %v4700_v46 = vld [vmem:[%s5927_s1 + $0x1f0] sm:$0xff]  }
  0x4f   :  { %2366 = vmatpush1.bf16.msra.mxu1 %v4677_v2  ;;  %v91_v2 = vld [vmem:[%s5928_s0 + $0x260] sm:$0xff] }
  0x50   :  { %2944 = vmatpush1.bf16.msra.mxu0 %v4678_v3  ;;  %2367 = vmatprep.subr.bf16.mxu1 %v4704_v0  ;;  %v89_v3 = vld [vmem:[%s5928_s0 + $0x250] sm:$0xff] }
  0x51   :  { %2119 = vmatmul.mubr.bf16.gmra.mrb[8].mxu1 %v3631_v4  ;;  %2945 = vmatprep.subr.bf16.mxu0 %v4704_v0  ;;  %v93_v4 = vld [vmem:[%s5928_s0 + $0x270] sm:$0xff] }
  0x52   :  { %2697 = vmatmul.mubr.bf16.gmra.mrb[8].mxu0 %v3635_v6  ;;  %2126 = vmatprep.mubr.bf16.mxu1 %v3640_v7  ;;  %v3683_v6 = vcombine.low %v81_v58, %v85_v59  ;;  %v3688_v7 = vcombine.high %v87_v1, %v91_v2  ;;  %v3727_v58 = vcombine.low %v127_v47, %v131_v48 }
  0x53   :  { %2704 = vmatprep.mubr.bf16.mxu0 %v3644_v9  ;;  %2368 = vmatpush1.bf16.msra.mxu1 %v4679_v5  ;;  %v3679_v5 = vcombine.low %v79_v56, %v83_v57  ;;  %v4695_v9 = vld [vmem:[%s5927_s1 + $0xe0] sm:$0xff]   ;;  %v137_v57 = vld [vmem:[%s5928_s0 + $0x3d0] sm:$0xff] }
  0x54   :  { %2946 = vmatpush1.bf16.msra.mxu0 %v4680_v8  ;;  %2369 = vmatprep.subr.bf16.mxu1 %v4704_v0  ;;  %v3692_v8 = vcombine.high %v89_v3, %v93_v4  ;;  %v139_v56 = vld [vmem:[%s5928_s0 + $0x3e0] sm:$0xff] }
  0x55   :  { %2947 = vmatprep.subr.bf16.mxu0 %v4704_v0 }
  0x57   :  { %2370 = vmatpush1.bf16.msra.mxu1 %v4681_v14  ;;  %v101_v14 = vld [vmem:[%s5928_s0 + $0x2b0] sm:$0xff] }
  0x58   :  { %2948 = vmatpush1.bf16.msra.mxu0 %v4682_v15  ;;  %2371 = vmatprep.subr.bf16.mxu1 %v4704_v0  ;;  %v3687_v15 = vcombine.low %v87_v1, %v91_v2  ;;  %v143_v1 = vld [vmem:[%s5928_s0 + $0x400] sm:$0xff] }
  0x59   :  { %2127 = vmatmul.mubr.bf16.gmra.mrb[12].mxu1 %v3639_v16  ;;  %2949 = vmatprep.subr.bf16.mxu0 %v4704_v0  ;;  %v3691_v16 = vcombine.low %v89_v3, %v93_v4  ;;  %v147_v2 = vld [vmem:[%s5928_s0 + $0x420] sm:$0xff]  ;;  %v145_v3 = vld [vmem:[%s5928_s0 + $0x410] sm:$0xff] }
  0x5a   :  { %2705 = vmatmul.mubr.bf16.gmra.mrb[12].mxu0 %v3643_v17  ;;  %2134 = vmatprep.mubr.bf16.mxu1 %v3648_v18  ;;  %v3696_v17 = vcombine.high %v95_v11, %v99_v12  ;;  %v3700_v18 = vcombine.high %v97_v13, %v101_v14  ;;  %v149_v4 = vld [vmem:[%s5928_s0 + $0x430] sm:$0xff] }
  0x5b   :  { %2712 = vmatprep.mubr.bf16.mxu0 %v3652_v19  ;;  %2372 = vmatpush1.bf16.msra.mxu1 %v4683_v20  ;;  %v103_v19 = vld [vmem:[%s5928_s0 + $0x2c0] sm:$0xff]  ;;  %v153_v11 = vld [vmem:[%s5928_s0 + $0x450] sm:$0xff] }
  0x5c   :  { %2950 = vmatpush1.bf16.msra.mxu0 %v4684_v21  ;;  %2373 = vmatprep.subr.bf16.mxu1 %v4704_v0  ;;  %v107_v20 = vld [vmem:[%s5928_s0 + $0x2e0] sm:$0xff]  ;;  %v105_v21 = vld [vmem:[%s5928_s0 + $0x2d0] sm:$0xff] }
  0x5d   :  { %2951 = vmatprep.subr.bf16.mxu0 %v4704_v0  ;;  %v3704_v25 = vcombine.high %v103_v19, %v107_v20  ;;  %v3708_v26 = vcombine.high %v105_v21, %v109_v22  ;;  %v3707_v34 = vcombine.low %v105_v21, %v109_v22  ;;  %v157_v12 = vld [vmem:[%s5928_s0 + $0x470] sm:$0xff] }
  0x5e   :  { %v3755_v22 = vcombine.low %v153_v11, %v157_v12 }
  0x5f   :  { %2374 = vmatpush1.bf16.msra.mxu1 %v4685_v24  ;;  %v3699_v24 = vcombine.low %v97_v13, %v101_v14  ;;  %v3743_v13 = vcombine.low %v143_v1, %v147_v2  ;;  %v3747_v14 = vcombine.low %v145_v3, %v149_v4 }
  0x60   :  { %2952 = vmatpush1.bf16.msra.mxu0 %v4686_v27  ;;  %2375 = vmatprep.subr.bf16.mxu1 %v4704_v0  ;;  %v4697_v27 = vld [vmem:[%s5927_s1 + $0xe8] sm:$0xff]  }
  0x61   :  { %2135 = vmatmul.mubr.bf16.gmra.mrb[16].mxu1 %v3647_v28  ;;  %2953 = vmatprep.subr.bf16.mxu0 %v4704_v0  ;;  %v4698_v28 = vld [vmem:[%s5927_s1 + $0x1e8] sm:$0xff]  }
  0x62   :  { %2713 = vmatmul.mubr.bf16.gmra.mrb[16].mxu0 %v3651_v29  ;;  %2142 = vmatprep.mubr.bf16.mxu1 %v3656_v30  ;;  %v111_v29 = vld [vmem:[%s5928_s0 + $0x300] sm:$0xff] }
  0x63   :  { %2720 = vmatprep.mubr.bf16.mxu0 %v3660_v31  ;;  %2376 = vmatpush1.bf16.msra.mxu1 %v4687_v32  ;;  %v115_v30 = vld [vmem:[%s5928_s0 + $0x320] sm:$0xff]  ;;  %v113_v31 = vld [vmem:[%s5928_s0 + $0x310] sm:$0xff] }
  0x64   :  { %2954 = vmatpush1.bf16.msra.mxu0 %v4688_v33  ;;  %2377 = vmatprep.subr.bf16.mxu1 %v4704_v0  ;;  %v117_v32 = vld [vmem:[%s5928_s0 + $0x330] sm:$0xff]  ;;  %v3703_v33 = vcombine.low %v103_v19, %v107_v20  ;;  %v3712_v35 = vcombine.high %v111_v29, %v115_v30 }
  0x65   :  { %2955 = vmatprep.subr.bf16.mxu0 %v4704_v0  ;;  %v161_v19 = vld [vmem:[%s5928_s0 + $0x490] sm:$0xff] }
  0x66   :  { %v165_v20 = vld [vmem:[%s5928_s0 + $0x4b0] sm:$0xff] }
  0x67   :  { %2378 = vmatpush1.bf16.msra.mxu1 %v4689_v36  ;;  %v3716_v36 = vcombine.high %v113_v31, %v117_v32 }
  0x68   :  { %2956 = vmatpush1.bf16.msra.mxu0 %v4690_v39  ;;  %2379 = vmatprep.subr.bf16.mxu1 %v4704_v0  ;;  %v121_v39 = vld [vmem:[%s5928_s0 + $0x350] sm:$0xff] }
  0x69   :  { %2143 = vmatmul.mubr.bf16.gmra.mrb[20].mxu1 %v3655_v40  ;;  %2957 = vmatprep.subr.bf16.mxu0 %v4704_v0  ;;  %v125_v40 = vld [vmem:[%s5928_s0 + $0x370] sm:$0xff] }
  0x6a   :  { %2721 = vmatmul.mubr.bf16.gmra.mrb[20].mxu0 %v3659_v41  ;;  %2150 = vmatprep.mubr.bf16.mxu1 %v3664_v42  ;;  %v3711_v41 = vcombine.low %v111_v29, %v115_v30  ;;  %v3715_v42 = vcombine.low %v113_v31, %v117_v32  ;;  %v3763_v30 = vcombine.low %v161_v19, %v165_v20 }
  0x6b   :  { %2728 = vmatprep.mubr.bf16.mxu0 %v3668_v43  ;;  %2380 = vmatpush1.bf16.msra.mxu1 %v4691_v44  ;;  %v3720_v43 = vcombine.high %v119_v37, %v123_v38  ;;  %v3724_v44 = vcombine.high %v121_v39, %v125_v40 }
  0x6c   :  { %2958 = vmatpush1.bf16.msra.mxu0 %v4692_v45  ;;  %2381 = vmatprep.subr.bf16.mxu1 %v4704_v0  ;;  %v4699_v45 = vld [vmem:[%s5927_s1 + $0xf0] sm:$0xff]  }
  0x6d   :  { %2959 = vmatprep.subr.bf16.mxu0 %v4704_v0 }
  0x6f   :  { %2382 = vmatpush1.bf16.msra.mxu1 %v4693_v54 }
  0x70   :  { %2960 = vmatpush1.bf16.msra.mxu0 %v4694_v55  ;;  %2383 = vmatprep.subr.bf16.mxu1 %v4704_v0  ;;  %v135_v55 = vld [vmem:[%s5928_s0 + $0x3c0] sm:$0xff] }
  0x71   :  { %2151 = vmatmul.mubr.bf16.gmra.mrb[24].mxu1 %v3663_v50  ;;  %2961 = vmatprep.subr.bf16.mxu0 %v4704_v0  ;;  %v133_v50 = vld [vmem:[%s5928_s0 + $0x3b0] sm:$0xff] }
  0x72   :  { %2729 = vmatmul.mubr.bf16.gmra.mrb[24].mxu0 %v3667_v51  ;;  %2158 = vmatprep.mubr.bf16.mxu1 %v3672_v52  ;;  %v3719_v51 = vcombine.low %v119_v37, %v123_v38  ;;  %v3723_v52 = vcombine.low %v121_v39, %v125_v40  ;;  %v3732_v54 = vcombine.high %v129_v49, %v133_v50 }
  0x73   :  { %2736 = vmatprep.mubr.bf16.mxu0 %v3676_v53  ;;  %2384 = vmatpush1.bf16.msra.mxu1 %v4695_v9  ;;  %v3728_v53 = vcombine.high %v127_v47, %v131_v48  ;;  %v3731_v59 = vcombine.low %v129_v49, %v133_v50  ;;  %v151_v9 = vld [vmem:[%s5928_s0 + $0x440] sm:$0xff] }
  0x74   :  { %2962 = vmatpush1.bf16.msra.mxu0 %v4696_v10  ;;  %2385 = vmatprep.subr.bf16.mxu1 %v4704_v0  ;;  %v155_v10 = vld [vmem:[%s5928_s0 + $0x460] sm:$0xff] }
  0x75   :  { %2963 = vmatprep.subr.bf16.mxu0 %v4704_v0  ;;  %v3751_v21 = vcombine.low %v151_v9, %v155_v10  ;;  %v191_v49 = vld [vmem:[%s5928_s0 + $0x580] sm:$0xff] }
  0x76   :  { %v195_v50 = vld [vmem:[%s5928_s0 + $0x5a0] sm:$0xff] }
  0x77   :  { %2386 = vmatpush1.bf16.msra.mxu1 %v4697_v27  ;;  %v169_v27 = vld [vmem:[%s5928_s0 + $0x4d0] sm:$0xff] }
  0x78   :  { %2964 = vmatpush1.bf16.msra.mxu0 %v4698_v28  ;;  %2387 = vmatprep.subr.bf16.mxu1 %v4704_v0  ;;  %v173_v28 = vld [vmem:[%s5928_s0 + $0x4f0] sm:$0xff] }
  0x79   :  { %2159 = vmatmul.mubr.bf16.gmra.mrb[28].mxu1 %v3671_v60  ;;  %2965 = vmatprep.subr.bf16.mxu0 %v4704_v0  ;;  %v3736_v60 = vcombine.high %v135_v55, %v139_v56  ;;  %v3772_v32 = vcombine.high %v169_v27, %v173_v28  ;;  %v3771_v38 = vcombine.low %v169_v27, %v173_v28  ;;  %v233_v27 = vld [vmem:[%s5928_s0 + $0x6d0] sm:$0xff] }
  0x7a   :  { %2737 = vmatmul.mubr.bf16.gmra.mrb[28].mxu0 %v3675_v61  ;;  %2166 = vmatprep.mubr.bf16.mxu1 %v3680_v62  ;;  %v4701_v62 = vld [vmem:[%s5927_s1 + $0xf8] sm:$0xff]   ;;  %v237_v28 = vld [vmem:[%s5928_s0 + $0x6f0] sm:$0xff] }
  0x7b   :  { %2744 = vmatprep.mubr.bf16.mxu0 %v3684_v63  ;;  %2388 = vmatpush1.bf16.msra.mxu1 %v4699_v45  ;;  %v4702_v63 = vld [vmem:[%s5927_s1 + $0x1f8] sm:$0xff]  }
  0x7c   :  { %2966 = vmatpush1.bf16.msra.mxu0 %v4700_v46  ;;  %2389 = vmatprep.subr.bf16.mxu1 %v4704_v0 }
  0x7d   :  { %2967 = vmatprep.subr.bf16.mxu0 %v4704_v0  ;;  %v141_v0 = vld [vmem:[%s5928_s0 + $0x3f0] sm:$0xff] }
  0x7e   :  { %v3740_v61 = vcombine.high %v137_v57, %v141_v0 }
  0x7f   :  { %2390 = vmatpush1.bf16.msra.mxu1 %v4701_v62 }
  0x80   :  { %2968 = vmatpush1.bf16.msra.mxu0 %v4702_v63 }
  0x81   :  { %2167 = vmatmul.mubr.bf16.gmra.mrb[32].mxu1 %v3679_v5  ;;  %v3735_v5 = vcombine.low %v135_v55, %v139_v56  ;;  %v3792_v55 = vcombine.high %v191_v49, %v195_v50 }
  0x82   :  { %2745 = vmatmul.mubr.bf16.gmra.mrb[32].mxu0 %v3683_v6  ;;  %2174 = vmatprep.mubr.bf16.mxu1 %v3688_v7  ;;  %v3739_v6 = vcombine.low %v137_v57, %v141_v0  ;;  %v3744_v7 = vcombine.high %v143_v1, %v147_v2  ;;  %v199_v57 = vld [vmem:[%s5928_s0 + $0x5c0] sm:$0xff] }
  0x83   :  { %2752 = vmatprep.mubr.bf16.mxu0 %v3692_v8  ;;  %v3748_v8 = vcombine.high %v145_v3, %v149_v4  ;;  %v203_v0 = vld [vmem:[%s5928_s0 + $0x5e0] sm:$0xff]  ;;  %v209_v3 = vld [vmem:[%s5928_s0 + $0x610] sm:$0xff] }
  0x84   :  { %v3800_v62 = vcombine.high %v199_v57, %v203_v0  ;;  %v207_v1 = vld [vmem:[%s5928_s0 + $0x600] sm:$0xff]  ;;  %v213_v4 = vld [vmem:[%s5928_s0 + $0x630] sm:$0xff] }
  0x85   :  { %v211_v2 = vld [vmem:[%s5928_s0 + $0x620] sm:$0xff] }
  0x89   :  { %2175 = vmatmul.mubr.bf16.gmra.mrb[36].mxu1 %v3687_v15  ;;  %v3752_v15 = vcombine.high %v151_v9, %v155_v10  ;;  %v215_v9 = vld [vmem:[%s5928_s0 + $0x640] sm:$0xff] }
  0x8a   :  { %2753 = vmatmul.mubr.bf16.gmra.mrb[36].mxu0 %v3691_v16  ;;  %2182 = vmatprep.mubr.bf16.mxu1 %v3696_v17  ;;  %v3756_v16 = vcombine.high %v153_v11, %v157_v12  ;;  %v159_v17 = vld [vmem:[%s5928_s0 + $0x480] sm:$0xff]  ;;  %v217_v11 = vld [vmem:[%s5928_s0 + $0x650] sm:$0xff] }
  0x8b   :  { %2760 = vmatprep.mubr.bf16.mxu0 %v3700_v18  ;;  %v163_v18 = vld [vmem:[%s5928_s0 + $0x4a0] sm:$0xff]  ;;  %v221_v12 = vld [vmem:[%s5928_s0 + $0x670] sm:$0xff] }
  0x8c   :  { %v3759_v29 = vcombine.low %v159_v17, %v163_v18  ;;  %v219_v10 = vld [vmem:[%s5928_s0 + $0x660] sm:$0xff] }
  0x91   :  { %2183 = vmatmul.mubr.bf16.gmra.mrb[40].mxu1 %v3695_v23  ;;  %v3760_v23 = vcombine.high %v159_v17, %v163_v18  ;;  %v223_v17 = vld [vmem:[%s5928_s0 + $0x680] sm:$0xff] }
  0x92   :  { %2761 = vmatmul.mubr.bf16.gmra.mrb[40].mxu0 %v3699_v24  ;;  %2190 = vmatprep.mubr.bf16.mxu1 %v3704_v25  ;;  %v3764_v24 = vcombine.high %v161_v19, %v165_v20  ;;  %v167_v25 = vld [vmem:[%s5928_s0 + $0x4c0] sm:$0xff]  ;;  %v225_v19 = vld [vmem:[%s5928_s0 + $0x690] sm:$0xff] }
  0x93   :  { %2768 = vmatprep.mubr.bf16.mxu0 %v3708_v26  ;;  %v171_v26 = vld [vmem:[%s5928_s0 + $0x4e0] sm:$0xff]  ;;  %v229_v20 = vld [vmem:[%s5928_s0 + $0x6b0] sm:$0xff] }
  0x94   :  { %v3768_v31 = vcombine.high %v167_v25, %v171_v26  ;;  %v3767_v37 = vcombine.low %v167_v25, %v171_v26  ;;  %v227_v18 = vld [vmem:[%s5928_s0 + $0x6a0] sm:$0xff] }
  0x95   :  { %v231_v25 = vld [vmem:[%s5928_s0 + $0x6c0] sm:$0xff] }
  0x96   :  { %v235_v26 = vld [vmem:[%s5928_s0 + $0x6e0] sm:$0xff] }
  0x99   :  { %2191 = vmatmul.mubr.bf16.gmra.mrb[44].mxu1 %v3703_v33  ;;  %v175_v33 = vld [vmem:[%s5928_s0 + $0x500] sm:$0xff] }
  0x9a   :  { %2769 = vmatmul.mubr.bf16.gmra.mrb[44].mxu0 %v3707_v34  ;;  %2198 = vmatprep.mubr.bf16.mxu1 %v3712_v35  ;;  %v179_v34 = vld [vmem:[%s5928_s0 + $0x520] sm:$0xff]  ;;  %v177_v35 = vld [vmem:[%s5928_s0 + $0x510] sm:$0xff] }
  0x9b   :  { %2776 = vmatprep.mubr.bf16.mxu0 %v3716_v36  ;;  %v181_v36 = vld [vmem:[%s5928_s0 + $0x530] sm:$0xff]  ;;  %v3776_v39 = vcombine.high %v175_v33, %v179_v34  ;;  %v3775_v45 = vcombine.low %v175_v33, %v179_v34  ;;  %v239_v33 = vld [vmem:[%s5928_s0 + $0x700] sm:$0xff] }
  0x9c   :  { %v3780_v40 = vcombine.high %v177_v35, %v181_v36  ;;  %v3779_v46 = vcombine.low %v177_v35, %v181_v36  ;;  %v243_v34 = vld [vmem:[%s5928_s0 + $0x720] sm:$0xff]  ;;  %v241_v35 = vld [vmem:[%s5928_s0 + $0x710] sm:$0xff] }
  0x9d   :  { %v245_v36 = vld [vmem:[%s5928_s0 + $0x730] sm:$0xff] }
  0xa1   :  { %2199 = vmatmul.mubr.bf16.gmra.mrb[48].mxu1 %v3711_v41  ;;  %v183_v41 = vld [vmem:[%s5928_s0 + $0x540] sm:$0xff] }
  0xa2   :  { %2777 = vmatmul.mubr.bf16.gmra.mrb[48].mxu0 %v3715_v42  ;;  %2206 = vmatprep.mubr.bf16.mxu1 %v3720_v43  ;;  %v187_v42 = vld [vmem:[%s5928_s0 + $0x560] sm:$0xff]  ;;  %v185_v43 = vld [vmem:[%s5928_s0 + $0x550] sm:$0xff] }
  0xa3   :  { %2784 = vmatprep.mubr.bf16.mxu0 %v3724_v44  ;;  %v189_v44 = vld [vmem:[%s5928_s0 + $0x570] sm:$0xff]  ;;  %v3784_v47 = vcombine.high %v183_v41, %v187_v42 }
  0xa4   :  { %v3788_v48 = vcombine.high %v185_v43, %v189_v44 }
  0xa9   :  { %2207 = vmatmul.mubr.bf16.gmra.mrb[52].mxu1 %v3719_v51  ;;  %v193_v51 = vld [vmem:[%s5928_s0 + $0x590] sm:$0xff] }
  0xaa   :  { %2785 = vmatmul.mubr.bf16.gmra.mrb[52].mxu0 %v3723_v52  ;;  %2214 = vmatprep.mubr.bf16.mxu1 %v3728_v53  ;;  %v197_v52 = vld [vmem:[%s5928_s0 + $0x5b0] sm:$0xff]  ;;  %v3783_v53 = vcombine.low %v183_v41, %v187_v42  ;;  %v247_v41 = vld [vmem:[%s5928_s0 + $0x740] sm:$0xff] }
  0xab   :  { %2792 = vmatprep.mubr.bf16.mxu0 %v3732_v54  ;;  %v3787_v54 = vcombine.low %v185_v43, %v189_v44  ;;  %v3796_v56 = vcombine.high %v193_v51, %v197_v52  ;;  %v251_v42 = vld [vmem:[%s5928_s0 + $0x760] sm:$0xff]  ;;  %v249_v43 = vld [vmem:[%s5928_s0 + $0x750] sm:$0xff] }
  0xac   :  { %v253_v44 = vld [vmem:[%s5928_s0 + $0x770] sm:$0xff] }
  0xb1   :  { %2215 = vmatmul.mubr.bf16.gmra.mrb[56].mxu1 %v3727_v58  ;;  %v201_v58 = vld [vmem:[%s5928_s0 + $0x5d0] sm:$0xff] }
  0xb2   :  { %2793 = vmatmul.mubr.bf16.gmra.mrb[56].mxu0 %v3731_v59  ;;  %2222 = vmatprep.mubr.bf16.mxu1 %v3736_v60  ;;  %v205_v59 = vld [vmem:[%s5928_s0 + $0x5f0] sm:$0xff]  ;;  %v3791_v60 = vcombine.low %v191_v49, %v195_v50  ;;  %v255_v49 = vld [vmem:[%s5928_s0 + $0x780] sm:$0xff] }
  0xb3   :  { %2800 = vmatprep.mubr.bf16.mxu0 %v3740_v61  ;;  %v3795_v61 = vcombine.low %v193_v51, %v197_v52  ;;  %v3804_v63 = vcombine.high %v201_v58, %v205_v59  ;;  %v259_v50 = vld [vmem:[%s5928_s0 + $0x7a0] sm:$0xff]  ;;  %v257_v51 = vld [vmem:[%s5928_s0 + $0x790] sm:$0xff] }
  0xb4   :  { %v261_v52 = vld [vmem:[%s5928_s0 + $0x7b0] sm:$0xff] }
  0xb9   :  { %2223 = vmatmul.mubr.bf16.gmra.mrb[60].mxu1 %v3735_v5  ;;  %v3799_v5 = vcombine.low %v199_v57, %v203_v0  ;;  %v263_v57 = vld [vmem:[%s5928_s0 + $0x7c0] sm:$0xff] }
  0xba   :  { %2801 = vmatmul.mubr.bf16.gmra.mrb[60].mxu0 %v3739_v6  ;;  %2230 = vmatprep.mubr.bf16.mxu1 %v3744_v7  ;;  %v3803_v6 = vcombine.low %v201_v58, %v205_v59  ;;  %v3808_v7 = vcombine.high %v207_v1, %v211_v2  ;;  %v267_v0 = vld [vmem:[%s5928_s0 + $0x7e0] sm:$0xff]  ;;  %v265_v58 = vld [vmem:[%s5928_s0 + $0x7d0] sm:$0xff] }
  0xbb   :  { %2808 = vmatprep.mubr.bf16.mxu0 %v3748_v8  ;;  %v3812_v8 = vcombine.high %v209_v3, %v213_v4  ;;  %v269_v59 = vld [vmem:[%s5928_s0 + $0x7f0] sm:$0xff] }
  0xc1   :  { %2231 = vmatmul.mubr.bf16.gmra.mrb[64].mxu1 %v3743_v13  ;;  %v3807_v13 = vcombine.low %v207_v1, %v211_v2  ;;  %v16_v1 = vld [vmem:[%s5928_s0 + $0x8] sm:$0xff] }
  0xc2   :  { %2809 = vmatmul.mubr.bf16.gmra.mrb[64].mxu0 %v3747_v14  ;;  %2238 = vmatprep.mubr.bf16.mxu1 %v3752_v15  ;;  %v3811_v14 = vcombine.low %v209_v3, %v213_v4  ;;  %v3816_v15 = vcombine.high %v215_v9, %v219_v10  ;;  %v20_v2 = vld [vmem:[%s5928_s0 + $0x28] sm:$0xff]  ;;  %v18_v3 = vld [vmem:[%s5928_s0 + $0x18] sm:$0xff] }
  0xc3   :  { %2816 = vmatprep.mubr.bf16.mxu0 %v3756_v16  ;;  %v3820_v16 = vcombine.high %v217_v11, %v221_v12  ;;  %v22_v4 = vld [vmem:[%s5928_s0 + $0x38] sm:$0xff] }
  0xc9   :  { %2239 = vmatmul.mubr.bf16.gmra.mrb[68].mxu1 %v3751_v21  ;;  %v3815_v21 = vcombine.low %v215_v9, %v219_v10  ;;  %v24_v9 = vld [vmem:[%s5928_s0 + $0x48] sm:$0xff] }
  0xca   :  { %2817 = vmatmul.mubr.bf16.gmra.mrb[68].mxu0 %v3755_v22  ;;  %2246 = vmatprep.mubr.bf16.mxu1 %v3760_v23  ;;  %v3819_v22 = vcombine.low %v217_v11, %v221_v12  ;;  %v3824_v23 = vcombine.high %v223_v17, %v227_v18  ;;  %v28_v10 = vld [vmem:[%s5928_s0 + $0x68] sm:$0xff]  ;;  %v26_v11 = vld [vmem:[%s5928_s0 + $0x58] sm:$0xff] }
  0xcb   :  { %2824 = vmatprep.mubr.bf16.mxu0 %v3764_v24  ;;  %v3828_v24 = vcombine.high %v225_v19, %v229_v20  ;;  %v30_v12 = vld [vmem:[%s5928_s0 + $0x78] sm:$0xff] }
  0xd1   :  { %2247 = vmatmul.mubr.bf16.gmra.mrb[72].mxu1 %v3759_v29  ;;  %v3823_v29 = vcombine.low %v223_v17, %v227_v18  ;;  %v32_v17 = vld [vmem:[%s5928_s0 + $0x88] sm:$0xff] }
  0xd2   :  { %2825 = vmatmul.mubr.bf16.gmra.mrb[72].mxu0 %v3763_v30  ;;  %2254 = vmatprep.mubr.bf16.mxu1 %v3768_v31  ;;  %v3827_v30 = vcombine.low %v225_v19, %v229_v20  ;;  %v3832_v31 = vcombine.high %v231_v25, %v235_v26  ;;  %v36_v18 = vld [vmem:[%s5928_s0 + $0xa8] sm:$0xff]  ;;  %v34_v19 = vld [vmem:[%s5928_s0 + $0x98] sm:$0xff] }
  0xd3   :  { %2832 = vmatprep.mubr.bf16.mxu0 %v3772_v32  ;;  %v3836_v32 = vcombine.high %v233_v27, %v237_v28  ;;  %v38_v20 = vld [vmem:[%s5928_s0 + $0xb8] sm:$0xff] }
  0xd9   :  { %2255 = vmatmul.mubr.bf16.gmra.mrb[76].mxu1 %v3767_v37  ;;  %v3831_v37 = vcombine.low %v231_v25, %v235_v26  ;;  %v40_v25 = vld [vmem:[%s5928_s0 + $0xc8] sm:$0xff] }
  0xda   :  { %2833 = vmatmul.mubr.bf16.gmra.mrb[76].mxu0 %v3771_v38  ;;  %2262 = vmatprep.mubr.bf16.mxu1 %v3776_v39  ;;  %v3835_v38 = vcombine.low %v233_v27, %v237_v28  ;;  %v3840_v39 = vcombine.high %v239_v33, %v243_v34  ;;  %v44_v26 = vld [vmem:[%s5928_s0 + $0xe8] sm:$0xff]  ;;  %v42_v27 = vld [vmem:[%s5928_s0 + $0xd8] sm:$0xff] }
  0xdb   :  { %2840 = vmatprep.mubr.bf16.mxu0 %v3780_v40  ;;  %v3844_v40 = vcombine.high %v241_v35, %v245_v36  ;;  %v46_v28 = vld [vmem:[%s5928_s0 + $0xf8] sm:$0xff] }
  0xe1   :  { %2263 = vmatmul.mubr.bf16.gmra.mrb[80].mxu1 %v3775_v45  ;;  %v3839_v45 = vcombine.low %v239_v33, %v243_v34  ;;  %v48_v33 = vld [vmem:[%s5928_s0 + $0x108] sm:$0xff] }
  0xe2   :  { %2841 = vmatmul.mubr.bf16.gmra.mrb[80].mxu0 %v3779_v46  ;;  %2270 = vmatprep.mubr.bf16.mxu1 %v3784_v47  ;;  %v3843_v46 = vcombine.low %v241_v35, %v245_v36  ;;  %v3848_v47 = vcombine.high %v247_v41, %v251_v42  ;;  %v52_v34 = vld [vmem:[%s5928_s0 + $0x128] sm:$0xff]  ;;  %v50_v35 = vld [vmem:[%s5928_s0 + $0x118] sm:$0xff] }
  0xe3   :  { %2848 = vmatprep.mubr.bf16.mxu0 %v3788_v48  ;;  %v3852_v48 = vcombine.high %v249_v43, %v253_v44  ;;  %v54_v36 = vld [vmem:[%s5928_s0 + $0x138] sm:$0xff] }
  0xe9   :  { %2271 = vmatmul.mubr.bf16.gmra.mrb[84].mxu1 %v3783_v53  ;;  %v3847_v53 = vcombine.low %v247_v41, %v251_v42  ;;  %v56_v41 = vld [vmem:[%s5928_s0 + $0x148] sm:$0xff] }
  0xea   :  { %2849 = vmatmul.mubr.bf16.gmra.mrb[84].mxu0 %v3787_v54  ;;  %2278 = vmatprep.mubr.bf16.mxu1 %v3792_v55  ;;  %v3851_v54 = vcombine.low %v249_v43, %v253_v44  ;;  %v3856_v55 = vcombine.high %v255_v49, %v259_v50  ;;  %v60_v42 = vld [vmem:[%s5928_s0 + $0x168] sm:$0xff]  ;;  %v58_v43 = vld [vmem:[%s5928_s0 + $0x158] sm:$0xff] }
  0xeb   :  { %2856 = vmatprep.mubr.bf16.mxu0 %v3796_v56  ;;  %v3860_v56 = vcombine.high %v257_v51, %v261_v52  ;;  %v62_v44 = vld [vmem:[%s5928_s0 + $0x178] sm:$0xff] }
  0xf1   :  { %2279 = vmatmul.mubr.bf16.gmra.mrb[88].mxu1 %v3791_v60  ;;  %v3855_v60 = vcombine.low %v255_v49, %v259_v50  ;;  %v64_v49 = vld [vmem:[%s5928_s0 + $0x188] sm:$0xff] }
  0xf2   :  { %2857 = vmatmul.mubr.bf16.gmra.mrb[88].mxu0 %v3795_v61  ;;  %2286 = vmatprep.mubr.bf16.mxu1 %v3800_v62  ;;  %v3859_v61 = vcombine.low %v257_v51, %v261_v52  ;;  %v3864_v62 = vcombine.high %v263_v57, %v267_v0  ;;  %v68_v50 = vld [vmem:[%s5928_s0 + $0x1a8] sm:$0xff]  ;;  %v66_v51 = vld [vmem:[%s5928_s0 + $0x198] sm:$0xff] }
  0xf3   :  { %2864 = vmatprep.mubr.bf16.mxu0 %v3804_v63  ;;  %v3868_v63 = vcombine.high %v265_v58, %v269_v59  ;;  %v70_v52 = vld [vmem:[%s5928_s0 + $0x1b8] sm:$0xff] }
  0xf9   :  { %2287 = vmatmul.mubr.bf16.gmra.mrb[92].mxu1 %v3799_v5  ;;  %v3863_v5 = vcombine.low %v263_v57, %v267_v0  ;;  %v72_v57 = vld [vmem:[%s5928_s0 + $0x1c8] sm:$0xff] }
  0xfa   :  { %2865 = vmatmul.mubr.bf16.gmra.mrb[92].mxu0 %v3803_v6  ;;  %2294 = vmatprep.mubr.bf16.mxu1 %v3808_v7  ;;  %v3867_v6 = vcombine.low %v265_v58, %v269_v59  ;;  %v3618_v7 = vcombine.high %v16_v1, %v20_v2  ;;  %v76_v0 = vld [vmem:[%s5928_s0 + $0x1e8] sm:$0xff]  ;;  %v74_v58 = vld [vmem:[%s5928_s0 + $0x1d8] sm:$0xff] }
  0xfb   :  { %2872 = vmatprep.mubr.bf16.mxu0 %v3812_v8  ;;  %v3622_v8 = vcombine.high %v18_v3, %v22_v4  ;;  %v78_v59 = vld [vmem:[%s5928_s0 + $0x1f8] sm:$0xff] }
 0x101   :  { %2295 = vmatmul.mubr.bf16.gmra.mrb[96].mxu1 %v3807_v13  ;;  %v3617_v13 = vcombine.low %v16_v1, %v20_v2  ;;  %v80_v1 = vld [vmem:[%s5928_s0 + $0x208] sm:$0xff] }
 0x102   :  { %2873 = vmatmul.mubr.bf16.gmra.mrb[96].mxu0 %v3811_v14  ;;  %2302 = vmatprep.mubr.bf16.mxu1 %v3816_v15  ;;  %v3621_v14 = vcombine.low %v18_v3, %v22_v4  ;;  %v3626_v15 = vcombine.high %v24_v9, %v28_v10  ;;  %v84_v2 = vld [vmem:[%s5928_s0 + $0x228] sm:$0xff]  ;;  %v82_v3 = vld [vmem:[%s5928_s0 + $0x218] sm:$0xff] }
 0x103   :  { %2880 = vmatprep.mubr.bf16.mxu0 %v3820_v16  ;;  %v3630_v16 = vcombine.high %v26_v11, %v30_v12  ;;  %v86_v4 = vld [vmem:[%s5928_s0 + $0x238] sm:$0xff] }
 0x109   :  { %2303 = vmatmul.mubr.bf16.gmra.mrb[100].mxu1 %v3815_v21  ;;  %v3625_v21 = vcombine.low %v24_v9, %v28_v10  ;;  %v88_v9 = vld [vmem:[%s5928_s0 + $0x248] sm:$0xff] }
 0x10a   :  { %2881 = vmatmul.mubr.bf16.gmra.mrb[100].mxu0 %v3819_v22  ;;  %2310 = vmatprep.mubr.bf16.mxu1 %v3824_v23  ;;  %v3629_v22 = vcombine.low %v26_v11, %v30_v12  ;;  %v3634_v23 = vcombine.high %v32_v17, %v36_v18  ;;  %v92_v10 = vld [vmem:[%s5928_s0 + $0x268] sm:$0xff]  ;;  %v90_v11 = vld [vmem:[%s5928_s0 + $0x258] sm:$0xff] }
 0x10b   :  { %2888 = vmatprep.mubr.bf16.mxu0 %v3828_v24  ;;  %v3638_v24 = vcombine.high %v34_v19, %v38_v20  ;;  %v94_v12 = vld [vmem:[%s5928_s0 + $0x278] sm:$0xff] }
 0x111   :  { %2311 = vmatmul.mubr.bf16.gmra.mrb[104].mxu1 %v3823_v29  ;;  %v3633_v29 = vcombine.low %v32_v17, %v36_v18  ;;  %v96_v17 = vld [vmem:[%s5928_s0 + $0x288] sm:$0xff] }
 0x112   :  { %2889 = vmatmul.mubr.bf16.gmra.mrb[104].mxu0 %v3827_v30  ;;  %2318 = vmatprep.mubr.bf16.mxu1 %v3832_v31  ;;  %v3637_v30 = vcombine.low %v34_v19, %v38_v20  ;;  %v3642_v31 = vcombine.high %v40_v25, %v44_v26  ;;  %v100_v18 = vld [vmem:[%s5928_s0 + $0x2a8] sm:$0xff]  ;;  %v98_v19 = vld [vmem:[%s5928_s0 + $0x298] sm:$0xff] }
 0x113   :  { %2896 = vmatprep.mubr.bf16.mxu0 %v3836_v32  ;;  %v3646_v32 = vcombine.high %v42_v27, %v46_v28  ;;  %v102_v20 = vld [vmem:[%s5928_s0 + $0x2b8] sm:$0xff] }
 0x119   :  { %2319 = vmatmul.mubr.bf16.gmra.mrb[108].mxu1 %v3831_v37  ;;  %v3641_v37 = vcombine.low %v40_v25, %v44_v26  ;;  %v104_v25 = vld [vmem:[%s5928_s0 + $0x2c8] sm:$0xff] }
 0x11a   :  { %2897 = vmatmul.mubr.bf16.gmra.mrb[108].mxu0 %v3835_v38  ;;  %2326 = vmatprep.mubr.bf16.mxu1 %v3840_v39  ;;  %v3645_v38 = vcombine.low %v42_v27, %v46_v28  ;;  %v3650_v39 = vcombine.high %v48_v33, %v52_v34  ;;  %v108_v26 = vld [vmem:[%s5928_s0 + $0x2e8] sm:$0xff]  ;;  %v106_v27 = vld [vmem:[%s5928_s0 + $0x2d8] sm:$0xff] }
 0x11b   :  { %2904 = vmatprep.mubr.bf16.mxu0 %v3844_v40  ;;  %v3654_v40 = vcombine.high %v50_v35, %v54_v36  ;;  %v110_v28 = vld [vmem:[%s5928_s0 + $0x2f8] sm:$0xff] }
 0x121   :  { %2327 = vmatmul.mubr.bf16.gmra.mrb[112].mxu1 %v3839_v45  ;;  %v3649_v45 = vcombine.low %v48_v33, %v52_v34  ;;  %v112_v33 = vld [vmem:[%s5928_s0 + $0x308] sm:$0xff] }
 0x122   :  { %2905 = vmatmul.mubr.bf16.gmra.mrb[112].mxu0 %v3843_v46  ;;  %2334 = vmatprep.mubr.bf16.mxu1 %v3848_v47  ;;  %v3653_v46 = vcombine.low %v50_v35, %v54_v36  ;;  %v3658_v47 = vcombine.high %v56_v41, %v60_v42  ;;  %v116_v34 = vld [vmem:[%s5928_s0 + $0x328] sm:$0xff]  ;;  %v114_v35 = vld [vmem:[%s5928_s0 + $0x318] sm:$0xff] }
 0x123   :  { %2912 = vmatprep.mubr.bf16.mxu0 %v3852_v48  ;;  %v3662_v48 = vcombine.high %v58_v43, %v62_v44  ;;  %v118_v36 = vld [vmem:[%s5928_s0 + $0x338] sm:$0xff] }
 0x129   :  { %2335 = vmatmul.mubr.bf16.gmra.mrb[116].mxu1 %v3847_v53  ;;  %v3657_v53 = vcombine.low %v56_v41, %v60_v42  ;;  %v120_v41 = vld [vmem:[%s5928_s0 + $0x348] sm:$0xff] }
 0x12a   :  { %2913 = vmatmul.mubr.bf16.gmra.mrb[116].mxu0 %v3851_v54  ;;  %2342 = vmatprep.mubr.bf16.mxu1 %v3856_v55  ;;  %v3661_v54 = vcombine.low %v58_v43, %v62_v44  ;;  %v3666_v55 = vcombine.high %v64_v49, %v68_v50  ;;  %v124_v42 = vld [vmem:[%s5928_s0 + $0x368] sm:$0xff]  ;;  %v122_v43 = vld [vmem:[%s5928_s0 + $0x358] sm:$0xff] }
 0x12b   :  { %2920 = vmatprep.mubr.bf16.mxu0 %v3860_v56  ;;  %v3670_v56 = vcombine.high %v66_v51, %v70_v52  ;;  %v126_v44 = vld [vmem:[%s5928_s0 + $0x378] sm:$0xff] }
 0x131   :  { %2343 = vmatmul.mubr.bf16.gmra.mrb[120].mxu1 %v3855_v60  ;;  %v3665_v60 = vcombine.low %v64_v49, %v68_v50  ;;  %v128_v49 = vld [vmem:[%s5928_s0 + $0x388] sm:$0xff] }
 0x132   :  { %2921 = vmatmul.mubr.bf16.gmra.mrb[120].mxu0 %v3859_v61  ;;  %2350 = vmatprep.mubr.bf16.mxu1 %v3864_v62  ;;  %v3669_v61 = vcombine.low %v66_v51, %v70_v52  ;;  %v3674_v62 = vcombine.high %v72_v57, %v76_v0  ;;  %v132_v50 = vld [vmem:[%s5928_s0 + $0x3a8] sm:$0xff]  ;;  %v130_v51 = vld [vmem:[%s5928_s0 + $0x398] sm:$0xff] }
 0x133   :  { %2928 = vmatprep.mubr.bf16.mxu0 %v3868_v63  ;;  %v3678_v63 = vcombine.high %v74_v58, %v78_v59  ;;  %v134_v52 = vld [vmem:[%s5928_s0 + $0x3b8] sm:$0xff] }
 0x139   :  { %2351 = vmatmul.mubr.bf16.gmra.mrb[124].mxu1 %v3863_v5  ;;  %v3673_v5 = vcombine.low %v72_v57, %v76_v0  ;;  %v136_v57 = vld [vmem:[%s5928_s0 + $0x3c8] sm:$0xff] }
 0x13a   :  { %2929 = vmatmul.mubr.bf16.gmra.mrb[124].mxu0 %v3867_v6  ;;  %2391 = vmatprep.mubr.bf16.mxu1 %v3618_v7  ;;  %v3677_v6 = vcombine.low %v74_v58, %v78_v59  ;;  %v3682_v7 = vcombine.high %v80_v1, %v84_v2  ;;  %v140_v0 = vld [vmem:[%s5928_s0 + $0x3e8] sm:$0xff]  ;;  %v138_v58 = vld [vmem:[%s5928_s0 + $0x3d8] sm:$0xff] }
 0x13b   :  { %2969 = vmatprep.mubr.bf16.mxu0 %v3622_v8  ;;  %v3686_v8 = vcombine.high %v82_v3, %v86_v4  ;;  %v142_v59 = vld [vmem:[%s5928_s0 + $0x3f8] sm:$0xff] }
 0x141   :  { %2392 = vmatmul.mubr.bf16.vlgmr.msra.gmra.mrb[0].mxu1 %v3617_v13  ;;  %v3681_v13 = vcombine.low %v80_v1, %v84_v2  ;;  %v144_v1 = vld [vmem:[%s5928_s0 + $0x408] sm:$0xff] }
 0x142   :  { %2970 = vmatmul.mubr.bf16.vlgmr.msra.gmra.mrb[0].mxu0 %v3621_v14  ;;  %2399 = vmatprep.mubr.bf16.mxu1 %v3626_v15  ;;  %v3685_v14 = vcombine.low %v82_v3, %v86_v4  ;;  %v3690_v15 = vcombine.high %v88_v9, %v92_v10  ;;  %v148_v2 = vld [vmem:[%s5928_s0 + $0x428] sm:$0xff]  ;;  %v146_v3 = vld [vmem:[%s5928_s0 + $0x418] sm:$0xff] }
 0x143   :  { %2977 = vmatprep.mubr.bf16.mxu0 %v3630_v16  ;;  %v3694_v16 = vcombine.high %v90_v11, %v94_v12  ;;  %v150_v4 = vld [vmem:[%s5928_s0 + $0x438] sm:$0xff] }
 0x149   :  { %2400 = vmatmul.mubr.bf16.gmra.mrb[4].mxu1 %v3625_v21  ;;  %v3689_v21 = vcombine.low %v88_v9, %v92_v10  ;;  %v152_v9 = vld [vmem:[%s5928_s0 + $0x448] sm:$0xff] }
 0x14a   :  { %2978 = vmatmul.mubr.bf16.gmra.mrb[4].mxu0 %v3629_v22  ;;  %2407 = vmatprep.mubr.bf16.mxu1 %v3634_v23  ;;  %v3693_v22 = vcombine.low %v90_v11, %v94_v12  ;;  %v3698_v23 = vcombine.high %v96_v17, %v100_v18  ;;  %v156_v10 = vld [vmem:[%s5928_s0 + $0x468] sm:$0xff]  ;;  %v154_v11 = vld [vmem:[%s5928_s0 + $0x458] sm:$0xff] }
 0x14b   :  { %2985 = vmatprep.mubr.bf16.mxu0 %v3638_v24  ;;  %v3702_v24 = vcombine.high %v98_v19, %v102_v20  ;;  %v158_v12 = vld [vmem:[%s5928_s0 + $0x478] sm:$0xff] }
 0x151   :  { %2408 = vmatmul.mubr.bf16.gmra.mrb[8].mxu1 %v3633_v29  ;;  %v3697_v29 = vcombine.low %v96_v17, %v100_v18  ;;  %v160_v17 = vld [vmem:[%s5928_s0 + $0x488] sm:$0xff] }
 0x152   :  { %2986 = vmatmul.mubr.bf16.gmra.mrb[8].mxu0 %v3637_v30  ;;  %2415 = vmatprep.mubr.bf16.mxu1 %v3642_v31  ;;  %v3701_v30 = vcombine.low %v98_v19, %v102_v20  ;;  %v3706_v31 = vcombine.high %v104_v25, %v108_v26  ;;  %v164_v18 = vld [vmem:[%s5928_s0 + $0x4a8] sm:$0xff]  ;;  %v162_v19 = vld [vmem:[%s5928_s0 + $0x498] sm:$0xff] }
 0x153   :  { %2993 = vmatprep.mubr.bf16.mxu0 %v3646_v32  ;;  %v3710_v32 = vcombine.high %v106_v27, %v110_v28  ;;  %v166_v20 = vld [vmem:[%s5928_s0 + $0x4b8] sm:$0xff] }
 0x159   :  { %2416 = vmatmul.mubr.bf16.gmra.mrb[12].mxu1 %v3641_v37  ;;  %v3705_v37 = vcombine.low %v104_v25, %v108_v26  ;;  %v168_v25 = vld [vmem:[%s5928_s0 + $0x4c8] sm:$0xff] }
 0x15a   :  { %2994 = vmatmul.mubr.bf16.gmra.mrb[12].mxu0 %v3645_v38  ;;  %2423 = vmatprep.mubr.bf16.mxu1 %v3650_v39  ;;  %v3709_v38 = vcombine.low %v106_v27, %v110_v28  ;;  %v3714_v39 = vcombine.high %v112_v33, %v116_v34  ;;  %v172_v26 = vld [vmem:[%s5928_s0 + $0x4e8] sm:$0xff]  ;;  %v170_v27 = vld [vmem:[%s5928_s0 + $0x4d8] sm:$0xff] }
 0x15b   :  { %3001 = vmatprep.mubr.bf16.mxu0 %v3654_v40  ;;  %v3718_v40 = vcombine.high %v114_v35, %v118_v36  ;;  %v174_v28 = vld [vmem:[%s5928_s0 + $0x4f8] sm:$0xff] }
 0x161   :  { %2424 = vmatmul.mubr.bf16.gmra.mrb[16].mxu1 %v3649_v45  ;;  %v3713_v45 = vcombine.low %v112_v33, %v116_v34  ;;  %v176_v33 = vld [vmem:[%s5928_s0 + $0x508] sm:$0xff] }
 0x162   :  { %3002 = vmatmul.mubr.bf16.gmra.mrb[16].mxu0 %v3653_v46  ;;  %2431 = vmatprep.mubr.bf16.mxu1 %v3658_v47  ;;  %v3717_v46 = vcombine.low %v114_v35, %v118_v36  ;;  %v3722_v47 = vcombine.high %v120_v41, %v124_v42  ;;  %v180_v34 = vld [vmem:[%s5928_s0 + $0x528] sm:$0xff]  ;;  %v178_v35 = vld [vmem:[%s5928_s0 + $0x518] sm:$0xff] }
 0x163   :  { %3009 = vmatprep.mubr.bf16.mxu0 %v3662_v48  ;;  %v3726_v48 = vcombine.high %v122_v43, %v126_v44  ;;  %v182_v36 = vld [vmem:[%s5928_s0 + $0x538] sm:$0xff] }
 0x169   :  { %2432 = vmatmul.mubr.bf16.gmra.mrb[20].mxu1 %v3657_v53  ;;  %v3721_v53 = vcombine.low %v120_v41, %v124_v42  ;;  %v184_v41 = vld [vmem:[%s5928_s0 + $0x548] sm:$0xff] }
 0x16a   :  { %3010 = vmatmul.mubr.bf16.gmra.mrb[20].mxu0 %v3661_v54  ;;  %2439 = vmatprep.mubr.bf16.mxu1 %v3666_v55  ;;  %v3725_v54 = vcombine.low %v122_v43, %v126_v44  ;;  %v3730_v55 = vcombine.high %v128_v49, %v132_v50  ;;  %v188_v42 = vld [vmem:[%s5928_s0 + $0x568] sm:$0xff]  ;;  %v186_v43 = vld [vmem:[%s5928_s0 + $0x558] sm:$0xff] }
 0x16b   :  { %3017 = vmatprep.mubr.bf16.mxu0 %v3670_v56  ;;  %v3734_v56 = vcombine.high %v130_v51, %v134_v52  ;;  %v190_v44 = vld [vmem:[%s5928_s0 + $0x578] sm:$0xff] }
 0x171   :  { %2440 = vmatmul.mubr.bf16.gmra.mrb[24].mxu1 %v3665_v60  ;;  %v3729_v60 = vcombine.low %v128_v49, %v132_v50  ;;  %v192_v49 = vld [vmem:[%s5928_s0 + $0x588] sm:$0xff] }
 0x172   :  { %3018 = vmatmul.mubr.bf16.gmra.mrb[24].mxu0 %v3669_v61  ;;  %2447 = vmatprep.mubr.bf16.mxu1 %v3674_v62  ;;  %v3733_v61 = vcombine.low %v130_v51, %v134_v52  ;;  %v3738_v62 = vcombine.high %v136_v57, %v140_v0  ;;  %v196_v50 = vld [vmem:[%s5928_s0 + $0x5a8] sm:$0xff]  ;;  %v194_v51 = vld [vmem:[%s5928_s0 + $0x598] sm:$0xff] }
 0x173   :  { %3025 = vmatprep.mubr.bf16.mxu0 %v3678_v63  ;;  %v3742_v63 = vcombine.high %v138_v58, %v142_v59  ;;  %v198_v52 = vld [vmem:[%s5928_s0 + $0x5b8] sm:$0xff] }
 0x179   :  { %2448 = vmatmul.mubr.bf16.gmra.mrb[28].mxu1 %v3673_v5  ;;  %v3737_v5 = vcombine.low %v136_v57, %v140_v0  ;;  %v200_v57 = vld [vmem:[%s5928_s0 + $0x5c8] sm:$0xff] }
 0x17a   :  { %3026 = vmatmul.mubr.bf16.gmra.mrb[28].mxu0 %v3677_v6  ;;  %2455 = vmatprep.mubr.bf16.mxu1 %v3682_v7  ;;  %v3741_v6 = vcombine.low %v138_v58, %v142_v59  ;;  %v3746_v7 = vcombine.high %v144_v1, %v148_v2  ;;  %v204_v0 = vld [vmem:[%s5928_s0 + $0x5e8] sm:$0xff]  ;;  %v202_v58 = vld [vmem:[%s5928_s0 + $0x5d8] sm:$0xff] }
 0x17b   :  { %3033 = vmatprep.mubr.bf16.mxu0 %v3686_v8  ;;  %v3750_v8 = vcombine.high %v146_v3, %v150_v4  ;;  %v206_v59 = vld [vmem:[%s5928_s0 + $0x5f8] sm:$0xff] }
 0x181   :  { %2456 = vmatmul.mubr.bf16.gmra.mrb[32].mxu1 %v3681_v13  ;;  %v3745_v13 = vcombine.low %v144_v1, %v148_v2  ;;  %v208_v1 = vld [vmem:[%s5928_s0 + $0x608] sm:$0xff] }
 0x182   :  { %3034 = vmatmul.mubr.bf16.gmra.mrb[32].mxu0 %v3685_v14  ;;  %2463 = vmatprep.mubr.bf16.mxu1 %v3690_v15  ;;  %v3749_v14 = vcombine.low %v146_v3, %v150_v4  ;;  %v3754_v15 = vcombine.high %v152_v9, %v156_v10  ;;  %v212_v2 = vld [vmem:[%s5928_s0 + $0x628] sm:$0xff]  ;;  %v210_v3 = vld [vmem:[%s5928_s0 + $0x618] sm:$0xff] }
 0x183   :  { %3041 = vmatprep.mubr.bf16.mxu0 %v3694_v16  ;;  %v3758_v16 = vcombine.high %v154_v11, %v158_v12  ;;  %v214_v4 = vld [vmem:[%s5928_s0 + $0x638] sm:$0xff] }
 0x189   :  { %2464 = vmatmul.mubr.bf16.gmra.mrb[36].mxu1 %v3689_v21  ;;  %v3753_v21 = vcombine.low %v152_v9, %v156_v10  ;;  %v216_v9 = vld [vmem:[%s5928_s0 + $0x648] sm:$0xff] }
 0x18a   :  { %3042 = vmatmul.mubr.bf16.gmra.mrb[36].mxu0 %v3693_v22  ;;  %2471 = vmatprep.mubr.bf16.mxu1 %v3698_v23  ;;  %v3757_v22 = vcombine.low %v154_v11, %v158_v12  ;;  %v3762_v23 = vcombine.high %v160_v17, %v164_v18  ;;  %v220_v10 = vld [vmem:[%s5928_s0 + $0x668] sm:$0xff]  ;;  %v218_v11 = vld [vmem:[%s5928_s0 + $0x658] sm:$0xff] }
 0x18b   :  { %3049 = vmatprep.mubr.bf16.mxu0 %v3702_v24  ;;  %v3766_v24 = vcombine.high %v162_v19, %v166_v20  ;;  %v222_v12 = vld [vmem:[%s5928_s0 + $0x678] sm:$0xff] }
 0x191   :  { %2472 = vmatmul.mubr.bf16.gmra.mrb[40].mxu1 %v3697_v29  ;;  %v3761_v29 = vcombine.low %v160_v17, %v164_v18  ;;  %v224_v17 = vld [vmem:[%s5928_s0 + $0x688] sm:$0xff] }
 0x192   :  { %3050 = vmatmul.mubr.bf16.gmra.mrb[40].mxu0 %v3701_v30  ;;  %2479 = vmatprep.mubr.bf16.mxu1 %v3706_v31  ;;  %v3765_v30 = vcombine.low %v162_v19, %v166_v20  ;;  %v3770_v31 = vcombine.high %v168_v25, %v172_v26  ;;  %v228_v18 = vld [vmem:[%s5928_s0 + $0x6a8] sm:$0xff]  ;;  %v226_v19 = vld [vmem:[%s5928_s0 + $0x698] sm:$0xff] }
 0x193   :  { %3057 = vmatprep.mubr.bf16.mxu0 %v3710_v32  ;;  %v3774_v32 = vcombine.high %v170_v27, %v174_v28  ;;  %v230_v20 = vld [vmem:[%s5928_s0 + $0x6b8] sm:$0xff] }
 0x199   :  { %2480 = vmatmul.mubr.bf16.gmra.mrb[44].mxu1 %v3705_v37  ;;  %v3769_v37 = vcombine.low %v168_v25, %v172_v26  ;;  %v232_v25 = vld [vmem:[%s5928_s0 + $0x6c8] sm:$0xff] }
 0x19a   :  { %3058 = vmatmul.mubr.bf16.gmra.mrb[44].mxu0 %v3709_v38  ;;  %2487 = vmatprep.mubr.bf16.mxu1 %v3714_v39  ;;  %v3773_v38 = vcombine.low %v170_v27, %v174_v28  ;;  %v3778_v39 = vcombine.high %v176_v33, %v180_v34  ;;  %v236_v26 = vld [vmem:[%s5928_s0 + $0x6e8] sm:$0xff]  ;;  %v234_v27 = vld [vmem:[%s5928_s0 + $0x6d8] sm:$0xff] }
 0x19b   :  { %3065 = vmatprep.mubr.bf16.mxu0 %v3718_v40  ;;  %v3782_v40 = vcombine.high %v178_v35, %v182_v36  ;;  %v238_v28 = vld [vmem:[%s5928_s0 + $0x6f8] sm:$0xff] }
 0x1a1   :  { %2488 = vmatmul.mubr.bf16.gmra.mrb[48].mxu1 %v3713_v45  ;;  %v3777_v45 = vcombine.low %v176_v33, %v180_v34  ;;  %v5720_v33 = vld [vmem:[%s5929_s2] ss:$0 sm:$0xff]  ;;  %v240_v34 = vld [vmem:[%s5928_s0 + $0x708] sm:$0xff] }
 0x1a2   :  { %3066 = vmatmul.mubr.bf16.gmra.mrb[48].mxu0 %v3717_v46  ;;  %2495 = vmatprep.mubr.bf16.mxu1 %v3722_v47  ;;  %v3781_v46 = vcombine.low %v178_v35, %v182_v36  ;;  %v3786_v47 = vcombine.high %v184_v41, %v188_v42  ;;  %v244_v35 = vld [vmem:[%s5928_s0 + $0x728] sm:$0xff] }
 0x1a3   :  { %3073 = vmatprep.mubr.bf16.mxu0 %v3726_v48  ;;  %v3790_v48 = vcombine.high %v186_v43, %v190_v44 }
 0x1a9   :  { %2496 = vmatmul.mubr.bf16.gmra.mrb[52].mxu1 %v3721_v53  ;;  %v3785_v53 = vcombine.low %v184_v41, %v188_v42  ;;  %v3833_v42 = vcombine.low %v232_v25, %v236_v26 }
 0x1aa   :  { %3074 = vmatmul.mubr.bf16.gmra.mrb[52].mxu0 %v3725_v54  ;;  %2503 = vmatprep.mubr.bf16.mxu1 %v3730_v55  ;;  %v3789_v54 = vcombine.low %v186_v43, %v190_v44  ;;  %v3794_v55 = vcombine.high %v192_v49, %v196_v50 }
 0x1ab   :  { %3081 = vmatprep.mubr.bf16.mxu0 %v3734_v56  ;;  %v3798_v56 = vcombine.high %v194_v51, %v198_v52 }
 0x1b1   :  { %2504 = vmatmul.mubr.bf16.gmra.mrb[56].mxu1 %v3729_v60  ;;  %v3793_v60 = vcombine.low %v192_v49, %v196_v50 }
 0x1b2   :  { %3082 = vmatmul.mubr.bf16.gmra.mrb[56].mxu0 %v3733_v61  ;;  %2511 = vmatprep.mubr.bf16.mxu1 %v3738_v62  ;;  %v3797_v61 = vcombine.low %v194_v51, %v198_v52  ;;  %v3802_v62 = vcombine.high %v200_v57, %v204_v0 }
 0x1b3   :  { %3089 = vmatprep.mubr.bf16.mxu0 %v3742_v63  ;;  %v3806_v63 = vcombine.high %v202_v58, %v206_v59 }
 0x1b9   :  { %2512 = vmatmul.mubr.bf16.gmra.mrb[60].mxu1 %v3737_v5  ;;  %v3801_v5 = vcombine.low %v200_v57, %v204_v0  ;;  %v252_v57 = vld [vmem:[%s5928_s0 + $0x768] sm:$0xff] }
 0x1ba   :  { %3090 = vmatmul.mubr.bf16.gmra.mrb[60].mxu0 %v3741_v6  ;;  %2519 = vmatprep.mubr.bf16.mxu1 %v3746_v7  ;;  %v3805_v6 = vcombine.low %v202_v58, %v206_v59  ;;  %v3810_v7 = vcombine.high %v208_v1, %v212_v2  ;;  %v250_v58 = vld [vmem:[%s5928_s0 + $0x758] sm:$0xff] }
 0x1bb   :  { %3097 = vmatprep.mubr.bf16.mxu0 %v3750_v8  ;;  %v3814_v8 = vcombine.high %v210_v3, %v214_v4  ;;  %v254_v59 = vld [vmem:[%s5928_s0 + $0x778] sm:$0xff] }
 0x1c1   :  { %2520 = vmatmul.mubr.bf16.gmra.mrb[64].mxu1 %v3745_v13  ;;  %v3809_v13 = vcombine.low %v208_v1, %v212_v2  ;;  %v3841_v1 = vcombine.low %v240_v34, %v244_v35 }
 0x1c2   :  { %3098 = vmatmul.mubr.bf16.gmra.mrb[64].mxu0 %v3749_v14  ;;  %2527 = vmatprep.mubr.bf16.mxu1 %v3754_v15  ;;  %v3813_v14 = vcombine.low %v210_v3, %v214_v4  ;;  %v3818_v15 = vcombine.high %v216_v9, %v220_v10 }
 0x1c3   :  { %3105 = vmatprep.mubr.bf16.mxu0 %v3758_v16  ;;  %v3822_v16 = vcombine.high %v218_v11, %v222_v12 }
 0x1c9   :  { %2528 = vmatmul.mubr.bf16.gmra.mrb[68].mxu1 %v3753_v21  ;;  %v3817_v21 = vcombine.low %v216_v9, %v220_v10  ;;  %v3854_v10 = vcombine.high %v250_v58, %v254_v59 }
 0x1ca   :  { %3106 = vmatmul.mubr.bf16.gmra.mrb[68].mxu0 %v3757_v22  ;;  %2535 = vmatprep.mubr.bf16.mxu1 %v3762_v23  ;;  %v3821_v22 = vcombine.low %v218_v11, %v222_v12  ;;  %v3826_v23 = vcombine.high %v224_v17, %v228_v18 }
 0x1cb   :  { %3113 = vmatprep.mubr.bf16.mxu0 %v3766_v24  ;;  %v3830_v24 = vcombine.high %v226_v19, %v230_v20 }
 0x1d1   :  { %2536 = vmatmul.mubr.bf16.gmra.mrb[72].mxu1 %v3761_v29  ;;  %v3825_v29 = vcombine.low %v224_v17, %v228_v18  ;;  %v258_v18 = vld [vmem:[%s5928_s0 + $0x798] sm:$0xff] }
 0x1d2   :  { %3114 = vmatmul.mubr.bf16.gmra.mrb[72].mxu0 %v3765_v30  ;;  %2543 = vmatprep.mubr.bf16.mxu1 %v3770_v31  ;;  %v3829_v30 = vcombine.low %v226_v19, %v230_v20  ;;  %v3834_v31 = vcombine.high %v232_v25, %v236_v26  ;;  %v262_v19 = vld [vmem:[%s5928_s0 + $0x7b8] sm:$0xff] }
 0x1d3   :  { %3121 = vmatprep.mubr.bf16.mxu0 %v3774_v32  ;;  %v3838_v32 = vcombine.high %v234_v27, %v238_v28 }
 0x1d9   :  { %2544 = vmatmul.mubr.bf16.gmra.mrb[76].mxu1 %v3769_v37  ;;  %v242_v37 = vld [vmem:[%s5928_s0 + $0x718] sm:$0xff] }
 0x1da   :  { %3122 = vmatmul.mubr.bf16.gmra.mrb[76].mxu0 %v3773_v38  ;;  %2551 = vmatprep.mubr.bf16.mxu1 %v3778_v39  ;;  %v246_v38 = vld [vmem:[%s5928_s0 + $0x738] sm:$0xff] }
 0x1db   :  { %3129 = vmatprep.mubr.bf16.mxu0 %v3782_v40  ;;  %v3846_v51 = vcombine.high %v242_v37, %v246_v38  ;;  %v3845_v4 = vcombine.low %v242_v37, %v246_v38 }
 0x1e1   :  { %2552 = vmatmul.mubr.bf16.gmra.mrb[80].mxu1 %v3777_v45  ;;  %v3837_v45 = vcombine.low %v234_v27, %v238_v28  ;;  %v3853_v27 = vcombine.low %v250_v58, %v254_v59 }
 0x1e2   :  { %3130 = vmatmul.mubr.bf16.gmra.mrb[80].mxu0 %v3781_v46  ;;  %2559 = vmatprep.mubr.bf16.mxu1 %v3786_v47  ;;  %v3842_v46 = vcombine.high %v240_v34, %v244_v35  ;;  %v3862_v34 = vcombine.high %v258_v18, %v262_v19 }
 0x1e3   :  { %3137 = vmatprep.mubr.bf16.mxu0 %v3790_v48 }
 0x1e9   :  { %2560 = vmatmul.mubr.bf16.gmra.mrb[84].mxu1 %v3785_v53 }
 0x1ea   :  { %3138 = vmatmul.mubr.bf16.gmra.mrb[84].mxu0 %v3789_v54  ;;  %2567 = vmatprep.mubr.bf16.mxu1 %v3794_v55 }
 0x1eb   :  { %3145 = vmatprep.mubr.bf16.mxu0 %v3798_v56  ;;  %v248_v56 = vld [vmem:[%s5928_s0 + $0x748] sm:$0xff] }
 0x1f1   :  { %2568 = vmatmul.mubr.bf16.gmra.mrb[88].mxu1 %v3793_v60 }
 0x1f2   :  { %3146 = vmatmul.mubr.bf16.gmra.mrb[88].mxu0 %v3797_v61  ;;  %2575 = vmatprep.mubr.bf16.mxu1 %v3802_v62 }
 0x1f3   :  { %3153 = vmatprep.mubr.bf16.mxu0 %v3806_v63 }
 0x1f9   :  { %2576 = vmatmul.mubr.bf16.gmra.mrb[92].mxu1 %v3801_v5  ;;  %v3850_v5 = vcombine.high %v248_v56, %v252_v57 }
 0x1fa   :  { %3154 = vmatmul.mubr.bf16.gmra.mrb[92].mxu0 %v3805_v6  ;;  %2583 = vmatprep.mubr.bf16.mxu1 %v3810_v7 }
 0x1fb   :  { %3161 = vmatprep.mubr.bf16.mxu0 %v3814_v8 }
 0x201   :  { %2584 = vmatmul.mubr.bf16.gmra.mrb[96].mxu1 %v3809_v13 }
 0x202   :  { %3162 = vmatmul.mubr.bf16.gmra.mrb[96].mxu0 %v3813_v14  ;;  %2591 = vmatprep.mubr.bf16.mxu1 %v3818_v15  ;;  %v256_v15 = vld [vmem:[%s5928_s0 + $0x788] sm:$0xff] }
 0x203   :  { %3169 = vmatprep.mubr.bf16.mxu0 %v3822_v16  ;;  %v260_v16 = vld [vmem:[%s5928_s0 + $0x7a8] sm:$0xff] }
 0x204   :  { %v3858_v28 = vcombine.high %v256_v15, %v260_v16 }
 0x209   :  { %2592 = vmatmul.mubr.bf16.gmra.mrb[100].mxu1 %v3817_v21 }
 0x20a   :  { %3170 = vmatmul.mubr.bf16.gmra.mrb[100].mxu0 %v3821_v22  ;;  %2599 = vmatprep.mubr.bf16.mxu1 %v3826_v23 }
 0x20b   :  { %3177 = vmatprep.mubr.bf16.mxu0 %v3830_v24  ;;  %v3849_v24 = vcombine.low %v248_v56, %v252_v57 }
 0x211   :  { %2600 = vmatmul.mubr.bf16.gmra.mrb[104].mxu1 %v3825_v29 }
 0x212   :  { %3178 = vmatmul.mubr.bf16.gmra.mrb[104].mxu0 %v3829_v30  ;;  %2607 = vmatprep.mubr.bf16.mxu1 %v3834_v31 }
 0x213   :  { %3185 = vmatprep.mubr.bf16.mxu0 %v3838_v32 }
 0x214   :  { %v2393_v36 = vpop.f32.mrb[0].mxu1 }
 0x215   :  { %v4254_v39 = vadd.f32 %v5720_v33, %v2393_v36  ;;  %v2971_v40 = vpop.f32.mrb[0].mxu0  ;;  %v2395_v41 = vpop.f32.mrb[1].mxu1 }
 0x216   :  { %v2973_v43 = vpop.f32.mrb[1].mxu0  ;;  %v2396_v44 = vpop.f32.mrb[2].mxu1 }
 0x217   :  { %v4255_v47 = vadd.f32 %v4254_v39, %v2971_v40  ;;  %v4256_v48 = vadd.f32 %v5720_v33, %v2396_v44  ;;  %v2974_v49 = vpop.f32.mrb[2].mxu0  ;;  %v2398_v50 = vpop.f32.mrb[3].mxu1  ;;  %v264_v39 = vld [vmem:[%s5928_s0 + $0x7c8] sm:$0xff]  ;;  %v270_v43 = vld [vmem:[%s5928_s0 + $0x7f8] sm:$0xff] }
 0x218   :  { %v2976_v52 = vpop.f32.mrb[3].mxu0  ;;  %v268_v40 = vld [vmem:[%s5928_s0 + $0x7e8] sm:$0xff] }
 0x219   :  { %v4257_v53 = vadd.f32 %v4256_v48, %v2974_v49  ;;  %2608 = vmatmul.mubr.bf16.gmra.mrb[108].mxu1 %v3833_v42  ;;  %v3226_v54 = vmax.f32 %v4255_v47, 0.0  ;;  %v266_v42 = vld [vmem:[%s5928_s0 + $0x7d8] sm:$0xff]  ;;  %v3857_v48 = vcombine.low %v256_v15, %v260_v16  ;;  %v3866_v52 = vcombine.high %v264_v39, %v268_v40 }
 0x21a   :  { %3186 = vmatmul.mubr.bf16.gmra.mrb[108].mxu0 %v3837_v45  ;;  %2615 = vmatprep.mubr.bf16.mxu1 %v3842_v46  ;;  %v3870_v57 = vcombine.high %v266_v42, %v270_v43 }
 0x21b   :  { %v3227_v55 = vmax.f32 %v4257_v53, 0.0  ;;  %3193 = vmatprep.mubr.bf16.mxu0 %v3846_v51  ;;  %v3861_v51 = vcombine.low %v258_v18, %v262_v19 }
 0x21c   :  { %v2401_v0 = vpop.f32.mrb[4].mxu1 }
 0x21d   :  { %v4066_v60 = vpack.c.bf16 %v3227_v55, %v3226_v54  ;;  %v4258_v61 = vadd.f32 %v5720_v33, %v2401_v0  ;;  %v2979_v62 = vpop.f32.mrb[4].mxu0  ;;  %v2403_v63 = vpop.f32.mrb[5].mxu1 }
 0x21e   :  { %v2981_v2 = vpop.f32.mrb[5].mxu0  ;;  %v2404_v3 = vpop.f32.mrb[6].mxu1 }
 0x21f   :  { %4067 = vst [vmem:[%s5930_s3] sm:$0xff] %v4066_v60   ;;  %v4259_v6 = vadd.f32 %v4258_v61, %v2979_v62  ;;  %v4260_v7 = vadd.f32 %v5720_v33, %v2404_v3  ;;  %v2982_v8 = vpop.f32.mrb[6].mxu0  ;;  %v2406_v9 = vpop.f32.mrb[7].mxu1  ;;  %v3865_v3 = vcombine.low %v264_v39, %v268_v40 }
 0x220   :  { %v2984_v11 = vpop.f32.mrb[7].mxu0 }
 0x221   :  { %v4261_v12 = vadd.f32 %v4260_v7, %v2982_v8  ;;  %2616 = vmatmul.mubr.bf16.gmra.mrb[112].mxu1 %v3841_v1  ;;  %v3228_v13 = vmax.f32 %v4259_v6, 0.0  ;;  %v3869_v6 = vcombine.low %v266_v42, %v270_v43 }
 0x222   :  { %3194 = vmatmul.mubr.bf16.gmra.mrb[112].mxu0 %v3845_v4  ;;  %2623 = vmatprep.mubr.bf16.mxu1 %v3850_v5 }
 0x223   :  { %v3229_v14 = vmax.f32 %v4261_v12, 0.0  ;;  %3201 = vmatprep.mubr.bf16.mxu0 %v3854_v10 }
 0x224   :  { %v2409_v17 = vpop.f32.mrb[8].mxu1 }
 0x225   :  { %v4071_v20 = vpack.c.bf16 %v3229_v14, %v3228_v13  ;;  %v4262_v21 = vadd.f32 %v5720_v33, %v2409_v17  ;;  %v2987_v22 = vpop.f32.mrb[8].mxu0  ;;  %v2411_v23 = vpop.f32.mrb[9].mxu1 }
 0x226   :  { %v2989_v25 = vpop.f32.mrb[9].mxu0  ;;  %v2412_v26 = vpop.f32.mrb[10].mxu1 }
 0x227   :  { %4223 = vst [vmem:[%s5930_s3 + $0x8] sm:$0xff] %v4071_v20   ;;  %v4263_v29 = vadd.f32 %v4262_v21, %v2987_v22  ;;  %v4264_v30 = vadd.f32 %v5720_v33, %v2412_v26  ;;  %v2990_v31 = vpop.f32.mrb[10].mxu0  ;;  %v2414_v32 = vpop.f32.mrb[11].mxu1 }
 0x228   :  { %v2992_v35 = vpop.f32.mrb[11].mxu0 }
 0x229   :  { %v4265_v36 = vadd.f32 %v4264_v30, %v2990_v31  ;;  %2624 = vmatmul.mubr.bf16.gmra.mrb[116].mxu1 %v3849_v24  ;;  %v3230_v37 = vmax.f32 %v4263_v29, 0.0 }
 0x22a   :  { %3202 = vmatmul.mubr.bf16.gmra.mrb[116].mxu0 %v3853_v27  ;;  %2631 = vmatprep.mubr.bf16.mxu1 %v3858_v28 }
 0x22b   :  { %v3231_v38 = vmax.f32 %v4265_v36, 0.0  ;;  %3209 = vmatprep.mubr.bf16.mxu0 %v3862_v34 }
 0x22c   :  { %v2417_v41 = vpop.f32.mrb[12].mxu1 }
 0x22d   :  { %v4076_v44 = vpack.c.bf16 %v3231_v38, %v3230_v37  ;;  %v4266_v45 = vadd.f32 %v5720_v33, %v2417_v41  ;;  %v2995_v46 = vpop.f32.mrb[12].mxu0  ;;  %v2419_v47 = vpop.f32.mrb[13].mxu1 }
 0x22e   :  { %v2997_v49 = vpop.f32.mrb[13].mxu0  ;;  %v2420_v50 = vpop.f32.mrb[14].mxu1 }
 0x22f   :  { %4224 = vst [vmem:[%s5930_s3 + $0x10] sm:$0xff] %v4076_v44   ;;  %v4267_v53 = vadd.f32 %v4266_v45, %v2995_v46  ;;  %v4268_v54 = vadd.f32 %v5720_v33, %v2420_v50  ;;  %v2998_v55 = vpop.f32.mrb[14].mxu0  ;;  %v2422_v56 = vpop.f32.mrb[15].mxu1 }
 0x230   :  { %v3000_v0 = vpop.f32.mrb[15].mxu0 }
 0x231   :  { %v4269_v58 = vadd.f32 %v4268_v54, %v2998_v55  ;;  %2632 = vmatmul.mubr.bf16.gmra.mrb[120].mxu1 %v3857_v48  ;;  %v3232_v59 = vmax.f32 %v4267_v53, 0.0 }
 0x232   :  { %3210 = vmatmul.mubr.bf16.gmra.mrb[120].mxu0 %v3861_v51  ;;  %2639 = vmatprep.mubr.bf16.mxu1 %v3866_v52 }
 0x233   :  { %v3233_v60 = vmax.f32 %v4269_v58, 0.0  ;;  %3217 = vmatprep.mubr.bf16.mxu0 %v3870_v57 }
 0x234   :  { %v2425_v61 = vpop.f32.mrb[16].mxu1 }
 0x235   :  { %v4081_v62 = vpack.c.bf16 %v3233_v60, %v3232_v59  ;;  %v4270_v63 = vadd.f32 %v5720_v33, %v2425_v61  ;;  %v3003_v1 = vpop.f32.mrb[16].mxu0  ;;  %v2427_v2 = vpop.f32.mrb[17].mxu1 }
 0x236   :  { %v3005_v4 = vpop.f32.mrb[17].mxu0  ;;  %v2428_v5 = vpop.f32.mrb[18].mxu1 }
 0x237   :  { %4225 = vst [vmem:[%s5930_s3 + $0x18] sm:$0xff] %v4081_v62   ;;  %v4271_v7 = vadd.f32 %v4270_v63, %v3003_v1  ;;  %v4272_v8 = vadd.f32 %v5720_v33, %v2428_v5  ;;  %v3006_v9 = vpop.f32.mrb[18].mxu0  ;;  %v2430_v10 = vpop.f32.mrb[19].mxu1 }
 0x238   :  { %v3008_v11 = vpop.f32.mrb[19].mxu0 }
 0x239   :  { %v4273_v12 = vadd.f32 %v4272_v8, %v3006_v9  ;;  %2640 = vmatmul.mubr.bf16.gmra.mrb[124].mxu1 %v3865_v3  ;;  %v3234_v13 = vmax.f32 %v4271_v7, 0.0 }
 0x23a   :  { %3218 = vmatmul.mubr.bf16.gmra.mrb[124].mxu0 %v3869_v6 }
 0x23b   :  { %v3235_v14 = vmax.f32 %v4273_v12, 0.0 }
 0x23c   :  { %v2433_v15 = vpop.f32.mrb[20].mxu1 }
 0x23d   :  { %v4086_v16 = vpack.c.bf16 %v3235_v14, %v3234_v13  ;;  %v4274_v17 = vadd.f32 %v5720_v33, %v2433_v15  ;;  %v3011_v18 = vpop.f32.mrb[20].mxu0  ;;  %v2435_v19 = vpop.f32.mrb[21].mxu1 }
 0x23e   :  { %v3013_v20 = vpop.f32.mrb[21].mxu0  ;;  %v2436_v21 = vpop.f32.mrb[22].mxu1 }
 0x23f   :  { %4226 = vst [vmem:[%s5930_s3 + $0x20] sm:$0xff] %v4086_v16   ;;  %v4275_v22 = vadd.f32 %v4274_v17, %v3011_v18  ;;  %v4276_v23 = vadd.f32 %v5720_v33, %v2436_v21  ;;  %v3014_v24 = vpop.f32.mrb[22].mxu0  ;;  %v2438_v25 = vpop.f32.mrb[23].mxu1 }
 0x240   :  { %v3016_v26 = vpop.f32.mrb[23].mxu0 }
 0x241   :  { %v4277_v27 = vadd.f32 %v4276_v23, %v3014_v24  ;;  %v3236_v28 = vmax.f32 %v4275_v22, 0.0 }
 0x243   :  { %v3237_v29 = vmax.f32 %v4277_v27, 0.0 }
 0x244   :  { %v2441_v30 = vpop.f32.mrb[24].mxu1 }
 0x245   :  { %v4091_v31 = vpack.c.bf16 %v3237_v29, %v3236_v28  ;;  %v4278_v32 = vadd.f32 %v5720_v33, %v2441_v30  ;;  %v3019_v34 = vpop.f32.mrb[24].mxu0  ;;  %v2443_v35 = vpop.f32.mrb[25].mxu1 }
 0x246   :  { %v3021_v36 = vpop.f32.mrb[25].mxu0  ;;  %v2444_v37 = vpop.f32.mrb[26].mxu1 }
 0x247   :  { %4227 = vst [vmem:[%s5930_s3 + $0x28] sm:$0xff] %v4091_v31   ;;  %v4279_v38 = vadd.f32 %v4278_v32, %v3019_v34  ;;  %v4280_v39 = vadd.f32 %v5720_v33, %v2444_v37  ;;  %v3022_v40 = vpop.f32.mrb[26].mxu0  ;;  %v2446_v41 = vpop.f32.mrb[27].mxu1 }
 0x248   :  { %v3024_v42 = vpop.f32.mrb[27].mxu0 }
 0x249   :  { %v4281_v43 = vadd.f32 %v4280_v39, %v3022_v40  ;;  %v3238_v44 = vmax.f32 %v4279_v38, 0.0 }
 0x24b   :  { %v3239_v45 = vmax.f32 %v4281_v43, 0.0 }
 0x24c   :  { %v2449_v46 = vpop.f32.mrb[28].mxu1 }
 0x24d   :  { %v4096_v47 = vpack.c.bf16 %v3239_v45, %v3238_v44  ;;  %v4282_v48 = vadd.f32 %v5720_v33, %v2449_v46  ;;  %v3027_v49 = vpop.f32.mrb[28].mxu0  ;;  %v2451_v50 = vpop.f32.mrb[29].mxu1 }
 0x24e   :  { %v3029_v51 = vpop.f32.mrb[29].mxu0  ;;  %v2452_v52 = vpop.f32.mrb[30].mxu1 }
 0x24f   :  { %4228 = vst [vmem:[%s5930_s3 + $0x30] sm:$0xff] %v4096_v47   ;;  %v4283_v53 = vadd.f32 %v4282_v48, %v3027_v49  ;;  %v4284_v54 = vadd.f32 %v5720_v33, %v2452_v52  ;;  %v3030_v55 = vpop.f32.mrb[30].mxu0  ;;  %v2454_v56 = vpop.f32.mrb[31].mxu1 }
 0x250   :  { %v3032_v57 = vpop.f32.mrb[31].mxu0 }
 0x251   :  { %v4285_v0 = vadd.f32 %v4284_v54, %v3030_v55  ;;  %v3240_v58 = vmax.f32 %v4283_v53, 0.0 }
 0x253   :  { %v3241_v59 = vmax.f32 %v4285_v0, 0.0 }
 0x254   :  { %v2457_v60 = vpop.f32.mrb[32].mxu1 }
 0x255   :  { %v4101_v61 = vpack.c.bf16 %v3241_v59, %v3240_v58  ;;  %v4286_v62 = vadd.f32 %v5720_v33, %v2457_v60  ;;  %v3035_v63 = vpop.f32.mrb[32].mxu0  ;;  %v2459_v1 = vpop.f32.mrb[33].mxu1 }
 0x256   :  { %v3037_v2 = vpop.f32.mrb[33].mxu0  ;;  %v2460_v3 = vpop.f32.mrb[34].mxu1 }
 0x257   :  { %4229 = vst [vmem:[%s5930_s3 + $0x38] sm:$0xff] %v4101_v61   ;;  %v4287_v4 = vadd.f32 %v4286_v62, %v3035_v63  ;;  %v4288_v5 = vadd.f32 %v5720_v33, %v2460_v3  ;;  %v3038_v6 = vpop.f32.mrb[34].mxu0  ;;  %v2462_v7 = vpop.f32.mrb[35].mxu1 }
 0x258   :  { %v3040_v8 = vpop.f32.mrb[35].mxu0 }
 0x259   :  { %v4289_v9 = vadd.f32 %v4288_v5, %v3038_v6  ;;  %v3242_v10 = vmax.f32 %v4287_v4, 0.0 }
 0x25b   :  { %v3243_v11 = vmax.f32 %v4289_v9, 0.0 }
 0x25c   :  { %v2465_v12 = vpop.f32.mrb[36].mxu1 }
 0x25d   :  { %v4106_v13 = vpack.c.bf16 %v3243_v11, %v3242_v10  ;;  %v4290_v14 = vadd.f32 %v5720_v33, %v2465_v12  ;;  %v3043_v15 = vpop.f32.mrb[36].mxu0  ;;  %v2467_v16 = vpop.f32.mrb[37].mxu1 }
 0x25e   :  { %v3045_v17 = vpop.f32.mrb[37].mxu0  ;;  %v2468_v18 = vpop.f32.mrb[38].mxu1 }
 0x25f   :  { %4230 = vst [vmem:[%s5930_s3 + $0x40] sm:$0xff] %v4106_v13   ;;  %v4291_v19 = vadd.f32 %v4290_v14, %v3043_v15  ;;  %v4292_v20 = vadd.f32 %v5720_v33, %v2468_v18  ;;  %v3046_v21 = vpop.f32.mrb[38].mxu0  ;;  %v2470_v22 = vpop.f32.mrb[39].mxu1 }
 0x260   :  { %v3048_v23 = vpop.f32.mrb[39].mxu0 }
 0x261   :  { %v4293_v24 = vadd.f32 %v4292_v20, %v3046_v21  ;;  %v3244_v25 = vmax.f32 %v4291_v19, 0.0 }
 0x263   :  { %v3245_v26 = vmax.f32 %v4293_v24, 0.0 }
 0x264   :  { %v2473_v27 = vpop.f32.mrb[40].mxu1 }
 0x265   :  { %v4111_v28 = vpack.c.bf16 %v3245_v26, %v3244_v25  ;;  %v4294_v29 = vadd.f32 %v5720_v33, %v2473_v27  ;;  %v3051_v30 = vpop.f32.mrb[40].mxu0  ;;  %v2475_v31 = vpop.f32.mrb[41].mxu1 }
 0x266   :  { %v3053_v32 = vpop.f32.mrb[41].mxu0  ;;  %v2476_v34 = vpop.f32.mrb[42].mxu1 }
 0x267   :  { %4231 = vst [vmem:[%s5930_s3 + $0x48] sm:$0xff] %v4111_v28   ;;  %v4295_v35 = vadd.f32 %v4294_v29, %v3051_v30  ;;  %v4296_v36 = vadd.f32 %v5720_v33, %v2476_v34  ;;  %v3054_v37 = vpop.f32.mrb[42].mxu0  ;;  %v2478_v38 = vpop.f32.mrb[43].mxu1 }
 0x268   :  { %v3056_v39 = vpop.f32.mrb[43].mxu0 }
 0x269   :  { %v4297_v40 = vadd.f32 %v4296_v36, %v3054_v37  ;;  %v3246_v41 = vmax.f32 %v4295_v35, 0.0 }
 0x26b   :  { %v3247_v42 = vmax.f32 %v4297_v40, 0.0 }
 0x26c   :  { %v2481_v43 = vpop.f32.mrb[44].mxu1 }
 0x26d   :  { %v4116_v44 = vpack.c.bf16 %v3247_v42, %v3246_v41  ;;  %v4298_v45 = vadd.f32 %v5720_v33, %v2481_v43  ;;  %v3059_v46 = vpop.f32.mrb[44].mxu0  ;;  %v2483_v47 = vpop.f32.mrb[45].mxu1 }
 0x26e   :  { %v3061_v48 = vpop.f32.mrb[45].mxu0  ;;  %v2484_v49 = vpop.f32.mrb[46].mxu1 }
 0x26f   :  { %4232 = vst [vmem:[%s5930_s3 + $0x50] sm:$0xff] %v4116_v44   ;;  %v4299_v50 = vadd.f32 %v4298_v45, %v3059_v46  ;;  %v4300_v51 = vadd.f32 %v5720_v33, %v2484_v49  ;;  %v3062_v52 = vpop.f32.mrb[46].mxu0  ;;  %v2486_v53 = vpop.f32.mrb[47].mxu1 }
 0x270   :  { %v3064_v54 = vpop.f32.mrb[47].mxu0 }
 0x271   :  { %v4301_v55 = vadd.f32 %v4300_v51, %v3062_v52  ;;  %v3248_v56 = vmax.f32 %v4299_v50, 0.0 }
 0x273   :  { %v3249_v57 = vmax.f32 %v4301_v55, 0.0 }
 0x274   :  { %v2489_v0 = vpop.f32.mrb[48].mxu1 }
 0x275   :  { %v4121_v58 = vpack.c.bf16 %v3249_v57, %v3248_v56  ;;  %v4302_v59 = vadd.f32 %v5720_v33, %v2489_v0  ;;  %v3067_v60 = vpop.f32.mrb[48].mxu0  ;;  %v2491_v61 = vpop.f32.mrb[49].mxu1 }
 0x276   :  { %v3069_v62 = vpop.f32.mrb[49].mxu0  ;;  %v2492_v63 = vpop.f32.mrb[50].mxu1 }
 0x277   :  { %4233 = vst [vmem:[%s5930_s3 + $0x58] sm:$0xff] %v4121_v58   ;;  %v4303_v1 = vadd.f32 %v4302_v59, %v3067_v60  ;;  %v4304_v2 = vadd.f32 %v5720_v33, %v2492_v63  ;;  %v3070_v3 = vpop.f32.mrb[50].mxu0  ;;  %v2494_v4 = vpop.f32.mrb[51].mxu1 }
 0x278   :  { %v3072_v5 = vpop.f32.mrb[51].mxu0 }
 0x279   :  { %v4305_v6 = vadd.f32 %v4304_v2, %v3070_v3  ;;  %v3250_v7 = vmax.f32 %v4303_v1, 0.0 }
 0x27b   :  { %v3251_v8 = vmax.f32 %v4305_v6, 0.0 }
 0x27c   :  { %v2497_v9 = vpop.f32.mrb[52].mxu1 }
 0x27d   :  { %v4126_v10 = vpack.c.bf16 %v3251_v8, %v3250_v7  ;;  %v4306_v11 = vadd.f32 %v5720_v33, %v2497_v9  ;;  %v3075_v12 = vpop.f32.mrb[52].mxu0  ;;  %v2499_v13 = vpop.f32.mrb[53].mxu1 }
 0x27e   :  { %v3077_v14 = vpop.f32.mrb[53].mxu0  ;;  %v2500_v15 = vpop.f32.mrb[54].mxu1 }
 0x27f   :  { %4234 = vst [vmem:[%s5930_s3 + $0x60] sm:$0xff] %v4126_v10   ;;  %v4307_v16 = vadd.f32 %v4306_v11, %v3075_v12  ;;  %v4308_v17 = vadd.f32 %v5720_v33, %v2500_v15  ;;  %v3078_v18 = vpop.f32.mrb[54].mxu0  ;;  %v2502_v19 = vpop.f32.mrb[55].mxu1 }
 0x280   :  { %v3080_v20 = vpop.f32.mrb[55].mxu0 }
 0x281   :  { %v4309_v21 = vadd.f32 %v4308_v17, %v3078_v18  ;;  %v3252_v22 = vmax.f32 %v4307_v16, 0.0 }
 0x283   :  { %v3253_v23 = vmax.f32 %v4309_v21, 0.0 }
 0x284   :  { %v2505_v24 = vpop.f32.mrb[56].mxu1 }
 0x285   :  { %v4131_v25 = vpack.c.bf16 %v3253_v23, %v3252_v22  ;;  %v4310_v26 = vadd.f32 %v5720_v33, %v2505_v24  ;;  %v3083_v27 = vpop.f32.mrb[56].mxu0  ;;  %v2507_v28 = vpop.f32.mrb[57].mxu1 }
 0x286   :  { %v3085_v29 = vpop.f32.mrb[57].mxu0  ;;  %v2508_v30 = vpop.f32.mrb[58].mxu1 }
 0x287   :  { %4235 = vst [vmem:[%s5930_s3 + $0x68] sm:$0xff] %v4131_v25   ;;  %v4311_v31 = vadd.f32 %v4310_v26, %v3083_v27  ;;  %v4312_v32 = vadd.f32 %v5720_v33, %v2508_v30  ;;  %v3086_v34 = vpop.f32.mrb[58].mxu0  ;;  %v2510_v35 = vpop.f32.mrb[59].mxu1 }
 0x288   :  { %v3088_v36 = vpop.f32.mrb[59].mxu0 }
 0x289   :  { %v4313_v37 = vadd.f32 %v4312_v32, %v3086_v34  ;;  %v3254_v38 = vmax.f32 %v4311_v31, 0.0 }
 0x28b   :  { %v3255_v39 = vmax.f32 %v4313_v37, 0.0 }
 0x28c   :  { %v2513_v40 = vpop.f32.mrb[60].mxu1 }
 0x28d   :  { %v4136_v41 = vpack.c.bf16 %v3255_v39, %v3254_v38  ;;  %v4314_v42 = vadd.f32 %v5720_v33, %v2513_v40  ;;  %v3091_v43 = vpop.f32.mrb[60].mxu0  ;;  %v2515_v44 = vpop.f32.mrb[61].mxu1 }
 0x28e   :  { %v3093_v45 = vpop.f32.mrb[61].mxu0  ;;  %v2516_v46 = vpop.f32.mrb[62].mxu1 }
 0x28f   :  { %4236 = vst [vmem:[%s5930_s3 + $0x70] sm:$0xff] %v4136_v41   ;;  %v4315_v47 = vadd.f32 %v4314_v42, %v3091_v43  ;;  %v4316_v48 = vadd.f32 %v5720_v33, %v2516_v46  ;;  %v3094_v49 = vpop.f32.mrb[62].mxu0  ;;  %v2518_v50 = vpop.f32.mrb[63].mxu1 }
 0x290   :  { %v3096_v51 = vpop.f32.mrb[63].mxu0 }
 0x291   :  { %v4317_v52 = vadd.f32 %v4316_v48, %v3094_v49  ;;  %v3256_v53 = vmax.f32 %v4315_v47, 0.0 }
 0x293   :  { %v3257_v54 = vmax.f32 %v4317_v52, 0.0 }
 0x294   :  { %v2521_v55 = vpop.f32.mrb[64].mxu1 }
 0x295   :  { %v4141_v56 = vpack.c.bf16 %v3257_v54, %v3256_v53  ;;  %v4318_v57 = vadd.f32 %v5720_v33, %v2521_v55  ;;  %v3099_v0 = vpop.f32.mrb[64].mxu0  ;;  %v2523_v58 = vpop.f32.mrb[65].mxu1 }
 0x296   :  { %v3101_v59 = vpop.f32.mrb[65].mxu0  ;;  %v2524_v60 = vpop.f32.mrb[66].mxu1 }
 0x297   :  { %4237 = vst [vmem:[%s5930_s3 + $0x78] sm:$0xff] %v4141_v56   ;;  %v4319_v61 = vadd.f32 %v4318_v57, %v3099_v0  ;;  %v4320_v62 = vadd.f32 %v5720_v33, %v2524_v60  ;;  %v3102_v63 = vpop.f32.mrb[66].mxu0  ;;  %v2526_v1 = vpop.f32.mrb[67].mxu1 }
 0x298   :  { %v3104_v2 = vpop.f32.mrb[67].mxu0 }
 0x299   :  { %v4321_v3 = vadd.f32 %v4320_v62, %v3102_v63  ;;  %v3258_v4 = vmax.f32 %v4319_v61, 0.0 }
 0x29b   :  { %v3259_v5 = vmax.f32 %v4321_v3, 0.0 }
 0x29c   :  { %v2529_v6 = vpop.f32.mrb[68].mxu1 }
 0x29d   :  { %v4146_v7 = vpack.c.bf16 %v3259_v5, %v3258_v4  ;;  %v4322_v8 = vadd.f32 %v5720_v33, %v2529_v6  ;;  %v3107_v9 = vpop.f32.mrb[68].mxu0  ;;  %v2531_v10 = vpop.f32.mrb[69].mxu1 }
 0x29e   :  { %v3109_v11 = vpop.f32.mrb[69].mxu0  ;;  %v2532_v12 = vpop.f32.mrb[70].mxu1 }
 0x29f   :  { %4238 = vst [vmem:[%s5930_s3 + $0x80] sm:$0xff] %v4146_v7   ;;  %v4323_v13 = vadd.f32 %v4322_v8, %v3107_v9  ;;  %v4324_v14 = vadd.f32 %v5720_v33, %v2532_v12  ;;  %v3110_v15 = vpop.f32.mrb[70].mxu0  ;;  %v2534_v16 = vpop.f32.mrb[71].mxu1 }
 0x2a0   :  { %v3112_v17 = vpop.f32.mrb[71].mxu0 }
 0x2a1   :  { %v4325_v18 = vadd.f32 %v4324_v14, %v3110_v15  ;;  %v3260_v19 = vmax.f32 %v4323_v13, 0.0 }
 0x2a3   :  { %v3261_v20 = vmax.f32 %v4325_v18, 0.0 }
 0x2a4   :  { %v2537_v21 = vpop.f32.mrb[72].mxu1 }
 0x2a5   :  { %v4151_v22 = vpack.c.bf16 %v3261_v20, %v3260_v19  ;;  %v4326_v23 = vadd.f32 %v5720_v33, %v2537_v21  ;;  %v3115_v24 = vpop.f32.mrb[72].mxu0  ;;  %v2539_v25 = vpop.f32.mrb[73].mxu1 }
 0x2a6   :  { %v3117_v26 = vpop.f32.mrb[73].mxu0  ;;  %v2540_v27 = vpop.f32.mrb[74].mxu1 }
 0x2a7   :  { %4239 = vst [vmem:[%s5930_s3 + $0x88] sm:$0xff] %v4151_v22   ;;  %v4327_v28 = vadd.f32 %v4326_v23, %v3115_v24  ;;  %v4328_v29 = vadd.f32 %v5720_v33, %v2540_v27  ;;  %v3118_v30 = vpop.f32.mrb[74].mxu0  ;;  %v2542_v31 = vpop.f32.mrb[75].mxu1 }
 0x2a8   :  { %v3120_v32 = vpop.f32.mrb[75].mxu0 }
 0x2a9   :  { %v4329_v34 = vadd.f32 %v4328_v29, %v3118_v30  ;;  %v3262_v35 = vmax.f32 %v4327_v28, 0.0 }
 0x2ab   :  { %v3263_v36 = vmax.f32 %v4329_v34, 0.0 }
 0x2ac   :  { %v2545_v37 = vpop.f32.mrb[76].mxu1 }
 0x2ad   :  { %v4156_v38 = vpack.c.bf16 %v3263_v36, %v3262_v35  ;;  %v4330_v39 = vadd.f32 %v5720_v33, %v2545_v37  ;;  %v3123_v40 = vpop.f32.mrb[76].mxu0  ;;  %v2547_v41 = vpop.f32.mrb[77].mxu1 }
 0x2ae   :  { %v3125_v42 = vpop.f32.mrb[77].mxu0  ;;  %v2548_v43 = vpop.f32.mrb[78].mxu1 }
 0x2af   :  { %4240 = vst [vmem:[%s5930_s3 + $0x90] sm:$0xff] %v4156_v38   ;;  %v4331_v44 = vadd.f32 %v4330_v39, %v3123_v40  ;;  %v4332_v45 = vadd.f32 %v5720_v33, %v2548_v43  ;;  %v3126_v46 = vpop.f32.mrb[78].mxu0  ;;  %v2550_v47 = vpop.f32.mrb[79].mxu1 }
 0x2b0   :  { %v3128_v48 = vpop.f32.mrb[79].mxu0 }
 0x2b1   :  { %v4333_v49 = vadd.f32 %v4332_v45, %v3126_v46  ;;  %v3264_v50 = vmax.f32 %v4331_v44, 0.0 }
 0x2b3   :  { %v3265_v51 = vmax.f32 %v4333_v49, 0.0 }
 0x2b4   :  { %v2553_v52 = vpop.f32.mrb[80].mxu1 }
 0x2b5   :  { %v4161_v53 = vpack.c.bf16 %v3265_v51, %v3264_v50  ;;  %v4334_v54 = vadd.f32 %v5720_v33, %v2553_v52  ;;  %v3131_v55 = vpop.f32.mrb[80].mxu0  ;;  %v2555_v56 = vpop.f32.mrb[81].mxu1 }
 0x2b6   :  { %v3133_v57 = vpop.f32.mrb[81].mxu0  ;;  %v2556_v0 = vpop.f32.mrb[82].mxu1 }
 0x2b7   :  { %4241 = vst [vmem:[%s5930_s3 + $0x98] sm:$0xff] %v4161_v53   ;;  %v4335_v58 = vadd.f32 %v4334_v54, %v3131_v55  ;;  %v4336_v59 = vadd.f32 %v5720_v33, %v2556_v0  ;;  %v3134_v60 = vpop.f32.mrb[82].mxu0  ;;  %v2558_v61 = vpop.f32.mrb[83].mxu1 }
 0x2b8   :  { %v3136_v62 = vpop.f32.mrb[83].mxu0 }
 0x2b9   :  { %v4337_v63 = vadd.f32 %v4336_v59, %v3134_v60  ;;  %v3266_v1 = vmax.f32 %v4335_v58, 0.0 }
 0x2bb   :  { %v3267_v2 = vmax.f32 %v4337_v63, 0.0 }
 0x2bc   :  { %v2561_v3 = vpop.f32.mrb[84].mxu1 }
 0x2bd   :  { %v4166_v4 = vpack.c.bf16 %v3267_v2, %v3266_v1  ;;  %v4338_v5 = vadd.f32 %v5720_v33, %v2561_v3  ;;  %v3139_v6 = vpop.f32.mrb[84].mxu0  ;;  %v2563_v7 = vpop.f32.mrb[85].mxu1 }
 0x2be   :  { %v3141_v8 = vpop.f32.mrb[85].mxu0  ;;  %v2564_v9 = vpop.f32.mrb[86].mxu1 }
 0x2bf   :  { %4242 = vst [vmem:[%s5930_s3 + $0xa0] sm:$0xff] %v4166_v4   ;;  %v4339_v10 = vadd.f32 %v4338_v5, %v3139_v6  ;;  %v4340_v11 = vadd.f32 %v5720_v33, %v2564_v9  ;;  %v3142_v12 = vpop.f32.mrb[86].mxu0  ;;  %v2566_v13 = vpop.f32.mrb[87].mxu1 }
 0x2c0   :  { %v3144_v14 = vpop.f32.mrb[87].mxu0 }
 0x2c1   :  { %v4341_v15 = vadd.f32 %v4340_v11, %v3142_v12  ;;  %v3268_v16 = vmax.f32 %v4339_v10, 0.0 }
 0x2c3   :  { %v3269_v17 = vmax.f32 %v4341_v15, 0.0 }
 0x2c4   :  { %v2569_v18 = vpop.f32.mrb[88].mxu1 }
 0x2c5   :  { %v4171_v19 = vpack.c.bf16 %v3269_v17, %v3268_v16  ;;  %v4342_v20 = vadd.f32 %v5720_v33, %v2569_v18  ;;  %v3147_v21 = vpop.f32.mrb[88].mxu0  ;;  %v2571_v22 = vpop.f32.mrb[89].mxu1 }
 0x2c6   :  { %v3149_v23 = vpop.f32.mrb[89].mxu0  ;;  %v2572_v24 = vpop.f32.mrb[90].mxu1 }
 0x2c7   :  { %4243 = vst [vmem:[%s5930_s3 + $0xa8] sm:$0xff] %v4171_v19   ;;  %v4343_v25 = vadd.f32 %v4342_v20, %v3147_v21  ;;  %v4344_v26 = vadd.f32 %v5720_v33, %v2572_v24  ;;  %v3150_v27 = vpop.f32.mrb[90].mxu0  ;;  %v2574_v28 = vpop.f32.mrb[91].mxu1 }
 0x2c8   :  { %v3152_v29 = vpop.f32.mrb[91].mxu0 }
 0x2c9   :  { %v4345_v30 = vadd.f32 %v4344_v26, %v3150_v27  ;;  %v3270_v31 = vmax.f32 %v4343_v25, 0.0 }
 0x2cb   :  { %v3271_v32 = vmax.f32 %v4345_v30, 0.0 }
 0x2cc   :  { %v2577_v34 = vpop.f32.mrb[92].mxu1 }
 0x2cd   :  { %v4176_v35 = vpack.c.bf16 %v3271_v32, %v3270_v31  ;;  %v4346_v36 = vadd.f32 %v5720_v33, %v2577_v34  ;;  %v3155_v37 = vpop.f32.mrb[92].mxu0  ;;  %v2579_v38 = vpop.f32.mrb[93].mxu1 }
 0x2ce   :  { %v3157_v39 = vpop.f32.mrb[93].mxu0  ;;  %v2580_v40 = vpop.f32.mrb[94].mxu1 }
 0x2cf   :  { %4244 = vst [vmem:[%s5930_s3 + $0xb0] sm:$0xff] %v4176_v35   ;;  %v4347_v41 = vadd.f32 %v4346_v36, %v3155_v37  ;;  %v4348_v42 = vadd.f32 %v5720_v33, %v2580_v40  ;;  %v3158_v43 = vpop.f32.mrb[94].mxu0  ;;  %v2582_v44 = vpop.f32.mrb[95].mxu1 }
 0x2d0   :  { %v3160_v45 = vpop.f32.mrb[95].mxu0 }
 0x2d1   :  { %v4349_v46 = vadd.f32 %v4348_v42, %v3158_v43  ;;  %v3272_v47 = vmax.f32 %v4347_v41, 0.0 }
 0x2d3   :  { %v3273_v48 = vmax.f32 %v4349_v46, 0.0 }
 0x2d4   :  { %v2585_v49 = vpop.f32.mrb[96].mxu1 }
 0x2d5   :  { %v4181_v50 = vpack.c.bf16 %v3273_v48, %v3272_v47  ;;  %v4350_v51 = vadd.f32 %v5720_v33, %v2585_v49  ;;  %v3163_v52 = vpop.f32.mrb[96].mxu0  ;;  %v2587_v53 = vpop.f32.mrb[97].mxu1 }
 0x2d6   :  { %v3165_v54 = vpop.f32.mrb[97].mxu0  ;;  %v2588_v55 = vpop.f32.mrb[98].mxu1 }
 0x2d7   :  { %4245 = vst [vmem:[%s5930_s3 + $0xb8] sm:$0xff] %v4181_v50   ;;  %v4351_v56 = vadd.f32 %v4350_v51, %v3163_v52  ;;  %v4352_v57 = vadd.f32 %v5720_v33, %v2588_v55  ;;  %v3166_v0 = vpop.f32.mrb[98].mxu0  ;;  %v2590_v58 = vpop.f32.mrb[99].mxu1 }
 0x2d8   :  { %v3168_v59 = vpop.f32.mrb[99].mxu0 }
 0x2d9   :  { %v4353_v60 = vadd.f32 %v4352_v57, %v3166_v0  ;;  %v3274_v61 = vmax.f32 %v4351_v56, 0.0 }
 0x2db   :  { %v3275_v62 = vmax.f32 %v4353_v60, 0.0 }
 0x2dc   :  { %v2593_v63 = vpop.f32.mrb[100].mxu1 }
 0x2dd   :  { %v4186_v1 = vpack.c.bf16 %v3275_v62, %v3274_v61  ;;  %v4354_v2 = vadd.f32 %v5720_v33, %v2593_v63  ;;  %v3171_v3 = vpop.f32.mrb[100].mxu0  ;;  %v2595_v4 = vpop.f32.mrb[101].mxu1  ;;  %v4703_v62 = vld [vmem:[%s5929_s2] ss:$0 sm:$0xff] }
 0x2de   :  { %v3173_v5 = vpop.f32.mrb[101].mxu0  ;;  %v2596_v6 = vpop.f32.mrb[102].mxu1 }
 0x2df   :  { %4246 = vst [vmem:[%s5930_s3 + $0xc0] sm:$0xff] %v4186_v1   ;;  %v4355_v7 = vadd.f32 %v4354_v2, %v3171_v3  ;;  %v4356_v8 = vadd.f32 %v5720_v33, %v2596_v6  ;;  %v3174_v9 = vpop.f32.mrb[102].mxu0  ;;  %v2598_v10 = vpop.f32.mrb[103].mxu1 }
 0x2e0   :  { %v3176_v11 = vpop.f32.mrb[103].mxu0 }
 0x2e1   :  { %v4357_v12 = vadd.f32 %v4356_v8, %v3174_v9  ;;  %v3276_v13 = vmax.f32 %v4355_v7, 0.0 }
 0x2e3   :  { %v3277_v14 = vmax.f32 %v4357_v12, 0.0 }
 0x2e4   :  { %v2601_v15 = vpop.f32.mrb[104].mxu1 }
 0x2e5   :  { %v4191_v16 = vpack.c.bf16 %v3277_v14, %v3276_v13  ;;  %v4358_v17 = vadd.f32 %v5720_v33, %v2601_v15  ;;  %v3179_v18 = vpop.f32.mrb[104].mxu0  ;;  %v2603_v19 = vpop.f32.mrb[105].mxu1 }
 0x2e6   :  { %v3181_v20 = vpop.f32.mrb[105].mxu0  ;;  %v2604_v21 = vpop.f32.mrb[106].mxu1 }
 0x2e7   :  { %4247 = vst [vmem:[%s5930_s3 + $0xc8] sm:$0xff] %v4191_v16   ;;  %v4359_v22 = vadd.f32 %v4358_v17, %v3179_v18  ;;  %v4360_v23 = vadd.f32 %v5720_v33, %v2604_v21  ;;  %v3182_v24 = vpop.f32.mrb[106].mxu0  ;;  %v2606_v25 = vpop.f32.mrb[107].mxu1 }
 0x2e8   :  { %v3184_v26 = vpop.f32.mrb[107].mxu0 }
 0x2e9   :  { %v4361_v27 = vadd.f32 %v4360_v23, %v3182_v24  ;;  %v3278_v28 = vmax.f32 %v4359_v22, 0.0 }
 0x2eb   :  { %v3279_v29 = vmax.f32 %v4361_v27, 0.0 }
 0x2ec   :  { %v2609_v30 = vpop.f32.mrb[108].mxu1 }
 0x2ed   :  { %v4196_v31 = vpack.c.bf16 %v3279_v29, %v3278_v28  ;;  %v4362_v32 = vadd.f32 %v5720_v33, %v2609_v30  ;;  %v3187_v34 = vpop.f32.mrb[108].mxu0  ;;  %v2611_v35 = vpop.f32.mrb[109].mxu1 }
 0x2ee   :  { %v3189_v36 = vpop.f32.mrb[109].mxu0  ;;  %v2612_v37 = vpop.f32.mrb[110].mxu1 }
 0x2ef   :  { %4248 = vst [vmem:[%s5930_s3 + $0xd0] sm:$0xff] %v4196_v31   ;;  %v4363_v38 = vadd.f32 %v4362_v32, %v3187_v34  ;;  %v4364_v39 = vadd.f32 %v5720_v33, %v2612_v37  ;;  %v3190_v40 = vpop.f32.mrb[110].mxu0  ;;  %v2614_v41 = vpop.f32.mrb[111].mxu1 }
 0x2f0   :  { %v3192_v42 = vpop.f32.mrb[111].mxu0 }
 0x2f1   :  { %v4365_v43 = vadd.f32 %v4364_v39, %v3190_v40  ;;  %v3280_v44 = vmax.f32 %v4363_v38, 0.0 }
 0x2f3   :  { %v3281_v45 = vmax.f32 %v4365_v43, 0.0 }
 0x2f4   :  { %v2617_v46 = vpop.f32.mrb[112].mxu1 }
 0x2f5   :  { %v4201_v47 = vpack.c.bf16 %v3281_v45, %v3280_v44  ;;  %v4366_v48 = vadd.f32 %v5720_v33, %v2617_v46  ;;  %v3195_v49 = vpop.f32.mrb[112].mxu0  ;;  %v2619_v50 = vpop.f32.mrb[113].mxu1 }
 0x2f6   :  { %v3197_v51 = vpop.f32.mrb[113].mxu0  ;;  %v2620_v52 = vpop.f32.mrb[114].mxu1 }
 0x2f7   :  { %4249 = vst [vmem:[%s5930_s3 + $0xd8] sm:$0xff] %v4201_v47   ;;  %v4367_v53 = vadd.f32 %v4366_v48, %v3195_v49  ;;  %v4368_v54 = vadd.f32 %v5720_v33, %v2620_v52  ;;  %v3198_v55 = vpop.f32.mrb[114].mxu0  ;;  %v2622_v56 = vpop.f32.mrb[115].mxu1 }
 0x2f8   :  { %v3200_v57 = vpop.f32.mrb[115].mxu0 }
 0x2f9   :  { %v4369_v0 = vadd.f32 %v4368_v54, %v3198_v55  ;;  %v3282_v58 = vmax.f32 %v4367_v53, 0.0 }
 0x2fb   :  { %v3283_v59 = vmax.f32 %v4369_v0, 0.0 }
 0x2fc   :  { %v2625_v60 = vpop.f32.mrb[116].mxu1 }
 0x2fd   :  { %v4206_v61 = vpack.c.bf16 %v3283_v59, %v3282_v58  ;;  %v4370_v63 = vadd.f32 %v4703_v62, %v2625_v60  ;;  %v3203_v1 = vpop.f32.mrb[116].mxu0  ;;  %v2627_v2 = vpop.f32.mrb[117].mxu1 }
 0x2fe   :  { %v3205_v3 = vpop.f32.mrb[117].mxu0  ;;  %v2628_v4 = vpop.f32.mrb[118].mxu1 }
 0x2ff   :  { %4250 = vst [vmem:[%s5930_s3 + $0xe0] sm:$0xff] %v4206_v61   ;;  %v4371_v33 = vadd.f32 %v4370_v63, %v3203_v1  ;;  %v4372_v5 = vadd.f32 %v4703_v62, %v2628_v4  ;;  %v3206_v6 = vpop.f32.mrb[118].mxu0  ;;  %v2630_v7 = vpop.f32.mrb[119].mxu1 }
 0x300   :  { %v3208_v8 = vpop.f32.mrb[119].mxu0 }
 0x301   :  { %v4373_v9 = vadd.f32 %v4372_v5, %v3206_v6  ;;  %v3284_v10 = vmax.f32 %v4371_v33, 0.0 }
 0x303   :  { %v3285_v11 = vmax.f32 %v4373_v9, 0.0 }
 0x304   :  { %v2633_v12 = vpop.f32.mrb[120].mxu1 }
 0x305   :  { %v4211_v13 = vpack.c.bf16 %v3285_v11, %v3284_v10  ;;  %v4374_v14 = vadd.f32 %v4703_v62, %v2633_v12  ;;  %v3211_v15 = vpop.f32.mrb[120].mxu0  ;;  %v2635_v16 = vpop.f32.mrb[121].mxu1 }
 0x306   :  { %v3213_v17 = vpop.f32.mrb[121].mxu0  ;;  %v2636_v18 = vpop.f32.mrb[122].mxu1 }
 0x307   :  { %4251 = vst [vmem:[%s5930_s3 + $0xe8] sm:$0xff] %v4211_v13   ;;  %v4375_v19 = vadd.f32 %v4374_v14, %v3211_v15  ;;  %v4376_v20 = vadd.f32 %v4703_v62, %v2636_v18  ;;  %v3214_v21 = vpop.f32.mrb[122].mxu0  ;;  %v2638_v22 = vpop.f32.mrb[123].mxu1 }
 0x308   :  { %v3216_v23 = vpop.f32.mrb[123].mxu0 }
 0x309   :  { %v4377_v24 = vadd.f32 %v4376_v20, %v3214_v21  ;;  %v3286_v25 = vmax.f32 %v4375_v19, 0.0 }
 0x30b   :  { %v3287_v26 = vmax.f32 %v4377_v24, 0.0 }
 0x30c   :  { %v2641_v27 = vpop.f32.mrb[124].mxu1 }
 0x30d   :  { %v4216_v28 = vpack.c.bf16 %v3287_v26, %v3286_v25  ;;  %v4378_v29 = vadd.f32 %v4703_v62, %v2641_v27  ;;  %v3219_v30 = vpop.f32.mrb[124].mxu0  ;;  %v2643_v31 = vpop.f32.mrb[125].mxu1 }
 0x30e   :  { %v3221_v32 = vpop.f32.mrb[125].mxu0  ;;  %v2644_v34 = vpop.f32.mrb[126].mxu1 }
 0x30f   :  { %4252 = vst [vmem:[%s5930_s3 + $0xf0] sm:$0xff] %v4216_v28   ;;  %v4379_v35 = vadd.f32 %v4378_v29, %v3219_v30  ;;  %v4380_v36 = vadd.f32 %v4703_v62, %v2644_v34  ;;  %v3222_v37 = vpop.f32.mrb[126].mxu0  ;;  %v2646_v38 = vpop.f32.mrb[127].mxu1 }
 0x310   :  { %v3224_v39 = vpop.f32.mrb[127].mxu0 }
 0x311   :  { %v4381_v40 = vadd.f32 %v4380_v36, %v3222_v37  ;;  %v3288_v41 = vmax.f32 %v4379_v35, 0.0 }
 0x313   :  { %v3289_v42 = vmax.f32 %v4381_v40, 0.0 }
 0x315   :  { %v4221_v43 = vpack.c.bf16 %v3289_v42, %v3288_v41 }
 0x317   :  { %4253 = vst [vmem:[%s5930_s3 + $0xf8] sm:$0xff] %v4221_v43  }

// kernel: actor_forward.6
= control target key start
LH: loop header
LB: loop body
LE: loop exit
PB: predicated region body
PF: predicated region fallthrough
CT: control target
= control target key end

     0   :  { %s5697_s1 = inlined_call_operand.vmem [shape: bf16[2048,256], index: 1, kind: input, shape index: {}]   ;;  %s5698_s0 = inlined_call_operand.vmem [shape: bf16[128,2048], index: 0, kind: input, shape index: {}]   ;;  %s5699_s2 = inlined_call_operand.vmem [shape: f32[1,256], index: 2, kind: input, shape index: {}]   ;;  %s5700_s3 = inlined_call_operand.vmem [shape: bf16[128,256], index: 3, kind: output, shape index: {}]  }
   0x1   :  { %v4054_v0 = vld [vmem:[%s5697_s1 + $0x4] ss:$8 sps:$4 sm:$0xff]   ;;  %v4058_v2 = vld [vmem:[%s5697_s1] ss:$8 sps:$4 sm:$0xff]   ;;  %v4060_v4 = vld [vmem:[%s5697_s1 + $0x14] ss:$8 sps:$4 sm:$0xff]  }
   0x2   :  { %v4056_v1 = vld [vmem:[%s5697_s1 + $0x404] ss:$8 sps:$4 sm:$0xff]   ;;  %2330 = vmatprep.subr.bf16.mxu1 %v4054_v0  ;;  %v4059_v3 = vld [vmem:[%s5697_s1 + $0x400] ss:$8 sps:$4 sm:$0xff]   ;;  %v4062_v5 = vld [vmem:[%s5697_s1 + $0x414] ss:$8 sps:$4 sm:$0xff]  }
   0x3   :  { %2782 = vmatprep.subr.bf16.mxu0 %v4056_v1  ;;  %2331 = vmatpush1.bf16.msra.mxu1 %v4058_v2  ;;  %v4064_v6 = vld [vmem:[%s5697_s1 + $0x10] ss:$8 sps:$4 sm:$0xff]   ;;  %v4066_v8 = vld [vmem:[%s5697_s1 + $0x24] ss:$8 sps:$4 sm:$0xff]   ;;  %v4070_v10 = vld [vmem:[%s5697_s1 + $0x20] ss:$8 sps:$4 sm:$0xff]  }
   0x4   :  { %2783 = vmatpush1.bf16.msra.mxu0 %v4059_v3  ;;  %2332 = vmatprep.subr.bf16.mxu1 %v4060_v4  ;;  %v4065_v7 = vld [vmem:[%s5697_s1 + $0x410] ss:$8 sps:$4 sm:$0xff]   ;;  %v4068_v9 = vld [vmem:[%s5697_s1 + $0x424] ss:$8 sps:$4 sm:$0xff]   ;;  %v4071_v11 = vld [vmem:[%s5697_s1 + $0x420] ss:$8 sps:$4 sm:$0xff]  }
   0x5   :  { %2784 = vmatprep.subr.bf16.mxu0 %v4062_v5  ;;  %v4072_v12 = vld [vmem:[%s5697_s1 + $0x34] ss:$8 sps:$4 sm:$0xff]   ;;  %v4076_v14 = vld [vmem:[%s5697_s1 + $0x30] ss:$8 sps:$4 sm:$0xff]   ;;  %v4078_v16 = vld [vmem:[%s5697_s1 + $0x44] ss:$8 sps:$4 sm:$0xff]  }
   0x6   :  { %v4074_v13 = vld [vmem:[%s5697_s1 + $0x434] ss:$8 sps:$4 sm:$0xff]   ;;  %v4077_v15 = vld [vmem:[%s5697_s1 + $0x430] ss:$8 sps:$4 sm:$0xff]   ;;  %v4080_v17 = vld [vmem:[%s5697_s1 + $0x444] ss:$8 sps:$4 sm:$0xff]  }
   0x7   :  { %2333 = vmatpush1.bf16.msra.mxu1 %v4064_v6  ;;  %v4082_v18 = vld [vmem:[%s5697_s1 + $0x40] ss:$8 sps:$4 sm:$0xff]   ;;  %v4084_v20 = vld [vmem:[%s5697_s1 + $0x54] ss:$8 sps:$4 sm:$0xff]   ;;  %v4088_v22 = vld [vmem:[%s5697_s1 + $0x50] ss:$8 sps:$4 sm:$0xff]  }
   0x8   :  { %2785 = vmatpush1.bf16.msra.mxu0 %v4065_v7  ;;  %2334 = vmatprep.subr.bf16.mxu1 %v4066_v8  ;;  %v4083_v19 = vld [vmem:[%s5697_s1 + $0x440] ss:$8 sps:$4 sm:$0xff]   ;;  %v4086_v21 = vld [vmem:[%s5697_s1 + $0x454] ss:$8 sps:$4 sm:$0xff]   ;;  %v4089_v23 = vld [vmem:[%s5697_s1 + $0x450] ss:$8 sps:$4 sm:$0xff]  }
   0x9   :  { %2786 = vmatprep.subr.bf16.mxu0 %v4068_v9  ;;  %v4090_v24 = vld [vmem:[%s5697_s1 + $0x64] ss:$8 sps:$4 sm:$0xff]   ;;  %v4094_v26 = vld [vmem:[%s5697_s1 + $0x60] ss:$8 sps:$4 sm:$0xff]   ;;  %v4096_v28 = vld [vmem:[%s5697_s1 + $0x74] ss:$8 sps:$4 sm:$0xff]  }
   0xa   :  { %v4092_v25 = vld [vmem:[%s5697_s1 + $0x464] ss:$8 sps:$4 sm:$0xff]   ;;  %v4095_v27 = vld [vmem:[%s5697_s1 + $0x460] ss:$8 sps:$4 sm:$0xff]   ;;  %v4098_v29 = vld [vmem:[%s5697_s1 + $0x474] ss:$8 sps:$4 sm:$0xff]  }
   0xb   :  { %2335 = vmatpush1.bf16.msra.mxu1 %v4070_v10  ;;  %v4100_v30 = vld [vmem:[%s5697_s1 + $0x70] ss:$8 sps:$4 sm:$0xff]   ;;  %v4102_v32 = vld [vmem:[%s5697_s1 + $0x84] ss:$8 sps:$4 sm:$0xff]   ;;  %v4106_v34 = vld [vmem:[%s5697_s1 + $0x80] ss:$8 sps:$4 sm:$0xff]  }
   0xc   :  { %2787 = vmatpush1.bf16.msra.mxu0 %v4071_v11  ;;  %2336 = vmatprep.subr.bf16.mxu1 %v4072_v12  ;;  %v4101_v31 = vld [vmem:[%s5697_s1 + $0x470] ss:$8 sps:$4 sm:$0xff]   ;;  %v4104_v33 = vld [vmem:[%s5697_s1 + $0x484] ss:$8 sps:$4 sm:$0xff]   ;;  %v4107_v35 = vld [vmem:[%s5697_s1 + $0x480] ss:$8 sps:$4 sm:$0xff]  }
   0xd   :  { %2788 = vmatprep.subr.bf16.mxu0 %v4074_v13  ;;  %v4108_v36 = vld [vmem:[%s5697_s1 + $0x94] ss:$8 sps:$4 sm:$0xff]   ;;  %v4112_v38 = vld [vmem:[%s5697_s1 + $0x90] ss:$8 sps:$4 sm:$0xff]   ;;  %v4114_v40 = vld [vmem:[%s5697_s1 + $0xa4] ss:$8 sps:$4 sm:$0xff]  }
   0xe   :  { %v4110_v37 = vld [vmem:[%s5697_s1 + $0x494] ss:$8 sps:$4 sm:$0xff]   ;;  %v4113_v39 = vld [vmem:[%s5697_s1 + $0x490] ss:$8 sps:$4 sm:$0xff]   ;;  %v4116_v41 = vld [vmem:[%s5697_s1 + $0x4a4] ss:$8 sps:$4 sm:$0xff]  }
   0xf   :  { %2337 = vmatpush1.bf16.msra.mxu1 %v4076_v14  ;;  %v4118_v42 = vld [vmem:[%s5697_s1 + $0xa0] ss:$8 sps:$4 sm:$0xff]   ;;  %v4120_v44 = vld [vmem:[%s5697_s1 + $0xb4] ss:$8 sps:$4 sm:$0xff]   ;;  %v4124_v46 = vld [vmem:[%s5697_s1 + $0xb0] ss:$8 sps:$4 sm:$0xff]  }
  0x10   :  { %2789 = vmatpush1.bf16.msra.mxu0 %v4077_v15  ;;  %2338 = vmatprep.subr.bf16.mxu1 %v4078_v16  ;;  %v4119_v43 = vld [vmem:[%s5697_s1 + $0x4a0] ss:$8 sps:$4 sm:$0xff]   ;;  %v4122_v45 = vld [vmem:[%s5697_s1 + $0x4b4] ss:$8 sps:$4 sm:$0xff]   ;;  %v4125_v47 = vld [vmem:[%s5697_s1 + $0x4b0] ss:$8 sps:$4 sm:$0xff]  }
  0x11   :  { %2790 = vmatprep.subr.bf16.mxu0 %v4080_v17  ;;  %v14_v48 = vld [vmem:[%s5698_s0] sm:$0xff]  ;;  %v4132_v58 = vld [vmem:[%s5697_s1 + $0xd4] ss:$8 sps:$4 sm:$0xff]   ;;  %v4136_v60 = vld [vmem:[%s5697_s1 + $0xd0] ss:$8 sps:$4 sm:$0xff]  }
  0x12   :  { %v22_v49 = vld [vmem:[%s5698_s0 + $0x40] sm:$0xff]  ;;  %v4134_v59 = vld [vmem:[%s5697_s1 + $0x4d4] ss:$8 sps:$4 sm:$0xff]   ;;  %v4137_v61 = vld [vmem:[%s5697_s1 + $0x4d0] ss:$8 sps:$4 sm:$0xff]  }
  0x13   :  { %2339 = vmatpush1.bf16.msra.mxu1 %v4082_v18  ;;  %v18_v50 = vld [vmem:[%s5698_s0 + $0x20] sm:$0xff]  ;;  %v3383_v53 = vcombine.high %v14_v48, %v22_v49  ;;  %v4144_v2 = vld [vmem:[%s5697_s1 + $0xf4] ss:$8 sps:$4 sm:$0xff]   ;;  %v4148_v4 = vld [vmem:[%s5697_s1 + $0xf0] ss:$8 sps:$4 sm:$0xff]   ;;  %v3382_v11 = vcombine.low %v14_v48, %v22_v49 }
  0x14   :  { %2791 = vmatpush1.bf16.msra.mxu0 %v4083_v19  ;;  %2340 = vmatprep.subr.bf16.mxu1 %v4084_v20  ;;  %v26_v51 = vld [vmem:[%s5698_s0 + $0x60] sm:$0xff]  ;;  %v4146_v3 = vld [vmem:[%s5697_s1 + $0x4f4] ss:$8 sps:$4 sm:$0xff]   ;;  %v4149_v5 = vld [vmem:[%s5697_s1 + $0x4f0] ss:$8 sps:$4 sm:$0xff]  }
  0x15   :  { %2792 = vmatprep.subr.bf16.mxu0 %v4086_v21  ;;  %v4126_v52 = vld [vmem:[%s5697_s1 + $0xc4] ss:$8 sps:$4 sm:$0xff]   ;;  %v3391_v55 = vcombine.high %v18_v50, %v26_v51  ;;  %2362 = vmatprep.mubr.bf16.mxu1 %v3383_v53  ;;  %v4130_v56 = vld [vmem:[%s5697_s1 + $0xc0] ss:$8 sps:$4 sm:$0xff]   ;;  %v3390_v12 = vcombine.low %v18_v50, %v26_v51  ;;  %v4158_v16 = vld [vmem:[%s5697_s1 + $0x114] ss:$8 sps:$4 sm:$0xff]  }
  0x16   :  { %v4128_v54 = vld [vmem:[%s5697_s1 + $0x4c4] ss:$8 sps:$4 sm:$0xff]   ;;  %v4131_v57 = vld [vmem:[%s5697_s1 + $0x4c0] ss:$8 sps:$4 sm:$0xff]   ;;  %v4161_v17 = vld [vmem:[%s5697_s1 + $0x514] ss:$8 sps:$4 sm:$0xff]  }
  0x17   :  { %2341 = vmatpush1.bf16.msra.mxu1 %v4088_v22  ;;  %2814 = vmatprep.mubr.bf16.mxu0 %v3391_v55  ;;  %v4138_v62 = vld [vmem:[%s5697_s1 + $0xe4] ss:$8 sps:$4 sm:$0xff]   ;;  %v4142_v0 = vld [vmem:[%s5697_s1 + $0xe0] ss:$8 sps:$4 sm:$0xff]   ;;  %v4156_v20 = vld [vmem:[%s5697_s1 + $0x110] ss:$8 sps:$4 sm:$0xff]  }
  0x18   :  { %2793 = vmatpush1.bf16.msra.mxu0 %v4089_v23  ;;  %2342 = vmatprep.subr.bf16.mxu1 %v4090_v24  ;;  %v4140_v63 = vld [vmem:[%s5697_s1 + $0x4e4] ss:$8 sps:$4 sm:$0xff]   ;;  %v4143_v1 = vld [vmem:[%s5697_s1 + $0x4e0] ss:$8 sps:$4 sm:$0xff]   ;;  %v4159_v21 = vld [vmem:[%s5697_s1 + $0x510] ss:$8 sps:$4 sm:$0xff]  }
  0x19   :  { %2794 = vmatprep.subr.bf16.mxu0 %v4092_v25  ;;  %v4152_v6 = vld [vmem:[%s5697_s1 + $0x104] ss:$8 sps:$4 sm:$0xff]   ;;  %v4150_v8 = vld [vmem:[%s5697_s1 + $0x100] ss:$8 sps:$4 sm:$0xff]   ;;  %v4182_v48 = vld [vmem:[%s5697_s1 + $0x154] ss:$8 sps:$4 sm:$0xff]  }
  0x1a   :  { %v4155_v7 = vld [vmem:[%s5697_s1 + $0x504] ss:$8 sps:$4 sm:$0xff]   ;;  %v4153_v9 = vld [vmem:[%s5697_s1 + $0x500] ss:$8 sps:$4 sm:$0xff]   ;;  %v4185_v49 = vld [vmem:[%s5697_s1 + $0x554] ss:$8 sps:$4 sm:$0xff]  }
  0x1b   :  { %2343 = vmatpush1.bf16.msra.mxu1 %v4094_v26  ;;  %v30_v10 = vld [vmem:[%s5698_s0 + $0x80] sm:$0xff]  ;;  %v4183_v53 = vld [vmem:[%s5697_s1 + $0x550] ss:$8 sps:$4 sm:$0xff]  }
  0x1c   :  { %2795 = vmatpush1.bf16.msra.mxu0 %v4095_v27  ;;  %2344 = vmatprep.subr.bf16.mxu1 %v4096_v28  ;;  %v38_v13 = vld [vmem:[%s5698_s0 + $0xc0] sm:$0xff] }
  0x1d   :  { %2796 = vmatprep.subr.bf16.mxu0 %v4098_v29  ;;  %v34_v14 = vld [vmem:[%s5698_s0 + $0xa0] sm:$0xff]  ;;  %v3399_v18 = vcombine.high %v30_v10, %v38_v13  ;;  %v3398_v28 = vcombine.low %v30_v10, %v38_v13 }
  0x1e   :  { %v42_v15 = vld [vmem:[%s5698_s0 + $0xe0] sm:$0xff] }
  0x1f   :  { %2345 = vmatpush1.bf16.msra.mxu1 %v4100_v30  ;;  %v3407_v19 = vcombine.high %v34_v14, %v42_v15  ;;  %v4164_v22 = vld [vmem:[%s5697_s1 + $0x124] ss:$8 sps:$4 sm:$0xff]   ;;  %v4162_v24 = vld [vmem:[%s5697_s1 + $0x120] ss:$8 sps:$4 sm:$0xff]   ;;  %v3406_v29 = vcombine.low %v34_v14, %v42_v15 }
  0x20   :  { %2797 = vmatpush1.bf16.msra.mxu0 %v4101_v31  ;;  %2346 = vmatprep.subr.bf16.mxu1 %v4102_v32  ;;  %v4167_v23 = vld [vmem:[%s5697_s1 + $0x524] ss:$8 sps:$4 sm:$0xff]   ;;  %v4165_v25 = vld [vmem:[%s5697_s1 + $0x520] ss:$8 sps:$4 sm:$0xff]   ;;  %v4170_v32 = vld [vmem:[%s5697_s1 + $0x134] ss:$8 sps:$4 sm:$0xff]  }
  0x21   :  { %2798 = vmatprep.subr.bf16.mxu0 %v4104_v33  ;;  %v46_v26 = vld [vmem:[%s5698_s0 + $0x100] sm:$0xff]  ;;  %v4173_v33 = vld [vmem:[%s5697_s1 + $0x534] ss:$8 sps:$4 sm:$0xff]  }
  0x22   :  { %v54_v27 = vld [vmem:[%s5698_s0 + $0x140] sm:$0xff] }
  0x23   :  { %2347 = vmatpush1.bf16.msra.mxu1 %v4106_v34  ;;  %v50_v30 = vld [vmem:[%s5698_s0 + $0x120] sm:$0xff]  ;;  %v3415_v34 = vcombine.high %v46_v26, %v54_v27 }
  0x24   :  { %2799 = vmatpush1.bf16.msra.mxu0 %v4107_v35  ;;  %2348 = vmatprep.subr.bf16.mxu1 %v4108_v36  ;;  %v58_v31 = vld [vmem:[%s5698_s0 + $0x160] sm:$0xff]  ;;  %v4168_v36 = vld [vmem:[%s5697_s1 + $0x130] ss:$8 sps:$4 sm:$0xff]  }
  0x25   :  { %2800 = vmatprep.subr.bf16.mxu0 %v4110_v37  ;;  %v3423_v35 = vcombine.high %v50_v30, %v58_v31  ;;  %v4171_v37 = vld [vmem:[%s5697_s1 + $0x530] ss:$8 sps:$4 sm:$0xff]   ;;  %v4191_v55 = vld [vmem:[%s5697_s1 + $0x564] ss:$8 sps:$4 sm:$0xff]   ;;  %v4198_v14 = vld [vmem:[%s5697_s1 + $0x180] ss:$8 sps:$4 sm:$0xff]  }
  0x26   :  { %v106_v13 = vld [vmem:[%s5698_s0 + $0x2e0] sm:$0xff] }
  0x27   :  { %2349 = vmatpush1.bf16.msra.mxu1 %v4112_v38  ;;  %v4176_v38 = vld [vmem:[%s5697_s1 + $0x144] ss:$8 sps:$4 sm:$0xff]   ;;  %v4201_v15 = vld [vmem:[%s5697_s1 + $0x580] ss:$8 sps:$4 sm:$0xff]  }
  0x28   :  { %2801 = vmatpush1.bf16.msra.mxu0 %v4113_v39  ;;  %2350 = vmatprep.subr.bf16.mxu1 %v4114_v40  ;;  %v4179_v39 = vld [vmem:[%s5697_s1 + $0x544] ss:$8 sps:$4 sm:$0xff]   ;;  %v4174_v40 = vld [vmem:[%s5697_s1 + $0x140] ss:$8 sps:$4 sm:$0xff]  }
  0x29   :  { %2802 = vmatprep.subr.bf16.mxu0 %v4116_v41  ;;  %v4177_v41 = vld [vmem:[%s5697_s1 + $0x540] ss:$8 sps:$4 sm:$0xff]  }
  0x2b   :  { %2351 = vmatpush1.bf16.msra.mxu1 %v4118_v42  ;;  %v62_v42 = vld [vmem:[%s5698_s0 + $0x180] sm:$0xff] }
  0x2c   :  { %2803 = vmatpush1.bf16.msra.mxu0 %v4119_v43  ;;  %2352 = vmatprep.subr.bf16.mxu1 %v4120_v44  ;;  %v70_v43 = vld [vmem:[%s5698_s0 + $0x1c0] sm:$0xff]  ;;  %v3414_v44 = vcombine.low %v46_v26, %v54_v27 }
  0x2d   :  { %2804 = vmatprep.subr.bf16.mxu0 %v4122_v45  ;;  %v3422_v45 = vcombine.low %v50_v30, %v58_v31  ;;  %v3431_v50 = vcombine.high %v62_v42, %v70_v43  ;;  %v110_v26 = vld [vmem:[%s5698_s0 + $0x300] sm:$0xff] }
  0x2e   :  { %v114_v30 = vld [vmem:[%s5698_s0 + $0x320] sm:$0xff] }
  0x2f   :  { %2353 = vmatpush1.bf16.msra.mxu1 %v4124_v46  ;;  %v66_v46 = vld [vmem:[%s5698_s0 + $0x1a0] sm:$0xff] }
  0x30   :  { %2805 = vmatpush1.bf16.msra.mxu0 %v4125_v47  ;;  %2354 = vmatprep.subr.bf16.mxu1 %v4126_v52  ;;  %v74_v47 = vld [vmem:[%s5698_s0 + $0x1e0] sm:$0xff]  ;;  %v4180_v52 = vld [vmem:[%s5697_s1 + $0x150] ss:$8 sps:$4 sm:$0xff]  }
  0x31   :  { %2806 = vmatprep.subr.bf16.mxu0 %v4128_v54  ;;  %v3439_v51 = vcombine.high %v66_v46, %v74_v47  ;;  %v4188_v54 = vld [vmem:[%s5697_s1 + $0x164] ss:$8 sps:$4 sm:$0xff]  }
  0x32   :  { %v122_v31 = vld [vmem:[%s5698_s0 + $0x360] sm:$0xff] }
  0x33   :  { %2355 = vmatpush1.bf16.msra.mxu1 %v4130_v56  ;;  %v4186_v56 = vld [vmem:[%s5697_s1 + $0x160] ss:$8 sps:$4 sm:$0xff]  }
  0x34   :  { %2807 = vmatpush1.bf16.msra.mxu0 %v4131_v57  ;;  %2356 = vmatprep.subr.bf16.mxu1 %v4132_v58  ;;  %v78_v57 = vld [vmem:[%s5698_s0 + $0x200] sm:$0xff] }
  0x35   :  { %2808 = vmatprep.subr.bf16.mxu0 %v4134_v59  ;;  %v86_v58 = vld [vmem:[%s5698_s0 + $0x240] sm:$0xff]  ;;  %v3430_v59 = vcombine.low %v62_v42, %v70_v43 }
  0x36   :  { %v3446_v10 = vcombine.low %v78_v57, %v86_v58  ;;  %v126_v42 = vld [vmem:[%s5698_s0 + $0x380] sm:$0xff] }
  0x37   :  { %2357 = vmatpush1.bf16.msra.mxu1 %v4136_v60  ;;  %v3438_v60 = vcombine.low %v66_v46, %v74_v47  ;;  %v134_v43 = vld [vmem:[%s5698_s0 + $0x3c0] sm:$0xff] }
  0x38   :  { %2809 = vmatpush1.bf16.msra.mxu0 %v4137_v61  ;;  %2358 = vmatprep.subr.bf16.mxu1 %v4138_v62  ;;  %v82_v61 = vld [vmem:[%s5698_s0 + $0x220] sm:$0xff] }
  0x39   :  { %2810 = vmatprep.subr.bf16.mxu0 %v4140_v63  ;;  %v90_v62 = vld [vmem:[%s5698_s0 + $0x260] sm:$0xff] }
  0x3a   :  { %v4189_v63 = vld [vmem:[%s5697_s1 + $0x560] ss:$8 sps:$4 sm:$0xff]  }
  0x3b   :  { %2359 = vmatpush1.bf16.msra.mxu1 %v4142_v0  ;;  %v4194_v0 = vld [vmem:[%s5697_s1 + $0x174] ss:$8 sps:$4 sm:$0xff]   ;;  %v130_v46 = vld [vmem:[%s5698_s0 + $0x3a0] sm:$0xff] }
  0x3c   :  { %2811 = vmatpush1.bf16.msra.mxu0 %v4143_v1  ;;  %2360 = vmatprep.subr.bf16.mxu1 %v4144_v2  ;;  %v4197_v1 = vld [vmem:[%s5697_s1 + $0x574] ss:$8 sps:$4 sm:$0xff]   ;;  %v3447_v2 = vcombine.high %v78_v57, %v86_v58  ;;  %v138_v47 = vld [vmem:[%s5698_s0 + $0x3e0] sm:$0xff]  ;;  %v15_v58 = vld [vmem:[%s5698_s0 + $0x8] sm:$0xff] }
  0x3d   :  { %2812 = vmatprep.subr.bf16.mxu0 %v4146_v3  ;;  %v3455_v3 = vcombine.high %v82_v61, %v90_v62  ;;  %v4237_v57 = vld [vmem:[%s5697_s1 + $0x5e0] ss:$8 sps:$4 sm:$0xff]  }
  0x3f   :  { %2361 = vmatpush1.bf16.msra.mxu1 %v4148_v4  ;;  %v4192_v4 = vld [vmem:[%s5697_s1 + $0x170] ss:$8 sps:$4 sm:$0xff]  }
  0x40   :  { %2813 = vmatpush1.bf16.msra.mxu0 %v4149_v5  ;;  %2443 = vmatprep.subr.bf16.mxu1 %v4152_v6  ;;  %v4195_v5 = vld [vmem:[%s5697_s1 + $0x570] ss:$8 sps:$4 sm:$0xff]   ;;  %v4200_v6 = vld [vmem:[%s5697_s1 + $0x184] ss:$8 sps:$4 sm:$0xff]  }
  0x41   :  { %2895 = vmatprep.subr.bf16.mxu0 %v4155_v7  ;;  %v4203_v7 = vld [vmem:[%s5697_s1 + $0x584] ss:$8 sps:$4 sm:$0xff]  }
  0x42   :  { %2363 = vmatmul.mubr.bf16.vlgmr.msra.gmra.mrb[0].mxu1 %v3382_v11  ;;  %v3454_v11 = vcombine.low %v82_v61, %v90_v62  ;;  %v3502_v61 = vcombine.low %v130_v46, %v138_v47  ;;  %v19_v62 = vld [vmem:[%s5698_s0 + $0x28] sm:$0xff] }
  0x43   :  { %2815 = vmatmul.mubr.bf16.vlgmr.msra.gmra.mrb[0].mxu0 %v3390_v12  ;;  %2444 = vmatpush1.bf16.msra.mxu1 %v4150_v8  ;;  %v94_v8 = vld [vmem:[%s5698_s0 + $0x280] sm:$0xff] }
  0x44   :  { %2896 = vmatpush1.bf16.msra.mxu0 %v4153_v9  ;;  %2445 = vmatprep.subr.bf16.mxu1 %v4158_v16  ;;  %v102_v9 = vld [vmem:[%s5698_s0 + $0x2c0] sm:$0xff]  ;;  %v4206_v16 = vld [vmem:[%s5697_s1 + $0x194] ss:$8 sps:$4 sm:$0xff]  }
  0x45   :  { %2897 = vmatprep.subr.bf16.mxu0 %v4161_v17  ;;  %2372 = vmatprep.mubr.bf16.mxu1 %v3399_v18  ;;  %v98_v12 = vld [vmem:[%s5698_s0 + $0x2a0] sm:$0xff]  ;;  %v4209_v17 = vld [vmem:[%s5697_s1 + $0x594] ss:$8 sps:$4 sm:$0xff]   ;;  %v3463_v18 = vcombine.high %v94_v8, %v102_v9  ;;  %v3462_v27 = vcombine.low %v94_v8, %v102_v9  ;;  %v31_v9 = vld [vmem:[%s5698_s0 + $0x88] sm:$0xff] }
  0x46   :  { %2824 = vmatprep.mubr.bf16.mxu0 %v3407_v19  ;;  %v3471_v19 = vcombine.high %v98_v12, %v106_v13  ;;  %v4246_v8 = vld [vmem:[%s5697_s1 + $0x200] ss:$8 sps:$4 sm:$0xff]  }
  0x47   :  { %2446 = vmatpush1.bf16.msra.mxu1 %v4156_v20  ;;  %v4204_v20 = vld [vmem:[%s5697_s1 + $0x190] ss:$8 sps:$4 sm:$0xff]  }
  0x48   :  { %2898 = vmatpush1.bf16.msra.mxu0 %v4159_v21  ;;  %2447 = vmatprep.subr.bf16.mxu1 %v4164_v22  ;;  %v4207_v21 = vld [vmem:[%s5697_s1 + $0x590] ss:$8 sps:$4 sm:$0xff]   ;;  %v4212_v22 = vld [vmem:[%s5697_s1 + $0x1a4] ss:$8 sps:$4 sm:$0xff]  }
  0x49   :  { %2899 = vmatprep.subr.bf16.mxu0 %v4167_v23  ;;  %v4215_v23 = vld [vmem:[%s5697_s1 + $0x5a4] ss:$8 sps:$4 sm:$0xff]  }
  0x4a   :  { %2373 = vmatmul.mubr.bf16.gmra.mrb[4].mxu1 %v3398_v28  ;;  %v3470_v28 = vcombine.low %v98_v12, %v106_v13  ;;  %v35_v13 = vld [vmem:[%s5698_s0 + $0xa8] sm:$0xff] }
  0x4b   :  { %2825 = vmatmul.mubr.bf16.gmra.mrb[4].mxu0 %v3406_v29  ;;  %2448 = vmatpush1.bf16.msra.mxu1 %v4162_v24  ;;  %v4210_v24 = vld [vmem:[%s5697_s1 + $0x1a0] ss:$8 sps:$4 sm:$0xff]  }
  0x4c   :  { %2900 = vmatpush1.bf16.msra.mxu0 %v4165_v25  ;;  %2449 = vmatprep.subr.bf16.mxu1 %v4170_v32  ;;  %v4213_v25 = vld [vmem:[%s5697_s1 + $0x5a0] ss:$8 sps:$4 sm:$0xff]   ;;  %v4218_v32 = vld [vmem:[%s5697_s1 + $0x1b4] ss:$8 sps:$4 sm:$0xff]  }
  0x4d   :  { %2901 = vmatprep.subr.bf16.mxu0 %v4173_v33  ;;  %2382 = vmatprep.mubr.bf16.mxu1 %v3415_v34  ;;  %v118_v29 = vld [vmem:[%s5698_s0 + $0x340] sm:$0xff]  ;;  %v4221_v33 = vld [vmem:[%s5697_s1 + $0x5b4] ss:$8 sps:$4 sm:$0xff]  }
  0x4e   :  { %2834 = vmatprep.mubr.bf16.mxu0 %v3423_v35  ;;  %v3479_v34 = vcombine.high %v110_v26, %v118_v29  ;;  %v3487_v35 = vcombine.high %v114_v30, %v122_v31 }
  0x4f   :  { %2450 = vmatpush1.bf16.msra.mxu1 %v4168_v36  ;;  %v4216_v36 = vld [vmem:[%s5697_s1 + $0x1b0] ss:$8 sps:$4 sm:$0xff]  }
  0x50   :  { %2902 = vmatpush1.bf16.msra.mxu0 %v4171_v37  ;;  %2451 = vmatprep.subr.bf16.mxu1 %v4176_v38  ;;  %v4219_v37 = vld [vmem:[%s5697_s1 + $0x5b0] ss:$8 sps:$4 sm:$0xff]   ;;  %v4224_v38 = vld [vmem:[%s5697_s1 + $0x1c4] ss:$8 sps:$4 sm:$0xff]  }
  0x51   :  { %2903 = vmatprep.subr.bf16.mxu0 %v4179_v39  ;;  %v4227_v39 = vld [vmem:[%s5697_s1 + $0x5c4] ss:$8 sps:$4 sm:$0xff]  }
  0x52   :  { %2383 = vmatmul.mubr.bf16.gmra.mrb[8].mxu1 %v3414_v44  ;;  %v3478_v44 = vcombine.low %v110_v26, %v118_v29  ;;  %v59_v29 = vld [vmem:[%s5698_s0 + $0x168] sm:$0xff] }
  0x53   :  { %2835 = vmatmul.mubr.bf16.gmra.mrb[8].mxu0 %v3422_v45  ;;  %2452 = vmatpush1.bf16.msra.mxu1 %v4174_v40  ;;  %v4222_v40 = vld [vmem:[%s5697_s1 + $0x1c0] ss:$8 sps:$4 sm:$0xff]   ;;  %v3486_v45 = vcombine.low %v114_v30, %v122_v31 }
  0x54   :  { %2904 = vmatpush1.bf16.msra.mxu0 %v4177_v41  ;;  %2453 = vmatprep.subr.bf16.mxu1 %v4182_v48  ;;  %v4225_v41 = vld [vmem:[%s5697_s1 + $0x5c0] ss:$8 sps:$4 sm:$0xff]   ;;  %v4230_v48 = vld [vmem:[%s5697_s1 + $0x1d4] ss:$8 sps:$4 sm:$0xff]  }
  0x55   :  { %2905 = vmatprep.subr.bf16.mxu0 %v4185_v49  ;;  %2392 = vmatprep.mubr.bf16.mxu1 %v3431_v50  ;;  %v4233_v49 = vld [vmem:[%s5697_s1 + $0x5d4] ss:$8 sps:$4 sm:$0xff]   ;;  %v3495_v50 = vcombine.high %v126_v42, %v134_v43  ;;  %v4258_v30 = vld [vmem:[%s5697_s1 + $0x220] ss:$8 sps:$4 sm:$0xff]  }
  0x56   :  { %2844 = vmatprep.mubr.bf16.mxu0 %v3439_v51  ;;  %v3503_v51 = vcombine.high %v130_v46, %v138_v47  ;;  %v4261_v31 = vld [vmem:[%s5697_s1 + $0x620] ss:$8 sps:$4 sm:$0xff]  }
  0x57   :  { %2454 = vmatpush1.bf16.msra.mxu1 %v4180_v52  ;;  %v4228_v52 = vld [vmem:[%s5697_s1 + $0x1d0] ss:$8 sps:$4 sm:$0xff]   ;;  %v67_v46 = vld [vmem:[%s5698_s0 + $0x1a8] sm:$0xff] }
  0x58   :  { %2906 = vmatpush1.bf16.msra.mxu0 %v4183_v53  ;;  %2455 = vmatprep.subr.bf16.mxu1 %v4188_v54  ;;  %v4231_v53 = vld [vmem:[%s5697_s1 + $0x5d0] ss:$8 sps:$4 sm:$0xff]   ;;  %v4236_v54 = vld [vmem:[%s5697_s1 + $0x1e4] ss:$8 sps:$4 sm:$0xff]  }
  0x59   :  { %2907 = vmatprep.subr.bf16.mxu0 %v4191_v55  ;;  %v4239_v55 = vld [vmem:[%s5697_s1 + $0x5e4] ss:$8 sps:$4 sm:$0xff]  }
  0x5a   :  { %2393 = vmatmul.mubr.bf16.gmra.mrb[12].mxu1 %v3430_v59  ;;  %v23_v59 = vld [vmem:[%s5698_s0 + $0x48] sm:$0xff] }
  0x5b   :  { %2845 = vmatmul.mubr.bf16.gmra.mrb[12].mxu0 %v3438_v60  ;;  %2456 = vmatpush1.bf16.msra.mxu1 %v4186_v56  ;;  %v4234_v56 = vld [vmem:[%s5697_s1 + $0x1e0] ss:$8 sps:$4 sm:$0xff]   ;;  %v3494_v60 = vcombine.low %v126_v42, %v134_v43 }
  0x5c   :  { %2908 = vmatpush1.bf16.msra.mxu0 %v4189_v63  ;;  %2457 = vmatprep.subr.bf16.mxu1 %v4194_v0  ;;  %v27_v63 = vld [vmem:[%s5698_s0 + $0x68] sm:$0xff]  ;;  %v4242_v0 = vld [vmem:[%s5697_s1 + $0x1f4] ss:$8 sps:$4 sm:$0xff]  }
  0x5d   :  { %2909 = vmatprep.subr.bf16.mxu0 %v4197_v1  ;;  %2402 = vmatprep.mubr.bf16.mxu1 %v3447_v2  ;;  %v4245_v1 = vld [vmem:[%s5697_s1 + $0x5f4] ss:$8 sps:$4 sm:$0xff]   ;;  %v3385_v2 = vcombine.high %v15_v58, %v23_v59  ;;  %v3392_v12 = vcombine.low %v19_v62, %v27_v63  ;;  %v63_v42 = vld [vmem:[%s5698_s0 + $0x188] sm:$0xff] }
  0x5e   :  { %2854 = vmatprep.mubr.bf16.mxu0 %v3455_v3  ;;  %v3393_v3 = vcombine.high %v19_v62, %v27_v63  ;;  %v75_v47 = vld [vmem:[%s5698_s0 + $0x1e8] sm:$0xff] }
  0x5f   :  { %2458 = vmatpush1.bf16.msra.mxu1 %v4192_v4  ;;  %v4240_v4 = vld [vmem:[%s5697_s1 + $0x1f0] ss:$8 sps:$4 sm:$0xff]   ;;  %v83_v62 = vld [vmem:[%s5698_s0 + $0x228] sm:$0xff] }
  0x60   :  { %2910 = vmatpush1.bf16.msra.mxu0 %v4195_v5  ;;  %2459 = vmatprep.subr.bf16.mxu1 %v4200_v6  ;;  %v4243_v5 = vld [vmem:[%s5697_s1 + $0x5f0] ss:$8 sps:$4 sm:$0xff]   ;;  %v4248_v6 = vld [vmem:[%s5697_s1 + $0x204] ss:$8 sps:$4 sm:$0xff]  }
  0x61   :  { %2911 = vmatprep.subr.bf16.mxu0 %v4203_v7  ;;  %v4251_v7 = vld [vmem:[%s5697_s1 + $0x604] ss:$8 sps:$4 sm:$0xff]  }
  0x62   :  { %2403 = vmatmul.mubr.bf16.gmra.mrb[16].mxu1 %v3446_v10  ;;  %v39_v10 = vld [vmem:[%s5698_s0 + $0xc8] sm:$0xff] }
  0x63   :  { %2855 = vmatmul.mubr.bf16.gmra.mrb[16].mxu0 %v3454_v11  ;;  %2460 = vmatpush1.bf16.msra.mxu1 %v4198_v14  ;;  %v3384_v11 = vcombine.low %v15_v58, %v23_v59  ;;  %v43_v14 = vld [vmem:[%s5698_s0 + $0xe8] sm:$0xff]  ;;  %v3400_v26 = vcombine.low %v31_v9, %v39_v10 }
  0x64   :  { %2912 = vmatpush1.bf16.msra.mxu0 %v4201_v15  ;;  %2461 = vmatprep.subr.bf16.mxu1 %v4206_v16  ;;  %v4249_v15 = vld [vmem:[%s5697_s1 + $0x600] ss:$8 sps:$4 sm:$0xff]   ;;  %v4254_v16 = vld [vmem:[%s5697_s1 + $0x214] ss:$8 sps:$4 sm:$0xff]  }
  0x65   :  { %2913 = vmatprep.subr.bf16.mxu0 %v4209_v17  ;;  %2412 = vmatprep.mubr.bf16.mxu1 %v3463_v18  ;;  %v4257_v17 = vld [vmem:[%s5697_s1 + $0x614] ss:$8 sps:$4 sm:$0xff]   ;;  %v3401_v18 = vcombine.high %v31_v9, %v39_v10  ;;  %v79_v58 = vld [vmem:[%s5698_s0 + $0x208] sm:$0xff] }
  0x66   :  { %2864 = vmatprep.mubr.bf16.mxu0 %v3471_v19  ;;  %v3409_v19 = vcombine.high %v35_v13, %v43_v14  ;;  %v87_v59 = vld [vmem:[%s5698_s0 + $0x248] sm:$0xff] }
  0x67   :  { %2462 = vmatpush1.bf16.msra.mxu1 %v4204_v20  ;;  %v4252_v20 = vld [vmem:[%s5697_s1 + $0x210] ss:$8 sps:$4 sm:$0xff]   ;;  %v91_v63 = vld [vmem:[%s5698_s0 + $0x268] sm:$0xff] }
  0x68   :  { %2914 = vmatpush1.bf16.msra.mxu0 %v4207_v21  ;;  %2463 = vmatprep.subr.bf16.mxu1 %v4212_v22  ;;  %v4255_v21 = vld [vmem:[%s5697_s1 + $0x610] ss:$8 sps:$4 sm:$0xff]   ;;  %v4260_v22 = vld [vmem:[%s5697_s1 + $0x224] ss:$8 sps:$4 sm:$0xff]   ;;  %v4297_v9 = vld [vmem:[%s5697_s1 + $0x680] ss:$8 sps:$4 sm:$0xff]  }
  0x69   :  { %2915 = vmatprep.subr.bf16.mxu0 %v4215_v23  ;;  %v4263_v23 = vld [vmem:[%s5697_s1 + $0x624] ss:$8 sps:$4 sm:$0xff]  }
  0x6a   :  { %2413 = vmatmul.mubr.bf16.gmra.mrb[20].mxu1 %v3462_v27  ;;  %v3408_v27 = vcombine.low %v35_v13, %v43_v14  ;;  %v95_v10 = vld [vmem:[%s5698_s0 + $0x288] sm:$0xff]  ;;  %v3456_v13 = vcombine.low %v83_v62, %v91_v63 }
  0x6b   :  { %2865 = vmatmul.mubr.bf16.gmra.mrb[20].mxu0 %v3470_v28  ;;  %2464 = vmatpush1.bf16.msra.mxu1 %v4210_v24  ;;  %v47_v24 = vld [vmem:[%s5698_s0 + $0x108] sm:$0xff] }
  0x6c   :  { %2916 = vmatpush1.bf16.msra.mxu0 %v4213_v25  ;;  %2465 = vmatprep.subr.bf16.mxu1 %v4218_v32  ;;  %v55_v25 = vld [vmem:[%s5698_s0 + $0x148] sm:$0xff]  ;;  %v4266_v32 = vld [vmem:[%s5697_s1 + $0x234] ss:$8 sps:$4 sm:$0xff]  }
  0x6d   :  { %2917 = vmatprep.subr.bf16.mxu0 %v4221_v33  ;;  %2422 = vmatprep.mubr.bf16.mxu1 %v3479_v34  ;;  %v51_v28 = vld [vmem:[%s5698_s0 + $0x128] sm:$0xff]  ;;  %v4269_v33 = vld [vmem:[%s5697_s1 + $0x634] ss:$8 sps:$4 sm:$0xff]   ;;  %v3417_v34 = vcombine.high %v47_v24, %v55_v25  ;;  %v3416_v43 = vcombine.low %v47_v24, %v55_v25 }
  0x6e   :  { %2874 = vmatprep.mubr.bf16.mxu0 %v3487_v35  ;;  %v3425_v35 = vcombine.high %v51_v28, %v59_v29  ;;  %v99_v14 = vld [vmem:[%s5698_s0 + $0x2a8] sm:$0xff] }
  0x6f   :  { %2466 = vmatpush1.bf16.msra.mxu1 %v4216_v36  ;;  %v4264_v36 = vld [vmem:[%s5697_s1 + $0x230] ss:$8 sps:$4 sm:$0xff]   ;;  %v4306_v24 = vld [vmem:[%s5697_s1 + $0x2a0] ss:$8 sps:$4 sm:$0xff]  }
  0x70   :  { %2918 = vmatpush1.bf16.msra.mxu0 %v4219_v37  ;;  %2467 = vmatprep.subr.bf16.mxu1 %v4224_v38  ;;  %v4267_v37 = vld [vmem:[%s5697_s1 + $0x630] ss:$8 sps:$4 sm:$0xff]   ;;  %v4272_v38 = vld [vmem:[%s5697_s1 + $0x244] ss:$8 sps:$4 sm:$0xff]  }
  0x71   :  { %2919 = vmatprep.subr.bf16.mxu0 %v4227_v39  ;;  %v4275_v39 = vld [vmem:[%s5697_s1 + $0x644] ss:$8 sps:$4 sm:$0xff]  }
  0x72   :  { %2423 = vmatmul.mubr.bf16.gmra.mrb[24].mxu1 %v3478_v44  ;;  %v3424_v44 = vcombine.low %v51_v28, %v59_v29  ;;  %v111_v25 = vld [vmem:[%s5698_s0 + $0x308] sm:$0xff] }
  0x73   :  { %2875 = vmatmul.mubr.bf16.gmra.mrb[24].mxu0 %v3486_v45  ;;  %2468 = vmatpush1.bf16.msra.mxu1 %v4222_v40  ;;  %v4270_v40 = vld [vmem:[%s5697_s1 + $0x240] ss:$8 sps:$4 sm:$0xff]  }
  0x74   :  { %2920 = vmatpush1.bf16.msra.mxu0 %v4225_v41  ;;  %2469 = vmatprep.subr.bf16.mxu1 %v4230_v48  ;;  %v4273_v41 = vld [vmem:[%s5697_s1 + $0x640] ss:$8 sps:$4 sm:$0xff]   ;;  %v4278_v48 = vld [vmem:[%s5697_s1 + $0x254] ss:$8 sps:$4 sm:$0xff]  }
  0x75   :  { %2921 = vmatprep.subr.bf16.mxu0 %v4233_v49  ;;  %2432 = vmatprep.mubr.bf16.mxu1 %v3495_v50  ;;  %v71_v45 = vld [vmem:[%s5698_s0 + $0x1c8] sm:$0xff]  ;;  %v4281_v49 = vld [vmem:[%s5697_s1 + $0x654] ss:$8 sps:$4 sm:$0xff]  }
  0x76   :  { %2884 = vmatprep.mubr.bf16.mxu0 %v3503_v51  ;;  %v3433_v50 = vcombine.high %v63_v42, %v71_v45  ;;  %v3441_v51 = vcombine.high %v67_v46, %v75_v47  ;;  %v115_v29 = vld [vmem:[%s5698_s0 + $0x328] sm:$0xff] }
  0x77   :  { %2470 = vmatpush1.bf16.msra.mxu1 %v4228_v52  ;;  %v4276_v52 = vld [vmem:[%s5697_s1 + $0x250] ss:$8 sps:$4 sm:$0xff]  }
  0x78   :  { %2922 = vmatpush1.bf16.msra.mxu0 %v4231_v53  ;;  %2471 = vmatprep.subr.bf16.mxu1 %v4236_v54  ;;  %v4279_v53 = vld [vmem:[%s5697_s1 + $0x650] ss:$8 sps:$4 sm:$0xff]   ;;  %v4284_v54 = vld [vmem:[%s5697_s1 + $0x264] ss:$8 sps:$4 sm:$0xff]  }
  0x79   :  { %2923 = vmatprep.subr.bf16.mxu0 %v4239_v55  ;;  %v4287_v55 = vld [vmem:[%s5697_s1 + $0x664] ss:$8 sps:$4 sm:$0xff]  }
  0x7a   :  { %2433 = vmatmul.mubr.bf16.gmra.mrb[28].mxu1 %v3494_v60  ;;  %v3432_v60 = vcombine.low %v63_v42, %v71_v45  ;;  %v139_v45 = vld [vmem:[%s5698_s0 + $0x3e8] sm:$0xff] }
  0x7b   :  { %2885 = vmatmul.mubr.bf16.gmra.mrb[28].mxu0 %v3502_v61  ;;  %2472 = vmatpush1.bf16.msra.mxu1 %v4234_v56  ;;  %v4282_v56 = vld [vmem:[%s5697_s1 + $0x260] ss:$8 sps:$4 sm:$0xff]   ;;  %v3440_v61 = vcombine.low %v67_v46, %v75_v47 }
  0x7c   :  { %2924 = vmatpush1.bf16.msra.mxu0 %v4237_v57  ;;  %2473 = vmatprep.subr.bf16.mxu1 %v4242_v0  ;;  %v4285_v57 = vld [vmem:[%s5697_s1 + $0x660] ss:$8 sps:$4 sm:$0xff]   ;;  %v4290_v0 = vld [vmem:[%s5697_s1 + $0x274] ss:$8 sps:$4 sm:$0xff]  }
  0x7d   :  { %2925 = vmatprep.subr.bf16.mxu0 %v4245_v1  ;;  %2475 = vmatprep.mubr.bf16.mxu1 %v3385_v2  ;;  %v4293_v1 = vld [vmem:[%s5697_s1 + $0x674] ss:$8 sps:$4 sm:$0xff]   ;;  %v3449_v2 = vcombine.high %v79_v58, %v87_v59  ;;  %v4318_v46 = vld [vmem:[%s5697_s1 + $0x2c0] ss:$8 sps:$4 sm:$0xff]  }
  0x7e   :  { %2927 = vmatprep.mubr.bf16.mxu0 %v3393_v3  ;;  %v3457_v3 = vcombine.high %v83_v62, %v91_v63  ;;  %v4321_v47 = vld [vmem:[%s5697_s1 + $0x6c0] ss:$8 sps:$4 sm:$0xff]   ;;  %v20_v62 = vld [vmem:[%s5698_s0 + $0x30] sm:$0xff] }
  0x7f   :  { %2474 = vmatpush1.bf16.msra.mxu1 %v4240_v4  ;;  %v4288_v4 = vld [vmem:[%s5697_s1 + $0x270] ss:$8 sps:$4 sm:$0xff]  }
  0x80   :  { %2926 = vmatpush1.bf16.msra.mxu0 %v4243_v5  ;;  %2556 = vmatprep.subr.bf16.mxu1 %v4248_v6  ;;  %v4291_v5 = vld [vmem:[%s5697_s1 + $0x670] ss:$8 sps:$4 sm:$0xff]   ;;  %v4296_v6 = vld [vmem:[%s5697_s1 + $0x284] ss:$8 sps:$4 sm:$0xff]  }
  0x81   :  { %3008 = vmatprep.subr.bf16.mxu0 %v4251_v7  ;;  %v4299_v7 = vld [vmem:[%s5697_s1 + $0x684] ss:$8 sps:$4 sm:$0xff]   ;;  %v28_v63 = vld [vmem:[%s5698_s0 + $0x70] sm:$0xff] }
  0x82   :  { %2476 = vmatmul.mubr.bf16.vlgmr.msra.gmra.mrb[0].mxu1 %v3384_v11  ;;  %v103_v11 = vld [vmem:[%s5698_s0 + $0x2c8] sm:$0xff] }
  0x83   :  { %2928 = vmatmul.mubr.bf16.vlgmr.msra.gmra.mrb[0].mxu0 %v3392_v12  ;;  %2557 = vmatpush1.bf16.msra.mxu1 %v4246_v8  ;;  %v4294_v8 = vld [vmem:[%s5697_s1 + $0x280] ss:$8 sps:$4 sm:$0xff]   ;;  %v3448_v12 = vcombine.low %v79_v58, %v87_v59  ;;  %v16_v58 = vld [vmem:[%s5698_s0 + $0x10] sm:$0xff] }
  0x84   :  { %3009 = vmatpush1.bf16.msra.mxu0 %v4249_v15  ;;  %2558 = vmatprep.subr.bf16.mxu1 %v4254_v16  ;;  %v107_v15 = vld [vmem:[%s5698_s0 + $0x2e8] sm:$0xff]  ;;  %v4302_v16 = vld [vmem:[%s5697_s1 + $0x294] ss:$8 sps:$4 sm:$0xff]  }
  0x85   :  { %3010 = vmatprep.subr.bf16.mxu0 %v4257_v17  ;;  %2485 = vmatprep.mubr.bf16.mxu1 %v3401_v18  ;;  %v4305_v17 = vld [vmem:[%s5697_s1 + $0x694] ss:$8 sps:$4 sm:$0xff]   ;;  %v3465_v18 = vcombine.high %v95_v10, %v103_v11  ;;  %v3472_v28 = vcombine.low %v99_v14, %v107_v15 }
  0x86   :  { %2937 = vmatprep.mubr.bf16.mxu0 %v3409_v19  ;;  %v3473_v19 = vcombine.high %v99_v14, %v107_v15  ;;  %v36_v14 = vld [vmem:[%s5698_s0 + $0xb0] sm:$0xff] }
  0x87   :  { %2559 = vmatpush1.bf16.msra.mxu1 %v4252_v20  ;;  %v4300_v20 = vld [vmem:[%s5697_s1 + $0x290] ss:$8 sps:$4 sm:$0xff]  }
  0x88   :  { %3011 = vmatpush1.bf16.msra.mxu0 %v4255_v21  ;;  %2560 = vmatprep.subr.bf16.mxu1 %v4260_v22  ;;  %v4303_v21 = vld [vmem:[%s5697_s1 + $0x690] ss:$8 sps:$4 sm:$0xff]   ;;  %v4308_v22 = vld [vmem:[%s5697_s1 + $0x2a4] ss:$8 sps:$4 sm:$0xff]  }
  0x89   :  { %3012 = vmatprep.subr.bf16.mxu0 %v4263_v23  ;;  %v4311_v23 = vld [vmem:[%s5697_s1 + $0x6a4] ss:$8 sps:$4 sm:$0xff]   ;;  %v44_v15 = vld [vmem:[%s5698_s0 + $0xf0] sm:$0xff] }
  0x8a   :  { %2486 = vmatmul.mubr.bf16.gmra.mrb[4].mxu1 %v3400_v26  ;;  %v119_v26 = vld [vmem:[%s5698_s0 + $0x348] sm:$0xff] }
  0x8b   :  { %2938 = vmatmul.mubr.bf16.gmra.mrb[4].mxu0 %v3408_v27  ;;  %2561 = vmatpush1.bf16.msra.mxu1 %v4258_v30  ;;  %v3464_v27 = vcombine.low %v95_v10, %v103_v11  ;;  %v123_v30 = vld [vmem:[%s5698_s0 + $0x368] sm:$0xff]  ;;  %v3480_v42 = vcombine.low %v111_v25, %v119_v26  ;;  %v32_v10 = vld [vmem:[%s5698_s0 + $0x90] sm:$0xff] }
  0x8c   :  { %3013 = vmatpush1.bf16.msra.mxu0 %v4261_v31  ;;  %2562 = vmatprep.subr.bf16.mxu1 %v4266_v32  ;;  %v4309_v31 = vld [vmem:[%s5697_s1 + $0x6a0] ss:$8 sps:$4 sm:$0xff]   ;;  %v4314_v32 = vld [vmem:[%s5697_s1 + $0x2b4] ss:$8 sps:$4 sm:$0xff]  }
  0x8d   :  { %3014 = vmatprep.subr.bf16.mxu0 %v4269_v33  ;;  %2495 = vmatprep.mubr.bf16.mxu1 %v3417_v34  ;;  %v4317_v33 = vld [vmem:[%s5697_s1 + $0x6b4] ss:$8 sps:$4 sm:$0xff]   ;;  %v3481_v34 = vcombine.high %v111_v25, %v119_v26  ;;  %v4357_v25 = vld [vmem:[%s5697_s1 + $0x720] ss:$8 sps:$4 sm:$0xff]  }
  0x8e   :  { %2947 = vmatprep.mubr.bf16.mxu0 %v3425_v35  ;;  %v3489_v35 = vcombine.high %v115_v29, %v123_v30  ;;  %v40_v11 = vld [vmem:[%s5698_s0 + $0xd0] sm:$0xff] }
  0x8f   :  { %2563 = vmatpush1.bf16.msra.mxu1 %v4264_v36  ;;  %v4312_v36 = vld [vmem:[%s5697_s1 + $0x2b0] ss:$8 sps:$4 sm:$0xff]  }
  0x90   :  { %3015 = vmatpush1.bf16.msra.mxu0 %v4267_v37  ;;  %2564 = vmatprep.subr.bf16.mxu1 %v4272_v38  ;;  %v4315_v37 = vld [vmem:[%s5697_s1 + $0x6b0] ss:$8 sps:$4 sm:$0xff]   ;;  %v4320_v38 = vld [vmem:[%s5697_s1 + $0x2c4] ss:$8 sps:$4 sm:$0xff]  }
  0x91   :  { %3016 = vmatprep.subr.bf16.mxu0 %v4275_v39  ;;  %v4323_v39 = vld [vmem:[%s5697_s1 + $0x6c4] ss:$8 sps:$4 sm:$0xff]   ;;  %v48_v26 = vld [vmem:[%s5698_s0 + $0x110] sm:$0xff] }
  0x92   :  { %2496 = vmatmul.mubr.bf16.gmra.mrb[8].mxu1 %v3416_v43  ;;  %v3488_v43 = vcombine.low %v115_v29, %v123_v30  ;;  %v3410_v29 = vcombine.low %v36_v14, %v44_v15  ;;  %v52_v30 = vld [vmem:[%s5698_s0 + $0x130] sm:$0xff] }
  0x93   :  { %2948 = vmatmul.mubr.bf16.gmra.mrb[8].mxu0 %v3424_v44  ;;  %2565 = vmatpush1.bf16.msra.mxu1 %v4270_v40  ;;  %v127_v40 = vld [vmem:[%s5698_s0 + $0x388] sm:$0xff] }
  0x94   :  { %3017 = vmatpush1.bf16.msra.mxu0 %v4273_v41  ;;  %2566 = vmatprep.subr.bf16.mxu1 %v4278_v48  ;;  %v135_v41 = vld [vmem:[%s5698_s0 + $0x3c8] sm:$0xff]  ;;  %v4326_v48 = vld [vmem:[%s5697_s1 + $0x2d4] ss:$8 sps:$4 sm:$0xff]  }
  0x95   :  { %3018 = vmatprep.subr.bf16.mxu0 %v4281_v49  ;;  %2505 = vmatprep.mubr.bf16.mxu1 %v3433_v50  ;;  %v131_v44 = vld [vmem:[%s5698_s0 + $0x3a8] sm:$0xff]  ;;  %v4329_v49 = vld [vmem:[%s5697_s1 + $0x6d4] ss:$8 sps:$4 sm:$0xff]   ;;  %v3497_v50 = vcombine.high %v127_v40, %v135_v41  ;;  %v3496_v59 = vcombine.low %v127_v40, %v135_v41 }
  0x96   :  { %2957 = vmatprep.mubr.bf16.mxu0 %v3441_v51  ;;  %v3505_v51 = vcombine.high %v131_v44, %v139_v45  ;;  %v64_v40 = vld [vmem:[%s5698_s0 + $0x190] sm:$0xff] }
  0x97   :  { %2567 = vmatpush1.bf16.msra.mxu1 %v4276_v52  ;;  %v4324_v52 = vld [vmem:[%s5697_s1 + $0x2d0] ss:$8 sps:$4 sm:$0xff]  }
  0x98   :  { %3019 = vmatpush1.bf16.msra.mxu0 %v4279_v53  ;;  %2568 = vmatprep.subr.bf16.mxu1 %v4284_v54  ;;  %v4327_v53 = vld [vmem:[%s5697_s1 + $0x6d0] ss:$8 sps:$4 sm:$0xff]   ;;  %v4332_v54 = vld [vmem:[%s5697_s1 + $0x2e4] ss:$8 sps:$4 sm:$0xff]  }
  0x99   :  { %3020 = vmatprep.subr.bf16.mxu0 %v4287_v55  ;;  %v4335_v55 = vld [vmem:[%s5697_s1 + $0x6e4] ss:$8 sps:$4 sm:$0xff]  }
  0x9a   :  { %2506 = vmatmul.mubr.bf16.gmra.mrb[12].mxu1 %v3432_v60  ;;  %v3504_v60 = vcombine.low %v131_v44, %v139_v45  ;;  %v68_v44 = vld [vmem:[%s5698_s0 + $0x1b0] sm:$0xff] }
  0x9b   :  { %2958 = vmatmul.mubr.bf16.gmra.mrb[12].mxu0 %v3440_v61  ;;  %2569 = vmatpush1.bf16.msra.mxu1 %v4282_v56  ;;  %v4330_v56 = vld [vmem:[%s5697_s1 + $0x2e0] ss:$8 sps:$4 sm:$0xff]   ;;  %v24_v61 = vld [vmem:[%s5698_s0 + $0x50] sm:$0xff] }
  0x9c   :  { %3021 = vmatpush1.bf16.msra.mxu0 %v4285_v57  ;;  %2570 = vmatprep.subr.bf16.mxu1 %v4290_v0  ;;  %v4333_v57 = vld [vmem:[%s5697_s1 + $0x6e0] ss:$8 sps:$4 sm:$0xff]   ;;  %v4338_v0 = vld [vmem:[%s5697_s1 + $0x2f4] ss:$8 sps:$4 sm:$0xff]  }
  0x9d   :  { %3022 = vmatprep.subr.bf16.mxu0 %v4293_v1  ;;  %2515 = vmatprep.mubr.bf16.mxu1 %v3449_v2  ;;  %v4341_v1 = vld [vmem:[%s5697_s1 + $0x6f4] ss:$8 sps:$4 sm:$0xff]   ;;  %v3387_v2 = vcombine.high %v16_v58, %v24_v61 }
  0x9e   :  { %2967 = vmatprep.mubr.bf16.mxu0 %v3457_v3  ;;  %v3395_v3 = vcombine.high %v20_v62, %v28_v63  ;;  %v76_v45 = vld [vmem:[%s5698_s0 + $0x1f0] sm:$0xff] }
  0x9f   :  { %2571 = vmatpush1.bf16.msra.mxu1 %v4288_v4  ;;  %v4336_v4 = vld [vmem:[%s5697_s1 + $0x2f0] ss:$8 sps:$4 sm:$0xff]  }
  0xa0   :  { %3023 = vmatpush1.bf16.msra.mxu0 %v4291_v5  ;;  %2572 = vmatprep.subr.bf16.mxu1 %v4296_v6  ;;  %v4339_v5 = vld [vmem:[%s5697_s1 + $0x6f0] ss:$8 sps:$4 sm:$0xff]   ;;  %v4344_v6 = vld [vmem:[%s5697_s1 + $0x304] ss:$8 sps:$4 sm:$0xff]  }
  0xa1   :  { %3024 = vmatprep.subr.bf16.mxu0 %v4299_v7  ;;  %v4347_v7 = vld [vmem:[%s5697_s1 + $0x704] ss:$8 sps:$4 sm:$0xff]  }
  0xa2   :  { %2516 = vmatmul.mubr.bf16.gmra.mrb[16].mxu1 %v3448_v12  ;;  %v3386_v12 = vcombine.low %v16_v58, %v24_v61  ;;  %v3442_v58 = vcombine.low %v68_v44, %v76_v45  ;;  %v92_v61 = vld [vmem:[%s5698_s0 + $0x270] sm:$0xff] }
  0xa3   :  { %2968 = vmatmul.mubr.bf16.gmra.mrb[16].mxu0 %v3456_v13  ;;  %2573 = vmatpush1.bf16.msra.mxu1 %v4294_v8  ;;  %v4342_v8 = vld [vmem:[%s5697_s1 + $0x300] ss:$8 sps:$4 sm:$0xff]   ;;  %v3394_v13 = vcombine.low %v20_v62, %v28_v63 }
  0xa4   :  { %3025 = vmatpush1.bf16.msra.mxu0 %v4297_v9  ;;  %2574 = vmatprep.subr.bf16.mxu1 %v4302_v16  ;;  %v4345_v9 = vld [vmem:[%s5697_s1 + $0x700] ss:$8 sps:$4 sm:$0xff]   ;;  %v4350_v16 = vld [vmem:[%s5697_s1 + $0x314] ss:$8 sps:$4 sm:$0xff]  }
  0xa5   :  { %3026 = vmatprep.subr.bf16.mxu0 %v4305_v17  ;;  %2525 = vmatprep.mubr.bf16.mxu1 %v3465_v18  ;;  %v4353_v17 = vld [vmem:[%s5697_s1 + $0x714] ss:$8 sps:$4 sm:$0xff]   ;;  %v3403_v18 = vcombine.high %v32_v10, %v40_v11  ;;  %v4378_v62 = vld [vmem:[%s5697_s1 + $0x360] ss:$8 sps:$4 sm:$0xff]  }
  0xa6   :  { %2977 = vmatprep.mubr.bf16.mxu0 %v3473_v19  ;;  %v3411_v19 = vcombine.high %v36_v14, %v44_v15  ;;  %v4381_v63 = vld [vmem:[%s5697_s1 + $0x760] ss:$8 sps:$4 sm:$0xff]  }
  0xa7   :  { %2575 = vmatpush1.bf16.msra.mxu1 %v4300_v20  ;;  %v4348_v20 = vld [vmem:[%s5697_s1 + $0x310] ss:$8 sps:$4 sm:$0xff]   ;;  %v4390_v14 = vld [vmem:[%s5697_s1 + $0x380] ss:$8 sps:$4 sm:$0xff]  }
  0xa8   :  { %3027 = vmatpush1.bf16.msra.mxu0 %v4303_v21  ;;  %2576 = vmatprep.subr.bf16.mxu1 %v4308_v22  ;;  %v4351_v21 = vld [vmem:[%s5697_s1 + $0x710] ss:$8 sps:$4 sm:$0xff]   ;;  %v4356_v22 = vld [vmem:[%s5697_s1 + $0x324] ss:$8 sps:$4 sm:$0xff]   ;;  %v4393_v15 = vld [vmem:[%s5697_s1 + $0x780] ss:$8 sps:$4 sm:$0xff]  }
  0xa9   :  { %3028 = vmatprep.subr.bf16.mxu0 %v4311_v23  ;;  %v4359_v23 = vld [vmem:[%s5697_s1 + $0x724] ss:$8 sps:$4 sm:$0xff]  }
  0xaa   :  { %2526 = vmatmul.mubr.bf16.gmra.mrb[20].mxu1 %v3464_v27  ;;  %v56_v27 = vld [vmem:[%s5698_s0 + $0x150] sm:$0xff] }
  0xab   :  { %2978 = vmatmul.mubr.bf16.gmra.mrb[20].mxu0 %v3472_v28  ;;  %2577 = vmatpush1.bf16.msra.mxu1 %v4306_v24  ;;  %v4354_v24 = vld [vmem:[%s5697_s1 + $0x320] ss:$8 sps:$4 sm:$0xff]   ;;  %v3402_v28 = vcombine.low %v32_v10, %v40_v11  ;;  %v3418_v41 = vcombine.low %v48_v26, %v56_v27  ;;  %v104_v11 = vld [vmem:[%s5698_s0 + $0x2d0] sm:$0xff] }
  0xac   :  { %3029 = vmatpush1.bf16.msra.mxu0 %v4309_v31  ;;  %2578 = vmatprep.subr.bf16.mxu1 %v4314_v32  ;;  %v60_v31 = vld [vmem:[%s5698_s0 + $0x170] sm:$0xff] }
  0xad   :  { %3030 = vmatprep.subr.bf16.mxu0 %v4317_v33  ;;  %2535 = vmatprep.mubr.bf16.mxu1 %v3481_v34  ;;  %v4362_v32 = vld [vmem:[%s5697_s1 + $0x334] ss:$8 sps:$4 sm:$0xff]   ;;  %v3419_v34 = vcombine.high %v48_v26, %v56_v27 }
  0xae   :  { %2987 = vmatprep.mubr.bf16.mxu0 %v3489_v35  ;;  %v4365_v33 = vld [vmem:[%s5697_s1 + $0x734] ss:$8 sps:$4 sm:$0xff]   ;;  %v3427_v35 = vcombine.high %v52_v30, %v60_v31 }
  0xaf   :  { %2579 = vmatpush1.bf16.msra.mxu1 %v4312_v36  ;;  %v4360_v36 = vld [vmem:[%s5697_s1 + $0x330] ss:$8 sps:$4 sm:$0xff]  }
  0xb0   :  { %3031 = vmatpush1.bf16.msra.mxu0 %v4315_v37  ;;  %2580 = vmatprep.subr.bf16.mxu1 %v4320_v38  ;;  %v4363_v37 = vld [vmem:[%s5697_s1 + $0x730] ss:$8 sps:$4 sm:$0xff]   ;;  %v4368_v38 = vld [vmem:[%s5697_s1 + $0x344] ss:$8 sps:$4 sm:$0xff]  }
  0xb1   :  { %3032 = vmatprep.subr.bf16.mxu0 %v4323_v39  ;;  %v4371_v39 = vld [vmem:[%s5697_s1 + $0x744] ss:$8 sps:$4 sm:$0xff]   ;;  %v120_v27 = vld [vmem:[%s5698_s0 + $0x350] sm:$0xff] }
  0xb2   :  { %2536 = vmatmul.mubr.bf16.gmra.mrb[24].mxu1 %v3480_v42  ;;  %v3426_v42 = vcombine.low %v52_v30, %v60_v31  ;;  %v4402_v30 = vld [vmem:[%s5697_s1 + $0x3a0] ss:$8 sps:$4 sm:$0xff]  }
  0xb3   :  { %2988 = vmatmul.mubr.bf16.gmra.mrb[24].mxu0 %v3488_v43  ;;  %2581 = vmatpush1.bf16.msra.mxu1 %v4318_v46  ;;  %v72_v43 = vld [vmem:[%s5698_s0 + $0x1d0] sm:$0xff]  ;;  %v4366_v46 = vld [vmem:[%s5697_s1 + $0x340] ss:$8 sps:$4 sm:$0xff]  }
  0xb4   :  { %3033 = vmatpush1.bf16.msra.mxu0 %v4321_v47  ;;  %2582 = vmatprep.subr.bf16.mxu1 %v4326_v48  ;;  %v4369_v47 = vld [vmem:[%s5697_s1 + $0x740] ss:$8 sps:$4 sm:$0xff]   ;;  %v4374_v48 = vld [vmem:[%s5697_s1 + $0x354] ss:$8 sps:$4 sm:$0xff]  }
  0xb5   :  { %3034 = vmatprep.subr.bf16.mxu0 %v4329_v49  ;;  %2545 = vmatprep.mubr.bf16.mxu1 %v3497_v50  ;;  %v4377_v49 = vld [vmem:[%s5697_s1 + $0x754] ss:$8 sps:$4 sm:$0xff]   ;;  %v3435_v50 = vcombine.high %v64_v40, %v72_v43  ;;  %v4405_v31 = vld [vmem:[%s5697_s1 + $0x7a0] ss:$8 sps:$4 sm:$0xff]  }
  0xb6   :  { %2997 = vmatprep.mubr.bf16.mxu0 %v3505_v51  ;;  %v3443_v51 = vcombine.high %v68_v44, %v76_v45  ;;  %v132_v44 = vld [vmem:[%s5698_s0 + $0x3b0] sm:$0xff] }
  0xb7   :  { %2583 = vmatpush1.bf16.msra.mxu1 %v4324_v52  ;;  %v4372_v52 = vld [vmem:[%s5697_s1 + $0x350] ss:$8 sps:$4 sm:$0xff]  }
  0xb8   :  { %3035 = vmatpush1.bf16.msra.mxu0 %v4327_v53  ;;  %2584 = vmatprep.subr.bf16.mxu1 %v4332_v54  ;;  %v4375_v53 = vld [vmem:[%s5697_s1 + $0x750] ss:$8 sps:$4 sm:$0xff]   ;;  %v4380_v54 = vld [vmem:[%s5697_s1 + $0x364] ss:$8 sps:$4 sm:$0xff]  }
  0xb9   :  { %3036 = vmatprep.subr.bf16.mxu0 %v4335_v55  ;;  %v4383_v55 = vld [vmem:[%s5697_s1 + $0x764] ss:$8 sps:$4 sm:$0xff]   ;;  %v140_v45 = vld [vmem:[%s5698_s0 + $0x3f0] sm:$0xff] }
  0xba   :  { %2546 = vmatmul.mubr.bf16.gmra.mrb[28].mxu1 %v3496_v59  ;;  %v88_v59 = vld [vmem:[%s5698_s0 + $0x250] sm:$0xff] }
  0xbb   :  { %2998 = vmatmul.mubr.bf16.gmra.mrb[28].mxu0 %v3504_v60  ;;  %2585 = vmatpush1.bf16.msra.mxu1 %v4330_v56  ;;  %v80_v56 = vld [vmem:[%s5698_s0 + $0x210] sm:$0xff] }
  0xbc   :  { %3037 = vmatpush1.bf16.msra.mxu0 %v4333_v57  ;;  %2586 = vmatprep.subr.bf16.mxu1 %v4338_v0  ;;  %v3434_v57 = vcombine.low %v64_v40, %v72_v43  ;;  %v84_v60 = vld [vmem:[%s5698_s0 + $0x230] sm:$0xff] }
  0xbd   :  { %3038 = vmatprep.subr.bf16.mxu0 %v4341_v1  ;;  %2588 = vmatprep.mubr.bf16.mxu1 %v3387_v2  ;;  %v4386_v0 = vld [vmem:[%s5697_s1 + $0x374] ss:$8 sps:$4 sm:$0xff]   ;;  %v3451_v2 = vcombine.high %v80_v56, %v88_v59  ;;  %v3458_v10 = vcombine.low %v84_v60, %v92_v61 }
  0xbe   :  { %3040 = vmatprep.mubr.bf16.mxu0 %v3395_v3  ;;  %v4389_v1 = vld [vmem:[%s5697_s1 + $0x774] ss:$8 sps:$4 sm:$0xff]   ;;  %v3459_v3 = vcombine.high %v84_v60, %v92_v61 }
  0xbf   :  { %2587 = vmatpush1.bf16.msra.mxu1 %v4336_v4  ;;  %v4384_v4 = vld [vmem:[%s5697_s1 + $0x370] ss:$8 sps:$4 sm:$0xff]  }
  0xc0   :  { %3039 = vmatpush1.bf16.msra.mxu0 %v4339_v5  ;;  %2669 = vmatprep.subr.bf16.mxu1 %v4344_v6  ;;  %v4387_v5 = vld [vmem:[%s5697_s1 + $0x770] ss:$8 sps:$4 sm:$0xff]   ;;  %v4392_v6 = vld [vmem:[%s5697_s1 + $0x384] ss:$8 sps:$4 sm:$0xff]  }
  0xc1   :  { %3121 = vmatprep.subr.bf16.mxu0 %v4347_v7  ;;  %v4395_v7 = vld [vmem:[%s5697_s1 + $0x784] ss:$8 sps:$4 sm:$0xff]   ;;  %v128_v40 = vld [vmem:[%s5698_s0 + $0x390] sm:$0xff]  ;;  %v21_v60 = vld [vmem:[%s5698_s0 + $0x38] sm:$0xff] }
  0xc2   :  { %2589 = vmatmul.mubr.bf16.vlgmr.msra.gmra.mrb[0].mxu1 %v3386_v12  ;;  %v100_v12 = vld [vmem:[%s5698_s0 + $0x2b0] sm:$0xff]  ;;  %v29_v61 = vld [vmem:[%s5698_s0 + $0x78] sm:$0xff] }
  0xc3   :  { %3041 = vmatmul.mubr.bf16.vlgmr.msra.gmra.mrb[0].mxu0 %v3394_v13  ;;  %2670 = vmatpush1.bf16.msra.mxu1 %v4342_v8  ;;  %v96_v8 = vld [vmem:[%s5698_s0 + $0x290] sm:$0xff] }
  0xc4   :  { %3122 = vmatpush1.bf16.msra.mxu0 %v4345_v9  ;;  %2671 = vmatprep.subr.bf16.mxu1 %v4350_v16  ;;  %v3450_v9 = vcombine.low %v80_v56, %v88_v59  ;;  %v108_v13 = vld [vmem:[%s5698_s0 + $0x2f0] sm:$0xff]  ;;  %v17_v56 = vld [vmem:[%s5698_s0 + $0x18] sm:$0xff] }
  0xc5   :  { %3123 = vmatprep.subr.bf16.mxu0 %v4353_v17  ;;  %2598 = vmatprep.mubr.bf16.mxu1 %v3403_v18  ;;  %v4398_v16 = vld [vmem:[%s5697_s1 + $0x394] ss:$8 sps:$4 sm:$0xff]   ;;  %v3467_v18 = vcombine.high %v96_v8, %v104_v11  ;;  %v3474_v26 = vcombine.low %v100_v12, %v108_v13 }
  0xc6   :  { %3050 = vmatprep.mubr.bf16.mxu0 %v3411_v19  ;;  %v4401_v17 = vld [vmem:[%s5697_s1 + $0x794] ss:$8 sps:$4 sm:$0xff]   ;;  %v3475_v19 = vcombine.high %v100_v12, %v108_v13 }
  0xc7   :  { %2672 = vmatpush1.bf16.msra.mxu1 %v4348_v20  ;;  %v4396_v20 = vld [vmem:[%s5697_s1 + $0x390] ss:$8 sps:$4 sm:$0xff]  }
  0xc8   :  { %3124 = vmatpush1.bf16.msra.mxu0 %v4351_v21  ;;  %2673 = vmatprep.subr.bf16.mxu1 %v4356_v22  ;;  %v4399_v21 = vld [vmem:[%s5697_s1 + $0x790] ss:$8 sps:$4 sm:$0xff]   ;;  %v4404_v22 = vld [vmem:[%s5697_s1 + $0x3a4] ss:$8 sps:$4 sm:$0xff]  }
  0xc9   :  { %3125 = vmatprep.subr.bf16.mxu0 %v4359_v23  ;;  %v4407_v23 = vld [vmem:[%s5697_s1 + $0x7a4] ss:$8 sps:$4 sm:$0xff]   ;;  %v136_v43 = vld [vmem:[%s5698_s0 + $0x3d0] sm:$0xff]  ;;  %v25_v59 = vld [vmem:[%s5698_s0 + $0x58] sm:$0xff] }
  0xca   :  { %2599 = vmatmul.mubr.bf16.gmra.mrb[4].mxu1 %v3402_v28  ;;  %v116_v28 = vld [vmem:[%s5698_s0 + $0x330] sm:$0xff] }
  0xcb   :  { %3051 = vmatmul.mubr.bf16.gmra.mrb[4].mxu0 %v3410_v29  ;;  %2674 = vmatpush1.bf16.msra.mxu1 %v4354_v24  ;;  %v112_v24 = vld [vmem:[%s5698_s0 + $0x310] sm:$0xff] }
  0xcc   :  { %3126 = vmatpush1.bf16.msra.mxu0 %v4357_v25  ;;  %2675 = vmatprep.subr.bf16.mxu1 %v4362_v32  ;;  %v3466_v25 = vcombine.low %v96_v8, %v104_v11  ;;  %v124_v29 = vld [vmem:[%s5698_s0 + $0x370] sm:$0xff]  ;;  %v37_v8 = vld [vmem:[%s5698_s0 + $0xb8] sm:$0xff]  ;;  %v3396_v11 = vcombine.low %v21_v60, %v29_v61 }
  0xcd   :  { %3127 = vmatprep.subr.bf16.mxu0 %v4365_v33  ;;  %2608 = vmatprep.mubr.bf16.mxu1 %v3419_v34  ;;  %v4410_v32 = vld [vmem:[%s5697_s1 + $0x3b4] ss:$8 sps:$4 sm:$0xff]   ;;  %v3483_v34 = vcombine.high %v112_v24, %v120_v27 }
  0xce   :  { %3060 = vmatprep.mubr.bf16.mxu0 %v3427_v35  ;;  %v4413_v33 = vld [vmem:[%s5697_s1 + $0x7b4] ss:$8 sps:$4 sm:$0xff]   ;;  %v3491_v35 = vcombine.high %v116_v28, %v124_v29 }
  0xcf   :  { %2676 = vmatpush1.bf16.msra.mxu1 %v4360_v36  ;;  %v4408_v36 = vld [vmem:[%s5697_s1 + $0x3b0] ss:$8 sps:$4 sm:$0xff]  }
  0xd0   :  { %3128 = vmatpush1.bf16.msra.mxu0 %v4363_v37  ;;  %2677 = vmatprep.subr.bf16.mxu1 %v4368_v38  ;;  %v4411_v37 = vld [vmem:[%s5697_s1 + $0x7b0] ss:$8 sps:$4 sm:$0xff]   ;;  %v4416_v38 = vld [vmem:[%s5697_s1 + $0x3c4] ss:$8 sps:$4 sm:$0xff]  }
  0xd1   :  { %3129 = vmatprep.subr.bf16.mxu0 %v4371_v39  ;;  %v4419_v39 = vld [vmem:[%s5697_s1 + $0x7c4] ss:$8 sps:$4 sm:$0xff]  }
  0xd2   :  { %2609 = vmatmul.mubr.bf16.gmra.mrb[8].mxu1 %v3418_v41  ;;  %v3482_v41 = vcombine.low %v112_v24, %v120_v27  ;;  %v69_v24 = vld [vmem:[%s5698_s0 + $0x1b8] sm:$0xff] }
  0xd3   :  { %3061 = vmatmul.mubr.bf16.gmra.mrb[8].mxu0 %v3426_v42  ;;  %2678 = vmatpush1.bf16.msra.mxu1 %v4366_v46  ;;  %v3490_v42 = vcombine.low %v116_v28, %v124_v29  ;;  %v4414_v46 = vld [vmem:[%s5697_s1 + $0x3c0] ss:$8 sps:$4 sm:$0xff]  }
  0xd4   :  { %3130 = vmatpush1.bf16.msra.mxu0 %v4369_v47  ;;  %2679 = vmatprep.subr.bf16.mxu1 %v4374_v48  ;;  %v4417_v47 = vld [vmem:[%s5697_s1 + $0x7c0] ss:$8 sps:$4 sm:$0xff]   ;;  %v4422_v48 = vld [vmem:[%s5697_s1 + $0x3d4] ss:$8 sps:$4 sm:$0xff]  }
  0xd5   :  { %3131 = vmatprep.subr.bf16.mxu0 %v4377_v49  ;;  %2618 = vmatprep.mubr.bf16.mxu1 %v3435_v50  ;;  %v4425_v49 = vld [vmem:[%s5697_s1 + $0x7d4] ss:$8 sps:$4 sm:$0xff]   ;;  %v3499_v50 = vcombine.high %v128_v40, %v136_v43 }
  0xd6   :  { %3070 = vmatprep.mubr.bf16.mxu0 %v3443_v51  ;;  %v3507_v51 = vcombine.high %v132_v44, %v140_v45 }
  0xd7   :  { %2680 = vmatpush1.bf16.msra.mxu1 %v4372_v52  ;;  %v4420_v52 = vld [vmem:[%s5697_s1 + $0x3d0] ss:$8 sps:$4 sm:$0xff]  }
  0xd8   :  { %3132 = vmatpush1.bf16.msra.mxu0 %v4375_v53  ;;  %2681 = vmatprep.subr.bf16.mxu1 %v4380_v54  ;;  %v4423_v53 = vld [vmem:[%s5697_s1 + $0x7d0] ss:$8 sps:$4 sm:$0xff]   ;;  %v4428_v54 = vld [vmem:[%s5697_s1 + $0x3e4] ss:$8 sps:$4 sm:$0xff]  }
  0xd9   :  { %3133 = vmatprep.subr.bf16.mxu0 %v4383_v55  ;;  %v4431_v55 = vld [vmem:[%s5697_s1 + $0x7e4] ss:$8 sps:$4 sm:$0xff]  }
  0xda   :  { %2619 = vmatmul.mubr.bf16.gmra.mrb[12].mxu1 %v3434_v57  ;;  %v3498_v57 = vcombine.low %v128_v40, %v136_v43  ;;  %v101_v40 = vld [vmem:[%s5698_s0 + $0x2b8] sm:$0xff] }
  0xdb   :  { %3071 = vmatmul.mubr.bf16.gmra.mrb[12].mxu0 %v3442_v58  ;;  %2682 = vmatpush1.bf16.msra.mxu1 %v4378_v62  ;;  %v3506_v58 = vcombine.low %v132_v44, %v140_v45  ;;  %v4426_v62 = vld [vmem:[%s5697_s1 + $0x3e0] ss:$8 sps:$4 sm:$0xff]  }
  0xdc   :  { %3134 = vmatpush1.bf16.msra.mxu0 %v4381_v63  ;;  %2683 = vmatprep.subr.bf16.mxu1 %v4386_v0  ;;  %v4429_v63 = vld [vmem:[%s5697_s1 + $0x7e0] ss:$8 sps:$4 sm:$0xff]   ;;  %v4434_v0 = vld [vmem:[%s5697_s1 + $0x3f4] ss:$8 sps:$4 sm:$0xff]  }
  0xdd   :  { %3135 = vmatprep.subr.bf16.mxu0 %v4389_v1  ;;  %2628 = vmatprep.mubr.bf16.mxu1 %v3451_v2  ;;  %v4437_v1 = vld [vmem:[%s5697_s1 + $0x7f4] ss:$8 sps:$4 sm:$0xff]   ;;  %v3389_v2 = vcombine.high %v17_v56, %v25_v59 }
  0xde   :  { %3080 = vmatprep.mubr.bf16.mxu0 %v3459_v3  ;;  %v3397_v3 = vcombine.high %v21_v60, %v29_v61 }
  0xdf   :  { %2684 = vmatpush1.bf16.msra.mxu1 %v4384_v4  ;;  %v4432_v4 = vld [vmem:[%s5697_s1 + $0x3f0] ss:$8 sps:$4 sm:$0xff]  }
  0xe0   :  { %3136 = vmatpush1.bf16.msra.mxu0 %v4387_v5  ;;  %2685 = vmatprep.subr.bf16.mxu1 %v4392_v6  ;;  %v4435_v5 = vld [vmem:[%s5697_s1 + $0x7f0] ss:$8 sps:$4 sm:$0xff]  }
  0xe1   :  { %3137 = vmatprep.subr.bf16.mxu0 %v4395_v7  ;;  %v33_v6 = vld [vmem:[%s5698_s0 + $0x98] sm:$0xff] }
  0xe2   :  { %2629 = vmatmul.mubr.bf16.gmra.mrb[16].mxu1 %v3450_v9  ;;  %v41_v7 = vld [vmem:[%s5698_s0 + $0xd8] sm:$0xff] }
  0xe3   :  { %3081 = vmatmul.mubr.bf16.gmra.mrb[16].mxu0 %v3458_v10  ;;  %2686 = vmatpush1.bf16.msra.mxu1 %v4390_v14  ;;  %v45_v9 = vld [vmem:[%s5698_s0 + $0xf8] sm:$0xff]  ;;  %v3388_v10 = vcombine.low %v17_v56, %v25_v59  ;;  %v3405_v12 = vcombine.high %v33_v6, %v41_v7 }
  0xe4   :  { %3138 = vmatpush1.bf16.msra.mxu0 %v4393_v15  ;;  %2687 = vmatprep.subr.bf16.mxu1 %v4398_v16  ;;  %v3413_v13 = vcombine.high %v37_v8, %v45_v9  ;;  %v49_v14 = vld [vmem:[%s5698_s0 + $0x118] sm:$0xff] }
  0xe5   :  { %3139 = vmatprep.subr.bf16.mxu0 %v4401_v17  ;;  %2638 = vmatprep.mubr.bf16.mxu1 %v3467_v18  ;;  %v57_v15 = vld [vmem:[%s5698_s0 + $0x158] sm:$0xff]  ;;  %v3404_v18 = vcombine.low %v33_v6, %v41_v7 }
  0xe6   :  { %3090 = vmatprep.mubr.bf16.mxu0 %v3475_v19  ;;  %v53_v16 = vld [vmem:[%s5698_s0 + $0x138] sm:$0xff]  ;;  %v3412_v19 = vcombine.low %v37_v8, %v45_v9 }
  0xe7   :  { %2688 = vmatpush1.bf16.msra.mxu1 %v4396_v20  ;;  %v61_v17 = vld [vmem:[%s5698_s0 + $0x178] sm:$0xff]  ;;  %v3421_v20 = vcombine.high %v49_v14, %v57_v15 }
  0xe8   :  { %3140 = vmatpush1.bf16.msra.mxu0 %v4399_v21  ;;  %2689 = vmatprep.subr.bf16.mxu1 %v4404_v22  ;;  %v3429_v21 = vcombine.high %v53_v16, %v61_v17  ;;  %v65_v22 = vld [vmem:[%s5698_s0 + $0x198] sm:$0xff]  ;;  %v3428_v27 = vcombine.low %v53_v16, %v61_v17 }
  0xe9   :  { %3141 = vmatprep.subr.bf16.mxu0 %v4407_v23  ;;  %v73_v23 = vld [vmem:[%s5698_s0 + $0x1d8] sm:$0xff] }
  0xea   :  { %2639 = vmatmul.mubr.bf16.gmra.mrb[20].mxu1 %v3466_v25  ;;  %v77_v25 = vld [vmem:[%s5698_s0 + $0x1f8] sm:$0xff]  ;;  %v3437_v28 = vcombine.high %v65_v22, %v73_v23 }
  0xeb   :  { %3091 = vmatmul.mubr.bf16.gmra.mrb[20].mxu0 %v3474_v26  ;;  %2690 = vmatpush1.bf16.msra.mxu1 %v4402_v30  ;;  %v3420_v26 = vcombine.low %v49_v14, %v57_v15  ;;  %v3445_v29 = vcombine.high %v69_v24, %v77_v25  ;;  %v81_v30 = vld [vmem:[%s5698_s0 + $0x218] sm:$0xff] }
  0xec   :  { %3142 = vmatpush1.bf16.msra.mxu0 %v4405_v31  ;;  %2691 = vmatprep.subr.bf16.mxu1 %v4410_v32  ;;  %v89_v31 = vld [vmem:[%s5698_s0 + $0x258] sm:$0xff] }
  0xed   :  { %3143 = vmatprep.subr.bf16.mxu0 %v4413_v33  ;;  %2648 = vmatprep.mubr.bf16.mxu1 %v3483_v34  ;;  %v85_v32 = vld [vmem:[%s5698_s0 + $0x238] sm:$0xff]  ;;  %v3436_v34 = vcombine.low %v65_v22, %v73_v23 }
  0xee   :  { %3100 = vmatprep.mubr.bf16.mxu0 %v3491_v35  ;;  %v93_v33 = vld [vmem:[%s5698_s0 + $0x278] sm:$0xff]  ;;  %v3444_v35 = vcombine.low %v69_v24, %v77_v25 }
  0xef   :  { %2692 = vmatpush1.bf16.msra.mxu1 %v4408_v36  ;;  %v3453_v36 = vcombine.high %v81_v30, %v89_v31  ;;  %v3460_v43 = vcombine.low %v85_v32, %v93_v33  ;;  %v133_v56 = vld [vmem:[%s5698_s0 + $0x3b8] sm:$0xff] }
  0xf0   :  { %3144 = vmatpush1.bf16.msra.mxu0 %v4411_v37  ;;  %2693 = vmatprep.subr.bf16.mxu1 %v4416_v38  ;;  %v3461_v37 = vcombine.high %v85_v32, %v93_v33  ;;  %v97_v38 = vld [vmem:[%s5698_s0 + $0x298] sm:$0xff] }
  0xf1   :  { %3145 = vmatprep.subr.bf16.mxu0 %v4419_v39  ;;  %v105_v39 = vld [vmem:[%s5698_s0 + $0x2d8] sm:$0xff] }
  0xf2   :  { %2649 = vmatmul.mubr.bf16.gmra.mrb[24].mxu1 %v3482_v41  ;;  %v109_v41 = vld [vmem:[%s5698_s0 + $0x2f8] sm:$0xff]  ;;  %v3469_v44 = vcombine.high %v97_v38, %v105_v39 }
  0xf3   :  { %3101 = vmatmul.mubr.bf16.gmra.mrb[24].mxu0 %v3490_v42  ;;  %2694 = vmatpush1.bf16.msra.mxu1 %v4414_v46  ;;  %v3452_v42 = vcombine.low %v81_v30, %v89_v31  ;;  %v3477_v45 = vcombine.high %v101_v40, %v109_v41  ;;  %v113_v46 = vld [vmem:[%s5698_s0 + $0x318] sm:$0xff] }
  0xf4   :  { %3146 = vmatpush1.bf16.msra.mxu0 %v4417_v47  ;;  %2695 = vmatprep.subr.bf16.mxu1 %v4422_v48  ;;  %v121_v47 = vld [vmem:[%s5698_s0 + $0x358] sm:$0xff] }
  0xf5   :  { %3147 = vmatprep.subr.bf16.mxu0 %v4425_v49  ;;  %2658 = vmatprep.mubr.bf16.mxu1 %v3499_v50  ;;  %v117_v48 = vld [vmem:[%s5698_s0 + $0x338] sm:$0xff]  ;;  %v3468_v50 = vcombine.low %v97_v38, %v105_v39 }
  0xf6   :  { %3110 = vmatprep.mubr.bf16.mxu0 %v3507_v51  ;;  %v125_v49 = vld [vmem:[%s5698_s0 + $0x378] sm:$0xff]  ;;  %v3476_v51 = vcombine.low %v101_v40, %v109_v41 }
  0xf7   :  { %2696 = vmatpush1.bf16.msra.mxu1 %v4420_v52  ;;  %v3485_v52 = vcombine.high %v113_v46, %v121_v47  ;;  %v3492_v59 = vcombine.low %v117_v48, %v125_v49 }
  0xf8   :  { %3148 = vmatpush1.bf16.msra.mxu0 %v4423_v53  ;;  %2697 = vmatprep.subr.bf16.mxu1 %v4428_v54  ;;  %v3493_v53 = vcombine.high %v117_v48, %v125_v49  ;;  %v129_v54 = vld [vmem:[%s5698_s0 + $0x398] sm:$0xff] }
  0xf9   :  { %3149 = vmatprep.subr.bf16.mxu0 %v4431_v55  ;;  %v137_v55 = vld [vmem:[%s5698_s0 + $0x3d8] sm:$0xff] }
  0xfa   :  { %2659 = vmatmul.mubr.bf16.gmra.mrb[28].mxu1 %v3498_v57  ;;  %v141_v57 = vld [vmem:[%s5698_s0 + $0x3f8] sm:$0xff]  ;;  %v3501_v60 = vcombine.high %v129_v54, %v137_v55 }
  0xfb   :  { %3111 = vmatmul.mubr.bf16.gmra.mrb[28].mxu0 %v3506_v58  ;;  %2698 = vmatpush1.bf16.msra.mxu1 %v4426_v62  ;;  %v3484_v58 = vcombine.low %v113_v46, %v121_v47  ;;  %v3509_v61 = vcombine.high %v133_v56, %v141_v57  ;;  %v3500_v62 = vcombine.low %v129_v54, %v137_v55 }
  0xfc   :  { %3150 = vmatpush1.bf16.msra.mxu0 %v4429_v63  ;;  %2699 = vmatprep.subr.bf16.mxu1 %v4434_v0  ;;  %v3508_v63 = vcombine.low %v133_v56, %v141_v57  ;;  %v400_v0 = vlaneseq }
  0xfd   :  { %3151 = vmatprep.subr.bf16.mxu0 %v4437_v1  ;;  %2701 = vmatprep.mubr.bf16.mxu1 %v3389_v2 }
  0xfe   :  { %3153 = vmatprep.mubr.bf16.mxu0 %v3397_v3  ;;  %v401_v1 = vshrl.u32 %v400_v0, 7  ;;  %v398_v3 = vld [vmem:[%s5699_s2] sm:$0x3] }
  0xff   :  { %2700 = vmatpush1.bf16.msra.mxu1 %v4432_v4 }
 0x100   :  { %3152 = vmatpush1.bf16.msra.mxu0 %v4435_v5  ;;  %v402_v2 = vsub.s32 0, %v401_v1  ;;  %v406_v4 = vsub.s32 1, %v401_v1 }
 0x102   :  { %2702 = vmatmul.mubr.bf16.vlgmr.msra.gmra.mrb[0].mxu1 %v3388_v10  ;;  %v5613_v5 = vrot.slane %v398_v3, %v402_v2  ;;  %v5615_v6 = vrot.slane %v398_v3, %v406_v4 }
 0x103   :  { %3154 = vmatmul.mubr.bf16.vlgmr.msra.gmra.mrb[0].mxu0 %v3396_v11  ;;  %2711 = vmatprep.mubr.bf16.mxu1 %v3405_v12 }
 0x104   :  { %3163 = vmatprep.mubr.bf16.mxu0 %v3413_v13 }
 0x10a   :  { %2712 = vmatmul.mubr.bf16.gmra.mrb[4].mxu1 %v3404_v18 }
 0x10b   :  { %3164 = vmatmul.mubr.bf16.gmra.mrb[4].mxu0 %v3412_v19  ;;  %2721 = vmatprep.mubr.bf16.mxu1 %v3421_v20 }
 0x10c   :  { %3173 = vmatprep.mubr.bf16.mxu0 %v3429_v21 }
 0x112   :  { %2722 = vmatmul.mubr.bf16.gmra.mrb[8].mxu1 %v3420_v26 }
 0x113   :  { %3174 = vmatmul.mubr.bf16.gmra.mrb[8].mxu0 %v3428_v27  ;;  %2731 = vmatprep.mubr.bf16.mxu1 %v3437_v28 }
 0x114   :  { %3183 = vmatprep.mubr.bf16.mxu0 %v3445_v29 }
 0x11a   :  { %2732 = vmatmul.mubr.bf16.gmra.mrb[12].mxu1 %v3436_v34 }
 0x11b   :  { %3184 = vmatmul.mubr.bf16.gmra.mrb[12].mxu0 %v3444_v35  ;;  %2741 = vmatprep.mubr.bf16.mxu1 %v3453_v36 }
 0x11c   :  { %3193 = vmatprep.mubr.bf16.mxu0 %v3461_v37 }
 0x122   :  { %2742 = vmatmul.mubr.bf16.gmra.mrb[16].mxu1 %v3452_v42 }
 0x123   :  { %3194 = vmatmul.mubr.bf16.gmra.mrb[16].mxu0 %v3460_v43  ;;  %2751 = vmatprep.mubr.bf16.mxu1 %v3469_v44 }
 0x124   :  { %3203 = vmatprep.mubr.bf16.mxu0 %v3477_v45 }
 0x12a   :  { %2752 = vmatmul.mubr.bf16.gmra.mrb[20].mxu1 %v3468_v50 }
 0x12b   :  { %3204 = vmatmul.mubr.bf16.gmra.mrb[20].mxu0 %v3476_v51  ;;  %2761 = vmatprep.mubr.bf16.mxu1 %v3485_v52 }
 0x12c   :  { %3213 = vmatprep.mubr.bf16.mxu0 %v3493_v53 }
 0x132   :  { %2762 = vmatmul.mubr.bf16.gmra.mrb[24].mxu1 %v3484_v58 }
 0x133   :  { %3214 = vmatmul.mubr.bf16.gmra.mrb[24].mxu0 %v3492_v59  ;;  %2771 = vmatprep.mubr.bf16.mxu1 %v3501_v60 }
 0x134   :  { %3223 = vmatprep.mubr.bf16.mxu0 %v3509_v61 }
 0x13a   :  { %2772 = vmatmul.mubr.bf16.gmra.mrb[28].mxu1 %v3500_v62 }
 0x13b   :  { %3224 = vmatmul.mubr.bf16.gmra.mrb[28].mxu0 %v3508_v63 }
 0x1d5   :  { %v2703_v7 = vpop.f32.mrb[0].mxu1 }
 0x1d6   :  { %v3155_v8 = vpop.f32.mrb[0].mxu0  ;;  %v3798_v9 = vadd.f32 %v2703_v7, %v5613_v5  ;;  %v2705_v10 = vpop.f32.mrb[1].mxu1 }
 0x1d7   :  { %v3157_v11 = vpop.f32.mrb[1].mxu0  ;;  %v3800_v12 = vadd.f32 %v2705_v10, %v5615_v6  ;;  %v2707_v13 = vpop.f32.mrb[2].mxu1 }
 0x1d8   :  { %v3159_v14 = vpop.f32.mrb[2].mxu0  ;;  %v3799_v15 = vadd.f32 %v3798_v9, %v3155_v8  ;;  %v3802_v16 = vadd.f32 %v2707_v13, %v5613_v5  ;;  %v2709_v17 = vpop.f32.mrb[3].mxu1 }
 0x1d9   :  { %v3161_v18 = vpop.f32.mrb[3].mxu0  ;;  %v3801_v19 = vadd.f32 %v3800_v12, %v3157_v11  ;;  %v3804_v20 = vadd.f32 %v2709_v17, %v5615_v6 }
 0x1da   :  { %v3234_v21 = vmax.f32 %v3799_v15, 0.0  ;;  %v3803_v22 = vadd.f32 %v3802_v16, %v3159_v14 }
 0x1db   :  { %v3235_v23 = vmax.f32 %v3801_v19, 0.0  ;;  %v3805_v24 = vadd.f32 %v3804_v20, %v3161_v18 }
 0x1dc   :  { %v3236_v25 = vmax.f32 %v3803_v22, 0.0 }
 0x1dd   :  { %v3782_v26 = vpack.c.bf16 %v3235_v23, %v3234_v21  ;;  %v3237_v27 = vmax.f32 %v3805_v24, 0.0  ;;  %v2713_v28 = vpop.f32.mrb[4].mxu1 }
 0x1de   :  { %v3165_v29 = vpop.f32.mrb[4].mxu0  ;;  %v3806_v30 = vadd.f32 %v2713_v28, %v5613_v5  ;;  %v2715_v31 = vpop.f32.mrb[5].mxu1 }
 0x1df   :  { %v3167_v32 = vpop.f32.mrb[5].mxu0  ;;  %3362 = vst [vmem:[%s5700_s3] sm:$0xff] %v3782_v26  ;;  %v3783_v33 = vpack.c.bf16 %v3237_v27, %v3236_v25  ;;  %v3808_v34 = vadd.f32 %v2715_v31, %v5615_v6  ;;  %v2717_v35 = vpop.f32.mrb[6].mxu1 }
 0x1e0   :  { %v3169_v36 = vpop.f32.mrb[6].mxu0  ;;  %v3807_v37 = vadd.f32 %v3806_v30, %v3165_v29  ;;  %v3810_v38 = vadd.f32 %v2717_v35, %v5613_v5  ;;  %v2719_v39 = vpop.f32.mrb[7].mxu1 }
 0x1e1   :  { %v3171_v40 = vpop.f32.mrb[7].mxu0  ;;  %3363 = vst [vmem:[%s5700_s3 + $0x8] sm:$0xff] %v3783_v33  ;;  %v3809_v41 = vadd.f32 %v3808_v34, %v3167_v32  ;;  %v3812_v42 = vadd.f32 %v2719_v39, %v5615_v6 }
 0x1e2   :  { %v3238_v43 = vmax.f32 %v3807_v37, 0.0  ;;  %v3811_v44 = vadd.f32 %v3810_v38, %v3169_v36 }
 0x1e3   :  { %v3239_v45 = vmax.f32 %v3809_v41, 0.0  ;;  %v3813_v46 = vadd.f32 %v3812_v42, %v3171_v40 }
 0x1e4   :  { %v3240_v47 = vmax.f32 %v3811_v44, 0.0 }
 0x1e5   :  { %v3784_v48 = vpack.c.bf16 %v3239_v45, %v3238_v43  ;;  %v3241_v49 = vmax.f32 %v3813_v46, 0.0  ;;  %v2723_v50 = vpop.f32.mrb[8].mxu1 }
 0x1e6   :  { %v3175_v51 = vpop.f32.mrb[8].mxu0  ;;  %v3814_v52 = vadd.f32 %v2723_v50, %v5613_v5  ;;  %v2725_v53 = vpop.f32.mrb[9].mxu1 }
 0x1e7   :  { %v3177_v54 = vpop.f32.mrb[9].mxu0  ;;  %3364 = vst [vmem:[%s5700_s3 + $0x10] sm:$0xff] %v3784_v48  ;;  %v3785_v55 = vpack.c.bf16 %v3241_v49, %v3240_v47  ;;  %v3816_v56 = vadd.f32 %v2725_v53, %v5615_v6  ;;  %v2727_v57 = vpop.f32.mrb[10].mxu1 }
 0x1e8   :  { %v3179_v58 = vpop.f32.mrb[10].mxu0  ;;  %v3815_v59 = vadd.f32 %v3814_v52, %v3175_v51  ;;  %v3818_v60 = vadd.f32 %v2727_v57, %v5613_v5  ;;  %v2729_v61 = vpop.f32.mrb[11].mxu1 }
 0x1e9   :  { %v3181_v62 = vpop.f32.mrb[11].mxu0  ;;  %3365 = vst [vmem:[%s5700_s3 + $0x18] sm:$0xff] %v3785_v55  ;;  %v3817_v63 = vadd.f32 %v3816_v56, %v3177_v54  ;;  %v3820_v0 = vadd.f32 %v2729_v61, %v5615_v6 }
 0x1ea   :  { %v3242_v1 = vmax.f32 %v3815_v59, 0.0  ;;  %v3819_v2 = vadd.f32 %v3818_v60, %v3179_v58 }
 0x1eb   :  { %v3243_v3 = vmax.f32 %v3817_v63, 0.0  ;;  %v3821_v4 = vadd.f32 %v3820_v0, %v3181_v62 }
 0x1ec   :  { %v3244_v7 = vmax.f32 %v3819_v2, 0.0 }
 0x1ed   :  { %v3786_v8 = vpack.c.bf16 %v3243_v3, %v3242_v1  ;;  %v3245_v9 = vmax.f32 %v3821_v4, 0.0  ;;  %v2733_v10 = vpop.f32.mrb[12].mxu1 }
 0x1ee   :  { %v3185_v11 = vpop.f32.mrb[12].mxu0  ;;  %v3822_v12 = vadd.f32 %v2733_v10, %v5613_v5  ;;  %v2735_v13 = vpop.f32.mrb[13].mxu1 }
 0x1ef   :  { %v3187_v14 = vpop.f32.mrb[13].mxu0  ;;  %3366 = vst [vmem:[%s5700_s3 + $0x20] sm:$0xff] %v3786_v8  ;;  %v3787_v15 = vpack.c.bf16 %v3245_v9, %v3244_v7  ;;  %v3824_v16 = vadd.f32 %v2735_v13, %v5615_v6  ;;  %v2737_v17 = vpop.f32.mrb[14].mxu1 }
 0x1f0   :  { %v3189_v18 = vpop.f32.mrb[14].mxu0  ;;  %v3823_v19 = vadd.f32 %v3822_v12, %v3185_v11  ;;  %v3826_v20 = vadd.f32 %v2737_v17, %v5613_v5  ;;  %v2739_v21 = vpop.f32.mrb[15].mxu1 }
 0x1f1   :  { %v3191_v22 = vpop.f32.mrb[15].mxu0  ;;  %3367 = vst [vmem:[%s5700_s3 + $0x28] sm:$0xff] %v3787_v15  ;;  %v3825_v23 = vadd.f32 %v3824_v16, %v3187_v14  ;;  %v3828_v24 = vadd.f32 %v2739_v21, %v5615_v6 }
 0x1f2   :  { %v3246_v25 = vmax.f32 %v3823_v19, 0.0  ;;  %v3827_v26 = vadd.f32 %v3826_v20, %v3189_v18 }
 0x1f3   :  { %v3247_v27 = vmax.f32 %v3825_v23, 0.0  ;;  %v3829_v28 = vadd.f32 %v3828_v24, %v3191_v22 }
 0x1f4   :  { %v3248_v29 = vmax.f32 %v3827_v26, 0.0 }
 0x1f5   :  { %v3788_v30 = vpack.c.bf16 %v3247_v27, %v3246_v25  ;;  %v3249_v31 = vmax.f32 %v3829_v28, 0.0  ;;  %v2743_v32 = vpop.f32.mrb[16].mxu1 }
 0x1f6   :  { %v3195_v33 = vpop.f32.mrb[16].mxu0  ;;  %v3830_v34 = vadd.f32 %v2743_v32, %v5613_v5  ;;  %v2745_v35 = vpop.f32.mrb[17].mxu1 }
 0x1f7   :  { %v3197_v36 = vpop.f32.mrb[17].mxu0  ;;  %3368 = vst [vmem:[%s5700_s3 + $0x30] sm:$0xff] %v3788_v30  ;;  %v3789_v37 = vpack.c.bf16 %v3249_v31, %v3248_v29  ;;  %v3832_v38 = vadd.f32 %v2745_v35, %v5615_v6  ;;  %v2747_v39 = vpop.f32.mrb[18].mxu1 }
 0x1f8   :  { %v3199_v40 = vpop.f32.mrb[18].mxu0  ;;  %v3831_v41 = vadd.f32 %v3830_v34, %v3195_v33  ;;  %v3834_v42 = vadd.f32 %v2747_v39, %v5613_v5  ;;  %v2749_v43 = vpop.f32.mrb[19].mxu1 }
 0x1f9   :  { %v3201_v44 = vpop.f32.mrb[19].mxu0  ;;  %3369 = vst [vmem:[%s5700_s3 + $0x38] sm:$0xff] %v3789_v37  ;;  %v3833_v45 = vadd.f32 %v3832_v38, %v3197_v36  ;;  %v3836_v46 = vadd.f32 %v2749_v43, %v5615_v6 }
 0x1fa   :  { %v3250_v47 = vmax.f32 %v3831_v41, 0.0  ;;  %v3835_v48 = vadd.f32 %v3834_v42, %v3199_v40 }
 0x1fb   :  { %v3251_v49 = vmax.f32 %v3833_v45, 0.0  ;;  %v3837_v50 = vadd.f32 %v3836_v46, %v3201_v44 }
 0x1fc   :  { %v3252_v51 = vmax.f32 %v3835_v48, 0.0 }
 0x1fd   :  { %v3790_v52 = vpack.c.bf16 %v3251_v49, %v3250_v47  ;;  %v3253_v53 = vmax.f32 %v3837_v50, 0.0  ;;  %v2753_v54 = vpop.f32.mrb[20].mxu1 }
 0x1fe   :  { %v3205_v55 = vpop.f32.mrb[20].mxu0  ;;  %v3838_v56 = vadd.f32 %v2753_v54, %v5613_v5  ;;  %v2755_v57 = vpop.f32.mrb[21].mxu1 }
 0x1ff   :  { %v3207_v58 = vpop.f32.mrb[21].mxu0  ;;  %3370 = vst [vmem:[%s5700_s3 + $0x40] sm:$0xff] %v3790_v52  ;;  %v3791_v59 = vpack.c.bf16 %v3253_v53, %v3252_v51  ;;  %v3840_v60 = vadd.f32 %v2755_v57, %v5615_v6  ;;  %v2757_v61 = vpop.f32.mrb[22].mxu1 }
 0x200   :  { %v3209_v62 = vpop.f32.mrb[22].mxu0  ;;  %v3839_v63 = vadd.f32 %v3838_v56, %v3205_v55  ;;  %v3842_v0 = vadd.f32 %v2757_v61, %v5613_v5  ;;  %v2759_v1 = vpop.f32.mrb[23].mxu1 }
 0x201   :  { %v3211_v2 = vpop.f32.mrb[23].mxu0  ;;  %3371 = vst [vmem:[%s5700_s3 + $0x48] sm:$0xff] %v3791_v59  ;;  %v3841_v3 = vadd.f32 %v3840_v60, %v3207_v58  ;;  %v3844_v4 = vadd.f32 %v2759_v1, %v5615_v6 }
 0x202   :  { %v3254_v7 = vmax.f32 %v3839_v63, 0.0  ;;  %v3843_v8 = vadd.f32 %v3842_v0, %v3209_v62 }
 0x203   :  { %v3255_v9 = vmax.f32 %v3841_v3, 0.0  ;;  %v3845_v10 = vadd.f32 %v3844_v4, %v3211_v2 }
 0x204   :  { %v3256_v11 = vmax.f32 %v3843_v8, 0.0 }
 0x205   :  { %v3792_v12 = vpack.c.bf16 %v3255_v9, %v3254_v7  ;;  %v3257_v13 = vmax.f32 %v3845_v10, 0.0  ;;  %v2763_v14 = vpop.f32.mrb[24].mxu1 }
 0x206   :  { %v3215_v15 = vpop.f32.mrb[24].mxu0  ;;  %v3846_v16 = vadd.f32 %v2763_v14, %v5613_v5  ;;  %v2765_v17 = vpop.f32.mrb[25].mxu1 }
 0x207   :  { %v3217_v18 = vpop.f32.mrb[25].mxu0  ;;  %3372 = vst [vmem:[%s5700_s3 + $0x50] sm:$0xff] %v3792_v12  ;;  %v3793_v19 = vpack.c.bf16 %v3257_v13, %v3256_v11  ;;  %v3848_v20 = vadd.f32 %v2765_v17, %v5615_v6  ;;  %v2767_v21 = vpop.f32.mrb[26].mxu1 }
 0x208   :  { %v3219_v22 = vpop.f32.mrb[26].mxu0  ;;  %v3847_v23 = vadd.f32 %v3846_v16, %v3215_v15  ;;  %v3850_v24 = vadd.f32 %v2767_v21, %v5613_v5  ;;  %v2769_v25 = vpop.f32.mrb[27].mxu1 }
 0x209   :  { %v3221_v26 = vpop.f32.mrb[27].mxu0  ;;  %3373 = vst [vmem:[%s5700_s3 + $0x58] sm:$0xff] %v3793_v19  ;;  %v3849_v27 = vadd.f32 %v3848_v20, %v3217_v18  ;;  %v3852_v28 = vadd.f32 %v2769_v25, %v5615_v6 }
 0x20a   :  { %v3258_v29 = vmax.f32 %v3847_v23, 0.0  ;;  %v3851_v30 = vadd.f32 %v3850_v24, %v3219_v22 }
 0x20b   :  { %v3259_v31 = vmax.f32 %v3849_v27, 0.0  ;;  %v3853_v32 = vadd.f32 %v3852_v28, %v3221_v26 }
 0x20c   :  { %v3260_v33 = vmax.f32 %v3851_v30, 0.0 }
 0x20d   :  { %v3794_v34 = vpack.c.bf16 %v3259_v31, %v3258_v29  ;;  %v3261_v35 = vmax.f32 %v3853_v32, 0.0  ;;  %v2773_v36 = vpop.f32.mrb[28].mxu1 }
 0x20e   :  { %v3225_v37 = vpop.f32.mrb[28].mxu0  ;;  %v3854_v38 = vadd.f32 %v2773_v36, %v5613_v5  ;;  %v2775_v39 = vpop.f32.mrb[29].mxu1 }
 0x20f   :  { %v3227_v40 = vpop.f32.mrb[29].mxu0  ;;  %3374 = vst [vmem:[%s5700_s3 + $0x60] sm:$0xff] %v3794_v34  ;;  %v3795_v41 = vpack.c.bf16 %v3261_v35, %v3260_v33  ;;  %v3856_v42 = vadd.f32 %v2775_v39, %v5615_v6  ;;  %v2777_v43 = vpop.f32.mrb[30].mxu1 }
 0x210   :  { %v3229_v44 = vpop.f32.mrb[30].mxu0  ;;  %v3855_v45 = vadd.f32 %v3854_v38, %v3225_v37  ;;  %v3858_v46 = vadd.f32 %v2777_v43, %v5613_v5  ;;  %v2779_v47 = vpop.f32.mrb[31].mxu1 }
 0x211   :  { %v3231_v48 = vpop.f32.mrb[31].mxu0  ;;  %3375 = vst [vmem:[%s5700_s3 + $0x68] sm:$0xff] %v3795_v41  ;;  %v3857_v49 = vadd.f32 %v3856_v42, %v3227_v40  ;;  %v3860_v50 = vadd.f32 %v2779_v47, %v5615_v6 }
 0x212   :  { %v3262_v51 = vmax.f32 %v3855_v45, 0.0  ;;  %v3859_v52 = vadd.f32 %v3858_v46, %v3229_v44 }
 0x213   :  { %v3263_v53 = vmax.f32 %v3857_v49, 0.0  ;;  %v3861_v54 = vadd.f32 %v3860_v50, %v3231_v48 }
 0x214   :  { %v3264_v55 = vmax.f32 %v3859_v52, 0.0 }
 0x215   :  { %v3796_v56 = vpack.c.bf16 %v3263_v53, %v3262_v51  ;;  %v3265_v57 = vmax.f32 %v3861_v54, 0.0 }
 0x217   :  { %3376 = vst [vmem:[%s5700_s3 + $0x70] sm:$0xff] %v3796_v56  ;;  %v3797_v5 = vpack.c.bf16 %v3265_v57, %v3264_v55 }
 0x219   :  { %3377 = vst [vmem:[%s5700_s3 + $0x78] sm:$0xff] %v3797_v5 }

// kernel: actor_forward.7
= control target key start
LH: loop header
LB: loop body
LE: loop exit
PB: predicated region body
PF: predicated region fallthrough
CT: control target
= control target key end

     0   :  { %s7182_s21 = smov 0   ;;  %s7184_s22 = smov 0   ;;  %s8173_s0 = inlined_call_operand.vmem [shape: bf16[128,4096], index: 0, kind: input, shape index: {}]   ;;  %s8174_s1 = inlined_call_operand.vmem [shape: bf16[4,1024,512], index: 1, kind: input, shape index: {}]   ;;  %s8175_s2 = inlined_call_operand.vmem [shape: f32[1,512], index: 2, kind: input, shape index: {}]   ;;  %s8176_s3 = inlined_call_operand.vmem [shape: bf16[16,512,512], index: 3, kind: input, shape index: {}]   ;;  %s8177_s4 = inlined_call_operand.vmem [shape: f32[1,512], index: 4, kind: input, shape index: {}]   ;;  %s8178_s5 = inlined_call_operand.vmem [shape: bf16[8,128], index: 5, kind: input, shape index: {}]   ;;  %s8179_s6 = inlined_call_operand.vmem [shape: bf16[512,64], index: 6, kind: input, shape index: {}]   ;;  %s8180_s7 = inlined_call_operand.vmem [shape: bf16[128,64], index: 7, kind: input, shape index: {}]   ;;  %s8181_s8 = inlined_call_operand.vmem [shape: f32[1,64], index: 8, kind: input, shape index: {}]   ;;  %s8182_s9 = inlined_call_operand.vmem [shape: bf16[64,128], index: 9, kind: input, shape index: {}]   ;;  %s8183_s10 = inlined_call_operand.vmem [shape: f32[1,128], index: 10, kind: input, shape index: {}]   ;;  %s8184_s11 = inlined_call_operand.vmem [shape: f32[8,128], index: 11, kind: output, shape index: {0}]   ;;  %s8185_s12 = inlined_call_operand.vmem [shape: f32[8,128], index: 12, kind: output, shape index: {1}]  }
   0x1   :  { %s7186_s23 = smov 0  }
   0x2 LB: > { %s7198_s24 = sadd.s32 4294967295, %s7112_s23   ;;  %s7201_s25 = sadd.s32 1, %s7112_s23   ;;  %s7112_s23 = sphi %s7186_s23, %s8188_s23   ;;  %s7108_s22 = sphi %s7184_s22, %s8187_s22   ;;  %s7104_s21 = sphi %s7182_s21, %s8186_s21  }
   0x3   : > { %p27_p0 = scmp.lt.s32.totalorder %s7112_s23, 3  ;;  %p29_p1 = scmp.lt.s32.totalorder %s7201_s25, 3 }
   0x4   : > { %p41_p2 = scmp.ne.s32.totalorder %s7108_s22, %s7104_s21  ;;  %p42_p3 = scmp.eq.s32.totalorder %s7112_s23, 0 }
   0x5   : > { %s28_s26 = scalar_select %p27_p0, %s7112_s23, 3 }
   0x6   : > { %s30_s27 = scalar_select %p29_p1, %s7201_s25, 3 }
   0x7   : > { %s34_s29 = sadd.s32 1, %s7108_s22  ;;  %p43_p5 = por %p42_p3, %p41_p2 }
   0x8   : > { %s31_s28 = ssub.s32 %s28_s26, %s30_s27  ;;  %p5626_p6 = scmp.ge.s32.totalorder %s7112_s23, 20 }
   0x9   : > { %p32_p4 = scmp.eq.s32.totalorder %s31_s28, 0 }
   0xa   : > { %363 = sbr.rel (%p5626_p6) target bundleno = 53 (0x35), region = 48 }
   0xb   : > { %s7212_s30 = scalar_select %p32_p4, %s7108_s22, %s34_s29  }
  0x11   : > { %366 = sbr.rel (!%p43_p5) target bundleno = 53 (0x35), region = 52  ;;  %s368_s13 = sand.u32 (%p43_p5), 1, %s7108_s22  }
  0x12   : > { %s6151_s14 = sshll.u32 (%p43_p5), %s28_s26, 5  ;;  %s5627_s15 = sshll.u32 (%p43_p5), %s368_s13, 9 }
  0x13   : > { %s7219_s18 = scalar_lea.vmem (%p43_p5), %s8173_s0, %s6151_s14  ;;  %s7224_s19 = scalar_lea.vmem (%p43_p5), [#allocation5], %s5627_s15 }
  0x14   : > { %v388_v0 = vld [vmem:[%s7219_s18] sm:$0xff] (%p43_p5)  ;;  %v390_v1 = vld [vmem:[%s7219_s18 + $0x8] sm:$0xff] (%p43_p5)  ;;  %v392_v2 = vld [vmem:[%s7219_s18 + $0x10] sm:$0xff] (%p43_p5) }
  0x15   : > { %389 = vst [vmem:[%s7224_s19] sm:$0xff] (%p43_p5), %v388_v0  ;;  %391 = vst [vmem:[%s7224_s19 + $0x8] sm:$0xff] (%p43_p5), %v390_v1  ;;  %v394_v3 = vld [vmem:[%s7219_s18 + $0x18] sm:$0xff] (%p43_p5)  ;;  %v396_v4 = vld [vmem:[%s7219_s18 + $0x80] sm:$0xff] (%p43_p5) }
  0x16   : > { %393 = vst [vmem:[%s7224_s19 + $0x10] sm:$0xff] (%p43_p5), %v392_v2  ;;  %v398_v5 = vld [vmem:[%s7219_s18 + $0x88] sm:$0xff] (%p43_p5)  ;;  %395 = vst [vmem:[%s7224_s19 + $0x18] sm:$0xff] (%p43_p5), %v394_v3  ;;  %v400_v6 = vld [vmem:[%s7219_s18 + $0x90] sm:$0xff] (%p43_p5) }
  0x17   : > { %397 = vst [vmem:[%s7224_s19 + $0x20] sm:$0xff] (%p43_p5), %v396_v4  ;;  %399 = vst [vmem:[%s7224_s19 + $0x28] sm:$0xff] (%p43_p5), %v398_v5  ;;  %v402_v7 = vld [vmem:[%s7219_s18 + $0x98] sm:$0xff] (%p43_p5)  ;;  %v404_v8 = vld [vmem:[%s7219_s18 + $0x100] sm:$0xff] (%p43_p5) }
  0x18   : > { %401 = vst [vmem:[%s7224_s19 + $0x30] sm:$0xff] %v400_v6  ;;  %403 = vst [vmem:[%s7224_s19 + $0x38] sm:$0xff] %v402_v7  ;;  %v406_v9 = vld [vmem:[%s7219_s18 + $0x108] sm:$0xff]  ;;  %v408_v10 = vld [vmem:[%s7219_s18 + $0x110] sm:$0xff] }
  0x19   : > { %405 = vst [vmem:[%s7224_s19 + $0x40] sm:$0xff] %v404_v8  ;;  %v410_v11 = vld [vmem:[%s7219_s18 + $0x118] sm:$0xff]  ;;  %407 = vst [vmem:[%s7224_s19 + $0x48] sm:$0xff] %v406_v9  ;;  %v412_v12 = vld [vmem:[%s7219_s18 + $0x180] sm:$0xff] }
  0x1a   : > { %409 = vst [vmem:[%s7224_s19 + $0x50] sm:$0xff] %v408_v10  ;;  %411 = vst [vmem:[%s7224_s19 + $0x58] sm:$0xff] %v410_v11  ;;  %v414_v13 = vld [vmem:[%s7219_s18 + $0x188] sm:$0xff]  ;;  %v416_v14 = vld [vmem:[%s7219_s18 + $0x190] sm:$0xff] }
  0x1b   : > { %413 = vst [vmem:[%s7224_s19 + $0x60] sm:$0xff] %v412_v12  ;;  %415 = vst [vmem:[%s7224_s19 + $0x68] sm:$0xff] %v414_v13  ;;  %v418_v15 = vld [vmem:[%s7219_s18 + $0x198] sm:$0xff]  ;;  %v420_v16 = vld [vmem:[%s7219_s18 + $0x200] sm:$0xff] }
  0x1c   : > { %417 = vst [vmem:[%s7224_s19 + $0x70] sm:$0xff] %v416_v14  ;;  %v422_v17 = vld [vmem:[%s7219_s18 + $0x208] sm:$0xff]  ;;  %419 = vst [vmem:[%s7224_s19 + $0x78] sm:$0xff] %v418_v15  ;;  %v424_v18 = vld [vmem:[%s7219_s18 + $0x210] sm:$0xff] }
  0x1d   : > { %421 = vst [vmem:[%s7224_s19 + $0x80] sm:$0xff] %v420_v16  ;;  %423 = vst [vmem:[%s7224_s19 + $0x88] sm:$0xff] %v422_v17  ;;  %v426_v19 = vld [vmem:[%s7219_s18 + $0x218] sm:$0xff]  ;;  %v428_v20 = vld [vmem:[%s7219_s18 + $0x280] sm:$0xff] }
  0x1e   : > { %425 = vst [vmem:[%s7224_s19 + $0x90] sm:$0xff] %v424_v18  ;;  %427 = vst [vmem:[%s7224_s19 + $0x98] sm:$0xff] %v426_v19  ;;  %v430_v21 = vld [vmem:[%s7219_s18 + $0x288] sm:$0xff]  ;;  %v432_v22 = vld [vmem:[%s7219_s18 + $0x290] sm:$0xff] }
  0x1f   : > { %429 = vst [vmem:[%s7224_s19 + $0xa0] sm:$0xff] %v428_v20  ;;  %v434_v23 = vld [vmem:[%s7219_s18 + $0x298] sm:$0xff]  ;;  %431 = vst [vmem:[%s7224_s19 + $0xa8] sm:$0xff] %v430_v21  ;;  %v436_v24 = vld [vmem:[%s7219_s18 + $0x300] sm:$0xff] }
  0x20   : > { %433 = vst [vmem:[%s7224_s19 + $0xb0] sm:$0xff] %v432_v22  ;;  %435 = vst [vmem:[%s7224_s19 + $0xb8] sm:$0xff] %v434_v23  ;;  %v438_v25 = vld [vmem:[%s7219_s18 + $0x308] sm:$0xff]  ;;  %v440_v26 = vld [vmem:[%s7219_s18 + $0x310] sm:$0xff] }
  0x21   : > { %437 = vst [vmem:[%s7224_s19 + $0xc0] sm:$0xff] %v436_v24  ;;  %439 = vst [vmem:[%s7224_s19 + $0xc8] sm:$0xff] %v438_v25  ;;  %v442_v27 = vld [vmem:[%s7219_s18 + $0x318] sm:$0xff]  ;;  %v444_v28 = vld [vmem:[%s7219_s18 + $0x380] sm:$0xff] }
  0x22   : > { %441 = vst [vmem:[%s7224_s19 + $0xd0] sm:$0xff] %v440_v26  ;;  %v446_v29 = vld [vmem:[%s7219_s18 + $0x388] sm:$0xff]  ;;  %443 = vst [vmem:[%s7224_s19 + $0xd8] sm:$0xff] %v442_v27  ;;  %v448_v30 = vld [vmem:[%s7219_s18 + $0x390] sm:$0xff] }
  0x23   : > { %445 = vst [vmem:[%s7224_s19 + $0xe0] sm:$0xff] %v444_v28  ;;  %447 = vst [vmem:[%s7224_s19 + $0xe8] sm:$0xff] %v446_v29  ;;  %v450_v31 = vld [vmem:[%s7219_s18 + $0x398] sm:$0xff]  ;;  %v452_v32 = vld [vmem:[%s7219_s18 + $0x400] sm:$0xff] }
  0x24   : > { %449 = vst [vmem:[%s7224_s19 + $0xf0] sm:$0xff] %v448_v30  ;;  %451 = vst [vmem:[%s7224_s19 + $0xf8] sm:$0xff] %v450_v31  ;;  %v454_v33 = vld [vmem:[%s7219_s18 + $0x408] sm:$0xff]  ;;  %v456_v34 = vld [vmem:[%s7219_s18 + $0x410] sm:$0xff] }
  0x25   : > { %453 = vst [vmem:[%s7224_s19 + $0x100] sm:$0xff] %v452_v32  ;;  %v458_v35 = vld [vmem:[%s7219_s18 + $0x418] sm:$0xff]  ;;  %455 = vst [vmem:[%s7224_s19 + $0x108] sm:$0xff] %v454_v33  ;;  %v460_v36 = vld [vmem:[%s7219_s18 + $0x480] sm:$0xff] }
  0x26   : > { %457 = vst [vmem:[%s7224_s19 + $0x110] sm:$0xff] %v456_v34  ;;  %459 = vst [vmem:[%s7224_s19 + $0x118] sm:$0xff] %v458_v35  ;;  %v462_v37 = vld [vmem:[%s7219_s18 + $0x488] sm:$0xff]  ;;  %v464_v38 = vld [vmem:[%s7219_s18 + $0x490] sm:$0xff] }
  0x27   : > { %461 = vst [vmem:[%s7224_s19 + $0x120] sm:$0xff] %v460_v36  ;;  %463 = vst [vmem:[%s7224_s19 + $0x128] sm:$0xff] %v462_v37  ;;  %v466_v39 = vld [vmem:[%s7219_s18 + $0x498] sm:$0xff]  ;;  %v468_v40 = vld [vmem:[%s7219_s18 + $0x500] sm:$0xff] }
  0x28   : > { %465 = vst [vmem:[%s7224_s19 + $0x130] sm:$0xff] %v464_v38  ;;  %v470_v41 = vld [vmem:[%s7219_s18 + $0x508] sm:$0xff]  ;;  %467 = vst [vmem:[%s7224_s19 + $0x138] sm:$0xff] %v466_v39  ;;  %v472_v42 = vld [vmem:[%s7219_s18 + $0x510] sm:$0xff] }
  0x29   : > { %469 = vst [vmem:[%s7224_s19 + $0x140] sm:$0xff] %v468_v40  ;;  %471 = vst [vmem:[%s7224_s19 + $0x148] sm:$0xff] %v470_v41  ;;  %v474_v43 = vld [vmem:[%s7219_s18 + $0x518] sm:$0xff]  ;;  %v476_v44 = vld [vmem:[%s7219_s18 + $0x580] sm:$0xff] }
  0x2a   : > { %473 = vst [vmem:[%s7224_s19 + $0x150] sm:$0xff] %v472_v42  ;;  %475 = vst [vmem:[%s7224_s19 + $0x158] sm:$0xff] %v474_v43  ;;  %v478_v45 = vld [vmem:[%s7219_s18 + $0x588] sm:$0xff]  ;;  %v480_v46 = vld [vmem:[%s7219_s18 + $0x590] sm:$0xff] }
  0x2b   : > { %477 = vst [vmem:[%s7224_s19 + $0x160] sm:$0xff] %v476_v44  ;;  %v482_v47 = vld [vmem:[%s7219_s18 + $0x598] sm:$0xff]  ;;  %479 = vst [vmem:[%s7224_s19 + $0x168] sm:$0xff] %v478_v45  ;;  %v484_v48 = vld [vmem:[%s7219_s18 + $0x600] sm:$0xff] }
  0x2c   : > { %481 = vst [vmem:[%s7224_s19 + $0x170] sm:$0xff] %v480_v46  ;;  %483 = vst [vmem:[%s7224_s19 + $0x178] sm:$0xff] %v482_v47  ;;  %v486_v49 = vld [vmem:[%s7219_s18 + $0x608] sm:$0xff]  ;;  %v488_v50 = vld [vmem:[%s7219_s18 + $0x610] sm:$0xff] }
  0x2d   : > { %485 = vst [vmem:[%s7224_s19 + $0x180] sm:$0xff] %v484_v48  ;;  %487 = vst [vmem:[%s7224_s19 + $0x188] sm:$0xff] %v486_v49  ;;  %v490_v51 = vld [vmem:[%s7219_s18 + $0x618] sm:$0xff]  ;;  %v492_v52 = vld [vmem:[%s7219_s18 + $0x680] sm:$0xff] }
  0x2e   : > { %489 = vst [vmem:[%s7224_s19 + $0x190] sm:$0xff] %v488_v50  ;;  %v494_v53 = vld [vmem:[%s7219_s18 + $0x688] sm:$0xff]  ;;  %491 = vst [vmem:[%s7224_s19 + $0x198] sm:$0xff] %v490_v51  ;;  %v496_v54 = vld [vmem:[%s7219_s18 + $0x690] sm:$0xff] }
  0x2f   : > { %493 = vst [vmem:[%s7224_s19 + $0x1a0] sm:$0xff] %v492_v52  ;;  %495 = vst [vmem:[%s7224_s19 + $0x1a8] sm:$0xff] %v494_v53  ;;  %v498_v55 = vld [vmem:[%s7219_s18 + $0x698] sm:$0xff]  ;;  %v500_v56 = vld [vmem:[%s7219_s18 + $0x700] sm:$0xff] }
  0x30   : > { %497 = vst [vmem:[%s7224_s19 + $0x1b0] sm:$0xff] %v496_v54  ;;  %499 = vst [vmem:[%s7224_s19 + $0x1b8] sm:$0xff] %v498_v55  ;;  %v502_v57 = vld [vmem:[%s7219_s18 + $0x708] sm:$0xff]  ;;  %v504_v58 = vld [vmem:[%s7219_s18 + $0x710] sm:$0xff] }
  0x31   : > { %501 = vst [vmem:[%s7224_s19 + $0x1c0] sm:$0xff] %v500_v56  ;;  %v506_v59 = vld [vmem:[%s7219_s18 + $0x718] sm:$0xff]  ;;  %503 = vst [vmem:[%s7224_s19 + $0x1c8] sm:$0xff] %v502_v57  ;;  %v508_v60 = vld [vmem:[%s7219_s18 + $0x780] sm:$0xff] }
  0x32   : > { %505 = vst [vmem:[%s7224_s19 + $0x1d0] sm:$0xff] %v504_v58  ;;  %507 = vst [vmem:[%s7224_s19 + $0x1d8] sm:$0xff] %v506_v59  ;;  %v510_v61 = vld [vmem:[%s7219_s18 + $0x788] sm:$0xff]  ;;  %v512_v62 = vld [vmem:[%s7219_s18 + $0x790] sm:$0xff] }
  0x33   : > { %509 = vst [vmem:[%s7224_s19 + $0x1e0] sm:$0xff] %v508_v60  ;;  %511 = vst [vmem:[%s7224_s19 + $0x1e8] sm:$0xff] %v510_v61  ;;  %v514_v63 = vld [vmem:[%s7219_s18 + $0x798] sm:$0xff] }
  0x34   : > { %513 = vst [vmem:[%s7224_s19 + $0x1f0] sm:$0xff] %v512_v62  ;;  %515 = vst [vmem:[%s7224_s19 + $0x1f8] sm:$0xff] %v514_v63 }
  0x35 PF: > { %p5630_p7 = scmp.ge.s32.totalorder %s7112_s23, 1  ;;  %p546_p8 = scmp.lt.s32.totalorder %s7112_s23, 21 }
  0x37   : > { %p547_p9 = pnand %p5630_p7, %p546_p8 }
  0x38   : > { %s553_s20 = sand.u32 (!%p547_p9), 1, %s7104_s21   ;;  %p607_p10 = scmp.lt.s32.totalorder (!%p547_p9), %s7198_s24, 3 }
  0x39   : > { %550 = sbr.rel (%p547_p9) target bundleno = 1846 (0x736), region = 83  ;;  %s5631_s26 = sshll.u32 (!%p547_p9), %s553_s20, 9 }
  0x3a   : > { %s7356_s27 = sadd.s32 (!%p547_p9), 4294967292, %s7198_s24  ;;  %s7372_s19 = scalar_lea.vmem (!%p547_p9), [#allocation5], %s5631_s26 }
  0x3b   : > { %p617_p11 = scmp.gt.s32.totalorder (!%p547_p9), %s7356_s27, 0  ;;  %p5638_p12 = scmp.lt.s32.totalorder (!%p547_p9), %s7356_s27, 15 }
  0x3c   : > { %p5645_p13 = scmp.ne.s32.totalorder (!%p547_p9), %s7198_s24, 0 }
  0x40   : > { %s608_s28 = scalar_select %p607_p10, %s7198_s24, 3 }
  0x41   : > { %s618_s29 = scalar_select %p617_p11, %s7356_s27, 0 }
  0x42   : > { %s8190_s28 = smov (!%p607_p10, %s608_s28), 3  ;;  %631 = sbr.rel (%p5645_p13) target bundleno = 102 (0x66), region = 91 }
  0x43   : > { %s6152_s23 = sshll.u32 %s8190_s28, 11  ;;  %s8192_s29 = smov (!%p5638_p12, %s618_s29), 15  ;;  %v7114_v0 = vmov (!%p5645_p13), 0.0  }
  0x44   : > { %s7365_s15 = scalar_lea.vmem %s8174_s1, %s6152_s23  ;;  %s6155_s21 = sshll.u32 %s8192_s29, 10  ;;  %632 = vst [vmem:[#allocation2] sm:$0xff] (!%p5645_p13), %v7114_v0  ;;  %633 = vst [vmem:[#allocation2 + $0x8] sm:$0xff] (!%p5645_p13), %v7114_v0 }
  0x45   : > { %s7370_s18 = scalar_lea.vmem %s8176_s3, %s6155_s21  ;;  %634 = vst [vmem:[#allocation2 + $0x10] sm:$0xff] (!%p5645_p13), %v7114_v0  ;;  %635 = vst [vmem:[#allocation2 + $0x18] sm:$0xff] (!%p5645_p13), %v7114_v0 }
  0x46   : > { %636 = vst [vmem:[#allocation2 + $0x20] sm:$0xff] (!%p5645_p13), %v7114_v0  ;;  %637 = vst [vmem:[#allocation2 + $0x28] sm:$0xff] (!%p5645_p13), %v7114_v0 }
  0x47   : > { %638 = vst [vmem:[#allocation2 + $0x30] sm:$0xff] (!%p5645_p13), %v7114_v0  ;;  %639 = vst [vmem:[#allocation2 + $0x38] sm:$0xff] (!%p5645_p13), %v7114_v0 }
  0x48   : > { %640 = vst [vmem:[#allocation2 + $0x40] sm:$0xff] (!%p5645_p13), %v7114_v0  ;;  %641 = vst [vmem:[#allocation2 + $0x48] sm:$0xff] (!%p5645_p13), %v7114_v0 }
  0x49   : > { %642 = vst [vmem:[#allocation2 + $0x50] sm:$0xff] %v7114_v0  ;;  %643 = vst [vmem:[#allocation2 + $0x58] sm:$0xff] %v7114_v0 }
  0x4a   : > { %644 = vst [vmem:[#allocation2 + $0x60] sm:$0xff] %v7114_v0  ;;  %645 = vst [vmem:[#allocation2 + $0x68] sm:$0xff] %v7114_v0 }
  0x4b   : > { %646 = vst [vmem:[#allocation2 + $0x70] sm:$0xff] %v7114_v0  ;;  %647 = vst [vmem:[#allocation2 + $0x78] sm:$0xff] %v7114_v0 }
  0x4c   : > { %648 = vst [vmem:[#allocation2 + $0x80] sm:$0xff] %v7114_v0  ;;  %649 = vst [vmem:[#allocation2 + $0x88] sm:$0xff] %v7114_v0 }
  0x4d   : > { %650 = vst [vmem:[#allocation2 + $0x90] sm:$0xff] %v7114_v0  ;;  %651 = vst [vmem:[#allocation2 + $0x98] sm:$0xff] %v7114_v0 }
  0x4e   : > { %652 = vst [vmem:[#allocation2 + $0xa0] sm:$0xff] %v7114_v0  ;;  %653 = vst [vmem:[#allocation2 + $0xa8] sm:$0xff] %v7114_v0 }
  0x4f   : > { %654 = vst [vmem:[#allocation2 + $0xb0] sm:$0xff] %v7114_v0  ;;  %655 = vst [vmem:[#allocation2 + $0xb8] sm:$0xff] %v7114_v0 }
  0x50   : > { %656 = vst [vmem:[#allocation2 + $0xc0] sm:$0xff] %v7114_v0  ;;  %657 = vst [vmem:[#allocation2 + $0xc8] sm:$0xff] %v7114_v0 }
  0x51   : > { %658 = vst [vmem:[#allocation2 + $0xd0] sm:$0xff] %v7114_v0  ;;  %659 = vst [vmem:[#allocation2 + $0xd8] sm:$0xff] %v7114_v0 }
  0x52   : > { %660 = vst [vmem:[#allocation2 + $0xe0] sm:$0xff] %v7114_v0  ;;  %661 = vst [vmem:[#allocation2 + $0xe8] sm:$0xff] %v7114_v0 }
  0x53   : > { %662 = vst [vmem:[#allocation2 + $0xf0] sm:$0xff] %v7114_v0  ;;  %663 = vst [vmem:[#allocation2 + $0xf8] sm:$0xff] %v7114_v0 }
  0x54   : > { %664 = vst [vmem:[#allocation2 + $0x100] sm:$0xff] %v7114_v0  ;;  %665 = vst [vmem:[#allocation2 + $0x108] sm:$0xff] %v7114_v0 }
  0x55   : > { %666 = vst [vmem:[#allocation2 + $0x110] sm:$0xff] %v7114_v0  ;;  %667 = vst [vmem:[#allocation2 + $0x118] sm:$0xff] %v7114_v0 }
  0x56   : > { %668 = vst [vmem:[#allocation2 + $0x120] sm:$0xff] %v7114_v0  ;;  %669 = vst [vmem:[#allocation2 + $0x128] sm:$0xff] %v7114_v0 }
  0x57   : > { %670 = vst [vmem:[#allocation2 + $0x130] sm:$0xff] %v7114_v0  ;;  %671 = vst [vmem:[#allocation2 + $0x138] sm:$0xff] %v7114_v0 }
  0x58   : > { %672 = vst [vmem:[#allocation2 + $0x140] sm:$0xff] %v7114_v0  ;;  %673 = vst [vmem:[#allocation2 + $0x148] sm:$0xff] %v7114_v0 }
  0x59   : > { %674 = vst [vmem:[#allocation2 + $0x150] sm:$0xff] %v7114_v0  ;;  %675 = vst [vmem:[#allocation2 + $0x158] sm:$0xff] %v7114_v0 }
  0x5a   : > { %676 = vst [vmem:[#allocation2 + $0x160] sm:$0xff] %v7114_v0  ;;  %677 = vst [vmem:[#allocation2 + $0x168] sm:$0xff] %v7114_v0 }
  0x5b   : > { %678 = vst [vmem:[#allocation2 + $0x170] sm:$0xff] %v7114_v0  ;;  %679 = vst [vmem:[#allocation2 + $0x178] sm:$0xff] %v7114_v0 }
  0x5c   : > { %680 = vst [vmem:[#allocation2 + $0x180] sm:$0xff] %v7114_v0  ;;  %681 = vst [vmem:[#allocation2 + $0x188] sm:$0xff] %v7114_v0 }
  0x5d   : > { %682 = vst [vmem:[#allocation2 + $0x190] sm:$0xff] %v7114_v0  ;;  %683 = vst [vmem:[#allocation2 + $0x198] sm:$0xff] %v7114_v0 }
  0x5e   : > { %684 = vst [vmem:[#allocation2 + $0x1a0] sm:$0xff] %v7114_v0  ;;  %685 = vst [vmem:[#allocation2 + $0x1a8] sm:$0xff] %v7114_v0 }
  0x5f   : > { %686 = vst [vmem:[#allocation2 + $0x1b0] sm:$0xff] %v7114_v0  ;;  %687 = vst [vmem:[#allocation2 + $0x1b8] sm:$0xff] %v7114_v0 }
  0x60   : > { %688 = vst [vmem:[#allocation2 + $0x1c0] sm:$0xff] %v7114_v0  ;;  %689 = vst [vmem:[#allocation2 + $0x1c8] sm:$0xff] %v7114_v0 }
  0x61   : > { %690 = vst [vmem:[#allocation2 + $0x1d0] sm:$0xff] %v7114_v0  ;;  %691 = vst [vmem:[#allocation2 + $0x1d8] sm:$0xff] %v7114_v0 }
  0x62   : > { %692 = vst [vmem:[#allocation2 + $0x1e0] sm:$0xff] %v7114_v0  ;;  %693 = vst [vmem:[#allocation2 + $0x1e8] sm:$0xff] %v7114_v0 }
  0x63   : > { %694 = vst [vmem:[#allocation2 + $0x1f0] sm:$0xff] %v7114_v0  ;;  %695 = vst [vmem:[#allocation2 + $0x1f8] sm:$0xff] %v7114_v0 }
  0x64   : > { %696 = vst [vmem:[#allocation4] sm:$0xff] %v7114_v0  ;;  %697 = vst [vmem:[#allocation4 + $0x8] sm:$0xff] %v7114_v0 }
  0x65   : > { %698 = vst [vmem:[#allocation4 + $0x10] sm:$0xff] %v7114_v0  ;;  %699 = vst [vmem:[#allocation4 + $0x18] sm:$0xff] %v7114_v0 }
  0x66 PF: > { %p5646_p0 = scmp.ge.s32.totalorder %s7198_s24, 4 }
  0x67   : > { %v6466_v1 = vld [vmem:[%s7365_s15 + $0x4] ss:$16 sps:$4 sm:$0xff] (!%p5646_p0)   ;;  %v6468_v2 = vld [vmem:[%s7365_s15 + $0xc] ss:$16 sps:$4 sm:$0xff] (!%p5646_p0)   ;;  %v6470_v3 = vld [vmem:[%s7365_s15] ss:$16 sps:$4 sm:$0xff] (!%p5646_p0)  }
  0x68   : > { %703 = sbr.rel (%p5646_p0) target bundleno = 634 (0x27a), region = 95  ;;  %2688 = vmatprep.subr.bf16.mxu0 (!%p5646_p0), %v6466_v1  ;;  %v6471_v4 = vld [vmem:[%s7365_s15 + $0x8] ss:$16 sps:$4 sm:$0xff] (!%p5646_p0)   ;;  %3140 = vmatprep.subr.bf16.mxu1 (!%p5646_p0), %v6468_v2  ;;  %v6472_v5 = vld [vmem:[%s7365_s15 + $0x24] ss:$16 sps:$4 sm:$0xff] (!%p5646_p0)  }
  0x69   : > { %2689 = vmatpush1.bf16.msra.mxu0 (!%p5646_p0), %v6470_v3  ;;  %3141 = vmatpush1.bf16.msra.mxu1 (!%p5646_p0), %v6471_v4  ;;  %v6474_v6 = vld [vmem:[%s7365_s15 + $0x2c] ss:$16 sps:$4 sm:$0xff] (!%p5646_p0)   ;;  %v6476_v7 = vld [vmem:[%s7365_s15 + $0x20] ss:$16 sps:$4 sm:$0xff] (!%p5646_p0)   ;;  %v6477_v8 = vld [vmem:[%s7365_s15 + $0x28] ss:$16 sps:$4 sm:$0xff] (!%p5646_p0)  }
  0x6a   : > { %2690 = vmatprep.subr.bf16.mxu0 (!%p5646_p0), %v6472_v5  ;;  %3142 = vmatprep.subr.bf16.mxu1 (!%p5646_p0), %v6474_v6  ;;  %v6478_v9 = vld [vmem:[%s7365_s15 + $0x44] ss:$16 sps:$4 sm:$0xff] (!%p5646_p0)   ;;  %v6480_v10 = vld [vmem:[%s7365_s15 + $0x4c] ss:$16 sps:$4 sm:$0xff] (!%p5646_p0)   ;;  %v6482_v11 = vld [vmem:[%s7365_s15 + $0x40] ss:$16 sps:$4 sm:$0xff] (!%p5646_p0)  }
  0x6b   : > { %v6483_v12 = vld [vmem:[%s7365_s15 + $0x48] ss:$16 sps:$4 sm:$0xff] (!%p5646_p0)   ;;  %v6484_v13 = vld [vmem:[%s7365_s15 + $0x64] ss:$16 sps:$4 sm:$0xff] (!%p5646_p0)   ;;  %v6486_v14 = vld [vmem:[%s7365_s15 + $0x6c] ss:$16 sps:$4 sm:$0xff] (!%p5646_p0)  }
  0x6c   : > { %v6488_v15 = vld [vmem:[%s7365_s15 + $0x60] ss:$16 sps:$4 sm:$0xff] (!%p5646_p0)   ;;  %v6489_v16 = vld [vmem:[%s7365_s15 + $0x68] ss:$16 sps:$4 sm:$0xff] (!%p5646_p0)   ;;  %v6490_v17 = vld [vmem:[%s7365_s15 + $0x84] ss:$16 sps:$4 sm:$0xff] (!%p5646_p0)  }
  0x6d   : > { %2691 = vmatpush1.bf16.msra.mxu0 (!%p5646_p0), %v6476_v7  ;;  %3143 = vmatpush1.bf16.msra.mxu1 (!%p5646_p0), %v6477_v8  ;;  %v6492_v18 = vld [vmem:[%s7365_s15 + $0x8c] ss:$16 sps:$4 sm:$0xff] (!%p5646_p0)   ;;  %v6494_v19 = vld [vmem:[%s7365_s15 + $0x80] ss:$16 sps:$4 sm:$0xff] (!%p5646_p0)   ;;  %v6495_v20 = vld [vmem:[%s7365_s15 + $0x88] ss:$16 sps:$4 sm:$0xff] (!%p5646_p0)  }
  0x6e   : > { %2692 = vmatprep.subr.bf16.mxu0 (!%p5646_p0), %v6478_v9  ;;  %3144 = vmatprep.subr.bf16.mxu1 (!%p5646_p0), %v6480_v10  ;;  %v6496_v21 = vld [vmem:[%s7365_s15 + $0xa4] ss:$16 sps:$4 sm:$0xff] (!%p5646_p0)   ;;  %v6498_v22 = vld [vmem:[%s7365_s15 + $0xac] ss:$16 sps:$4 sm:$0xff] (!%p5646_p0)   ;;  %v6500_v23 = vld [vmem:[%s7365_s15 + $0xa0] ss:$16 sps:$4 sm:$0xff] (!%p5646_p0)  }
  0x6f   : > { %v6501_v24 = vld [vmem:[%s7365_s15 + $0xa8] ss:$16 sps:$4 sm:$0xff]   ;;  %v6502_v25 = vld [vmem:[%s7365_s15 + $0xc4] ss:$16 sps:$4 sm:$0xff]   ;;  %v6504_v26 = vld [vmem:[%s7365_s15 + $0xcc] ss:$16 sps:$4 sm:$0xff]  }
  0x70   : > { %v6506_v27 = vld [vmem:[%s7365_s15 + $0xc0] ss:$16 sps:$4 sm:$0xff]   ;;  %v6507_v28 = vld [vmem:[%s7365_s15 + $0xc8] ss:$16 sps:$4 sm:$0xff]   ;;  %v6508_v29 = vld [vmem:[%s7365_s15 + $0xe4] ss:$16 sps:$4 sm:$0xff]  }
  0x71   : > { %2693 = vmatpush1.bf16.msra.mxu0 %v6482_v11  ;;  %3145 = vmatpush1.bf16.msra.mxu1 %v6483_v12  ;;  %v6510_v30 = vld [vmem:[%s7365_s15 + $0xec] ss:$16 sps:$4 sm:$0xff]   ;;  %v6512_v31 = vld [vmem:[%s7365_s15 + $0xe0] ss:$16 sps:$4 sm:$0xff]   ;;  %v6513_v32 = vld [vmem:[%s7365_s15 + $0xe8] ss:$16 sps:$4 sm:$0xff]  }
  0x72   : > { %2694 = vmatprep.subr.bf16.mxu0 %v6484_v13  ;;  %3146 = vmatprep.subr.bf16.mxu1 %v6486_v14  ;;  %v6514_v33 = vld [vmem:[%s7365_s15 + $0x104] ss:$16 sps:$4 sm:$0xff]   ;;  %v6516_v34 = vld [vmem:[%s7365_s15 + $0x10c] ss:$16 sps:$4 sm:$0xff]   ;;  %v6518_v35 = vld [vmem:[%s7365_s15 + $0x100] ss:$16 sps:$4 sm:$0xff]  }
  0x73   : > { %v6519_v36 = vld [vmem:[%s7365_s15 + $0x108] ss:$16 sps:$4 sm:$0xff]   ;;  %v6520_v37 = vld [vmem:[%s7365_s15 + $0x124] ss:$16 sps:$4 sm:$0xff]   ;;  %v6522_v38 = vld [vmem:[%s7365_s15 + $0x12c] ss:$16 sps:$4 sm:$0xff]  }
  0x74   : > { %v6524_v39 = vld [vmem:[%s7365_s15 + $0x120] ss:$16 sps:$4 sm:$0xff]   ;;  %v6525_v40 = vld [vmem:[%s7365_s15 + $0x128] ss:$16 sps:$4 sm:$0xff]   ;;  %v6526_v41 = vld [vmem:[%s7365_s15 + $0x144] ss:$16 sps:$4 sm:$0xff]  }
  0x75   : > { %2695 = vmatpush1.bf16.msra.mxu0 %v6488_v15  ;;  %3147 = vmatpush1.bf16.msra.mxu1 %v6489_v16  ;;  %v6528_v42 = vld [vmem:[%s7365_s15 + $0x14c] ss:$16 sps:$4 sm:$0xff]   ;;  %v6530_v43 = vld [vmem:[%s7365_s15 + $0x140] ss:$16 sps:$4 sm:$0xff]   ;;  %v6531_v44 = vld [vmem:[%s7365_s15 + $0x148] ss:$16 sps:$4 sm:$0xff]  }
  0x76   : > { %2696 = vmatprep.subr.bf16.mxu0 %v6490_v17  ;;  %3148 = vmatprep.subr.bf16.mxu1 %v6492_v18  ;;  %v6532_v45 = vld [vmem:[%s7365_s15 + $0x164] ss:$16 sps:$4 sm:$0xff]   ;;  %v6534_v46 = vld [vmem:[%s7365_s15 + $0x16c] ss:$16 sps:$4 sm:$0xff]   ;;  %v6536_v49 = vld [vmem:[%s7365_s15 + $0x160] ss:$16 sps:$4 sm:$0xff]  }
  0x77   : > { %v768_v47 = vld [vmem:[%s7372_s19] sm:$0xff]  ;;  %v6537_v50 = vld [vmem:[%s7365_s15 + $0x168] ss:$16 sps:$4 sm:$0xff]   ;;  %v6540_v53 = vld [vmem:[%s7365_s15 + $0x18c] ss:$16 sps:$4 sm:$0xff]  }
  0x78   : > { %v772_v48 = vld [vmem:[%s7372_s19 + $0x20] sm:$0xff]  ;;  %v6543_v55 = vld [vmem:[%s7365_s15 + $0x188] ss:$16 sps:$4 sm:$0xff]   ;;  %v6546_v57 = vld [vmem:[%s7365_s15 + $0x1ac] ss:$16 sps:$4 sm:$0xff]  }
  0x79   : > { %2697 = vmatpush1.bf16.msra.mxu0 %v6494_v19  ;;  %3149 = vmatpush1.bf16.msra.mxu1 %v6495_v20  ;;  %v5648_v51 = vcombine.high %v768_v47, %v772_v48  ;;  %v6538_v52 = vld [vmem:[%s7365_s15 + $0x184] ss:$16 sps:$4 sm:$0xff]   ;;  %v6542_v54 = vld [vmem:[%s7365_s15 + $0x180] ss:$16 sps:$4 sm:$0xff]   ;;  %v6549_v59 = vld [vmem:[%s7365_s15 + $0x1a8] ss:$16 sps:$4 sm:$0xff]   ;;  %v5647_v8 = vcombine.low %v768_v47, %v772_v48 }
  0x7a   : > { %2698 = vmatprep.subr.bf16.mxu0 %v6496_v21  ;;  %3150 = vmatprep.subr.bf16.mxu1 %v6498_v22  ;;  %v6544_v56 = vld [vmem:[%s7365_s15 + $0x1a4] ss:$16 sps:$4 sm:$0xff]   ;;  %v6548_v58 = vld [vmem:[%s7365_s15 + $0x1a0] ss:$16 sps:$4 sm:$0xff]   ;;  %v6552_v61 = vld [vmem:[%s7365_s15 + $0x1cc] ss:$16 sps:$4 sm:$0xff]  }
  0x7b   : > { %2720 = vmatprep.mubr.bf16.mxu0 %v5648_v51  ;;  %3172 = vmatprep.mubr.bf16.mxu1 %v5648_v51  ;;  %v6550_v60 = vld [vmem:[%s7365_s15 + $0x1c4] ss:$16 sps:$4 sm:$0xff]   ;;  %v6554_v62 = vld [vmem:[%s7365_s15 + $0x1c0] ss:$16 sps:$4 sm:$0xff]   ;;  %v6555_v63 = vld [vmem:[%s7365_s15 + $0x1c8] ss:$16 sps:$4 sm:$0xff]  }
  0x7c   : > { %v6556_v0 = vld [vmem:[%s7365_s15 + $0x1e4] ss:$16 sps:$4 sm:$0xff]   ;;  %v6558_v1 = vld [vmem:[%s7365_s15 + $0x1ec] ss:$16 sps:$4 sm:$0xff]   ;;  %v6560_v2 = vld [vmem:[%s7365_s15 + $0x1e0] ss:$16 sps:$4 sm:$0xff]  }
  0x7d   : > { %2699 = vmatpush1.bf16.msra.mxu0 %v6500_v23  ;;  %3151 = vmatpush1.bf16.msra.mxu1 %v6501_v24  ;;  %v6561_v3 = vld [vmem:[%s7365_s15 + $0x1e8] ss:$16 sps:$4 sm:$0xff]   ;;  %v6564_v4 = vld [vmem:[%s7365_s15 + $0x204] ss:$16 sps:$4 sm:$0xff]   ;;  %v6567_v5 = vld [vmem:[%s7365_s15 + $0x20c] ss:$16 sps:$4 sm:$0xff]  }
  0x7e   : > { %2700 = vmatprep.subr.bf16.mxu0 %v6502_v25  ;;  %3152 = vmatprep.subr.bf16.mxu1 %v6504_v26  ;;  %v6562_v6 = vld [vmem:[%s7365_s15 + $0x200] ss:$16 sps:$4 sm:$0xff]   ;;  %v6565_v7 = vld [vmem:[%s7365_s15 + $0x208] ss:$16 sps:$4 sm:$0xff]   ;;  %v6570_v11 = vld [vmem:[%s7365_s15 + $0x224] ss:$16 sps:$4 sm:$0xff]  }
  0x7f   : > { %v776_v9 = vld [vmem:[%s7372_s19 + $0x40] sm:$0xff]  ;;  %v6573_v12 = vld [vmem:[%s7365_s15 + $0x22c] ss:$16 sps:$4 sm:$0xff]   ;;  %v6571_v15 = vld [vmem:[%s7365_s15 + $0x228] ss:$16 sps:$4 sm:$0xff]  }
  0x80   : > { %v780_v10 = vld [vmem:[%s7372_s19 + $0x60] sm:$0xff]  ;;  %v6579_v17 = vld [vmem:[%s7365_s15 + $0x24c] ss:$16 sps:$4 sm:$0xff]   ;;  %v6577_v22 = vld [vmem:[%s7365_s15 + $0x248] ss:$16 sps:$4 sm:$0xff]  }
  0x81   : > { %2701 = vmatpush1.bf16.msra.mxu0 %v6506_v27  ;;  %3153 = vmatpush1.bf16.msra.mxu1 %v6507_v28  ;;  %v5656_v13 = vcombine.high %v776_v9, %v780_v10  ;;  %v6568_v14 = vld [vmem:[%s7365_s15 + $0x220] ss:$16 sps:$4 sm:$0xff]   ;;  %v6576_v16 = vld [vmem:[%s7365_s15 + $0x244] ss:$16 sps:$4 sm:$0xff]   ;;  %v5655_v19 = vcombine.low %v776_v9, %v780_v10  ;;  %v6585_v24 = vld [vmem:[%s7365_s15 + $0x26c] ss:$16 sps:$4 sm:$0xff]  }
  0x82   : > { %2702 = vmatprep.subr.bf16.mxu0 %v6508_v29  ;;  %3154 = vmatprep.subr.bf16.mxu1 %v6510_v30  ;;  %v784_v18 = vld [vmem:[%s7372_s19 + $0x80] sm:$0xff]  ;;  %v6583_v27 = vld [vmem:[%s7365_s15 + $0x268] ss:$16 sps:$4 sm:$0xff]   ;;  %v6591_v29 = vld [vmem:[%s7365_s15 + $0x28c] ss:$16 sps:$4 sm:$0xff]  }
  0x83   : > { %v788_v20 = vld [vmem:[%s7372_s19 + $0xa0] sm:$0xff]  ;;  %v6609_v48 = vld [vmem:[%s7365_s15 + $0x2ec] ss:$16 sps:$4 sm:$0xff]   ;;  %v6607_v51 = vld [vmem:[%s7365_s15 + $0x2e8] ss:$16 sps:$4 sm:$0xff]  }
  0x84   : > { %v6574_v21 = vld [vmem:[%s7365_s15 + $0x240] ss:$16 sps:$4 sm:$0xff]   ;;  %v6582_v23 = vld [vmem:[%s7365_s15 + $0x264] ss:$16 sps:$4 sm:$0xff]   ;;  %v5664_v25 = vcombine.high %v784_v18, %v788_v20 }
  0x85   : > { %2703 = vmatpush1.bf16.msra.mxu0 %v6512_v31  ;;  %3155 = vmatpush1.bf16.msra.mxu1 %v6513_v32  ;;  %v6580_v26 = vld [vmem:[%s7365_s15 + $0x260] ss:$16 sps:$4 sm:$0xff]   ;;  %v6588_v28 = vld [vmem:[%s7365_s15 + $0x284] ss:$16 sps:$4 sm:$0xff]   ;;  %v5663_v31 = vcombine.low %v784_v18, %v788_v20  ;;  %v6645_v20 = vld [vmem:[%s7365_s15 + $0x3ac] ss:$16 sps:$4 sm:$0xff]  }
  0x86   : > { %2704 = vmatprep.subr.bf16.mxu0 %v6514_v33  ;;  %3156 = vmatprep.subr.bf16.mxu1 %v6516_v34  ;;  %v792_v30 = vld [vmem:[%s7372_s19 + $0xc0] sm:$0xff]  ;;  %v6589_v34 = vld [vmem:[%s7365_s15 + $0x288] ss:$16 sps:$4 sm:$0xff]  }
  0x87   : > { %v796_v32 = vld [vmem:[%s7372_s19 + $0xe0] sm:$0xff] }
  0x88   : > { %v6586_v33 = vld [vmem:[%s7365_s15 + $0x280] ss:$16 sps:$4 sm:$0xff]   ;;  %v6606_v47 = vld [vmem:[%s7365_s15 + $0x2e4] ss:$16 sps:$4 sm:$0xff]  }
  0x89   : > { %2705 = vmatpush1.bf16.msra.mxu0 %v6518_v35  ;;  %3157 = vmatpush1.bf16.msra.mxu1 %v6519_v36  ;;  %v6594_v35 = vld [vmem:[%s7365_s15 + $0x2a4] ss:$16 sps:$4 sm:$0xff]   ;;  %v6597_v36 = vld [vmem:[%s7365_s15 + $0x2ac] ss:$16 sps:$4 sm:$0xff]   ;;  %v6628_v10 = vld [vmem:[%s7365_s15 + $0x360] ss:$16 sps:$4 sm:$0xff]  }
  0x8a   : > { %2706 = vmatprep.subr.bf16.mxu0 %v6520_v37  ;;  %3158 = vmatprep.subr.bf16.mxu1 %v6522_v38  ;;  %v5672_v37 = vcombine.high %v792_v30, %v796_v32  ;;  %v6592_v38 = vld [vmem:[%s7365_s15 + $0x2a0] ss:$16 sps:$4 sm:$0xff]  }
  0x8b   : > { %v828_v18 = vld [vmem:[%s7372_s19 + $0x1e0] sm:$0xff] }
  0x8d   : > { %2707 = vmatpush1.bf16.msra.mxu0 %v6524_v39  ;;  %3159 = vmatpush1.bf16.msra.mxu1 %v6525_v40  ;;  %v6595_v39 = vld [vmem:[%s7365_s15 + $0x2a8] ss:$16 sps:$4 sm:$0xff]   ;;  %v6600_v40 = vld [vmem:[%s7365_s15 + $0x2c4] ss:$16 sps:$4 sm:$0xff]  }
  0x8e   : > { %2708 = vmatprep.subr.bf16.mxu0 %v6526_v41  ;;  %3160 = vmatprep.subr.bf16.mxu1 %v6528_v42  ;;  %v6603_v41 = vld [vmem:[%s7365_s15 + $0x2cc] ss:$16 sps:$4 sm:$0xff]   ;;  %v6598_v42 = vld [vmem:[%s7365_s15 + $0x2c0] ss:$16 sps:$4 sm:$0xff]  }
  0x91   : > { %2709 = vmatpush1.bf16.msra.mxu0 %v6530_v43  ;;  %3161 = vmatpush1.bf16.msra.mxu1 %v6531_v44  ;;  %v6601_v43 = vld [vmem:[%s7365_s15 + $0x2c8] ss:$16 sps:$4 sm:$0xff]   ;;  %v5671_v44 = vcombine.low %v792_v30, %v796_v32  ;;  %v6657_v32 = vld [vmem:[%s7365_s15 + $0x3ec] ss:$16 sps:$4 sm:$0xff]  }
  0x92   : > { %2710 = vmatprep.subr.bf16.mxu0 %v6532_v45  ;;  %3162 = vmatprep.subr.bf16.mxu1 %v6534_v46  ;;  %v800_v45 = vld [vmem:[%s7372_s19 + $0x100] sm:$0xff]  ;;  %v6649_v30 = vld [vmem:[%s7365_s15 + $0x3c8] ss:$16 sps:$4 sm:$0xff]  }
  0x93   : > { %v804_v46 = vld [vmem:[%s7372_s19 + $0x120] sm:$0xff] }
  0x95   : > { %2711 = vmatpush1.bf16.msra.mxu0 %v6536_v49  ;;  %3163 = vmatpush1.bf16.msra.mxu1 %v6537_v50  ;;  %v5680_v49 = vcombine.high %v800_v45, %v804_v46  ;;  %v6604_v50 = vld [vmem:[%s7365_s15 + $0x2e0] ss:$16 sps:$4 sm:$0xff]  }
  0x96   : > { %2712 = vmatprep.subr.bf16.mxu0 %v6538_v52  ;;  %3164 = vmatprep.subr.bf16.mxu1 %v6540_v53  ;;  %v6612_v52 = vld [vmem:[%s7365_s15 + $0x304] ss:$16 sps:$4 sm:$0xff]   ;;  %v6615_v53 = vld [vmem:[%s7365_s15 + $0x30c] ss:$16 sps:$4 sm:$0xff]  }
  0x99   : > { %2713 = vmatpush1.bf16.msra.mxu0 %v6542_v54  ;;  %3165 = vmatpush1.bf16.msra.mxu1 %v6543_v55  ;;  %v808_v54 = vld [vmem:[%s7372_s19 + $0x140] sm:$0xff]  ;;  %v5679_v55 = vcombine.low %v800_v45, %v804_v46 }
  0x9a   : > { %2714 = vmatprep.subr.bf16.mxu0 %v6544_v56  ;;  %3166 = vmatprep.subr.bf16.mxu1 %v6546_v57  ;;  %v812_v56 = vld [vmem:[%s7372_s19 + $0x160] sm:$0xff] }
  0x9b   : > { %v6610_v57 = vld [vmem:[%s7365_s15 + $0x300] ss:$16 sps:$4 sm:$0xff]  }
  0x9c   : > { %v6664_v46 = vld [vmem:[%s7365_s15 + $0x420] ss:$16 sps:$4 sm:$0xff]  }
  0x9d   : > { %2715 = vmatpush1.bf16.msra.mxu0 %v6548_v58  ;;  %3167 = vmatpush1.bf16.msra.mxu1 %v6549_v59  ;;  %v6613_v58 = vld [vmem:[%s7365_s15 + $0x308] ss:$16 sps:$4 sm:$0xff]   ;;  %v6618_v59 = vld [vmem:[%s7365_s15 + $0x324] ss:$16 sps:$4 sm:$0xff]  }
  0x9e   : > { %2716 = vmatprep.subr.bf16.mxu0 %v6550_v60  ;;  %3168 = vmatprep.subr.bf16.mxu1 %v6552_v61  ;;  %v6621_v60 = vld [vmem:[%s7365_s15 + $0x32c] ss:$16 sps:$4 sm:$0xff]   ;;  %v5688_v61 = vcombine.high %v808_v54, %v812_v56 }
  0xa1   : > { %2717 = vmatpush1.bf16.msra.mxu0 %v6554_v62  ;;  %3169 = vmatpush1.bf16.msra.mxu1 %v6555_v63  ;;  %v6616_v62 = vld [vmem:[%s7365_s15 + $0x320] ss:$16 sps:$4 sm:$0xff]   ;;  %v6619_v63 = vld [vmem:[%s7365_s15 + $0x328] ss:$16 sps:$4 sm:$0xff]  }
  0xa2   : > { %2718 = vmatprep.subr.bf16.mxu0 %v6556_v0  ;;  %3170 = vmatprep.subr.bf16.mxu1 %v6558_v1  ;;  %v6624_v0 = vld [vmem:[%s7365_s15 + $0x344] ss:$16 sps:$4 sm:$0xff]   ;;  %v6627_v1 = vld [vmem:[%s7365_s15 + $0x34c] ss:$16 sps:$4 sm:$0xff]  }
  0xa5   : > { %2719 = vmatpush1.bf16.msra.mxu0 %v6560_v2  ;;  %3171 = vmatpush1.bf16.msra.mxu1 %v6561_v3  ;;  %v816_v2 = vld [vmem:[%s7372_s19 + $0x180] sm:$0xff]  ;;  %v5687_v3 = vcombine.low %v808_v54, %v812_v56  ;;  %v789_v54 = vld [vmem:[%s7372_s19 + $0xa8] sm:$0xff] }
  0xa6   : > { %2801 = vmatprep.subr.bf16.mxu0 %v6564_v4  ;;  %3253 = vmatprep.subr.bf16.mxu1 %v6567_v5  ;;  %v820_v4 = vld [vmem:[%s7372_s19 + $0x1a0] sm:$0xff]  ;;  %v6681_v56 = vld [vmem:[%s7365_s15 + $0x46c] ss:$16 sps:$4 sm:$0xff]  }
  0xa7   : > { %v6622_v5 = vld [vmem:[%s7365_s15 + $0x340] ss:$16 sps:$4 sm:$0xff]   ;;  %v5696_v9 = vcombine.high %v816_v2, %v820_v4 }
  0xa8   : > { %2721 = vmatmul.mubr.bf16.vlgmr.msra.gmra.mrb[0].mxu0 %v5647_v8  ;;  %3173 = vmatmul.mubr.bf16.vlgmr.msra.gmra.mrb[0].mxu1 %v5647_v8  ;;  %v6633_v8 = vld [vmem:[%s7365_s15 + $0x36c] ss:$16 sps:$4 sm:$0xff]  }
  0xa9   : > { %2802 = vmatpush1.bf16.msra.mxu0 %v6562_v6  ;;  %3254 = vmatpush1.bf16.msra.mxu1 %v6565_v7  ;;  %v6625_v6 = vld [vmem:[%s7365_s15 + $0x348] ss:$16 sps:$4 sm:$0xff]   ;;  %v6630_v7 = vld [vmem:[%s7365_s15 + $0x364] ss:$16 sps:$4 sm:$0xff]  }
  0xaa   : > { %2803 = vmatprep.subr.bf16.mxu0 %v6570_v11  ;;  %3255 = vmatprep.subr.bf16.mxu1 %v6573_v12  ;;  %v6631_v11 = vld [vmem:[%s7365_s15 + $0x368] ss:$16 sps:$4 sm:$0xff]   ;;  %v6636_v12 = vld [vmem:[%s7365_s15 + $0x384] ss:$16 sps:$4 sm:$0xff]  }
  0xab   : > { %2730 = vmatprep.mubr.bf16.mxu0 %v5656_v13  ;;  %3182 = vmatprep.mubr.bf16.mxu1 %v5656_v13  ;;  %v6639_v13 = vld [vmem:[%s7365_s15 + $0x38c] ss:$16 sps:$4 sm:$0xff]  }
  0xad   : > { %2804 = vmatpush1.bf16.msra.mxu0 %v6568_v14  ;;  %3256 = vmatpush1.bf16.msra.mxu1 %v6571_v15  ;;  %v6634_v14 = vld [vmem:[%s7365_s15 + $0x380] ss:$16 sps:$4 sm:$0xff]   ;;  %v6637_v15 = vld [vmem:[%s7365_s15 + $0x388] ss:$16 sps:$4 sm:$0xff]  }
  0xae   : > { %2805 = vmatprep.subr.bf16.mxu0 %v6576_v16  ;;  %3257 = vmatprep.subr.bf16.mxu1 %v6579_v17  ;;  %v5695_v16 = vcombine.low %v816_v2, %v820_v4  ;;  %v824_v17 = vld [vmem:[%s7372_s19 + $0x1c0] sm:$0xff]  ;;  %v6685_v2 = vld [vmem:[%s7365_s15 + $0x488] ss:$16 sps:$4 sm:$0xff]   ;;  %v6693_v4 = vld [vmem:[%s7365_s15 + $0x4ac] ss:$16 sps:$4 sm:$0xff]  }
  0xb0   : > { %2731 = vmatmul.mubr.bf16.gmra.mrb[4].mxu0 %v5655_v19  ;;  %3183 = vmatmul.mubr.bf16.gmra.mrb[4].mxu1 %v5655_v19  ;;  %v6642_v19 = vld [vmem:[%s7365_s15 + $0x3a4] ss:$16 sps:$4 sm:$0xff]  }
  0xb1   : > { %2806 = vmatpush1.bf16.msra.mxu0 %v6574_v21  ;;  %3258 = vmatpush1.bf16.msra.mxu1 %v6577_v22  ;;  %v5704_v21 = vcombine.high %v824_v17, %v828_v18  ;;  %v6640_v22 = vld [vmem:[%s7365_s15 + $0x3a0] ss:$16 sps:$4 sm:$0xff]  }
  0xb2   : > { %2807 = vmatprep.subr.bf16.mxu0 %v6582_v23  ;;  %3259 = vmatprep.subr.bf16.mxu1 %v6585_v24  ;;  %v6643_v23 = vld [vmem:[%s7365_s15 + $0x3a8] ss:$16 sps:$4 sm:$0xff]   ;;  %v6648_v24 = vld [vmem:[%s7365_s15 + $0x3c4] ss:$16 sps:$4 sm:$0xff]  }
  0xb3   : > { %2740 = vmatprep.mubr.bf16.mxu0 %v5664_v25  ;;  %3192 = vmatprep.mubr.bf16.mxu1 %v5664_v25  ;;  %v6651_v25 = vld [vmem:[%s7365_s15 + $0x3cc] ss:$16 sps:$4 sm:$0xff]  }
  0xb5   : > { %2808 = vmatpush1.bf16.msra.mxu0 %v6580_v26  ;;  %3260 = vmatpush1.bf16.msra.mxu1 %v6583_v27  ;;  %v769_v26 = vld [vmem:[%s7372_s19 + $0x8] sm:$0xff]  ;;  %v5703_v27 = vcombine.low %v824_v17, %v828_v18  ;;  %v6700_v18 = vld [vmem:[%s7365_s15 + $0x4e0] ss:$16 sps:$4 sm:$0xff]  }
  0xb6   : > { %2809 = vmatprep.subr.bf16.mxu0 %v6588_v28  ;;  %3261 = vmatprep.subr.bf16.mxu1 %v6591_v29  ;;  %v773_v28 = vld [vmem:[%s7372_s19 + $0x28] sm:$0xff]  ;;  %v6646_v29 = vld [vmem:[%s7365_s15 + $0x3c0] ss:$16 sps:$4 sm:$0xff]  }
  0xb8   : > { %2741 = vmatmul.mubr.bf16.gmra.mrb[8].mxu0 %v5663_v31  ;;  %3193 = vmatmul.mubr.bf16.gmra.mrb[8].mxu1 %v5663_v31  ;;  %v6654_v31 = vld [vmem:[%s7365_s15 + $0x3e4] ss:$16 sps:$4 sm:$0xff]  }
  0xb9   : > { %2810 = vmatpush1.bf16.msra.mxu0 %v6586_v33  ;;  %3262 = vmatpush1.bf16.msra.mxu1 %v6589_v34  ;;  %v5650_v33 = vcombine.high %v769_v26, %v773_v28  ;;  %v6652_v34 = vld [vmem:[%s7365_s15 + $0x3e0] ss:$16 sps:$4 sm:$0xff]  }
  0xba   : > { %2811 = vmatprep.subr.bf16.mxu0 %v6594_v35  ;;  %3263 = vmatprep.subr.bf16.mxu1 %v6597_v36  ;;  %v6655_v35 = vld [vmem:[%s7365_s15 + $0x3e8] ss:$16 sps:$4 sm:$0xff]   ;;  %v6660_v36 = vld [vmem:[%s7365_s15 + $0x404] ss:$16 sps:$4 sm:$0xff]  }
  0xbb   : > { %2750 = vmatprep.mubr.bf16.mxu0 %v5672_v37  ;;  %3202 = vmatprep.mubr.bf16.mxu1 %v5672_v37  ;;  %v6663_v37 = vld [vmem:[%s7365_s15 + $0x40c] ss:$16 sps:$4 sm:$0xff]  }
  0xbd   : > { %2812 = vmatpush1.bf16.msra.mxu0 %v6592_v38  ;;  %3264 = vmatpush1.bf16.msra.mxu1 %v6595_v39  ;;  %v777_v38 = vld [vmem:[%s7372_s19 + $0x48] sm:$0xff]  ;;  %v5649_v39 = vcombine.low %v769_v26, %v773_v28 }
  0xbe   : > { %2813 = vmatprep.subr.bf16.mxu0 %v6600_v40  ;;  %3265 = vmatprep.subr.bf16.mxu1 %v6603_v41  ;;  %v781_v40 = vld [vmem:[%s7372_s19 + $0x68] sm:$0xff]  ;;  %v6658_v41 = vld [vmem:[%s7365_s15 + $0x400] ss:$16 sps:$4 sm:$0xff]  }
  0xbf   : > { %v5658_v45 = vcombine.high %v777_v38, %v781_v40  ;;  %v813_v26 = vld [vmem:[%s7372_s19 + $0x168] sm:$0xff] }
  0xc0   : > { %2751 = vmatmul.mubr.bf16.gmra.mrb[12].mxu0 %v5671_v44  ;;  %3203 = vmatmul.mubr.bf16.gmra.mrb[12].mxu1 %v5671_v44  ;;  %v6669_v44 = vld [vmem:[%s7365_s15 + $0x42c] ss:$16 sps:$4 sm:$0xff]  }
  0xc1   : > { %2814 = vmatpush1.bf16.msra.mxu0 %v6598_v42  ;;  %3266 = vmatpush1.bf16.msra.mxu1 %v6601_v43  ;;  %v6661_v42 = vld [vmem:[%s7365_s15 + $0x408] ss:$16 sps:$4 sm:$0xff]   ;;  %v6666_v43 = vld [vmem:[%s7365_s15 + $0x424] ss:$16 sps:$4 sm:$0xff]   ;;  %v6717_v28 = vld [vmem:[%s7365_s15 + $0x52c] ss:$16 sps:$4 sm:$0xff]  }
  0xc2   : > { %2815 = vmatprep.subr.bf16.mxu0 %v6606_v47  ;;  %3267 = vmatprep.subr.bf16.mxu1 %v6609_v48  ;;  %v6667_v47 = vld [vmem:[%s7365_s15 + $0x428] ss:$16 sps:$4 sm:$0xff]   ;;  %v6672_v48 = vld [vmem:[%s7365_s15 + $0x444] ss:$16 sps:$4 sm:$0xff]  }
  0xc3   : > { %2760 = vmatprep.mubr.bf16.mxu0 %v5680_v49  ;;  %3212 = vmatprep.mubr.bf16.mxu1 %v5680_v49  ;;  %v6675_v49 = vld [vmem:[%s7365_s15 + $0x44c] ss:$16 sps:$4 sm:$0xff]  }
  0xc5   : > { %2816 = vmatpush1.bf16.msra.mxu0 %v6604_v50  ;;  %3268 = vmatpush1.bf16.msra.mxu1 %v6607_v51  ;;  %v6670_v50 = vld [vmem:[%s7365_s15 + $0x440] ss:$16 sps:$4 sm:$0xff]   ;;  %v6673_v51 = vld [vmem:[%s7365_s15 + $0x448] ss:$16 sps:$4 sm:$0xff]  }
  0xc6   : > { %2817 = vmatprep.subr.bf16.mxu0 %v6612_v52  ;;  %3269 = vmatprep.subr.bf16.mxu1 %v6615_v53  ;;  %v5657_v52 = vcombine.low %v777_v38, %v781_v40  ;;  %v785_v53 = vld [vmem:[%s7372_s19 + $0x88] sm:$0xff] }
  0xc7   : > { %v6721_v38 = vld [vmem:[%s7365_s15 + $0x548] ss:$16 sps:$4 sm:$0xff]   ;;  %v6729_v40 = vld [vmem:[%s7365_s15 + $0x56c] ss:$16 sps:$4 sm:$0xff]  }
  0xc8   : > { %2761 = vmatmul.mubr.bf16.gmra.mrb[16].mxu0 %v5679_v55  ;;  %3213 = vmatmul.mubr.bf16.gmra.mrb[16].mxu1 %v5679_v55  ;;  %v6678_v55 = vld [vmem:[%s7365_s15 + $0x464] ss:$16 sps:$4 sm:$0xff]  }
  0xc9   : > { %2818 = vmatpush1.bf16.msra.mxu0 %v6610_v57  ;;  %3270 = vmatpush1.bf16.msra.mxu1 %v6613_v58  ;;  %v5666_v57 = vcombine.high %v785_v53, %v789_v54  ;;  %v6676_v58 = vld [vmem:[%s7365_s15 + $0x460] ss:$16 sps:$4 sm:$0xff]  }
  0xca   : > { %2819 = vmatprep.subr.bf16.mxu0 %v6618_v59  ;;  %3271 = vmatprep.subr.bf16.mxu1 %v6621_v60  ;;  %v6679_v59 = vld [vmem:[%s7365_s15 + $0x468] ss:$16 sps:$4 sm:$0xff]   ;;  %v6684_v60 = vld [vmem:[%s7365_s15 + $0x484] ss:$16 sps:$4 sm:$0xff]  }
  0xcb   : > { %2770 = vmatprep.mubr.bf16.mxu0 %v5688_v61  ;;  %3222 = vmatprep.mubr.bf16.mxu1 %v5688_v61  ;;  %v6687_v61 = vld [vmem:[%s7365_s15 + $0x48c] ss:$16 sps:$4 sm:$0xff]  }
  0xcd   : > { %2820 = vmatpush1.bf16.msra.mxu0 %v6616_v62  ;;  %3272 = vmatpush1.bf16.msra.mxu1 %v6619_v63  ;;  %v793_v62 = vld [vmem:[%s7372_s19 + $0xc8] sm:$0xff]  ;;  %v5665_v63 = vcombine.low %v785_v53, %v789_v54  ;;  %v6736_v54 = vld [vmem:[%s7365_s15 + $0x5a0] ss:$16 sps:$4 sm:$0xff]  }
  0xce   : > { %2821 = vmatprep.subr.bf16.mxu0 %v6624_v0  ;;  %3273 = vmatprep.subr.bf16.mxu1 %v6627_v1  ;;  %v797_v0 = vld [vmem:[%s7372_s19 + $0xe8] sm:$0xff]  ;;  %v6682_v1 = vld [vmem:[%s7365_s15 + $0x480] ss:$16 sps:$4 sm:$0xff]  }
  0xd0   : > { %2771 = vmatmul.mubr.bf16.gmra.mrb[20].mxu0 %v5687_v3  ;;  %3223 = vmatmul.mubr.bf16.gmra.mrb[20].mxu1 %v5687_v3  ;;  %v6690_v3 = vld [vmem:[%s7365_s15 + $0x4a4] ss:$16 sps:$4 sm:$0xff]  }
  0xd1   : > { %2822 = vmatpush1.bf16.msra.mxu0 %v6622_v5  ;;  %3274 = vmatpush1.bf16.msra.mxu1 %v6625_v6  ;;  %v5674_v5 = vcombine.high %v793_v62, %v797_v0  ;;  %v6688_v6 = vld [vmem:[%s7365_s15 + $0x4a0] ss:$16 sps:$4 sm:$0xff]  }
  0xd2   : > { %2823 = vmatprep.subr.bf16.mxu0 %v6630_v7  ;;  %3275 = vmatprep.subr.bf16.mxu1 %v6633_v8  ;;  %v6691_v7 = vld [vmem:[%s7365_s15 + $0x4a8] ss:$16 sps:$4 sm:$0xff]   ;;  %v6696_v8 = vld [vmem:[%s7365_s15 + $0x4c4] ss:$16 sps:$4 sm:$0xff]  }
  0xd3   : > { %2780 = vmatprep.mubr.bf16.mxu0 %v5696_v9  ;;  %3232 = vmatprep.mubr.bf16.mxu1 %v5696_v9  ;;  %v6699_v9 = vld [vmem:[%s7365_s15 + $0x4cc] ss:$16 sps:$4 sm:$0xff]  }
  0xd5   : > { %2824 = vmatpush1.bf16.msra.mxu0 %v6628_v10  ;;  %3276 = vmatpush1.bf16.msra.mxu1 %v6631_v11  ;;  %v801_v10 = vld [vmem:[%s7372_s19 + $0x108] sm:$0xff]  ;;  %v5673_v11 = vcombine.low %v793_v62, %v797_v0  ;;  %v774_v62 = vld [vmem:[%s7372_s19 + $0x30] sm:$0xff] }
  0xd6   : > { %2825 = vmatprep.subr.bf16.mxu0 %v6636_v12  ;;  %3277 = vmatprep.subr.bf16.mxu1 %v6639_v13  ;;  %v805_v12 = vld [vmem:[%s7372_s19 + $0x128] sm:$0xff]  ;;  %v6694_v13 = vld [vmem:[%s7365_s15 + $0x4c0] ss:$16 sps:$4 sm:$0xff]  }
  0xd7   : > { %v5682_v17 = vcombine.high %v801_v10, %v805_v12  ;;  %v6753_v0 = vld [vmem:[%s7365_s15 + $0x5ec] ss:$16 sps:$4 sm:$0xff]  }
  0xd8   : > { %2781 = vmatmul.mubr.bf16.gmra.mrb[24].mxu0 %v5695_v16  ;;  %3233 = vmatmul.mubr.bf16.gmra.mrb[24].mxu1 %v5695_v16  ;;  %v6705_v16 = vld [vmem:[%s7365_s15 + $0x4ec] ss:$16 sps:$4 sm:$0xff]  }
  0xd9   : > { %2826 = vmatpush1.bf16.msra.mxu0 %v6634_v14  ;;  %3278 = vmatpush1.bf16.msra.mxu1 %v6637_v15  ;;  %v6697_v14 = vld [vmem:[%s7365_s15 + $0x4c8] ss:$16 sps:$4 sm:$0xff]   ;;  %v6702_v15 = vld [vmem:[%s7365_s15 + $0x4e4] ss:$16 sps:$4 sm:$0xff]  }
  0xda   : > { %2827 = vmatprep.subr.bf16.mxu0 %v6642_v19  ;;  %3279 = vmatprep.subr.bf16.mxu1 %v6645_v20  ;;  %v6703_v19 = vld [vmem:[%s7365_s15 + $0x4e8] ss:$16 sps:$4 sm:$0xff]   ;;  %v6708_v20 = vld [vmem:[%s7365_s15 + $0x504] ss:$16 sps:$4 sm:$0xff]  }
  0xdb   : > { %2790 = vmatprep.mubr.bf16.mxu0 %v5704_v21  ;;  %3242 = vmatprep.mubr.bf16.mxu1 %v5704_v21  ;;  %v6711_v21 = vld [vmem:[%s7365_s15 + $0x50c] ss:$16 sps:$4 sm:$0xff]  }
  0xdd   : > { %2828 = vmatpush1.bf16.msra.mxu0 %v6640_v22  ;;  %3280 = vmatpush1.bf16.msra.mxu1 %v6643_v23  ;;  %v6706_v22 = vld [vmem:[%s7365_s15 + $0x500] ss:$16 sps:$4 sm:$0xff]   ;;  %v6709_v23 = vld [vmem:[%s7365_s15 + $0x508] ss:$16 sps:$4 sm:$0xff]  }
  0xde   : > { %2829 = vmatprep.subr.bf16.mxu0 %v6648_v24  ;;  %3281 = vmatprep.subr.bf16.mxu1 %v6651_v25  ;;  %v5681_v24 = vcombine.low %v801_v10, %v805_v12  ;;  %v809_v25 = vld [vmem:[%s7372_s19 + $0x148] sm:$0xff] }
  0xdf   : > { %v6757_v10 = vld [vmem:[%s7365_s15 + $0x608] ss:$16 sps:$4 sm:$0xff]   ;;  %v6765_v12 = vld [vmem:[%s7365_s15 + $0x62c] ss:$16 sps:$4 sm:$0xff]  }
  0xe0   : > { %2791 = vmatmul.mubr.bf16.gmra.mrb[28].mxu0 %v5703_v27  ;;  %3243 = vmatmul.mubr.bf16.gmra.mrb[28].mxu1 %v5703_v27  ;;  %v6714_v27 = vld [vmem:[%s7365_s15 + $0x524] ss:$16 sps:$4 sm:$0xff]  }
  0xe1   : > { %2830 = vmatpush1.bf16.msra.mxu0 %v6646_v29  ;;  %3282 = vmatpush1.bf16.msra.mxu1 %v6649_v30  ;;  %v5690_v29 = vcombine.high %v809_v25, %v813_v26  ;;  %v6712_v30 = vld [vmem:[%s7365_s15 + $0x520] ss:$16 sps:$4 sm:$0xff]  }
  0xe2   : > { %2831 = vmatprep.subr.bf16.mxu0 %v6654_v31  ;;  %3283 = vmatprep.subr.bf16.mxu1 %v6657_v32  ;;  %v6715_v31 = vld [vmem:[%s7365_s15 + $0x528] ss:$16 sps:$4 sm:$0xff]   ;;  %v6720_v32 = vld [vmem:[%s7365_s15 + $0x544] ss:$16 sps:$4 sm:$0xff]  }
  0xe3   : > { %2833 = vmatprep.mubr.bf16.mxu0 %v5650_v33  ;;  %3285 = vmatprep.mubr.bf16.mxu1 %v5650_v33  ;;  %v6723_v33 = vld [vmem:[%s7365_s15 + $0x54c] ss:$16 sps:$4 sm:$0xff]  }
  0xe5   : > { %2832 = vmatpush1.bf16.msra.mxu0 %v6652_v34  ;;  %3284 = vmatpush1.bf16.msra.mxu1 %v6655_v35  ;;  %v817_v34 = vld [vmem:[%s7372_s19 + $0x188] sm:$0xff]  ;;  %v5689_v35 = vcombine.low %v809_v25, %v813_v26  ;;  %v6772_v26 = vld [vmem:[%s7365_s15 + $0x660] ss:$16 sps:$4 sm:$0xff]  }
  0xe6   : > { %2914 = vmatprep.subr.bf16.mxu0 %v6660_v36  ;;  %3366 = vmatprep.subr.bf16.mxu1 %v6663_v37  ;;  %v821_v36 = vld [vmem:[%s7372_s19 + $0x1a8] sm:$0xff]  ;;  %v6718_v37 = vld [vmem:[%s7365_s15 + $0x540] ss:$16 sps:$4 sm:$0xff]  }
  0xe8   : > { %2834 = vmatmul.mubr.bf16.vlgmr.msra.gmra.mrb[0].mxu0 %v5649_v39  ;;  %3286 = vmatmul.mubr.bf16.vlgmr.msra.gmra.mrb[0].mxu1 %v5649_v39  ;;  %v6726_v39 = vld [vmem:[%s7365_s15 + $0x564] ss:$16 sps:$4 sm:$0xff]  }
  0xe9   : > { %2915 = vmatpush1.bf16.msra.mxu0 %v6658_v41  ;;  %3367 = vmatpush1.bf16.msra.mxu1 %v6661_v42  ;;  %v5698_v41 = vcombine.high %v817_v34, %v821_v36  ;;  %v6724_v42 = vld [vmem:[%s7365_s15 + $0x560] ss:$16 sps:$4 sm:$0xff]  }
  0xea   : > { %2916 = vmatprep.subr.bf16.mxu0 %v6666_v43  ;;  %3368 = vmatprep.subr.bf16.mxu1 %v6669_v44  ;;  %v6727_v43 = vld [vmem:[%s7365_s15 + $0x568] ss:$16 sps:$4 sm:$0xff]   ;;  %v6732_v44 = vld [vmem:[%s7365_s15 + $0x584] ss:$16 sps:$4 sm:$0xff]  }
  0xeb   : > { %2843 = vmatprep.mubr.bf16.mxu0 %v5658_v45  ;;  %3295 = vmatprep.mubr.bf16.mxu1 %v5658_v45  ;;  %v6735_v45 = vld [vmem:[%s7365_s15 + $0x58c] ss:$16 sps:$4 sm:$0xff]  }
  0xed   : > { %2917 = vmatpush1.bf16.msra.mxu0 %v6664_v46  ;;  %3369 = vmatpush1.bf16.msra.mxu1 %v6667_v47  ;;  %v825_v46 = vld [vmem:[%s7372_s19 + $0x1c8] sm:$0xff]  ;;  %v5697_v47 = vcombine.low %v817_v34, %v821_v36 }
  0xee   : > { %2918 = vmatprep.subr.bf16.mxu0 %v6672_v48  ;;  %3370 = vmatprep.subr.bf16.mxu1 %v6675_v49  ;;  %v829_v48 = vld [vmem:[%s7372_s19 + $0x1e8] sm:$0xff]  ;;  %v6730_v49 = vld [vmem:[%s7365_s15 + $0x580] ss:$16 sps:$4 sm:$0xff]  }
  0xef   : > { %v5706_v53 = vcombine.high %v825_v46, %v829_v48  ;;  %v6781_v34 = vld [vmem:[%s7365_s15 + $0x688] ss:$16 sps:$4 sm:$0xff]   ;;  %v6789_v36 = vld [vmem:[%s7365_s15 + $0x6ac] ss:$16 sps:$4 sm:$0xff]  }
  0xf0   : > { %2844 = vmatmul.mubr.bf16.gmra.mrb[4].mxu0 %v5657_v52  ;;  %3296 = vmatmul.mubr.bf16.gmra.mrb[4].mxu1 %v5657_v52  ;;  %v6741_v52 = vld [vmem:[%s7365_s15 + $0x5ac] ss:$16 sps:$4 sm:$0xff]  }
  0xf1   : > { %2919 = vmatpush1.bf16.msra.mxu0 %v6670_v50  ;;  %3371 = vmatpush1.bf16.msra.mxu1 %v6673_v51  ;;  %v6733_v50 = vld [vmem:[%s7365_s15 + $0x588] ss:$16 sps:$4 sm:$0xff]   ;;  %v6738_v51 = vld [vmem:[%s7365_s15 + $0x5a4] ss:$16 sps:$4 sm:$0xff]  }
  0xf2   : > { %2920 = vmatprep.subr.bf16.mxu0 %v6678_v55  ;;  %3372 = vmatprep.subr.bf16.mxu1 %v6681_v56  ;;  %v6739_v55 = vld [vmem:[%s7365_s15 + $0x5a8] ss:$16 sps:$4 sm:$0xff]   ;;  %v6744_v56 = vld [vmem:[%s7365_s15 + $0x5c4] ss:$16 sps:$4 sm:$0xff]  }
  0xf3   : > { %2853 = vmatprep.mubr.bf16.mxu0 %v5666_v57  ;;  %3305 = vmatprep.mubr.bf16.mxu1 %v5666_v57  ;;  %v6747_v57 = vld [vmem:[%s7365_s15 + $0x5cc] ss:$16 sps:$4 sm:$0xff]  }
  0xf5   : > { %2921 = vmatpush1.bf16.msra.mxu0 %v6676_v58  ;;  %3373 = vmatpush1.bf16.msra.mxu1 %v6679_v59  ;;  %v6742_v58 = vld [vmem:[%s7365_s15 + $0x5c0] ss:$16 sps:$4 sm:$0xff]   ;;  %v6745_v59 = vld [vmem:[%s7365_s15 + $0x5c8] ss:$16 sps:$4 sm:$0xff]  }
  0xf6   : > { %2922 = vmatprep.subr.bf16.mxu0 %v6684_v60  ;;  %3374 = vmatprep.subr.bf16.mxu1 %v6687_v61  ;;  %v5705_v60 = vcombine.low %v825_v46, %v829_v48  ;;  %v770_v61 = vld [vmem:[%s7372_s19 + $0x10] sm:$0xff]  ;;  %v6793_v46 = vld [vmem:[%s7365_s15 + $0x6c8] ss:$16 sps:$4 sm:$0xff]   ;;  %v6801_v48 = vld [vmem:[%s7365_s15 + $0x6ec] ss:$16 sps:$4 sm:$0xff]  }
  0xf8   : > { %2854 = vmatmul.mubr.bf16.gmra.mrb[8].mxu0 %v5665_v63  ;;  %3306 = vmatmul.mubr.bf16.gmra.mrb[8].mxu1 %v5665_v63  ;;  %v6750_v63 = vld [vmem:[%s7365_s15 + $0x5e4] ss:$16 sps:$4 sm:$0xff]  }
  0xf9   : > { %2923 = vmatpush1.bf16.msra.mxu0 %v6682_v1  ;;  %3375 = vmatpush1.bf16.msra.mxu1 %v6685_v2  ;;  %v5652_v1 = vcombine.high %v770_v61, %v774_v62  ;;  %v6748_v2 = vld [vmem:[%s7365_s15 + $0x5e0] ss:$16 sps:$4 sm:$0xff]  }
  0xfa   : > { %2924 = vmatprep.subr.bf16.mxu0 %v6690_v3  ;;  %3376 = vmatprep.subr.bf16.mxu1 %v6693_v4  ;;  %v6751_v3 = vld [vmem:[%s7365_s15 + $0x5e8] ss:$16 sps:$4 sm:$0xff]   ;;  %v6756_v4 = vld [vmem:[%s7365_s15 + $0x604] ss:$16 sps:$4 sm:$0xff]  }
  0xfb   : > { %2863 = vmatprep.mubr.bf16.mxu0 %v5674_v5  ;;  %3315 = vmatprep.mubr.bf16.mxu1 %v5674_v5  ;;  %v6759_v5 = vld [vmem:[%s7365_s15 + $0x60c] ss:$16 sps:$4 sm:$0xff]  }
  0xfd   : > { %2925 = vmatpush1.bf16.msra.mxu0 %v6688_v6  ;;  %3377 = vmatpush1.bf16.msra.mxu1 %v6691_v7  ;;  %v5651_v6 = vcombine.low %v770_v61, %v774_v62  ;;  %v778_v7 = vld [vmem:[%s7372_s19 + $0x50] sm:$0xff] }
  0xfe   : > { %2926 = vmatprep.subr.bf16.mxu0 %v6696_v8  ;;  %3378 = vmatprep.subr.bf16.mxu1 %v6699_v9  ;;  %v782_v8 = vld [vmem:[%s7372_s19 + $0x70] sm:$0xff] }
  0xff   : > { %v6754_v9 = vld [vmem:[%s7365_s15 + $0x600] ss:$16 sps:$4 sm:$0xff]  }
 0x100   : > { %2864 = vmatmul.mubr.bf16.gmra.mrb[12].mxu0 %v5673_v11  ;;  %3316 = vmatmul.mubr.bf16.gmra.mrb[12].mxu1 %v5673_v11  ;;  %v6762_v11 = vld [vmem:[%s7365_s15 + $0x624] ss:$16 sps:$4 sm:$0xff]   ;;  %v6808_v62 = vld [vmem:[%s7365_s15 + $0x720] ss:$16 sps:$4 sm:$0xff]  }
 0x101   : > { %2927 = vmatpush1.bf16.msra.mxu0 %v6694_v13  ;;  %3379 = vmatpush1.bf16.msra.mxu1 %v6697_v14  ;;  %v5660_v13 = vcombine.high %v778_v7, %v782_v8  ;;  %v6760_v14 = vld [vmem:[%s7365_s15 + $0x620] ss:$16 sps:$4 sm:$0xff]  }
 0x102   : > { %2928 = vmatprep.subr.bf16.mxu0 %v6702_v15  ;;  %3380 = vmatprep.subr.bf16.mxu1 %v6705_v16  ;;  %v6763_v15 = vld [vmem:[%s7365_s15 + $0x628] ss:$16 sps:$4 sm:$0xff]   ;;  %v6768_v16 = vld [vmem:[%s7365_s15 + $0x644] ss:$16 sps:$4 sm:$0xff]  }
 0x103   : > { %2873 = vmatprep.mubr.bf16.mxu0 %v5682_v17  ;;  %3325 = vmatprep.mubr.bf16.mxu1 %v5682_v17  ;;  %v6771_v17 = vld [vmem:[%s7365_s15 + $0x64c] ss:$16 sps:$4 sm:$0xff]  }
 0x105   : > { %2929 = vmatpush1.bf16.msra.mxu0 %v6700_v18  ;;  %3381 = vmatpush1.bf16.msra.mxu1 %v6703_v19  ;;  %v5659_v18 = vcombine.low %v778_v7, %v782_v8  ;;  %v786_v19 = vld [vmem:[%s7372_s19 + $0x90] sm:$0xff]  ;;  %v6825_v8 = vld [vmem:[%s7365_s15 + $0x76c] ss:$16 sps:$4 sm:$0xff]  }
 0x106   : > { %2930 = vmatprep.subr.bf16.mxu0 %v6708_v20  ;;  %3382 = vmatprep.subr.bf16.mxu1 %v6711_v21  ;;  %v790_v20 = vld [vmem:[%s7372_s19 + $0xb0] sm:$0xff] }
 0x107   : > { %v6766_v21 = vld [vmem:[%s7365_s15 + $0x640] ss:$16 sps:$4 sm:$0xff]   ;;  %v5668_v25 = vcombine.high %v786_v19, %v790_v20  ;;  %v6822_v7 = vld [vmem:[%s7365_s15 + $0x764] ss:$16 sps:$4 sm:$0xff]  }
 0x108   : > { %2874 = vmatmul.mubr.bf16.gmra.mrb[16].mxu0 %v5681_v24  ;;  %3326 = vmatmul.mubr.bf16.gmra.mrb[16].mxu1 %v5681_v24  ;;  %v6777_v24 = vld [vmem:[%s7365_s15 + $0x66c] ss:$16 sps:$4 sm:$0xff]  }
 0x109   : > { %2931 = vmatpush1.bf16.msra.mxu0 %v6706_v22  ;;  %3383 = vmatpush1.bf16.msra.mxu1 %v6709_v23  ;;  %v6769_v22 = vld [vmem:[%s7365_s15 + $0x648] ss:$16 sps:$4 sm:$0xff]   ;;  %v6774_v23 = vld [vmem:[%s7365_s15 + $0x664] ss:$16 sps:$4 sm:$0xff]  }
 0x10a   : > { %2932 = vmatprep.subr.bf16.mxu0 %v6714_v27  ;;  %3384 = vmatprep.subr.bf16.mxu1 %v6717_v28  ;;  %v6775_v27 = vld [vmem:[%s7365_s15 + $0x668] ss:$16 sps:$4 sm:$0xff]   ;;  %v6780_v28 = vld [vmem:[%s7365_s15 + $0x684] ss:$16 sps:$4 sm:$0xff]  }
 0x10b   : > { %2883 = vmatprep.mubr.bf16.mxu0 %v5690_v29  ;;  %3335 = vmatprep.mubr.bf16.mxu1 %v5690_v29  ;;  %v6783_v29 = vld [vmem:[%s7365_s15 + $0x68c] ss:$16 sps:$4 sm:$0xff]  }
 0x10d   : > { %2933 = vmatpush1.bf16.msra.mxu0 %v6712_v30  ;;  %3385 = vmatpush1.bf16.msra.mxu1 %v6715_v31  ;;  %v5667_v30 = vcombine.low %v786_v19, %v790_v20  ;;  %v794_v31 = vld [vmem:[%s7372_s19 + $0xd0] sm:$0xff]  ;;  %v6837_v20 = vld [vmem:[%s7365_s15 + $0x7ac] ss:$16 sps:$4 sm:$0xff]  }
 0x10e   : > { %2934 = vmatprep.subr.bf16.mxu0 %v6720_v32  ;;  %3386 = vmatprep.subr.bf16.mxu1 %v6723_v33  ;;  %v798_v32 = vld [vmem:[%s7372_s19 + $0xf0] sm:$0xff] }
 0x10f   : > { %v6778_v33 = vld [vmem:[%s7365_s15 + $0x680] ss:$16 sps:$4 sm:$0xff]   ;;  %v6834_v19 = vld [vmem:[%s7365_s15 + $0x7a4] ss:$16 sps:$4 sm:$0xff]  }
 0x110   : > { %2884 = vmatmul.mubr.bf16.gmra.mrb[20].mxu0 %v5689_v35  ;;  %3336 = vmatmul.mubr.bf16.gmra.mrb[20].mxu1 %v5689_v35  ;;  %v6786_v35 = vld [vmem:[%s7365_s15 + $0x6a4] ss:$16 sps:$4 sm:$0xff]  }
 0x111   : > { %2935 = vmatpush1.bf16.msra.mxu0 %v6718_v37  ;;  %3387 = vmatpush1.bf16.msra.mxu1 %v6721_v38  ;;  %v5676_v37 = vcombine.high %v794_v31, %v798_v32  ;;  %v6784_v38 = vld [vmem:[%s7365_s15 + $0x6a0] ss:$16 sps:$4 sm:$0xff]  }
 0x112   : > { %2936 = vmatprep.subr.bf16.mxu0 %v6726_v39  ;;  %3388 = vmatprep.subr.bf16.mxu1 %v6729_v40  ;;  %v6787_v39 = vld [vmem:[%s7365_s15 + $0x6a8] ss:$16 sps:$4 sm:$0xff]   ;;  %v6792_v40 = vld [vmem:[%s7365_s15 + $0x6c4] ss:$16 sps:$4 sm:$0xff]  }
 0x113   : > { %2893 = vmatprep.mubr.bf16.mxu0 %v5698_v41  ;;  %3345 = vmatprep.mubr.bf16.mxu1 %v5698_v41  ;;  %v6795_v41 = vld [vmem:[%s7365_s15 + $0x6cc] ss:$16 sps:$4 sm:$0xff]  }
 0x115   : > { %2937 = vmatpush1.bf16.msra.mxu0 %v6724_v42  ;;  %3389 = vmatpush1.bf16.msra.mxu1 %v6727_v43  ;;  %v5675_v42 = vcombine.low %v794_v31, %v798_v32  ;;  %v802_v43 = vld [vmem:[%s7372_s19 + $0x110] sm:$0xff]  ;;  %v6849_v32 = vld [vmem:[%s7365_s15 + $0x7ec] ss:$16 sps:$4 sm:$0xff]  }
 0x116   : > { %2938 = vmatprep.subr.bf16.mxu0 %v6732_v44  ;;  %3390 = vmatprep.subr.bf16.mxu1 %v6735_v45  ;;  %v806_v44 = vld [vmem:[%s7372_s19 + $0x130] sm:$0xff] }
 0x117   : > { %v6790_v45 = vld [vmem:[%s7365_s15 + $0x6c0] ss:$16 sps:$4 sm:$0xff]   ;;  %v6846_v31 = vld [vmem:[%s7365_s15 + $0x7e4] ss:$16 sps:$4 sm:$0xff]  }
 0x118   : > { %2894 = vmatmul.mubr.bf16.gmra.mrb[24].mxu0 %v5697_v47  ;;  %3346 = vmatmul.mubr.bf16.gmra.mrb[24].mxu1 %v5697_v47  ;;  %v6798_v47 = vld [vmem:[%s7365_s15 + $0x6e4] ss:$16 sps:$4 sm:$0xff]  }
 0x119   : > { %2939 = vmatpush1.bf16.msra.mxu0 %v6730_v49  ;;  %3391 = vmatpush1.bf16.msra.mxu1 %v6733_v50  ;;  %v5684_v49 = vcombine.high %v802_v43, %v806_v44  ;;  %v6796_v50 = vld [vmem:[%s7365_s15 + $0x6e0] ss:$16 sps:$4 sm:$0xff]  }
 0x11a   : > { %2940 = vmatprep.subr.bf16.mxu0 %v6738_v51  ;;  %3392 = vmatprep.subr.bf16.mxu1 %v6741_v52  ;;  %v6799_v51 = vld [vmem:[%s7365_s15 + $0x6e8] ss:$16 sps:$4 sm:$0xff]   ;;  %v6804_v52 = vld [vmem:[%s7365_s15 + $0x704] ss:$16 sps:$4 sm:$0xff]  }
 0x11b   : > { %2903 = vmatprep.mubr.bf16.mxu0 %v5706_v53  ;;  %3355 = vmatprep.mubr.bf16.mxu1 %v5706_v53  ;;  %v6807_v53 = vld [vmem:[%s7365_s15 + $0x70c] ss:$16 sps:$4 sm:$0xff]  }
 0x11d   : > { %2941 = vmatpush1.bf16.msra.mxu0 %v6736_v54  ;;  %3393 = vmatpush1.bf16.msra.mxu1 %v6739_v55  ;;  %v5683_v54 = vcombine.low %v802_v43, %v806_v44  ;;  %v810_v55 = vld [vmem:[%s7372_s19 + $0x150] sm:$0xff]  ;;  %v795_v44 = vld [vmem:[%s7372_s19 + $0xd8] sm:$0xff] }
 0x11e   : > { %2942 = vmatprep.subr.bf16.mxu0 %v6744_v56  ;;  %3394 = vmatprep.subr.bf16.mxu1 %v6747_v57  ;;  %v814_v56 = vld [vmem:[%s7372_s19 + $0x170] sm:$0xff] }
 0x11f   : > { %v6802_v57 = vld [vmem:[%s7365_s15 + $0x700] ss:$16 sps:$4 sm:$0xff]   ;;  %v5692_v61 = vcombine.high %v810_v55, %v814_v56 }
 0x120   : > { %2904 = vmatmul.mubr.bf16.gmra.mrb[28].mxu0 %v5705_v60  ;;  %3356 = vmatmul.mubr.bf16.gmra.mrb[28].mxu1 %v5705_v60  ;;  %v6813_v60 = vld [vmem:[%s7365_s15 + $0x72c] ss:$16 sps:$4 sm:$0xff]  }
 0x121   : > { %2943 = vmatpush1.bf16.msra.mxu0 %v6742_v58  ;;  %3395 = vmatpush1.bf16.msra.mxu1 %v6745_v59  ;;  %v6805_v58 = vld [vmem:[%s7365_s15 + $0x708] ss:$16 sps:$4 sm:$0xff]   ;;  %v6810_v59 = vld [vmem:[%s7365_s15 + $0x724] ss:$16 sps:$4 sm:$0xff]  }
 0x122   : > { %2944 = vmatprep.subr.bf16.mxu0 %v6750_v63  ;;  %3396 = vmatprep.subr.bf16.mxu1 %v6753_v0  ;;  %v6811_v63 = vld [vmem:[%s7365_s15 + $0x728] ss:$16 sps:$4 sm:$0xff]   ;;  %v6816_v0 = vld [vmem:[%s7365_s15 + $0x744] ss:$16 sps:$4 sm:$0xff]  }
 0x123   : > { %2946 = vmatprep.mubr.bf16.mxu0 %v5652_v1  ;;  %3398 = vmatprep.mubr.bf16.mxu1 %v5652_v1  ;;  %v6819_v1 = vld [vmem:[%s7365_s15 + $0x74c] ss:$16 sps:$4 sm:$0xff]  }
 0x125   : > { %2945 = vmatpush1.bf16.msra.mxu0 %v6748_v2  ;;  %3397 = vmatpush1.bf16.msra.mxu1 %v6751_v3  ;;  %v5691_v2 = vcombine.low %v810_v55, %v814_v56  ;;  %v818_v3 = vld [vmem:[%s7372_s19 + $0x190] sm:$0xff]  ;;  %v819_v56 = vld [vmem:[%s7372_s19 + $0x198] sm:$0xff] }
 0x126   : > { %3027 = vmatprep.subr.bf16.mxu0 %v6756_v4  ;;  %3479 = vmatprep.subr.bf16.mxu1 %v6759_v5  ;;  %v822_v4 = vld [vmem:[%s7372_s19 + $0x1b0] sm:$0xff] }
 0x127   : > { %v6814_v5 = vld [vmem:[%s7365_s15 + $0x740] ss:$16 sps:$4 sm:$0xff]  }
 0x128   : > { %2947 = vmatmul.mubr.bf16.vlgmr.msra.gmra.mrb[0].mxu0 %v5651_v6  ;;  %3399 = vmatmul.mubr.bf16.vlgmr.msra.gmra.mrb[0].mxu1 %v5651_v6  ;;  %v6817_v6 = vld [vmem:[%s7365_s15 + $0x748] ss:$16 sps:$4 sm:$0xff]  }
 0x129   : > { %3028 = vmatpush1.bf16.msra.mxu0 %v6754_v9  ;;  %3480 = vmatpush1.bf16.msra.mxu1 %v6757_v10  ;;  %v5700_v9 = vcombine.high %v818_v3, %v822_v4  ;;  %v6820_v10 = vld [vmem:[%s7365_s15 + $0x760] ss:$16 sps:$4 sm:$0xff]  }
 0x12a   : > { %3029 = vmatprep.subr.bf16.mxu0 %v6762_v11  ;;  %3481 = vmatprep.subr.bf16.mxu1 %v6765_v12  ;;  %v6823_v11 = vld [vmem:[%s7365_s15 + $0x768] ss:$16 sps:$4 sm:$0xff]   ;;  %v6828_v12 = vld [vmem:[%s7365_s15 + $0x784] ss:$16 sps:$4 sm:$0xff]  }
 0x12b   : > { %2956 = vmatprep.mubr.bf16.mxu0 %v5660_v13  ;;  %3408 = vmatprep.mubr.bf16.mxu1 %v5660_v13  ;;  %v6831_v13 = vld [vmem:[%s7365_s15 + $0x78c] ss:$16 sps:$4 sm:$0xff]  }
 0x12d   : > { %3030 = vmatpush1.bf16.msra.mxu0 %v6760_v14  ;;  %3482 = vmatpush1.bf16.msra.mxu1 %v6763_v15  ;;  %v5699_v14 = vcombine.low %v818_v3, %v822_v4  ;;  %v826_v15 = vld [vmem:[%s7372_s19 + $0x1d0] sm:$0xff]  ;;  %v705_v3 = vld [vmem:[#allocation2 + $0x8] sm:$0xff]  ;;  %v707_v4 = vld [vmem:[#allocation2 + $0x18] sm:$0xff] }
 0x12e   : > { %3031 = vmatprep.subr.bf16.mxu0 %v6768_v16  ;;  %3483 = vmatprep.subr.bf16.mxu1 %v6771_v17  ;;  %v830_v16 = vld [vmem:[%s7372_s19 + $0x1f0] sm:$0xff] }
 0x12f   : > { %v6826_v17 = vld [vmem:[%s7365_s15 + $0x780] ss:$16 sps:$4 sm:$0xff]  }
 0x130   : > { %2957 = vmatmul.mubr.bf16.gmra.mrb[4].mxu0 %v5659_v18  ;;  %3409 = vmatmul.mubr.bf16.gmra.mrb[4].mxu1 %v5659_v18  ;;  %v6829_v18 = vld [vmem:[%s7365_s15 + $0x788] ss:$16 sps:$4 sm:$0xff]  }
 0x131   : > { %3032 = vmatpush1.bf16.msra.mxu0 %v6766_v21  ;;  %3484 = vmatpush1.bf16.msra.mxu1 %v6769_v22  ;;  %v5708_v21 = vcombine.high %v826_v15, %v830_v16  ;;  %v6832_v22 = vld [vmem:[%s7365_s15 + $0x7a0] ss:$16 sps:$4 sm:$0xff]  }
 0x132   : > { %3033 = vmatprep.subr.bf16.mxu0 %v6774_v23  ;;  %3485 = vmatprep.subr.bf16.mxu1 %v6777_v24  ;;  %v6835_v23 = vld [vmem:[%s7365_s15 + $0x7a8] ss:$16 sps:$4 sm:$0xff]   ;;  %v6840_v24 = vld [vmem:[%s7365_s15 + $0x7c4] ss:$16 sps:$4 sm:$0xff]  }
 0x133   : > { %2966 = vmatprep.mubr.bf16.mxu0 %v5668_v25  ;;  %3418 = vmatprep.mubr.bf16.mxu1 %v5668_v25  ;;  %v6843_v25 = vld [vmem:[%s7365_s15 + $0x7cc] ss:$16 sps:$4 sm:$0xff]  }
 0x135   : > { %3034 = vmatpush1.bf16.msra.mxu0 %v6772_v26  ;;  %3486 = vmatpush1.bf16.msra.mxu1 %v6775_v27  ;;  %v5707_v26 = vcombine.low %v826_v15, %v830_v16  ;;  %v771_v27 = vld [vmem:[%s7372_s19 + $0x18] sm:$0xff] }
 0x136   : > { %3035 = vmatprep.subr.bf16.mxu0 %v6780_v28  ;;  %3487 = vmatprep.subr.bf16.mxu1 %v6783_v29  ;;  %v775_v28 = vld [vmem:[%s7372_s19 + $0x38] sm:$0xff]  ;;  %v6838_v29 = vld [vmem:[%s7365_s15 + $0x7c0] ss:$16 sps:$4 sm:$0xff]  }
 0x138   : > { %2967 = vmatmul.mubr.bf16.gmra.mrb[8].mxu0 %v5667_v30  ;;  %3419 = vmatmul.mubr.bf16.gmra.mrb[8].mxu1 %v5667_v30  ;;  %v6841_v30 = vld [vmem:[%s7365_s15 + $0x7c8] ss:$16 sps:$4 sm:$0xff]  }
 0x139   : > { %3036 = vmatpush1.bf16.msra.mxu0 %v6778_v33  ;;  %3488 = vmatpush1.bf16.msra.mxu1 %v6781_v34  ;;  %v5654_v33 = vcombine.high %v771_v27, %v775_v28  ;;  %v6844_v34 = vld [vmem:[%s7365_s15 + $0x7e0] ss:$16 sps:$4 sm:$0xff]  }
 0x13a   : > { %3037 = vmatprep.subr.bf16.mxu0 %v6786_v35  ;;  %3489 = vmatprep.subr.bf16.mxu1 %v6789_v36  ;;  %v6847_v35 = vld [vmem:[%s7365_s15 + $0x7e8] ss:$16 sps:$4 sm:$0xff]  }
 0x13b   : > { %2976 = vmatprep.mubr.bf16.mxu0 %v5676_v37  ;;  %3428 = vmatprep.mubr.bf16.mxu1 %v5676_v37  ;;  %v779_v36 = vld [vmem:[%s7372_s19 + $0x58] sm:$0xff] }
 0x13c   : > { %v783_v37 = vld [vmem:[%s7372_s19 + $0x78] sm:$0xff] }
 0x13d   : > { %3038 = vmatpush1.bf16.msra.mxu0 %v6784_v38  ;;  %3490 = vmatpush1.bf16.msra.mxu1 %v6787_v39  ;;  %v5653_v38 = vcombine.low %v771_v27, %v775_v28  ;;  %v5662_v39 = vcombine.high %v779_v36, %v783_v37  ;;  %v713_v27 = vld [vmem:[#allocation2 + $0x48] sm:$0xff]  ;;  %v715_v28 = vld [vmem:[#allocation2 + $0x58] sm:$0xff] }
 0x13e   : > { %3039 = vmatprep.subr.bf16.mxu0 %v6792_v40  ;;  %3491 = vmatprep.subr.bf16.mxu1 %v6795_v41  ;;  %v787_v40 = vld [vmem:[%s7372_s19 + $0x98] sm:$0xff] }
 0x13f   : > { %v791_v41 = vld [vmem:[%s7372_s19 + $0xb8] sm:$0xff] }
 0x140   : > { %2977 = vmatmul.mubr.bf16.gmra.mrb[12].mxu0 %v5675_v42  ;;  %3429 = vmatmul.mubr.bf16.gmra.mrb[12].mxu1 %v5675_v42  ;;  %v5661_v42 = vcombine.low %v779_v36, %v783_v37  ;;  %v5670_v43 = vcombine.high %v787_v40, %v791_v41  ;;  %v717_v37 = vld [vmem:[#allocation2 + $0x68] sm:$0xff] }
 0x141   : > { %3040 = vmatpush1.bf16.msra.mxu0 %v6790_v45  ;;  %3492 = vmatpush1.bf16.msra.mxu1 %v6793_v46  ;;  %v799_v45 = vld [vmem:[%s7372_s19 + $0xf8] sm:$0xff]  ;;  %v5669_v46 = vcombine.low %v787_v40, %v791_v41 }
 0x142   : > { %3041 = vmatprep.subr.bf16.mxu0 %v6798_v47  ;;  %3493 = vmatprep.subr.bf16.mxu1 %v6801_v48  ;;  %v5678_v47 = vcombine.high %v795_v44, %v799_v45  ;;  %v803_v48 = vld [vmem:[%s7372_s19 + $0x118] sm:$0xff] }
 0x143   : > { %2986 = vmatprep.mubr.bf16.mxu0 %v5684_v49  ;;  %3438 = vmatprep.mubr.bf16.mxu1 %v5684_v49  ;;  %v807_v49 = vld [vmem:[%s7372_s19 + $0x138] sm:$0xff] }
 0x145   : > { %3042 = vmatpush1.bf16.msra.mxu0 %v6796_v50  ;;  %3494 = vmatpush1.bf16.msra.mxu1 %v6799_v51  ;;  %v5677_v50 = vcombine.low %v795_v44, %v799_v45  ;;  %v5686_v51 = vcombine.high %v803_v48, %v807_v49 }
 0x146   : > { %3043 = vmatprep.subr.bf16.mxu0 %v6804_v52  ;;  %3495 = vmatprep.subr.bf16.mxu1 %v6807_v53  ;;  %v811_v52 = vld [vmem:[%s7372_s19 + $0x158] sm:$0xff] }
 0x147   : > { %v815_v53 = vld [vmem:[%s7372_s19 + $0x178] sm:$0xff] }
 0x148   : > { %2987 = vmatmul.mubr.bf16.gmra.mrb[16].mxu0 %v5683_v54  ;;  %3439 = vmatmul.mubr.bf16.gmra.mrb[16].mxu1 %v5683_v54  ;;  %v5685_v54 = vcombine.low %v803_v48, %v807_v49  ;;  %v5694_v55 = vcombine.high %v811_v52, %v815_v53  ;;  %v720_v49 = vld [vmem:[#allocation2 + $0x80] sm:$0xff] }
 0x149   : > { %3044 = vmatpush1.bf16.msra.mxu0 %v6802_v57  ;;  %3496 = vmatpush1.bf16.msra.mxu1 %v6805_v58  ;;  %v823_v57 = vld [vmem:[%s7372_s19 + $0x1b8] sm:$0xff]  ;;  %v5693_v58 = vcombine.low %v811_v52, %v815_v53 }
 0x14a   : > { %3045 = vmatprep.subr.bf16.mxu0 %v6810_v59  ;;  %3497 = vmatprep.subr.bf16.mxu1 %v6813_v60  ;;  %v5702_v59 = vcombine.high %v819_v56, %v823_v57  ;;  %v827_v60 = vld [vmem:[%s7372_s19 + $0x1d8] sm:$0xff] }
 0x14b   : > { %2996 = vmatprep.mubr.bf16.mxu0 %v5692_v61  ;;  %3448 = vmatprep.mubr.bf16.mxu1 %v5692_v61  ;;  %v831_v61 = vld [vmem:[%s7372_s19 + $0x1f8] sm:$0xff] }
 0x14c   : > { %v723_v52 = vld [vmem:[#allocation2 + $0x98] sm:$0xff] }
 0x14d   : > { %3046 = vmatpush1.bf16.msra.mxu0 %v6808_v62  ;;  %3498 = vmatpush1.bf16.msra.mxu1 %v6811_v63  ;;  %v5701_v62 = vcombine.low %v819_v56, %v823_v57  ;;  %v5710_v63 = vcombine.high %v827_v60, %v831_v61  ;;  %v726_v56 = vld [vmem:[#allocation2 + $0xb0] sm:$0xff] }
 0x14e   : > { %3047 = vmatprep.subr.bf16.mxu0 %v6816_v0  ;;  %3499 = vmatprep.subr.bf16.mxu1 %v6819_v1  ;;  %v5709_v0 = vcombine.low %v827_v60, %v831_v61  ;;  %v704_v1 = vld [vmem:[#allocation2] sm:$0xff]  ;;  %v725_v61 = vld [vmem:[#allocation2 + $0xa8] sm:$0xff] }
 0x150   : > { %2997 = vmatmul.mubr.bf16.gmra.mrb[20].mxu0 %v5691_v2  ;;  %3449 = vmatmul.mubr.bf16.gmra.mrb[20].mxu1 %v5691_v2  ;;  %v706_v2 = vld [vmem:[#allocation2 + $0x10] sm:$0xff] }
 0x151   : > { %3048 = vmatpush1.bf16.msra.mxu0 %v6814_v5  ;;  %3500 = vmatpush1.bf16.msra.mxu1 %v6817_v6 }
 0x152   : > { %3049 = vmatprep.subr.bf16.mxu0 %v6822_v7  ;;  %3501 = vmatprep.subr.bf16.mxu1 %v6825_v8  ;;  %v708_v7 = vld [vmem:[#allocation2 + $0x20] sm:$0xff]  ;;  %v710_v8 = vld [vmem:[#allocation2 + $0x30] sm:$0xff] }
 0x153   : > { %3006 = vmatprep.mubr.bf16.mxu0 %v5700_v9  ;;  %3458 = vmatprep.mubr.bf16.mxu1 %v5700_v9 }
 0x155   : > { %3050 = vmatpush1.bf16.msra.mxu0 %v6820_v10  ;;  %3502 = vmatpush1.bf16.msra.mxu1 %v6823_v11 }
 0x156   : > { %3051 = vmatprep.subr.bf16.mxu0 %v6828_v12  ;;  %3503 = vmatprep.subr.bf16.mxu1 %v6831_v13  ;;  %v709_v13 = vld [vmem:[#allocation2 + $0x28] sm:$0xff] }
 0x158   : > { %3007 = vmatmul.mubr.bf16.gmra.mrb[24].mxu0 %v5699_v14  ;;  %3459 = vmatmul.mubr.bf16.gmra.mrb[24].mxu1 %v5699_v14  ;;  %v711_v14 = vld [vmem:[#allocation2 + $0x38] sm:$0xff] }
 0x159   : > { %3052 = vmatpush1.bf16.msra.mxu0 %v6826_v17  ;;  %3504 = vmatpush1.bf16.msra.mxu1 %v6829_v18 }
 0x15a   : > { %3053 = vmatprep.subr.bf16.mxu0 %v6834_v19  ;;  %3505 = vmatprep.subr.bf16.mxu1 %v6837_v20 }
 0x15b   : > { %3016 = vmatprep.mubr.bf16.mxu0 %v5708_v21  ;;  %3468 = vmatprep.mubr.bf16.mxu1 %v5708_v21 }
 0x15d   : > { %3054 = vmatpush1.bf16.msra.mxu0 %v6832_v22  ;;  %3506 = vmatpush1.bf16.msra.mxu1 %v6835_v23 }
 0x15e   : > { %3055 = vmatprep.subr.bf16.mxu0 %v6840_v24  ;;  %3507 = vmatprep.subr.bf16.mxu1 %v6843_v25  ;;  %v712_v25 = vld [vmem:[#allocation2 + $0x40] sm:$0xff] }
 0x160   : > { %3017 = vmatmul.mubr.bf16.gmra.mrb[28].mxu0 %v5707_v26  ;;  %3469 = vmatmul.mubr.bf16.gmra.mrb[28].mxu1 %v5707_v26  ;;  %v714_v26 = vld [vmem:[#allocation2 + $0x50] sm:$0xff] }
 0x161   : > { %3056 = vmatpush1.bf16.msra.mxu0 %v6838_v29  ;;  %3508 = vmatpush1.bf16.msra.mxu1 %v6841_v30 }
 0x162   : > { %3057 = vmatprep.subr.bf16.mxu0 %v6846_v31  ;;  %3509 = vmatprep.subr.bf16.mxu1 %v6849_v32  ;;  %v716_v31 = vld [vmem:[#allocation2 + $0x60] sm:$0xff]  ;;  %v718_v32 = vld [vmem:[#allocation2 + $0x70] sm:$0xff] }
 0x163   : > { %3059 = vmatprep.mubr.bf16.mxu0 %v5654_v33  ;;  %3511 = vmatprep.mubr.bf16.mxu1 %v5654_v33 }
 0x165   : > { %3058 = vmatpush1.bf16.msra.mxu0 %v6844_v34  ;;  %3510 = vmatpush1.bf16.msra.mxu1 %v6847_v35 }
 0x168   : > { %3060 = vmatmul.mubr.bf16.vlgmr.msra.gmra.mrb[0].mxu0 %v5653_v38  ;;  %3512 = vmatmul.mubr.bf16.vlgmr.msra.gmra.mrb[0].mxu1 %v5653_v38  ;;  %v719_v38 = vld [vmem:[#allocation2 + $0x78] sm:$0xff] }
 0x169   : > { %3069 = vmatprep.mubr.bf16.mxu0 %v5662_v39  ;;  %3521 = vmatprep.mubr.bf16.mxu1 %v5662_v39 }
 0x170   : > { %3070 = vmatmul.mubr.bf16.gmra.mrb[4].mxu0 %v5661_v42  ;;  %3522 = vmatmul.mubr.bf16.gmra.mrb[4].mxu1 %v5661_v42 }
 0x171   : > { %3079 = vmatprep.mubr.bf16.mxu0 %v5670_v43  ;;  %3531 = vmatprep.mubr.bf16.mxu1 %v5670_v43 }
 0x178   : > { %3080 = vmatmul.mubr.bf16.gmra.mrb[8].mxu0 %v5669_v46  ;;  %3532 = vmatmul.mubr.bf16.gmra.mrb[8].mxu1 %v5669_v46 }
 0x179   : > { %3089 = vmatprep.mubr.bf16.mxu0 %v5678_v47  ;;  %3541 = vmatprep.mubr.bf16.mxu1 %v5678_v47 }
 0x180   : > { %3090 = vmatmul.mubr.bf16.gmra.mrb[12].mxu0 %v5677_v50  ;;  %3542 = vmatmul.mubr.bf16.gmra.mrb[12].mxu1 %v5677_v50  ;;  %v722_v50 = vld [vmem:[#allocation2 + $0x90] sm:$0xff] }
 0x181   : > { %3099 = vmatprep.mubr.bf16.mxu0 %v5686_v51  ;;  %3551 = vmatprep.mubr.bf16.mxu1 %v5686_v51  ;;  %v721_v51 = vld [vmem:[#allocation2 + $0x88] sm:$0xff] }
 0x188   : > { %3100 = vmatmul.mubr.bf16.gmra.mrb[16].mxu0 %v5685_v54  ;;  %3552 = vmatmul.mubr.bf16.gmra.mrb[16].mxu1 %v5685_v54 }
 0x189   : > { %3109 = vmatprep.mubr.bf16.mxu0 %v5694_v55  ;;  %3561 = vmatprep.mubr.bf16.mxu1 %v5694_v55  ;;  %v724_v55 = vld [vmem:[#allocation2 + $0xa0] sm:$0xff] }
 0x190   : > { %3110 = vmatmul.mubr.bf16.gmra.mrb[20].mxu0 %v5693_v58  ;;  %3562 = vmatmul.mubr.bf16.gmra.mrb[20].mxu1 %v5693_v58 }
 0x191   : > { %3119 = vmatprep.mubr.bf16.mxu0 %v5702_v59  ;;  %3571 = vmatprep.mubr.bf16.mxu1 %v5702_v59 }
 0x198   : > { %3120 = vmatmul.mubr.bf16.gmra.mrb[24].mxu0 %v5701_v62  ;;  %3572 = vmatmul.mubr.bf16.gmra.mrb[24].mxu1 %v5701_v62  ;;  %v727_v62 = vld [vmem:[#allocation2 + $0xb8] sm:$0xff] }
 0x199   : > { %3129 = vmatprep.mubr.bf16.mxu0 %v5710_v63  ;;  %3581 = vmatprep.mubr.bf16.mxu1 %v5710_v63 }
 0x1a0   : > { %3130 = vmatmul.mubr.bf16.gmra.mrb[28].mxu0 %v5709_v0  ;;  %3582 = vmatmul.mubr.bf16.gmra.mrb[28].mxu1 %v5709_v0 }
 0x23b   : > { %v3061_v5 = vpop.f32.mrb[0].mxu0  ;;  %v3513_v6 = vpop.f32.mrb[0].mxu1 }
 0x23c   : > { %v3592_v9 = vadd.f32 %v3061_v5, %v704_v1  ;;  %v3594_v10 = vadd.f32 %v3513_v6, %v706_v2  ;;  %v3063_v11 = vpop.f32.mrb[1].mxu0  ;;  %v3515_v12 = vpop.f32.mrb[1].mxu1 }
 0x23d   : > { %v3593_v15 = vadd.f32 %v3063_v11, %v705_v3  ;;  %v3595_v16 = vadd.f32 %v3515_v12, %v707_v4  ;;  %v3065_v17 = vpop.f32.mrb[2].mxu0  ;;  %v3517_v18 = vpop.f32.mrb[2].mxu1  ;;  %v729_v11 = vld [vmem:[#allocation2 + $0xc8] sm:$0xff]  ;;  %v731_v12 = vld [vmem:[#allocation2 + $0xd8] sm:$0xff] }
 0x23e   : > { %3656 = vst [vmem:[#allocation2] sm:$0xff] %v3592_v9  ;;  %3658 = vst [vmem:[#allocation2 + $0x10] sm:$0xff] %v3594_v10  ;;  %v3596_v19 = vadd.f32 %v3065_v17, %v708_v7  ;;  %v3598_v20 = vadd.f32 %v3517_v18, %v710_v8  ;;  %v3067_v21 = vpop.f32.mrb[3].mxu0  ;;  %v3519_v22 = vpop.f32.mrb[3].mxu1  ;;  %v728_v9 = vld [vmem:[#allocation2 + $0xc0] sm:$0xff]  ;;  %v730_v10 = vld [vmem:[#allocation2 + $0xd0] sm:$0xff] }
 0x23f   : > { %3657 = vst [vmem:[#allocation2 + $0x8] sm:$0xff] %v3593_v15  ;;  %3659 = vst [vmem:[#allocation2 + $0x18] sm:$0xff] %v3595_v16  ;;  %v3597_v23 = vadd.f32 %v3067_v21, %v709_v13  ;;  %v3599_v24 = vadd.f32 %v3519_v22, %v711_v14  ;;  %v732_v15 = vld [vmem:[#allocation2 + $0xe0] sm:$0xff]  ;;  %v734_v16 = vld [vmem:[#allocation2 + $0xf0] sm:$0xff] }
 0x240   : > { %3660 = vst [vmem:[#allocation2 + $0x20] sm:$0xff] %v3596_v19  ;;  %3662 = vst [vmem:[#allocation2 + $0x30] sm:$0xff] %v3598_v20  ;;  %v733_v21 = vld [vmem:[#allocation2 + $0xe8] sm:$0xff]  ;;  %v735_v22 = vld [vmem:[#allocation2 + $0xf8] sm:$0xff] }
 0x241   : > { %3661 = vst [vmem:[#allocation2 + $0x28] sm:$0xff] %v3597_v23  ;;  %3663 = vst [vmem:[#allocation2 + $0x38] sm:$0xff] %v3599_v24 }
 0x243   : > { %v3071_v29 = vpop.f32.mrb[4].mxu0  ;;  %v3523_v30 = vpop.f32.mrb[4].mxu1 }
 0x244   : > { %v3600_v33 = vadd.f32 %v3071_v29, %v712_v25  ;;  %v3602_v34 = vadd.f32 %v3523_v30, %v714_v26  ;;  %v3073_v35 = vpop.f32.mrb[5].mxu0  ;;  %v3525_v36 = vpop.f32.mrb[5].mxu1 }
 0x245   : > { %v3601_v39 = vadd.f32 %v3073_v35, %v713_v27  ;;  %v3603_v40 = vadd.f32 %v3525_v36, %v715_v28  ;;  %v3075_v41 = vpop.f32.mrb[6].mxu0  ;;  %v3527_v42 = vpop.f32.mrb[6].mxu1  ;;  %v737_v35 = vld [vmem:[#allocation2 + $0x108] sm:$0xff]  ;;  %v739_v36 = vld [vmem:[#allocation2 + $0x118] sm:$0xff] }
 0x246   : > { %3664 = vst [vmem:[#allocation2 + $0x40] sm:$0xff] %v3600_v33  ;;  %3666 = vst [vmem:[#allocation2 + $0x50] sm:$0xff] %v3602_v34  ;;  %v3604_v43 = vadd.f32 %v3075_v41, %v716_v31  ;;  %v3606_v44 = vadd.f32 %v3527_v42, %v718_v32  ;;  %v3077_v45 = vpop.f32.mrb[7].mxu0  ;;  %v3529_v46 = vpop.f32.mrb[7].mxu1  ;;  %v736_v33 = vld [vmem:[#allocation2 + $0x100] sm:$0xff]  ;;  %v738_v34 = vld [vmem:[#allocation2 + $0x110] sm:$0xff] }
 0x247   : > { %3665 = vst [vmem:[#allocation2 + $0x48] sm:$0xff] %v3601_v39  ;;  %3667 = vst [vmem:[#allocation2 + $0x58] sm:$0xff] %v3603_v40  ;;  %v3605_v47 = vadd.f32 %v3077_v45, %v717_v37  ;;  %v3607_v48 = vadd.f32 %v3529_v46, %v719_v38  ;;  %v740_v39 = vld [vmem:[#allocation2 + $0x120] sm:$0xff]  ;;  %v742_v40 = vld [vmem:[#allocation2 + $0x130] sm:$0xff] }
 0x248   : > { %3668 = vst [vmem:[#allocation2 + $0x60] sm:$0xff] %v3604_v43  ;;  %3670 = vst [vmem:[#allocation2 + $0x70] sm:$0xff] %v3606_v44  ;;  %v741_v45 = vld [vmem:[#allocation2 + $0x128] sm:$0xff]  ;;  %v743_v46 = vld [vmem:[#allocation2 + $0x138] sm:$0xff] }
 0x249   : > { %3669 = vst [vmem:[#allocation2 + $0x68] sm:$0xff] %v3605_v47  ;;  %3671 = vst [vmem:[#allocation2 + $0x78] sm:$0xff] %v3607_v48 }
 0x24b   : > { %v3081_v53 = vpop.f32.mrb[8].mxu0  ;;  %v3533_v54 = vpop.f32.mrb[8].mxu1 }
 0x24c   : > { %v3608_v57 = vadd.f32 %v3081_v53, %v720_v49  ;;  %v3610_v58 = vadd.f32 %v3533_v54, %v722_v50  ;;  %v3083_v59 = vpop.f32.mrb[9].mxu0  ;;  %v3535_v60 = vpop.f32.mrb[9].mxu1 }
 0x24d   : > { %v3609_v63 = vadd.f32 %v3083_v59, %v721_v51  ;;  %v3611_v0 = vadd.f32 %v3535_v60, %v723_v52  ;;  %v3085_v1 = vpop.f32.mrb[10].mxu0  ;;  %v3537_v2 = vpop.f32.mrb[10].mxu1  ;;  %v745_v59 = vld [vmem:[#allocation2 + $0x148] sm:$0xff]  ;;  %v747_v60 = vld [vmem:[#allocation2 + $0x158] sm:$0xff] }
 0x24e   : > { %3672 = vst [vmem:[#allocation2 + $0x80] sm:$0xff] %v3608_v57  ;;  %3674 = vst [vmem:[#allocation2 + $0x90] sm:$0xff] %v3610_v58  ;;  %v3612_v3 = vadd.f32 %v3085_v1, %v724_v55  ;;  %v3614_v4 = vadd.f32 %v3537_v2, %v726_v56  ;;  %v3087_v5 = vpop.f32.mrb[11].mxu0  ;;  %v3539_v6 = vpop.f32.mrb[11].mxu1  ;;  %v744_v57 = vld [vmem:[#allocation2 + $0x140] sm:$0xff]  ;;  %v746_v58 = vld [vmem:[#allocation2 + $0x150] sm:$0xff] }
 0x24f   : > { %3673 = vst [vmem:[#allocation2 + $0x88] sm:$0xff] %v3609_v63  ;;  %3675 = vst [vmem:[#allocation2 + $0x98] sm:$0xff] %v3611_v0  ;;  %v3613_v7 = vadd.f32 %v3087_v5, %v725_v61  ;;  %v3615_v8 = vadd.f32 %v3539_v6, %v727_v62  ;;  %v748_v63 = vld [vmem:[#allocation2 + $0x160] sm:$0xff]  ;;  %v750_v0 = vld [vmem:[#allocation2 + $0x170] sm:$0xff] }
 0x250   : > { %3676 = vst [vmem:[#allocation2 + $0xa0] sm:$0xff] %v3612_v3  ;;  %3678 = vst [vmem:[#allocation2 + $0xb0] sm:$0xff] %v3614_v4  ;;  %v749_v5 = vld [vmem:[#allocation2 + $0x168] sm:$0xff]  ;;  %v751_v6 = vld [vmem:[#allocation2 + $0x178] sm:$0xff] }
 0x251   : > { %3677 = vst [vmem:[#allocation2 + $0xa8] sm:$0xff] %v3613_v7  ;;  %3679 = vst [vmem:[#allocation2 + $0xb8] sm:$0xff] %v3615_v8 }
 0x253   : > { %v3091_v13 = vpop.f32.mrb[12].mxu0  ;;  %v3543_v14 = vpop.f32.mrb[12].mxu1 }
 0x254   : > { %v3616_v17 = vadd.f32 %v3091_v13, %v728_v9  ;;  %v3618_v18 = vadd.f32 %v3543_v14, %v730_v10  ;;  %v3093_v19 = vpop.f32.mrb[13].mxu0  ;;  %v3545_v20 = vpop.f32.mrb[13].mxu1 }
 0x255   : > { %v3617_v23 = vadd.f32 %v3093_v19, %v729_v11  ;;  %v3619_v24 = vadd.f32 %v3545_v20, %v731_v12  ;;  %v3095_v25 = vpop.f32.mrb[14].mxu0  ;;  %v3547_v26 = vpop.f32.mrb[14].mxu1  ;;  %v753_v19 = vld [vmem:[#allocation2 + $0x188] sm:$0xff]  ;;  %v755_v20 = vld [vmem:[#allocation2 + $0x198] sm:$0xff] }
 0x256   : > { %3680 = vst [vmem:[#allocation2 + $0xc0] sm:$0xff] %v3616_v17  ;;  %3682 = vst [vmem:[#allocation2 + $0xd0] sm:$0xff] %v3618_v18  ;;  %v3620_v27 = vadd.f32 %v3095_v25, %v732_v15  ;;  %v3622_v28 = vadd.f32 %v3547_v26, %v734_v16  ;;  %v3097_v29 = vpop.f32.mrb[15].mxu0  ;;  %v3549_v30 = vpop.f32.mrb[15].mxu1  ;;  %v752_v17 = vld [vmem:[#allocation2 + $0x180] sm:$0xff]  ;;  %v754_v18 = vld [vmem:[#allocation2 + $0x190] sm:$0xff] }
 0x257   : > { %3681 = vst [vmem:[#allocation2 + $0xc8] sm:$0xff] %v3617_v23  ;;  %3683 = vst [vmem:[#allocation2 + $0xd8] sm:$0xff] %v3619_v24  ;;  %v3621_v31 = vadd.f32 %v3097_v29, %v733_v21  ;;  %v3623_v32 = vadd.f32 %v3549_v30, %v735_v22  ;;  %v756_v23 = vld [vmem:[#allocation2 + $0x1a0] sm:$0xff]  ;;  %v758_v24 = vld [vmem:[#allocation2 + $0x1b0] sm:$0xff] }
 0x258   : > { %3684 = vst [vmem:[#allocation2 + $0xe0] sm:$0xff] %v3620_v27  ;;  %3686 = vst [vmem:[#allocation2 + $0xf0] sm:$0xff] %v3622_v28  ;;  %v757_v29 = vld [vmem:[#allocation2 + $0x1a8] sm:$0xff]  ;;  %v759_v30 = vld [vmem:[#allocation2 + $0x1b8] sm:$0xff] }
 0x259   : > { %3685 = vst [vmem:[#allocation2 + $0xe8] sm:$0xff] %v3621_v31  ;;  %3687 = vst [vmem:[#allocation2 + $0xf8] sm:$0xff] %v3623_v32 }
 0x25b   : > { %v3101_v37 = vpop.f32.mrb[16].mxu0  ;;  %v3553_v38 = vpop.f32.mrb[16].mxu1 }
 0x25c   : > { %v3624_v41 = vadd.f32 %v3101_v37, %v736_v33  ;;  %v3626_v42 = vadd.f32 %v3553_v38, %v738_v34  ;;  %v3103_v43 = vpop.f32.mrb[17].mxu0  ;;  %v3555_v44 = vpop.f32.mrb[17].mxu1 }
 0x25d   : > { %v3625_v47 = vadd.f32 %v3103_v43, %v737_v35  ;;  %v3627_v48 = vadd.f32 %v3555_v44, %v739_v36  ;;  %v3105_v49 = vpop.f32.mrb[18].mxu0  ;;  %v3557_v50 = vpop.f32.mrb[18].mxu1  ;;  %v761_v43 = vld [vmem:[#allocation2 + $0x1c8] sm:$0xff]  ;;  %v763_v44 = vld [vmem:[#allocation2 + $0x1d8] sm:$0xff] }
 0x25e   : > { %3688 = vst [vmem:[#allocation2 + $0x100] sm:$0xff] %v3624_v41  ;;  %3690 = vst [vmem:[#allocation2 + $0x110] sm:$0xff] %v3626_v42  ;;  %v3628_v51 = vadd.f32 %v3105_v49, %v740_v39  ;;  %v3630_v52 = vadd.f32 %v3557_v50, %v742_v40  ;;  %v3107_v53 = vpop.f32.mrb[19].mxu0  ;;  %v3559_v54 = vpop.f32.mrb[19].mxu1  ;;  %v760_v41 = vld [vmem:[#allocation2 + $0x1c0] sm:$0xff]  ;;  %v762_v42 = vld [vmem:[#allocation2 + $0x1d0] sm:$0xff] }
 0x25f   : > { %3689 = vst [vmem:[#allocation2 + $0x108] sm:$0xff] %v3625_v47  ;;  %3691 = vst [vmem:[#allocation2 + $0x118] sm:$0xff] %v3627_v48  ;;  %v3629_v55 = vadd.f32 %v3107_v53, %v741_v45  ;;  %v3631_v56 = vadd.f32 %v3559_v54, %v743_v46  ;;  %v764_v47 = vld [vmem:[#allocation2 + $0x1e0] sm:$0xff]  ;;  %v766_v48 = vld [vmem:[#allocation2 + $0x1f0] sm:$0xff] }
 0x260   : > { %3692 = vst [vmem:[#allocation2 + $0x120] sm:$0xff] %v3628_v51  ;;  %3694 = vst [vmem:[#allocation2 + $0x130] sm:$0xff] %v3630_v52  ;;  %v765_v53 = vld [vmem:[#allocation2 + $0x1e8] sm:$0xff]  ;;  %v767_v54 = vld [vmem:[#allocation2 + $0x1f8] sm:$0xff] }
 0x261   : > { %3693 = vst [vmem:[#allocation2 + $0x128] sm:$0xff] %v3629_v55  ;;  %3695 = vst [vmem:[#allocation2 + $0x138] sm:$0xff] %v3631_v56 }
 0x263   : > { %v3111_v61 = vpop.f32.mrb[20].mxu0  ;;  %v3563_v62 = vpop.f32.mrb[20].mxu1 }
 0x264   : > { %v3632_v1 = vadd.f32 %v3111_v61, %v744_v57  ;;  %v3634_v2 = vadd.f32 %v3563_v62, %v746_v58  ;;  %v3113_v3 = vpop.f32.mrb[21].mxu0  ;;  %v3565_v4 = vpop.f32.mrb[21].mxu1 }
 0x265   : > { %v3633_v7 = vadd.f32 %v3113_v3, %v745_v59  ;;  %v3635_v8 = vadd.f32 %v3565_v4, %v747_v60  ;;  %v3115_v9 = vpop.f32.mrb[22].mxu0  ;;  %v3567_v10 = vpop.f32.mrb[22].mxu1 }
 0x266   : > { %3696 = vst [vmem:[#allocation2 + $0x140] sm:$0xff] %v3632_v1  ;;  %3698 = vst [vmem:[#allocation2 + $0x150] sm:$0xff] %v3634_v2  ;;  %v3636_v11 = vadd.f32 %v3115_v9, %v748_v63  ;;  %v3638_v12 = vadd.f32 %v3567_v10, %v750_v0  ;;  %v3117_v13 = vpop.f32.mrb[23].mxu0  ;;  %v3569_v14 = vpop.f32.mrb[23].mxu1 }
 0x267   : > { %3697 = vst [vmem:[#allocation2 + $0x148] sm:$0xff] %v3633_v7  ;;  %3699 = vst [vmem:[#allocation2 + $0x158] sm:$0xff] %v3635_v8  ;;  %v3637_v15 = vadd.f32 %v3117_v13, %v749_v5  ;;  %v3639_v16 = vadd.f32 %v3569_v14, %v751_v6 }
 0x268   : > { %3700 = vst [vmem:[#allocation2 + $0x160] sm:$0xff] %v3636_v11  ;;  %3702 = vst [vmem:[#allocation2 + $0x170] sm:$0xff] %v3638_v12 }
 0x269   : > { %3701 = vst [vmem:[#allocation2 + $0x168] sm:$0xff] %v3637_v15  ;;  %3703 = vst [vmem:[#allocation2 + $0x178] sm:$0xff] %v3639_v16 }
 0x26b   : > { %v3121_v21 = vpop.f32.mrb[24].mxu0  ;;  %v3573_v22 = vpop.f32.mrb[24].mxu1 }
 0x26c   : > { %v3640_v25 = vadd.f32 %v3121_v21, %v752_v17  ;;  %v3642_v26 = vadd.f32 %v3573_v22, %v754_v18  ;;  %v3123_v27 = vpop.f32.mrb[25].mxu0  ;;  %v3575_v28 = vpop.f32.mrb[25].mxu1 }
 0x26d   : > { %v3641_v31 = vadd.f32 %v3123_v27, %v753_v19  ;;  %v3643_v32 = vadd.f32 %v3575_v28, %v755_v20  ;;  %v3125_v33 = vpop.f32.mrb[26].mxu0  ;;  %v3577_v34 = vpop.f32.mrb[26].mxu1 }
 0x26e   : > { %3704 = vst [vmem:[#allocation2 + $0x180] sm:$0xff] %v3640_v25  ;;  %3706 = vst [vmem:[#allocation2 + $0x190] sm:$0xff] %v3642_v26  ;;  %v3644_v35 = vadd.f32 %v3125_v33, %v756_v23  ;;  %v3646_v36 = vadd.f32 %v3577_v34, %v758_v24  ;;  %v3127_v37 = vpop.f32.mrb[27].mxu0  ;;  %v3579_v38 = vpop.f32.mrb[27].mxu1 }
 0x26f   : > { %3705 = vst [vmem:[#allocation2 + $0x188] sm:$0xff] %v3641_v31  ;;  %3707 = vst [vmem:[#allocation2 + $0x198] sm:$0xff] %v3643_v32  ;;  %v3645_v39 = vadd.f32 %v3127_v37, %v757_v29  ;;  %v3647_v40 = vadd.f32 %v3579_v38, %v759_v30 }
 0x270   : > { %3708 = vst [vmem:[#allocation2 + $0x1a0] sm:$0xff] %v3644_v35  ;;  %3710 = vst [vmem:[#allocation2 + $0x1b0] sm:$0xff] %v3646_v36 }
 0x271   : > { %3709 = vst [vmem:[#allocation2 + $0x1a8] sm:$0xff] %v3645_v39  ;;  %3711 = vst [vmem:[#allocation2 + $0x1b8] sm:$0xff] %v3647_v40 }
 0x273   : > { %v3131_v45 = vpop.f32.mrb[28].mxu0  ;;  %v3583_v46 = vpop.f32.mrb[28].mxu1 }
 0x274   : > { %v3648_v49 = vadd.f32 %v3131_v45, %v760_v41  ;;  %v3650_v50 = vadd.f32 %v3583_v46, %v762_v42  ;;  %v3133_v51 = vpop.f32.mrb[29].mxu0  ;;  %v3585_v52 = vpop.f32.mrb[29].mxu1 }
 0x275   : > { %v3649_v55 = vadd.f32 %v3133_v51, %v761_v43  ;;  %v3651_v56 = vadd.f32 %v3585_v52, %v763_v44  ;;  %v3135_v57 = vpop.f32.mrb[30].mxu0  ;;  %v3587_v58 = vpop.f32.mrb[30].mxu1 }
 0x276   : > { %3712 = vst [vmem:[#allocation2 + $0x1c0] sm:$0xff] %v3648_v49  ;;  %3714 = vst [vmem:[#allocation2 + $0x1d0] sm:$0xff] %v3650_v50  ;;  %v3652_v59 = vadd.f32 %v3135_v57, %v764_v47  ;;  %v3654_v60 = vadd.f32 %v3587_v58, %v766_v48  ;;  %v3137_v61 = vpop.f32.mrb[31].mxu0  ;;  %v3589_v62 = vpop.f32.mrb[31].mxu1 }
 0x277   : > { %3713 = vst [vmem:[#allocation2 + $0x1c8] sm:$0xff] %v3649_v55  ;;  %3715 = vst [vmem:[#allocation2 + $0x1d8] sm:$0xff] %v3651_v56  ;;  %v3653_v63 = vadd.f32 %v3137_v61, %v765_v53  ;;  %v3655_v0 = vadd.f32 %v3589_v62, %v767_v54 }
 0x278   : > { %3716 = vst [vmem:[#allocation2 + $0x1e0] sm:$0xff] %v3652_v59  ;;  %3718 = vst [vmem:[#allocation2 + $0x1f0] sm:$0xff] %v3654_v60 }
 0x279   : > { %3717 = vst [vmem:[#allocation2 + $0x1e8] sm:$0xff] %v3653_v63  ;;  %3719 = vst [vmem:[#allocation2 + $0x1f8] sm:$0xff] %v3655_v0 }
 0x27a PF: > { %p5967_p1 = scmp.ne.s32.totalorder %s7198_s24, 3 }
 0x27b   : > { %v3790_v1 = vlaneseq (!%p5967_p1)  ;;  %v3788_v3 = vld [vmem:[%s8175_s2] sm:$0xf] (!%p5967_p1)  ;;  %v3725_v6 = vld [vmem:[#allocation2 + $0x8] sm:$0xff] (!%p5967_p1)  ;;  %v3726_v10 = vld [vmem:[#allocation2 + $0x10] sm:$0xff] (!%p5967_p1) }
 0x27c   : > { %3723 = sbr.rel (%p5967_p1) target bundleno = 680 (0x2a8), region = 99  ;;  %v3724_v4 = vld [vmem:[#allocation2] sm:$0xff] (!%p5967_p1)  ;;  %v3727_v11 = vld [vmem:[#allocation2 + $0x18] sm:$0xff] (!%p5967_p1)  ;;  %v3729_v17 = vld [vmem:[#allocation2 + $0x28] sm:$0xff] (!%p5967_p1) }
 0x27d   : > { %v3791_v2 = vshrl.u32 (!%p5967_p1), %v3790_v1, 7  ;;  %v3728_v12 = vld [vmem:[#allocation2 + $0x20] sm:$0xff] (!%p5967_p1)  ;;  %v3730_v18 = vld [vmem:[#allocation2 + $0x30] sm:$0xff] (!%p5967_p1)  ;;  %v3731_v19 = vld [vmem:[#allocation2 + $0x38] sm:$0xff] (!%p5967_p1) }
 0x27e   : > { %v3732_v24 = vld [vmem:[#allocation2 + $0x40] sm:$0xff] (!%p5967_p1)  ;;  %v3733_v25 = vld [vmem:[#allocation2 + $0x48] sm:$0xff] (!%p5967_p1)  ;;  %v3734_v26 = vld [vmem:[#allocation2 + $0x50] sm:$0xff] (!%p5967_p1) }
 0x27f   : > { %v3792_v5 = vsub.s32 (!%p5967_p1), 0, %v3791_v2  ;;  %v3796_v7 = vsub.s32 (!%p5967_p1), 1, %v3791_v2  ;;  %v3800_v8 = vsub.s32 (!%p5967_p1), 2, %v3791_v2  ;;  %v3804_v9 = vsub.s32 (!%p5967_p1), 3, %v3791_v2  ;;  %v3735_v31 = vld [vmem:[#allocation2 + $0x58] sm:$0xff] (!%p5967_p1)  ;;  %v3736_v32 = vld [vmem:[#allocation2 + $0x60] sm:$0xff] (!%p5967_p1) }
 0x280   : > { %v3737_v33 = vld [vmem:[#allocation2 + $0x68] sm:$0xff] (!%p5967_p1)  ;;  %v3738_v38 = vld [vmem:[#allocation2 + $0x70] sm:$0xff] (!%p5967_p1)  ;;  %v3739_v39 = vld [vmem:[#allocation2 + $0x78] sm:$0xff] (!%p5967_p1) }
 0x281   : > { %v7768_v13 = vrot.slane (!%p5967_p1), %v3788_v3, %v3792_v5  ;;  %v7770_v14 = vrot.slane (!%p5967_p1), %v3788_v3, %v3796_v7  ;;  %v7772_v15 = vrot.slane (!%p5967_p1), %v3788_v3, %v3800_v8  ;;  %v7774_v16 = vrot.slane (!%p5967_p1), %v3788_v3, %v3804_v9  ;;  %v3740_v48 = vld [vmem:[#allocation2 + $0x80] sm:$0xff] (!%p5967_p1)  ;;  %v3741_v49 = vld [vmem:[#allocation2 + $0x88] sm:$0xff] (!%p5967_p1)  ;;  %v3742_v50 = vld [vmem:[#allocation2 + $0x90] sm:$0xff] (!%p5967_p1) }
 0x282   : > { %v3743_v55 = vld [vmem:[#allocation2 + $0x98] sm:$0xff] (!%p5967_p1)  ;;  %v3744_v56 = vld [vmem:[#allocation2 + $0xa0] sm:$0xff] (!%p5967_p1)  ;;  %v3745_v57 = vld [vmem:[#allocation2 + $0xa8] sm:$0xff] (!%p5967_p1) }
 0x283   : > { %v3810_v20 = vadd.f32 %v7768_v13, %v3724_v4  ;;  %v3811_v21 = vadd.f32 %v7770_v14, %v3725_v6  ;;  %v3812_v22 = vadd.f32 %v7772_v15, %v3726_v10  ;;  %v3813_v23 = vadd.f32 %v7774_v16, %v3727_v11  ;;  %v3746_v62 = vld [vmem:[#allocation2 + $0xb0] sm:$0xff]  ;;  %v3747_v63 = vld [vmem:[#allocation2 + $0xb8] sm:$0xff]  ;;  %v3748_v8 = vld [vmem:[#allocation2 + $0xc0] sm:$0xff] }
 0x284   : > { %v3814_v27 = vadd.f32 %v7768_v13, %v3728_v12  ;;  %v3815_v28 = vadd.f32 %v7770_v14, %v3729_v17  ;;  %v3816_v29 = vadd.f32 %v7772_v15, %v3730_v18  ;;  %v3817_v30 = vadd.f32 %v7774_v16, %v3731_v19  ;;  %v3749_v9 = vld [vmem:[#allocation2 + $0xc8] sm:$0xff]  ;;  %v3750_v10 = vld [vmem:[#allocation2 + $0xd0] sm:$0xff]  ;;  %v3751_v19 = vld [vmem:[#allocation2 + $0xd8] sm:$0xff] }
 0x285   : > { %v3874_v34 = vmax.f32 %v3810_v20, 0.0  ;;  %v3875_v35 = vmax.f32 %v3811_v21, 0.0  ;;  %v3876_v36 = vmax.f32 %v3812_v22, 0.0  ;;  %v3877_v37 = vmax.f32 %v3813_v23, 0.0  ;;  %v3752_v20 = vld [vmem:[#allocation2 + $0xe0] sm:$0xff]  ;;  %v3753_v21 = vld [vmem:[#allocation2 + $0xe8] sm:$0xff] }
 0x286   : > { %v3878_v40 = vmax.f32 %v3814_v27, 0.0  ;;  %v3879_v41 = vmax.f32 %v3815_v28, 0.0  ;;  %v3880_v42 = vmax.f32 %v3816_v29, 0.0  ;;  %v3881_v43 = vmax.f32 %v3817_v30, 0.0  ;;  %v3755_v27 = vld [vmem:[#allocation2 + $0xf8] sm:$0xff] }
 0x287   : > { %3938 = vst [vmem:[#allocation3] sm:$0xff] %v3874_v34  ;;  %3939 = vst [vmem:[#allocation3 + $0x8] sm:$0xff] %v3875_v35  ;;  %v3818_v44 = vadd.f32 %v7768_v13, %v3732_v24  ;;  %v3819_v45 = vadd.f32 %v7770_v14, %v3733_v25  ;;  %v3820_v46 = vadd.f32 %v7772_v15, %v3734_v26  ;;  %v3754_v26 = vld [vmem:[#allocation2 + $0xf0] sm:$0xff] }
 0x288   : > { %3940 = vst [vmem:[#allocation3 + $0x10] sm:$0xff] %v3876_v36  ;;  %3941 = vst [vmem:[#allocation3 + $0x18] sm:$0xff] %v3877_v37  ;;  %v3821_v47 = vadd.f32 %v7774_v16, %v3735_v31  ;;  %v3822_v51 = vadd.f32 %v7768_v13, %v3736_v32  ;;  %v3823_v52 = vadd.f32 %v7770_v14, %v3737_v33  ;;  %v3756_v36 = vld [vmem:[#allocation2 + $0x100] sm:$0xff]  ;;  %v3757_v37 = vld [vmem:[#allocation2 + $0x108] sm:$0xff] }
 0x289   : > { %3942 = vst [vmem:[#allocation3 + $0x20] sm:$0xff] %v3878_v40  ;;  %3943 = vst [vmem:[#allocation3 + $0x28] sm:$0xff] %v3879_v41  ;;  %v3824_v53 = vadd.f32 %v7772_v15, %v3738_v38  ;;  %v3825_v54 = vadd.f32 %v7774_v16, %v3739_v39  ;;  %v3882_v58 = vmax.f32 %v3818_v44, 0.0  ;;  %v3883_v59 = vmax.f32 %v3819_v45, 0.0  ;;  %v3758_v38 = vld [vmem:[#allocation2 + $0x110] sm:$0xff]  ;;  %v3760_v44 = vld [vmem:[#allocation2 + $0x120] sm:$0xff] }
 0x28a   : > { %3944 = vst [vmem:[#allocation3 + $0x30] sm:$0xff] %v3880_v42  ;;  %3945 = vst [vmem:[#allocation3 + $0x38] sm:$0xff] %v3881_v43  ;;  %v3884_v60 = vmax.f32 %v3820_v46, 0.0  ;;  %v3885_v61 = vmax.f32 %v3821_v47, 0.0  ;;  %v3886_v0 = vmax.f32 %v3822_v51, 0.0  ;;  %v3887_v1 = vmax.f32 %v3823_v52, 0.0 }
 0x28b   : > { %v3888_v2 = vmax.f32 %v3824_v53, 0.0  ;;  %v3889_v3 = vmax.f32 %v3825_v54, 0.0  ;;  %3946 = vst [vmem:[#allocation3 + $0x40] sm:$0xff] %v3882_v58  ;;  %3947 = vst [vmem:[#allocation3 + $0x48] sm:$0xff] %v3883_v59  ;;  %v3826_v4 = vadd.f32 %v7768_v13, %v3740_v48  ;;  %v3827_v5 = vadd.f32 %v7770_v14, %v3741_v49  ;;  %v3759_v43 = vld [vmem:[#allocation2 + $0x118] sm:$0xff]  ;;  %v3761_v45 = vld [vmem:[#allocation2 + $0x128] sm:$0xff] }
 0x28c   : > { %3948 = vst [vmem:[#allocation3 + $0x50] sm:$0xff] %v3884_v60  ;;  %3949 = vst [vmem:[#allocation3 + $0x58] sm:$0xff] %v3885_v61  ;;  %v3828_v6 = vadd.f32 %v7772_v15, %v3742_v50  ;;  %v3829_v7 = vadd.f32 %v7774_v16, %v3743_v55  ;;  %v3830_v11 = vadd.f32 %v7768_v13, %v3744_v56  ;;  %v3762_v50 = vld [vmem:[#allocation2 + $0x130] sm:$0xff]  ;;  %v3763_v51 = vld [vmem:[#allocation2 + $0x138] sm:$0xff] }
 0x28d   : > { %3950 = vst [vmem:[#allocation3 + $0x60] sm:$0xff] %v3886_v0  ;;  %3951 = vst [vmem:[#allocation3 + $0x68] sm:$0xff] %v3887_v1  ;;  %v3831_v12 = vadd.f32 %v7770_v14, %v3745_v57  ;;  %v3832_v17 = vadd.f32 %v7772_v15, %v3746_v62  ;;  %v3833_v18 = vadd.f32 %v7774_v16, %v3747_v63  ;;  %v3890_v22 = vmax.f32 %v3826_v4, 0.0  ;;  %v3764_v60 = vld [vmem:[#allocation2 + $0x140] sm:$0xff]  ;;  %v3765_v61 = vld [vmem:[#allocation2 + $0x148] sm:$0xff] }
 0x28e   : > { %3952 = vst [vmem:[#allocation3 + $0x70] sm:$0xff] %v3888_v2  ;;  %3953 = vst [vmem:[#allocation3 + $0x78] sm:$0xff] %v3889_v3  ;;  %v3891_v23 = vmax.f32 %v3827_v5, 0.0  ;;  %v3892_v24 = vmax.f32 %v3828_v6, 0.0  ;;  %v3893_v25 = vmax.f32 %v3829_v7, 0.0  ;;  %v3894_v28 = vmax.f32 %v3830_v11, 0.0 }
 0x28f   : > { %v3895_v29 = vmax.f32 %v3831_v12, 0.0  ;;  %v3896_v30 = vmax.f32 %v3832_v17, 0.0  ;;  %v3897_v31 = vmax.f32 %v3833_v18, 0.0  ;;  %3954 = vst [vmem:[#allocation3 + $0x80] sm:$0xff] %v3890_v22  ;;  %v3834_v32 = vadd.f32 %v7768_v13, %v3748_v8  ;;  %v3766_v62 = vld [vmem:[#allocation2 + $0x150] sm:$0xff]  ;;  %v3767_v3 = vld [vmem:[#allocation2 + $0x158] sm:$0xff] }
 0x290   : > { %3955 = vst [vmem:[#allocation3 + $0x88] sm:$0xff] %v3891_v23  ;;  %3956 = vst [vmem:[#allocation3 + $0x90] sm:$0xff] %v3892_v24  ;;  %v3835_v33 = vadd.f32 %v7770_v14, %v3749_v9  ;;  %v3836_v34 = vadd.f32 %v7772_v15, %v3750_v10  ;;  %v3837_v35 = vadd.f32 %v7774_v16, %v3751_v19  ;;  %v3768_v4 = vld [vmem:[#allocation2 + $0x160] sm:$0xff]  ;;  %v3769_v5 = vld [vmem:[#allocation2 + $0x168] sm:$0xff] }
 0x291   : > { %3957 = vst [vmem:[#allocation3 + $0x98] sm:$0xff] %v3893_v25  ;;  %3958 = vst [vmem:[#allocation3 + $0xa0] sm:$0xff] %v3894_v28  ;;  %v3838_v39 = vadd.f32 %v7768_v13, %v3752_v20  ;;  %v3839_v40 = vadd.f32 %v7770_v14, %v3753_v21  ;;  %v3840_v41 = vadd.f32 %v7772_v15, %v3754_v26  ;;  %v3898_v46 = vmax.f32 %v3834_v32, 0.0  ;;  %v3770_v10 = vld [vmem:[#allocation2 + $0x170] sm:$0xff]  ;;  %v3771_v11 = vld [vmem:[#allocation2 + $0x178] sm:$0xff] }
 0x292   : > { %3959 = vst [vmem:[#allocation3 + $0xa8] sm:$0xff] %v3895_v29  ;;  %3960 = vst [vmem:[#allocation3 + $0xb0] sm:$0xff] %v3896_v30  ;;  %v3841_v42 = vadd.f32 %v7774_v16, %v3755_v27  ;;  %v3899_v47 = vmax.f32 %v3835_v33, 0.0  ;;  %v3900_v48 = vmax.f32 %v3836_v34, 0.0  ;;  %v3901_v49 = vmax.f32 %v3837_v35, 0.0  ;;  %v3772_v24 = vld [vmem:[#allocation2 + $0x180] sm:$0xff] }
 0x293   : > { %3961 = vst [vmem:[#allocation3 + $0xb8] sm:$0xff] %v3897_v31  ;;  %v3902_v52 = vmax.f32 %v3838_v39, 0.0  ;;  %v3903_v53 = vmax.f32 %v3839_v40, 0.0  ;;  %v3904_v54 = vmax.f32 %v3840_v41, 0.0  ;;  %3962 = vst [vmem:[#allocation3 + $0xc0] sm:$0xff] %v3898_v46  ;;  %v3842_v56 = vadd.f32 %v7768_v13, %v3756_v36  ;;  %v3773_v25 = vld [vmem:[#allocation2 + $0x188] sm:$0xff] }
 0x294   : > { %v3905_v55 = vmax.f32 %v3841_v42, 0.0  ;;  %3963 = vst [vmem:[#allocation3 + $0xc8] sm:$0xff] %v3899_v47  ;;  %3964 = vst [vmem:[#allocation3 + $0xd0] sm:$0xff] %v3900_v48  ;;  %v3843_v57 = vadd.f32 %v7770_v14, %v3757_v37  ;;  %v3844_v58 = vadd.f32 %v7772_v15, %v3758_v38  ;;  %v3845_v59 = vadd.f32 %v7774_v16, %v3759_v43  ;;  %v3774_v26 = vld [vmem:[#allocation2 + $0x190] sm:$0xff]  ;;  %v3775_v31 = vld [vmem:[#allocation2 + $0x198] sm:$0xff] }
 0x295   : > { %3965 = vst [vmem:[#allocation3 + $0xd8] sm:$0xff] %v3901_v49  ;;  %3966 = vst [vmem:[#allocation3 + $0xe0] sm:$0xff] %v3902_v52  ;;  %v3846_v63 = vadd.f32 %v7768_v13, %v3760_v44  ;;  %v3847_v0 = vadd.f32 %v7770_v14, %v3761_v45  ;;  %v3848_v1 = vadd.f32 %v7772_v15, %v3762_v50  ;;  %v3906_v6 = vmax.f32 %v3842_v56, 0.0  ;;  %v3776_v32 = vld [vmem:[#allocation2 + $0x1a0] sm:$0xff]  ;;  %v3777_v33 = vld [vmem:[#allocation2 + $0x1a8] sm:$0xff] }
 0x296   : > { %3967 = vst [vmem:[#allocation3 + $0xe8] sm:$0xff] %v3903_v53  ;;  %3968 = vst [vmem:[#allocation3 + $0xf0] sm:$0xff] %v3904_v54  ;;  %v3849_v2 = vadd.f32 %v7774_v16, %v3763_v51  ;;  %v3907_v7 = vmax.f32 %v3843_v57, 0.0  ;;  %v3908_v8 = vmax.f32 %v3844_v58, 0.0  ;;  %v3909_v9 = vmax.f32 %v3845_v59, 0.0  ;;  %v3778_v38 = vld [vmem:[#allocation2 + $0x1b0] sm:$0xff] }
 0x297   : > { %3969 = vst [vmem:[#allocation3 + $0xf8] sm:$0xff] %v3905_v55  ;;  %v3910_v12 = vmax.f32 %v3846_v63, 0.0  ;;  %v3911_v17 = vmax.f32 %v3847_v0, 0.0  ;;  %v3912_v18 = vmax.f32 %v3848_v1, 0.0  ;;  %3970 = vst [vmem:[#allocation3 + $0x100] sm:$0xff] %v3906_v6  ;;  %v3850_v20 = vadd.f32 %v7768_v13, %v3764_v60  ;;  %v3779_v39 = vld [vmem:[#allocation2 + $0x1b8] sm:$0xff] }
 0x298   : > { %v3913_v19 = vmax.f32 %v3849_v2, 0.0  ;;  %3971 = vst [vmem:[#allocation3 + $0x108] sm:$0xff] %v3907_v7  ;;  %3972 = vst [vmem:[#allocation3 + $0x110] sm:$0xff] %v3908_v8  ;;  %v3851_v21 = vadd.f32 %v7770_v14, %v3765_v61  ;;  %v3852_v22 = vadd.f32 %v7772_v15, %v3766_v62  ;;  %v3853_v23 = vadd.f32 %v7774_v16, %v3767_v3  ;;  %v3780_v48 = vld [vmem:[#allocation2 + $0x1c0] sm:$0xff]  ;;  %v3781_v49 = vld [vmem:[#allocation2 + $0x1c8] sm:$0xff] }
 0x299   : > { %3973 = vst [vmem:[#allocation3 + $0x118] sm:$0xff] %v3909_v9  ;;  %3974 = vst [vmem:[#allocation3 + $0x120] sm:$0xff] %v3910_v12  ;;  %v3854_v27 = vadd.f32 %v7768_v13, %v3768_v4  ;;  %v3855_v28 = vadd.f32 %v7770_v14, %v3769_v5  ;;  %v3856_v29 = vadd.f32 %v7772_v15, %v3770_v10  ;;  %v3914_v34 = vmax.f32 %v3850_v20, 0.0  ;;  %v3782_v50 = vld [vmem:[#allocation2 + $0x1d0] sm:$0xff]  ;;  %v3783_v55 = vld [vmem:[#allocation2 + $0x1d8] sm:$0xff] }
 0x29a   : > { %3975 = vst [vmem:[#allocation3 + $0x128] sm:$0xff] %v3911_v17  ;;  %3976 = vst [vmem:[#allocation3 + $0x130] sm:$0xff] %v3912_v18  ;;  %v3857_v30 = vadd.f32 %v7774_v16, %v3771_v11  ;;  %v3915_v35 = vmax.f32 %v3851_v21, 0.0  ;;  %v3916_v36 = vmax.f32 %v3852_v22, 0.0  ;;  %v3917_v37 = vmax.f32 %v3853_v23, 0.0  ;;  %v3784_v56 = vld [vmem:[#allocation2 + $0x1e0] sm:$0xff] }
 0x29b   : > { %3977 = vst [vmem:[#allocation3 + $0x138] sm:$0xff] %v3913_v19  ;;  %v3918_v40 = vmax.f32 %v3854_v27, 0.0  ;;  %v3919_v41 = vmax.f32 %v3855_v28, 0.0  ;;  %v3920_v42 = vmax.f32 %v3856_v29, 0.0  ;;  %3978 = vst [vmem:[#allocation3 + $0x140] sm:$0xff] %v3914_v34  ;;  %v3858_v44 = vadd.f32 %v7768_v13, %v3772_v24  ;;  %v3785_v57 = vld [vmem:[#allocation2 + $0x1e8] sm:$0xff] }
 0x29c   : > { %v3921_v43 = vmax.f32 %v3857_v30, 0.0  ;;  %3979 = vst [vmem:[#allocation3 + $0x148] sm:$0xff] %v3915_v35  ;;  %3980 = vst [vmem:[#allocation3 + $0x150] sm:$0xff] %v3916_v36  ;;  %v3859_v45 = vadd.f32 %v7770_v14, %v3773_v25  ;;  %v3860_v46 = vadd.f32 %v7772_v15, %v3774_v26  ;;  %v3861_v47 = vadd.f32 %v7774_v16, %v3775_v31  ;;  %v3786_v62 = vld [vmem:[#allocation2 + $0x1f0] sm:$0xff]  ;;  %v3787_v63 = vld [vmem:[#allocation2 + $0x1f8] sm:$0xff] }
 0x29d   : > { %3981 = vst [vmem:[#allocation3 + $0x158] sm:$0xff] %v3917_v37  ;;  %3982 = vst [vmem:[#allocation3 + $0x160] sm:$0xff] %v3918_v40  ;;  %v3862_v51 = vadd.f32 %v7768_v13, %v3776_v32  ;;  %v3863_v52 = vadd.f32 %v7770_v14, %v3777_v33  ;;  %v3864_v53 = vadd.f32 %v7772_v15, %v3778_v38  ;;  %v3922_v58 = vmax.f32 %v3858_v44, 0.0 }
 0x29e   : > { %3983 = vst [vmem:[#allocation3 + $0x168] sm:$0xff] %v3919_v41  ;;  %3984 = vst [vmem:[#allocation3 + $0x170] sm:$0xff] %v3920_v42  ;;  %v3865_v54 = vadd.f32 %v7774_v16, %v3779_v39  ;;  %v3923_v59 = vmax.f32 %v3859_v45, 0.0  ;;  %v3924_v60 = vmax.f32 %v3860_v46, 0.0  ;;  %v3925_v61 = vmax.f32 %v3861_v47, 0.0 }
 0x29f   : > { %3985 = vst [vmem:[#allocation3 + $0x178] sm:$0xff] %v3921_v43  ;;  %v3926_v0 = vmax.f32 %v3862_v51, 0.0  ;;  %v3927_v1 = vmax.f32 %v3863_v52, 0.0  ;;  %v3928_v2 = vmax.f32 %v3864_v53, 0.0  ;;  %3986 = vst [vmem:[#allocation3 + $0x180] sm:$0xff] %v3922_v58  ;;  %v3866_v4 = vadd.f32 %v7768_v13, %v3780_v48 }
 0x2a0   : > { %v3929_v3 = vmax.f32 %v3865_v54, 0.0  ;;  %3987 = vst [vmem:[#allocation3 + $0x188] sm:$0xff] %v3923_v59  ;;  %3988 = vst [vmem:[#allocation3 + $0x190] sm:$0xff] %v3924_v60  ;;  %v3867_v5 = vadd.f32 %v7770_v14, %v3781_v49  ;;  %v3868_v6 = vadd.f32 %v7772_v15, %v3782_v50  ;;  %v3869_v7 = vadd.f32 %v7774_v16, %v3783_v55 }
 0x2a1   : > { %3989 = vst [vmem:[#allocation3 + $0x198] sm:$0xff] %v3925_v61  ;;  %3990 = vst [vmem:[#allocation3 + $0x1a0] sm:$0xff] %v3926_v0  ;;  %v3870_v8 = vadd.f32 %v7768_v13, %v3784_v56  ;;  %v3871_v9 = vadd.f32 %v7770_v14, %v3785_v57  ;;  %v3872_v10 = vadd.f32 %v7772_v15, %v3786_v62  ;;  %v3930_v12 = vmax.f32 %v3866_v4, 0.0 }
 0x2a2   : > { %3991 = vst [vmem:[#allocation3 + $0x1a8] sm:$0xff] %v3927_v1  ;;  %3992 = vst [vmem:[#allocation3 + $0x1b0] sm:$0xff] %v3928_v2  ;;  %v3873_v11 = vadd.f32 %v7774_v16, %v3787_v63  ;;  %v3931_v17 = vmax.f32 %v3867_v5, 0.0  ;;  %v3932_v18 = vmax.f32 %v3868_v6, 0.0  ;;  %v3933_v19 = vmax.f32 %v3869_v7, 0.0 }
 0x2a3   : > { %3993 = vst [vmem:[#allocation3 + $0x1b8] sm:$0xff] %v3929_v3  ;;  %v3934_v20 = vmax.f32 %v3870_v8, 0.0  ;;  %v3935_v21 = vmax.f32 %v3871_v9, 0.0  ;;  %v3936_v22 = vmax.f32 %v3872_v10, 0.0  ;;  %3994 = vst [vmem:[#allocation3 + $0x1c0] sm:$0xff] %v3930_v12 }
 0x2a4   : > { %v3937_v23 = vmax.f32 %v3873_v11, 0.0  ;;  %3995 = vst [vmem:[#allocation3 + $0x1c8] sm:$0xff] %v3931_v17  ;;  %3996 = vst [vmem:[#allocation3 + $0x1d0] sm:$0xff] %v3932_v18 }
 0x2a5   : > { %3997 = vst [vmem:[#allocation3 + $0x1d8] sm:$0xff] %v3933_v19  ;;  %3998 = vst [vmem:[#allocation3 + $0x1e0] sm:$0xff] %v3934_v20 }
 0x2a6   : > { %3999 = vst [vmem:[#allocation3 + $0x1e8] sm:$0xff] %v3935_v21  ;;  %4000 = vst [vmem:[#allocation3 + $0x1f0] sm:$0xff] %v3936_v22 }
 0x2a7   : > { %4001 = vst [vmem:[#allocation3 + $0x1f8] sm:$0xff] %v3937_v23 }
 0x2a8 PF: > { %p5968_p2 = scmp.lt.s32.totalorder %s7198_s24, 4 }
 0x2a9   : > { %v6850_v13 = vld [vmem:[%s7370_s18 + $0x4] ss:$16 sps:$4 sm:$0xff] (!%p5968_p2)   ;;  %v6854_v15 = vld [vmem:[%s7370_s18] ss:$16 sps:$4 sm:$0xff] (!%p5968_p2)   ;;  %s5970_s28 = sshll.u32 (!%p5968_p2), %s7356_s27, 3 }
 0x2aa   : > { %4005 = sbr.rel (%p5968_p2) target bundleno = 1029 (0x405), region = 103  ;;  %v6852_v14 = vld [vmem:[%s7370_s18 + $0x204] ss:$16 sps:$4 sm:$0xff] (!%p5968_p2)   ;;  %4793 = vmatprep.subr.bf16.mxu0 (!%p5968_p2), %v6850_v13  ;;  %v6855_v16 = vld [vmem:[%s7370_s18 + $0x200] ss:$16 sps:$4 sm:$0xff] (!%p5968_p2)   ;;  %s4008_s29 = sshra.s32 (!%p5968_p2), %s5970_s28, 3 }
 0x2ab   : > { %4834 = vmatprep.subr.bf16.mxu1 (!%p5968_p2), %v6852_v14  ;;  %v6856_v24 = vld [vmem:[%s7370_s18 + $0x24] ss:$16 sps:$4 sm:$0xff] (!%p5968_p2)   ;;  %4794 = vmatpush1.bf16.msra.mxu0 (!%p5968_p2), %v6854_v15  ;;  %v6860_v26 = vld [vmem:[%s7370_s18 + $0x20] ss:$16 sps:$4 sm:$0xff] (!%p5968_p2)   ;;  %s6156_s27 = sshll.u32 (!%p5968_p2), %s4008_s29, 5 }
 0x2ac   : > { %4835 = vmatpush1.bf16.msra.mxu1 (!%p5968_p2), %v6855_v16  ;;  %v6858_v25 = vld [vmem:[%s7370_s18 + $0x224] ss:$16 sps:$4 sm:$0xff] (!%p5968_p2)   ;;  %4795 = vmatprep.subr.bf16.mxu0 (!%p5968_p2), %v6856_v24  ;;  %v6861_v27 = vld [vmem:[%s7370_s18 + $0x220] ss:$16 sps:$4 sm:$0xff] (!%p5968_p2)   ;;  %s7888_s23 = scalar_lea.vmem (!%p5968_p2), [#allocation3], %s6156_s27 }
 0x2ad   : > { %4836 = vmatprep.subr.bf16.mxu1 (!%p5968_p2), %v6858_v25  ;;  %v6862_v28 = vld [vmem:[%s7370_s18 + $0x44] ss:$16 sps:$4 sm:$0xff] (!%p5968_p2)   ;;  %v6866_v30 = vld [vmem:[%s7370_s18 + $0x40] ss:$16 sps:$4 sm:$0xff] (!%p5968_p2)  }
 0x2ae   : > { %v6864_v29 = vld [vmem:[%s7370_s18 + $0x244] ss:$16 sps:$4 sm:$0xff] (!%p5968_p2)   ;;  %v6867_v31 = vld [vmem:[%s7370_s18 + $0x240] ss:$16 sps:$4 sm:$0xff] (!%p5968_p2)   ;;  %v4014_v2 = vld [vmem:[%s7888_s23 + $0x8] sm:$0xff] (!%p5968_p2) }
 0x2af   : > { %4796 = vmatpush1.bf16.msra.mxu0 (!%p5968_p2), %v6860_v26  ;;  %v6868_v32 = vld [vmem:[%s7370_s18 + $0x64] ss:$16 sps:$4 sm:$0xff] (!%p5968_p2)   ;;  %v6872_v34 = vld [vmem:[%s7370_s18 + $0x60] ss:$16 sps:$4 sm:$0xff] (!%p5968_p2)   ;;  %v7893_v5 = vpack.c.bf16 (!%p5968_p2), %v4014_v2, %v4014_v2  ;;  %v4016_v6 = vld [vmem:[%s7888_s23 + $0x18] sm:$0xff] (!%p5968_p2) }
 0x2b0   : > { %4837 = vmatpush1.bf16.msra.mxu1 (!%p5968_p2), %v6861_v27  ;;  %4797 = vmatprep.subr.bf16.mxu0 (!%p5968_p2), %v6862_v28  ;;  %v6870_v33 = vld [vmem:[%s7370_s18 + $0x264] ss:$16 sps:$4 sm:$0xff] (!%p5968_p2)   ;;  %v6873_v35 = vld [vmem:[%s7370_s18 + $0x260] ss:$16 sps:$4 sm:$0xff] (!%p5968_p2)   ;;  %v4020_v8 = vpack.c.bf16 (!%p5968_p2), %v4016_v6, %v4016_v6  ;;  %v6948_v26 = vld [vmem:[%s7370_s18 + $0xc] ss:$16 sps:$4 sm:$0xff] (!%p5968_p2)  }
 0x2b1   : > { %4838 = vmatprep.subr.bf16.mxu1 %v6864_v29  ;;  %v6874_v36 = vld [vmem:[%s7370_s18 + $0x84] ss:$16 sps:$4 sm:$0xff]   ;;  %v6878_v38 = vld [vmem:[%s7370_s18 + $0x80] ss:$16 sps:$4 sm:$0xff]   ;;  %4825 = vmatprep.mubr.bf16.mxu0 %v7893_v5  ;;  %v6951_v27 = vld [vmem:[%s7370_s18 + $0x20c] ss:$16 sps:$4 sm:$0xff]  }
 0x2b2   : > { %v6876_v37 = vld [vmem:[%s7370_s18 + $0x284] ss:$16 sps:$4 sm:$0xff]   ;;  %v6879_v39 = vld [vmem:[%s7370_s18 + $0x280] ss:$16 sps:$4 sm:$0xff]   ;;  %4866 = vmatprep.mubr.bf16.mxu1 %v4020_v8  ;;  %v7000_v2 = vld [vmem:[%s7370_s18 + $0x128] ss:$16 sps:$4 sm:$0xff]  }
 0x2b3   : > { %4798 = vmatpush1.bf16.msra.mxu0 %v6866_v30  ;;  %v6880_v40 = vld [vmem:[%s7370_s18 + $0xa4] ss:$16 sps:$4 sm:$0xff]   ;;  %v6884_v42 = vld [vmem:[%s7370_s18 + $0xa0] ss:$16 sps:$4 sm:$0xff]   ;;  %v6946_v30 = vld [vmem:[%s7370_s18 + $0x8] ss:$16 sps:$4 sm:$0xff]  }
 0x2b4   : > { %4839 = vmatpush1.bf16.msra.mxu1 %v6867_v31  ;;  %4799 = vmatprep.subr.bf16.mxu0 %v6868_v32  ;;  %v6882_v41 = vld [vmem:[%s7370_s18 + $0x2a4] ss:$16 sps:$4 sm:$0xff]   ;;  %v6885_v43 = vld [vmem:[%s7370_s18 + $0x2a0] ss:$16 sps:$4 sm:$0xff]   ;;  %v6949_v31 = vld [vmem:[%s7370_s18 + $0x208] ss:$16 sps:$4 sm:$0xff]  }
 0x2b5   : > { %4840 = vmatprep.subr.bf16.mxu1 %v6870_v33  ;;  %v6886_v44 = vld [vmem:[%s7370_s18 + $0xc4] ss:$16 sps:$4 sm:$0xff]   ;;  %v6890_v46 = vld [vmem:[%s7370_s18 + $0xc0] ss:$16 sps:$4 sm:$0xff]   ;;  %v6954_v32 = vld [vmem:[%s7370_s18 + $0x2c] ss:$16 sps:$4 sm:$0xff]  }
 0x2b6   : > { %v6888_v45 = vld [vmem:[%s7370_s18 + $0x2c4] ss:$16 sps:$4 sm:$0xff]   ;;  %v6891_v47 = vld [vmem:[%s7370_s18 + $0x2c0] ss:$16 sps:$4 sm:$0xff]   ;;  %v6957_v33 = vld [vmem:[%s7370_s18 + $0x22c] ss:$16 sps:$4 sm:$0xff]  }
 0x2b7   : > { %4800 = vmatpush1.bf16.msra.mxu0 %v6872_v34  ;;  %v6892_v48 = vld [vmem:[%s7370_s18 + $0xe4] ss:$16 sps:$4 sm:$0xff]   ;;  %v6896_v50 = vld [vmem:[%s7370_s18 + $0xe0] ss:$16 sps:$4 sm:$0xff]   ;;  %v6952_v34 = vld [vmem:[%s7370_s18 + $0x28] ss:$16 sps:$4 sm:$0xff]  }
 0x2b8   : > { %4841 = vmatpush1.bf16.msra.mxu1 %v6873_v35  ;;  %4801 = vmatprep.subr.bf16.mxu0 %v6874_v36  ;;  %v6894_v49 = vld [vmem:[%s7370_s18 + $0x2e4] ss:$16 sps:$4 sm:$0xff]   ;;  %v6897_v51 = vld [vmem:[%s7370_s18 + $0x2e0] ss:$16 sps:$4 sm:$0xff]   ;;  %v6955_v35 = vld [vmem:[%s7370_s18 + $0x228] ss:$16 sps:$4 sm:$0xff]  }
 0x2b9   : > { %4842 = vmatprep.subr.bf16.mxu1 %v6876_v37  ;;  %v6898_v52 = vld [vmem:[%s7370_s18 + $0x104] ss:$16 sps:$4 sm:$0xff]   ;;  %v6902_v54 = vld [vmem:[%s7370_s18 + $0x100] ss:$16 sps:$4 sm:$0xff]   ;;  %v6960_v36 = vld [vmem:[%s7370_s18 + $0x4c] ss:$16 sps:$4 sm:$0xff]  }
 0x2ba   : > { %v6900_v53 = vld [vmem:[%s7370_s18 + $0x304] ss:$16 sps:$4 sm:$0xff]   ;;  %v6903_v55 = vld [vmem:[%s7370_s18 + $0x300] ss:$16 sps:$4 sm:$0xff]   ;;  %v6963_v37 = vld [vmem:[%s7370_s18 + $0x24c] ss:$16 sps:$4 sm:$0xff]  }
 0x2bb   : > { %4802 = vmatpush1.bf16.msra.mxu0 %v6878_v38  ;;  %v6904_v56 = vld [vmem:[%s7370_s18 + $0x124] ss:$16 sps:$4 sm:$0xff]   ;;  %v6908_v58 = vld [vmem:[%s7370_s18 + $0x120] ss:$16 sps:$4 sm:$0xff]   ;;  %v6958_v38 = vld [vmem:[%s7370_s18 + $0x48] ss:$16 sps:$4 sm:$0xff]  }
 0x2bc   : > { %4843 = vmatpush1.bf16.msra.mxu1 %v6879_v39  ;;  %4803 = vmatprep.subr.bf16.mxu0 %v6880_v40  ;;  %v6906_v57 = vld [vmem:[%s7370_s18 + $0x324] ss:$16 sps:$4 sm:$0xff]   ;;  %v6909_v59 = vld [vmem:[%s7370_s18 + $0x320] ss:$16 sps:$4 sm:$0xff]   ;;  %v6961_v39 = vld [vmem:[%s7370_s18 + $0x248] ss:$16 sps:$4 sm:$0xff]  }
 0x2bd   : > { %4844 = vmatprep.subr.bf16.mxu1 %v6882_v41  ;;  %v6910_v60 = vld [vmem:[%s7370_s18 + $0x144] ss:$16 sps:$4 sm:$0xff]   ;;  %v6914_v62 = vld [vmem:[%s7370_s18 + $0x140] ss:$16 sps:$4 sm:$0xff]   ;;  %v6966_v40 = vld [vmem:[%s7370_s18 + $0x6c] ss:$16 sps:$4 sm:$0xff]  }
 0x2be   : > { %v6912_v61 = vld [vmem:[%s7370_s18 + $0x344] ss:$16 sps:$4 sm:$0xff]   ;;  %v6915_v63 = vld [vmem:[%s7370_s18 + $0x340] ss:$16 sps:$4 sm:$0xff]   ;;  %v6969_v41 = vld [vmem:[%s7370_s18 + $0x26c] ss:$16 sps:$4 sm:$0xff]  }
 0x2bf   : > { %4804 = vmatpush1.bf16.msra.mxu0 %v6884_v42  ;;  %v6916_v0 = vld [vmem:[%s7370_s18 + $0x164] ss:$16 sps:$4 sm:$0xff]   ;;  %v6920_v3 = vld [vmem:[%s7370_s18 + $0x160] ss:$16 sps:$4 sm:$0xff]   ;;  %v6964_v42 = vld [vmem:[%s7370_s18 + $0x68] ss:$16 sps:$4 sm:$0xff]  }
 0x2c0   : > { %4845 = vmatpush1.bf16.msra.mxu1 %v6885_v43  ;;  %4805 = vmatprep.subr.bf16.mxu0 %v6886_v44  ;;  %v6918_v1 = vld [vmem:[%s7370_s18 + $0x364] ss:$16 sps:$4 sm:$0xff]   ;;  %v6921_v4 = vld [vmem:[%s7370_s18 + $0x360] ss:$16 sps:$4 sm:$0xff]   ;;  %v6967_v43 = vld [vmem:[%s7370_s18 + $0x268] ss:$16 sps:$4 sm:$0xff]  }
 0x2c1   : > { %4846 = vmatprep.subr.bf16.mxu1 %v6888_v45  ;;  %v6922_v7 = vld [vmem:[%s7370_s18 + $0x184] ss:$16 sps:$4 sm:$0xff]   ;;  %v6926_v10 = vld [vmem:[%s7370_s18 + $0x180] ss:$16 sps:$4 sm:$0xff]   ;;  %v6972_v44 = vld [vmem:[%s7370_s18 + $0x8c] ss:$16 sps:$4 sm:$0xff]  }
 0x2c2   : > { %v6924_v9 = vld [vmem:[%s7370_s18 + $0x384] ss:$16 sps:$4 sm:$0xff]   ;;  %v6927_v11 = vld [vmem:[%s7370_s18 + $0x380] ss:$16 sps:$4 sm:$0xff]   ;;  %v6975_v45 = vld [vmem:[%s7370_s18 + $0x28c] ss:$16 sps:$4 sm:$0xff]  }
 0x2c3   : > { %4806 = vmatpush1.bf16.msra.mxu0 %v6890_v46  ;;  %v6928_v12 = vld [vmem:[%s7370_s18 + $0x1a4] ss:$16 sps:$4 sm:$0xff]   ;;  %v6932_v18 = vld [vmem:[%s7370_s18 + $0x1a0] ss:$16 sps:$4 sm:$0xff]   ;;  %v6970_v46 = vld [vmem:[%s7370_s18 + $0x88] ss:$16 sps:$4 sm:$0xff]  }
 0x2c4   : > { %4847 = vmatpush1.bf16.msra.mxu1 %v6891_v47  ;;  %4807 = vmatprep.subr.bf16.mxu0 %v6892_v48  ;;  %v6930_v17 = vld [vmem:[%s7370_s18 + $0x3a4] ss:$16 sps:$4 sm:$0xff]   ;;  %v6933_v19 = vld [vmem:[%s7370_s18 + $0x3a0] ss:$16 sps:$4 sm:$0xff]   ;;  %v6973_v47 = vld [vmem:[%s7370_s18 + $0x288] ss:$16 sps:$4 sm:$0xff]  }
 0x2c5   : > { %4848 = vmatprep.subr.bf16.mxu1 %v6894_v49  ;;  %v6934_v20 = vld [vmem:[%s7370_s18 + $0x1c4] ss:$16 sps:$4 sm:$0xff]   ;;  %v6938_v22 = vld [vmem:[%s7370_s18 + $0x1c0] ss:$16 sps:$4 sm:$0xff]   ;;  %v6978_v48 = vld [vmem:[%s7370_s18 + $0xac] ss:$16 sps:$4 sm:$0xff]  }
 0x2c6   : > { %v6936_v21 = vld [vmem:[%s7370_s18 + $0x3c4] ss:$16 sps:$4 sm:$0xff]   ;;  %v6939_v23 = vld [vmem:[%s7370_s18 + $0x3c0] ss:$16 sps:$4 sm:$0xff]   ;;  %v6981_v49 = vld [vmem:[%s7370_s18 + $0x2ac] ss:$16 sps:$4 sm:$0xff]  }
 0x2c7   : > { %4808 = vmatpush1.bf16.msra.mxu0 %v6896_v50  ;;  %v6940_v13 = vld [vmem:[%s7370_s18 + $0x1e4] ss:$16 sps:$4 sm:$0xff]   ;;  %v6944_v15 = vld [vmem:[%s7370_s18 + $0x1e0] ss:$16 sps:$4 sm:$0xff]   ;;  %v6976_v50 = vld [vmem:[%s7370_s18 + $0xa8] ss:$16 sps:$4 sm:$0xff]  }
 0x2c8   : > { %4849 = vmatpush1.bf16.msra.mxu1 %v6897_v51  ;;  %4809 = vmatprep.subr.bf16.mxu0 %v6898_v52  ;;  %v6942_v14 = vld [vmem:[%s7370_s18 + $0x3e4] ss:$16 sps:$4 sm:$0xff]   ;;  %v6945_v16 = vld [vmem:[%s7370_s18 + $0x3e0] ss:$16 sps:$4 sm:$0xff]   ;;  %v6979_v51 = vld [vmem:[%s7370_s18 + $0x2a8] ss:$16 sps:$4 sm:$0xff]  }
 0x2c9   : > { %4850 = vmatprep.subr.bf16.mxu1 %v6900_v53  ;;  %v4013_v24 = vld [vmem:[%s7888_s23] sm:$0xff]  ;;  %v4015_v25 = vld [vmem:[%s7888_s23 + $0x10] sm:$0xff]  ;;  %v6984_v52 = vld [vmem:[%s7370_s18 + $0xcc] ss:$16 sps:$4 sm:$0xff]  }
 0x2ca   : > { %v7917_v28 = vpack.c.bf16 %v4013_v24, %v4013_v24  ;;  %v7919_v29 = vpack.c.bf16 %v4015_v25, %v4015_v25  ;;  %v6987_v53 = vld [vmem:[%s7370_s18 + $0x2cc] ss:$16 sps:$4 sm:$0xff]   ;;  %v7006_v6 = vld [vmem:[%s7370_s18 + $0x148] ss:$16 sps:$4 sm:$0xff]  }
 0x2cb   : > { %4810 = vmatpush1.bf16.msra.mxu0 %v6902_v54  ;;  %v6982_v54 = vld [vmem:[%s7370_s18 + $0xc8] ss:$16 sps:$4 sm:$0xff]   ;;  %v7038_v24 = vld [vmem:[%s7370_s18 + $0x1ec] ss:$16 sps:$4 sm:$0xff]  }
 0x2cc   : > { %4851 = vmatpush1.bf16.msra.mxu1 %v6903_v55  ;;  %4811 = vmatprep.subr.bf16.mxu0 %v6904_v56  ;;  %v6985_v55 = vld [vmem:[%s7370_s18 + $0x2c8] ss:$16 sps:$4 sm:$0xff]   ;;  %v6990_v56 = vld [vmem:[%s7370_s18 + $0xec] ss:$16 sps:$4 sm:$0xff]  }
 0x2cd   : > { %4852 = vmatprep.subr.bf16.mxu1 %v6906_v57  ;;  %v6993_v57 = vld [vmem:[%s7370_s18 + $0x2ec] ss:$16 sps:$4 sm:$0xff]  }
 0x2ce   : > { %v7041_v25 = vld [vmem:[%s7370_s18 + $0x3ec] ss:$16 sps:$4 sm:$0xff]  }
 0x2cf   : > { %4812 = vmatpush1.bf16.msra.mxu0 %v6908_v58  ;;  %v6988_v58 = vld [vmem:[%s7370_s18 + $0xe8] ss:$16 sps:$4 sm:$0xff]  }
 0x2d0   : > { %4853 = vmatpush1.bf16.msra.mxu1 %v6909_v59  ;;  %4813 = vmatprep.subr.bf16.mxu0 %v6910_v60  ;;  %v6991_v59 = vld [vmem:[%s7370_s18 + $0x2e8] ss:$16 sps:$4 sm:$0xff]   ;;  %v6996_v60 = vld [vmem:[%s7370_s18 + $0x10c] ss:$16 sps:$4 sm:$0xff]  }
 0x2d1   : > { %4854 = vmatprep.subr.bf16.mxu1 %v6912_v61  ;;  %v6999_v61 = vld [vmem:[%s7370_s18 + $0x30c] ss:$16 sps:$4 sm:$0xff]  }
 0x2d3   : > { %4814 = vmatpush1.bf16.msra.mxu0 %v6914_v62  ;;  %v6994_v62 = vld [vmem:[%s7370_s18 + $0x108] ss:$16 sps:$4 sm:$0xff]  }
 0x2d4   : > { %4855 = vmatpush1.bf16.msra.mxu1 %v6915_v63  ;;  %4815 = vmatprep.subr.bf16.mxu0 %v6916_v0  ;;  %v6997_v63 = vld [vmem:[%s7370_s18 + $0x308] ss:$16 sps:$4 sm:$0xff]   ;;  %v7002_v0 = vld [vmem:[%s7370_s18 + $0x12c] ss:$16 sps:$4 sm:$0xff]  }
 0x2d5   : > { %4856 = vmatprep.subr.bf16.mxu1 %v6918_v1  ;;  %v7005_v1 = vld [vmem:[%s7370_s18 + $0x32c] ss:$16 sps:$4 sm:$0xff]  }
 0x2d7   : > { %4816 = vmatpush1.bf16.msra.mxu0 %v6920_v3  ;;  %v7003_v3 = vld [vmem:[%s7370_s18 + $0x328] ss:$16 sps:$4 sm:$0xff]  }
 0x2d8   : > { %4857 = vmatpush1.bf16.msra.mxu1 %v6921_v4  ;;  %4817 = vmatprep.subr.bf16.mxu0 %v6922_v7  ;;  %v7008_v4 = vld [vmem:[%s7370_s18 + $0x14c] ss:$16 sps:$4 sm:$0xff]   ;;  %v7009_v7 = vld [vmem:[%s7370_s18 + $0x348] ss:$16 sps:$4 sm:$0xff]  }
 0x2d9   : > { %4858 = vmatprep.subr.bf16.mxu1 %v6924_v9  ;;  %v7017_v9 = vld [vmem:[%s7370_s18 + $0x36c] ss:$16 sps:$4 sm:$0xff]  }
 0x2db   : > { %4818 = vmatpush1.bf16.msra.mxu0 %v6926_v10  ;;  %v7012_v10 = vld [vmem:[%s7370_s18 + $0x168] ss:$16 sps:$4 sm:$0xff]  }
 0x2dc   : > { %4859 = vmatpush1.bf16.msra.mxu1 %v6927_v11  ;;  %4819 = vmatprep.subr.bf16.mxu0 %v6928_v12  ;;  %v7015_v11 = vld [vmem:[%s7370_s18 + $0x368] ss:$16 sps:$4 sm:$0xff]   ;;  %v7020_v12 = vld [vmem:[%s7370_s18 + $0x18c] ss:$16 sps:$4 sm:$0xff]  }
 0x2dd   : > { %4860 = vmatprep.subr.bf16.mxu1 %v6930_v17  ;;  %v7023_v17 = vld [vmem:[%s7370_s18 + $0x38c] ss:$16 sps:$4 sm:$0xff]  }
 0x2df   : > { %4820 = vmatpush1.bf16.msra.mxu0 %v6932_v18  ;;  %v7018_v18 = vld [vmem:[%s7370_s18 + $0x188] ss:$16 sps:$4 sm:$0xff]  }
 0x2e0   : > { %4861 = vmatpush1.bf16.msra.mxu1 %v6933_v19  ;;  %4821 = vmatprep.subr.bf16.mxu0 %v6934_v20  ;;  %v7021_v19 = vld [vmem:[%s7370_s18 + $0x388] ss:$16 sps:$4 sm:$0xff]   ;;  %v7026_v20 = vld [vmem:[%s7370_s18 + $0x1ac] ss:$16 sps:$4 sm:$0xff]  }
 0x2e1   : > { %4862 = vmatprep.subr.bf16.mxu1 %v6936_v21  ;;  %v7029_v21 = vld [vmem:[%s7370_s18 + $0x3ac] ss:$16 sps:$4 sm:$0xff]  }
 0x2e3   : > { %4822 = vmatpush1.bf16.msra.mxu0 %v6938_v22  ;;  %v7024_v22 = vld [vmem:[%s7370_s18 + $0x1a8] ss:$16 sps:$4 sm:$0xff]  }
 0x2e4   : > { %4863 = vmatpush1.bf16.msra.mxu1 %v6939_v23  ;;  %4823 = vmatprep.subr.bf16.mxu0 %v6940_v13  ;;  %v7027_v23 = vld [vmem:[%s7370_s18 + $0x3a8] ss:$16 sps:$4 sm:$0xff]   ;;  %v7032_v13 = vld [vmem:[%s7370_s18 + $0x1cc] ss:$16 sps:$4 sm:$0xff]  }
 0x2e5   : > { %4864 = vmatprep.subr.bf16.mxu1 %v6942_v14  ;;  %v7035_v14 = vld [vmem:[%s7370_s18 + $0x3cc] ss:$16 sps:$4 sm:$0xff]  }
 0x2e7   : > { %4824 = vmatpush1.bf16.msra.mxu0 %v6944_v15  ;;  %v7030_v15 = vld [vmem:[%s7370_s18 + $0x1c8] ss:$16 sps:$4 sm:$0xff]  }
 0x2e8   : > { %4865 = vmatpush1.bf16.msra.mxu1 %v6945_v16  ;;  %4875 = vmatprep.subr.bf16.mxu0 %v6948_v26  ;;  %v7033_v16 = vld [vmem:[%s7370_s18 + $0x3c8] ss:$16 sps:$4 sm:$0xff]  }
 0x2e9   : > { %4916 = vmatprep.subr.bf16.mxu1 %v6951_v27  ;;  %v7036_v26 = vld [vmem:[%s7370_s18 + $0x1e8] ss:$16 sps:$4 sm:$0xff]  }
 0x2ea   : > { %4826 = vmatmul.mubr.bf16.vlgmr.msra.gmra.mrb[0].mxu0 %v7917_v28  ;;  %v7039_v27 = vld [vmem:[%s7370_s18 + $0x3e8] ss:$16 sps:$4 sm:$0xff]  }
 0x2eb   : > { %4867 = vmatmul.mubr.bf16.vlgmr.msra.gmra.mrb[0].mxu1 %v7919_v29  ;;  %4876 = vmatpush1.bf16.msra.mxu0 %v6946_v30 }
 0x2ec   : > { %4917 = vmatpush1.bf16.msra.mxu1 %v6949_v31  ;;  %4877 = vmatprep.subr.bf16.mxu0 %v6954_v32  ;;  %v4021_v31 = vld [vmem:[#allocation4] sm:$0xff] }
 0x2ed   : > { %4918 = vmatprep.subr.bf16.mxu1 %v6957_v33  ;;  %4907 = vmatprep.mubr.bf16.mxu0 %v7893_v5  ;;  %v7011_v5 = vld [vmem:[%s7370_s18 + $0x34c] ss:$16 sps:$4 sm:$0xff]  }
 0x2ee   : > { %4948 = vmatprep.mubr.bf16.mxu1 %v4020_v8  ;;  %v7014_v8 = vld [vmem:[%s7370_s18 + $0x16c] ss:$16 sps:$4 sm:$0xff]  }
 0x2ef   : > { %4878 = vmatpush1.bf16.msra.mxu0 %v6952_v34 }
 0x2f0   : > { %4919 = vmatpush1.bf16.msra.mxu1 %v6955_v35  ;;  %4879 = vmatprep.subr.bf16.mxu0 %v6960_v36  ;;  %v4022_v35 = vld [vmem:[#allocation4 + $0x8] sm:$0xff] }
 0x2f1   : > { %4920 = vmatprep.subr.bf16.mxu1 %v6963_v37 }
 0x2f3   : > { %4880 = vmatpush1.bf16.msra.mxu0 %v6958_v38 }
 0x2f4   : > { %4921 = vmatpush1.bf16.msra.mxu1 %v6961_v39  ;;  %4881 = vmatprep.subr.bf16.mxu0 %v6966_v40 }
 0x2f5   : > { %4922 = vmatprep.subr.bf16.mxu1 %v6969_v41 }
 0x2f7   : > { %4882 = vmatpush1.bf16.msra.mxu0 %v6964_v42 }
 0x2f8   : > { %4923 = vmatpush1.bf16.msra.mxu1 %v6967_v43  ;;  %4883 = vmatprep.subr.bf16.mxu0 %v6972_v44 }
 0x2f9   : > { %4924 = vmatprep.subr.bf16.mxu1 %v6975_v45 }
 0x2fb   : > { %4884 = vmatpush1.bf16.msra.mxu0 %v6970_v46 }
 0x2fc   : > { %4925 = vmatpush1.bf16.msra.mxu1 %v6973_v47  ;;  %4885 = vmatprep.subr.bf16.mxu0 %v6978_v48  ;;  %v4024_v47 = vld [vmem:[#allocation4 + $0x18] sm:$0xff] }
 0x2fd   : > { %4926 = vmatprep.subr.bf16.mxu1 %v6981_v49 }
 0x2ff   : > { %4886 = vmatpush1.bf16.msra.mxu0 %v6976_v50 }
 0x300   : > { %4927 = vmatpush1.bf16.msra.mxu1 %v6979_v51  ;;  %4887 = vmatprep.subr.bf16.mxu0 %v6984_v52 }
 0x301   : > { %4928 = vmatprep.subr.bf16.mxu1 %v6987_v53 }
 0x303   : > { %4888 = vmatpush1.bf16.msra.mxu0 %v6982_v54 }
 0x304   : > { %4929 = vmatpush1.bf16.msra.mxu1 %v6985_v55  ;;  %4889 = vmatprep.subr.bf16.mxu0 %v6990_v56 }
 0x305   : > { %4930 = vmatprep.subr.bf16.mxu1 %v6993_v57 }
 0x307   : > { %4890 = vmatpush1.bf16.msra.mxu0 %v6988_v58 }
 0x308   : > { %4931 = vmatpush1.bf16.msra.mxu1 %v6991_v59  ;;  %4891 = vmatprep.subr.bf16.mxu0 %v6996_v60 }
 0x309   : > { %4932 = vmatprep.subr.bf16.mxu1 %v6999_v61 }
 0x30b   : > { %4892 = vmatpush1.bf16.msra.mxu0 %v6994_v62 }
 0x30c   : > { %4933 = vmatpush1.bf16.msra.mxu1 %v6997_v63  ;;  %4893 = vmatprep.subr.bf16.mxu0 %v7002_v0 }
 0x30d   : > { %4934 = vmatprep.subr.bf16.mxu1 %v7005_v1 }
 0x30f   : > { %4894 = vmatpush1.bf16.msra.mxu0 %v7000_v2 }
 0x310   : > { %4935 = vmatpush1.bf16.msra.mxu1 %v7003_v3  ;;  %4895 = vmatprep.subr.bf16.mxu0 %v7008_v4 }
 0x311   : > { %4936 = vmatprep.subr.bf16.mxu1 %v7011_v5 }
 0x313   : > { %4896 = vmatpush1.bf16.msra.mxu0 %v7006_v6 }
 0x314   : > { %4937 = vmatpush1.bf16.msra.mxu1 %v7009_v7  ;;  %4897 = vmatprep.subr.bf16.mxu0 %v7014_v8 }
 0x315   : > { %4938 = vmatprep.subr.bf16.mxu1 %v7017_v9 }
 0x317   : > { %4898 = vmatpush1.bf16.msra.mxu0 %v7012_v10 }
 0x318   : > { %4939 = vmatpush1.bf16.msra.mxu1 %v7015_v11  ;;  %4899 = vmatprep.subr.bf16.mxu0 %v7020_v12 }
 0x319   : > { %4940 = vmatprep.subr.bf16.mxu1 %v7023_v17 }
 0x31b   : > { %4900 = vmatpush1.bf16.msra.mxu0 %v7018_v18 }
 0x31c   : > { %4941 = vmatpush1.bf16.msra.mxu1 %v7021_v19  ;;  %4901 = vmatprep.subr.bf16.mxu0 %v7026_v20 }
 0x31d   : > { %4942 = vmatprep.subr.bf16.mxu1 %v7029_v21 }
 0x31f   : > { %4902 = vmatpush1.bf16.msra.mxu0 %v7024_v22 }
 0x320   : > { %4943 = vmatpush1.bf16.msra.mxu1 %v7027_v23  ;;  %4903 = vmatprep.subr.bf16.mxu0 %v7032_v13 }
 0x321   : > { %4944 = vmatprep.subr.bf16.mxu1 %v7035_v14 }
 0x323   : > { %4904 = vmatpush1.bf16.msra.mxu0 %v7030_v15 }
 0x324   : > { %4945 = vmatpush1.bf16.msra.mxu1 %v7033_v16  ;;  %4905 = vmatprep.subr.bf16.mxu0 %v7038_v24 }
 0x325   : > { %4946 = vmatprep.subr.bf16.mxu1 %v7041_v25 }
 0x327   : > { %4906 = vmatpush1.bf16.msra.mxu0 %v7036_v26 }
 0x328   : > { %4947 = vmatpush1.bf16.msra.mxu1 %v7039_v27 }
 0x32a   : > { %4908 = vmatmul.mubr.bf16.vlgmr.msra.gmra.mrb[4].mxu0 %v7917_v28  ;;  %v4023_v28 = vld [vmem:[#allocation4 + $0x10] sm:$0xff] }
 0x32b   : > { %4949 = vmatmul.mubr.bf16.vlgmr.msra.gmra.mrb[4].mxu1 %v7919_v29 }
 0x3bd   : > { %v4827_v30 = vpop.f32.mrb[0].mxu0 }
 0x3be   : > { %v4868_v32 = vpop.f32.mrb[0].mxu1  ;;  %v4829_v34 = vpop.f32.mrb[1].mxu0 }
 0x3bf   : > { %v4869_v33 = vadd.f32 %v4868_v32, %v4827_v30  ;;  %v4870_v36 = vpop.f32.mrb[1].mxu1  ;;  %v4831_v38 = vpop.f32.mrb[2].mxu0 }
 0x3c0   : > { %v4871_v37 = vadd.f32 %v4870_v36, %v4829_v34  ;;  %v4872_v39 = vpop.f32.mrb[2].mxu1  ;;  %v4832_v41 = vpop.f32.mrb[3].mxu0 }
 0x3c1   : > { %v4957_v40 = vadd.f32 %v4869_v33, %v4021_v31  ;;  %v4873_v42 = vpop.f32.mrb[3].mxu1 }
 0x3c2   : > { %v4958_v43 = vadd.f32 %v4871_v37, %v4022_v35 }
 0x3c3   : > { %4961 = vst [vmem:[#allocation4] sm:$0xff] %v4957_v40 }
 0x3c4   : > { %4962 = vst [vmem:[#allocation4 + $0x8] sm:$0xff] %v4958_v43 }
 0x3fd   : > { %v4909_v44 = vpop.f32.mrb[4].mxu0 }
 0x3fe   : > { %v4950_v45 = vpop.f32.mrb[4].mxu1  ;;  %v4911_v46 = vpop.f32.mrb[5].mxu0 }
 0x3ff   : > { %v4951_v29 = vadd.f32 %v4950_v45, %v4909_v44  ;;  %v4952_v48 = vpop.f32.mrb[5].mxu1  ;;  %v4913_v50 = vpop.f32.mrb[6].mxu0 }
 0x400   : > { %v4953_v49 = vadd.f32 %v4952_v48, %v4911_v46  ;;  %v4954_v51 = vpop.f32.mrb[6].mxu1  ;;  %v4914_v53 = vpop.f32.mrb[7].mxu0 }
 0x401   : > { %v4959_v52 = vadd.f32 %v4951_v29, %v4023_v28  ;;  %v4955_v54 = vpop.f32.mrb[7].mxu1 }
 0x402   : > { %v4960_v55 = vadd.f32 %v4953_v49, %v4024_v47 }
 0x403   : > { %4963 = vst [vmem:[#allocation4 + $0x10] sm:$0xff] %v4959_v52 }
 0x404   : > { %4964 = vst [vmem:[#allocation4 + $0x18] sm:$0xff] %v4960_v55 }
 0x405 PF: > { %p6101_p3 = scmp.ne.s32.totalorder %s7198_s24, 19 }
 0x406   : > { %v7042_v56 = vld [vmem:[%s8180_s7] sm:$0xff] (!%p6101_p3)   ;;  %v7115_v57 = vmov (!%p6101_p3), 0.0   ;;  %vm7116_vm0 = vmmov (!%p6101_p3), 0   ;;  %v7045_v60 = vld [vmem:[%s8180_s7 + $0x8] sm:$0xff] (!%p6101_p3)   ;;  %v7048_v63 = vld [vmem:[%s8180_s7 + $0x10] sm:$0xff] (!%p6101_p3)   ;;  %v4975_v5 = vlaneseq (!%p6101_p3)  ;;  %vm5497_vm1 = vcmask (!%p6101_p3), 523264  }
 0x407   : > { %4968 = sbr.rel (%p6101_p3) target bundleno = 1846 (0x736), region = 107  ;;  %6215 = vmatprep.subr.bf16.mxu0 (!%p6101_p3), %v7115_v57  ;;  %v7043_v58 = vld [vmem:[%s8179_s6 + $0x40] sm:$0xff] (!%p6101_p3)   ;;  %6231 = vmatprep.mubr.msk.bf16.mxu0 (!%p6101_p3), %vm7116_vm0, %v7115_v57  ;;  %v7046_v61 = vld [vmem:[%s8179_s6 + $0x48] sm:$0xff] (!%p6101_p3)   ;;  %v7049_v0 = vld [vmem:[%s8179_s6 + $0x50] sm:$0xff] (!%p6101_p3)  }
 0x408   : > { %6216 = vmatpush3.bf16.msra.mxu0 (!%p6101_p3), %v7042_v56  ;;  %v7044_v59 = vld [vmem:[%s8179_s6] sm:$0xff] (!%p6101_p3)   ;;  %6166 = vmatprep.subr.bf16.mxu1 (!%p6101_p3), %v7043_v58  ;;  %v7047_v62 = vld [vmem:[%s8179_s6 + $0x8] sm:$0xff] (!%p6101_p3)   ;;  %v7050_v1 = vld [vmem:[%s8179_s6 + $0x10] sm:$0xff] (!%p6101_p3)   ;;  %v8042_v9 = vshrl.u32 (!%p6101_p3), %v4975_v5, 7 }
 0x409   : > { %6217 = vmatprep.subr.bf16.mxu0 (!%p6101_p3), %v7115_v57  ;;  %6167 = vmatpush3.bf16.msra.mxu1 (!%p6101_p3), %v7044_v59  ;;  %v7051_v2 = vld [vmem:[%s8180_s7 + $0x18] sm:$0xff] (!%p6101_p3)   ;;  %v7055_v6 = vld [vmem:[%s8179_s6 + $0x60] sm:$0xff] (!%p6101_p3)   ;;  %v7058_v10 = vld [vmem:[%s8179_s6 + $0x68] sm:$0xff] (!%p6101_p3)  }
 0x40a   : > { %6168 = vmatprep.subr.bf16.mxu1 (!%p6101_p3), %v7046_v61  ;;  %v7052_v3 = vld [vmem:[%s8179_s6 + $0x58] sm:$0xff] (!%p6101_p3)   ;;  %v7054_v7 = vld [vmem:[%s8180_s7 + $0x20] sm:$0xff] (!%p6101_p3)   ;;  %v7057_v11 = vld [vmem:[%s8180_s7 + $0x28] sm:$0xff] (!%p6101_p3)   ;;  %v4981_v17 = vsub.s32 (!%p6101_p3), 1, %v8042_v9  ;;  %v4977_v19 = vsub.s32 (!%p6101_p3), 0, %v8042_v9  ;;  %v4989_v39 = vsub.s32 (!%p6101_p3), 3, %v8042_v9 }
 0x40b   : > { %v7053_v4 = vld [vmem:[%s8179_s6 + $0x18] sm:$0xff] (!%p6101_p3)   ;;  %v7056_v8 = vld [vmem:[%s8179_s6 + $0x20] sm:$0xff] (!%p6101_p3)   ;;  %v7059_v12 = vld [vmem:[%s8179_s6 + $0x28] sm:$0xff] (!%p6101_p3)   ;;  %v4985_v47 = vsub.s32 (!%p6101_p3), 2, %v8042_v9 }
 0x40c   : > { %6218 = vmatpush3.bf16.msra.mxu0 (!%p6101_p3), %v7045_v60  ;;  %v7061_v18 = vld [vmem:[%s8179_s6 + $0x70] sm:$0xff] (!%p6101_p3)   ;;  %v7063_v22 = vld [vmem:[%s8180_s7 + $0x38] sm:$0xff] (!%p6101_p3)   ;;  %v4970_v23 = vld [vmem:[#allocation4 + $0x8] sm:$0xff] (!%p6101_p3) }
 0x40d   : > { %6219 = vmatprep.subr.bf16.mxu0 (!%p6101_p3), %v7115_v57  ;;  %6169 = vmatpush3.bf16.msra.mxu1 (!%p6101_p3), %v7047_v62  ;;  %v7060_v20 = vld [vmem:[%s8180_s7 + $0x30] sm:$0xff] (!%p6101_p3)   ;;  %v4973_v13 = vld [vmem:[%s8177_s4] sm:$0xf] (!%p6101_p3)  ;;  %v7064_v14 = vld [vmem:[%s8179_s6 + $0x78] sm:$0xff] (!%p6101_p3)  }
 0x40e   : > { %6170 = vmatprep.subr.bf16.mxu1 %v7049_v0  ;;  %v7062_v21 = vld [vmem:[%s8179_s6 + $0x30] sm:$0xff]   ;;  %v4982_v15 = vrot.slane %v4973_v13, %v4981_v17  ;;  %v4978_v16 = vrot.slane %v4973_v13, %v4977_v19  ;;  %v7065_v24 = vld [vmem:[%s8179_s6 + $0x38] sm:$0xff]   ;;  %v4969_v25 = vld [vmem:[#allocation4] sm:$0xff]  ;;  %v4990_v42 = vrot.slane %v4973_v13, %v4989_v39  ;;  %v4986_v51 = vrot.slane %v4973_v13, %v4985_v47 }
 0x40f   : > { %v7066_v27 = vld [vmem:[%s8179_s6 + $0xc0] sm:$0xff]   ;;  %v7068_v37 = vld [vmem:[%s8179_s6 + $0xc8] sm:$0xff]   ;;  %v7070_v40 = vld [vmem:[%s8179_s6 + $0xd0] sm:$0xff]  }
 0x410   : > { %6220 = vmatpush3.bf16.msra.mxu0 %v7048_v63  ;;  %v4996_v26 = vadd.f32 %v4982_v15, %v4970_v23  ;;  %v4995_v30 = vadd.f32 %v4978_v16, %v4969_v25  ;;  %v5071_v31 = vld [vmem:[%s8178_s5] sm:$0xf]  ;;  %v7069_v38 = vld [vmem:[%s8179_s6 + $0x88] sm:$0xff]   ;;  %v7071_v41 = vld [vmem:[%s8179_s6 + $0x90] sm:$0xff]   ;;  %v5542_v15 = vand.u32 127, %v4975_v5 }
 0x411   : > { %6221 = vmatprep.subr.bf16.mxu0 %v7115_v57  ;;  %6171 = vmatpush3.bf16.msra.mxu1 %v7050_v1  ;;  %v7067_v34 = vld [vmem:[%s8179_s6 + $0x80] sm:$0xff]   ;;  %v7072_v43 = vld [vmem:[%s8179_s6 + $0xd8] sm:$0xff]   ;;  %v7076_v50 = vld [vmem:[%s8179_s6 + $0xe8] sm:$0xff]  }
 0x412   : > { %6172 = vmatprep.subr.bf16.mxu1 %v7052_v3  ;;  %v5000_v32 = vmax.f32 %v4996_v26, 0.0  ;;  %v4999_v33 = vmax.f32 %v4995_v30, 0.0  ;;  %v7073_v44 = vld [vmem:[%s8179_s6 + $0x98] sm:$0xff]   ;;  %v7074_v28 = vld [vmem:[%s8179_s6 + $0xe0] sm:$0xff]   ;;  %v7077_v52 = vld [vmem:[%s8179_s6 + $0xa8] sm:$0xff]   ;;  %vm5543_vm2 = vcmp.lt.s32.totalorder %v5542_v15, 6 }
 0x413   : > { %v4972_v45 = vld [vmem:[#allocation4 + $0x18] sm:$0xff]  ;;  %v7075_v48 = vld [vmem:[%s8179_s6 + $0xa0] sm:$0xff]   ;;  %v4971_v53 = vld [vmem:[#allocation4 + $0x10] sm:$0xff] }
 0x414   : > { %6222 = vmatpush3.bf16.msra.mxu0 %v7051_v2  ;;  %v5004_v35 = vpack.c.bf16 %v5000_v32, %v5000_v32  ;;  %v5003_v36 = vpack.c.bf16 %v4999_v33, %v4999_v33  ;;  %v4998_v29 = vadd.f32 %v4990_v42, %v4972_v45  ;;  %v7078_v54 = vld [vmem:[%s8179_s6 + $0xf0] sm:$0xff]   ;;  %v4997_v55 = vadd.f32 %v4986_v51, %v4971_v53  ;;  %v7080_v58 = vld [vmem:[%s8179_s6 + $0xf8] sm:$0xff]   ;;  %v7082_v62 = vld [vmem:[%s8182_s9] sm:$0xff]  }
 0x415   : > { %6223 = vmatprep.subr.bf16.mxu0 %v7115_v57  ;;  %6173 = vmatpush3.bf16.msra.mxu1 %v7053_v4  ;;  %v7079_v56 = vld [vmem:[%s8179_s6 + $0xb0] sm:$0xff]   ;;  %v7081_v60 = vld [vmem:[%s8179_s6 + $0xb8] sm:$0xff]   ;;  %v7083_v63 = vld [vmem:[%s8182_s9 + $0x8] sm:$0xff]  }
 0x416   : > { %6174 = vmatprep.subr.bf16.mxu1 %v7055_v6  ;;  %5400 = vmatprep.mubr.bf16.mxu1 %v5004_v35  ;;  %v5002_v46 = vmax.f32 %v4998_v29, 0.0  ;;  %v5001_v59 = vmax.f32 %v4997_v55, 0.0  ;;  %v7084_v0 = vld [vmem:[%s8182_s9 + $0x10] sm:$0xff]   ;;  %v7085_v1 = vld [vmem:[%s8182_s9 + $0x18] sm:$0xff]   ;;  %v6143_v16 = vld [vmem:[%s8183_s10] ss:$0 sm:$0xff] }
 0x418   : > { %6224 = vmatpush3.bf16.msra.mxu0 %v7054_v7  ;;  %v5006_v49 = vpack.c.bf16 %v5002_v46, %v5002_v46  ;;  %v5005_v61 = vpack.c.bf16 %v5001_v59, %v5001_v59 }
 0x419   : > { %6225 = vmatprep.subr.bf16.mxu0 %v7115_v57  ;;  %6175 = vmatpush3.bf16.msra.mxu1 %v7056_v8 }
 0x41a   : > { %6176 = vmatprep.subr.bf16.mxu1 %v7058_v10 }
 0x41c   : > { %6226 = vmatpush3.bf16.msra.mxu0 %v7057_v11 }
 0x41d   : > { %6227 = vmatprep.subr.bf16.mxu0 %v7115_v57  ;;  %6177 = vmatpush3.bf16.msra.mxu1 %v7059_v12 }
 0x41e   : > { %6178 = vmatprep.subr.bf16.mxu1 %v7061_v18 }
 0x420   : > { %6228 = vmatpush3.bf16.msra.mxu0 %v7060_v20 }
 0x421   : > { %6229 = vmatprep.subr.bf16.mxu0 %v7115_v57  ;;  %6179 = vmatpush3.bf16.msra.mxu1 %v7062_v21 }
 0x422   : > { %6180 = vmatprep.subr.bf16.mxu1 %v7064_v14 }
 0x424   : > { %6230 = vmatpush3.bf16.msra.mxu0 %v7063_v22 }
 0x425   : > { %6188 = vmatprep.subr.bf16.mxu0 %v7066_v27  ;;  %6181 = vmatpush3.bf16.msra.mxu1 %v7065_v24 }
 0x426   : > { %6235 = vmatprep.subr.bf16.mxu1 %v7115_v57 }
 0x427   : > { %6232 = vmatmul.mubr.bf16.vlgmr.msra.gmra.mrb[0].mxu0 %v5071_v31 }
 0x428   : > { %6189 = vmatpush3.bf16.msra.mxu0 %v7067_v34  ;;  %5401 = vmatmul.mubr.bf16.vlgmr.msra.gmra.mrb[0].mxu1 %v5003_v36 }
 0x429   : > { %6190 = vmatprep.subr.bf16.mxu0 %v7068_v37  ;;  %6243 = vmatprep.mubr.msk.bf16.mxu1 %vm7116_vm0, %v7115_v57 }
 0x42a   : > { %5440 = vmatprep.mubr.bf16.mxu0 %v5006_v49  ;;  %6236 = vmatpush3.bf16.msra.mxu1 %v7082_v62 }
 0x42b   : > { %6237 = vmatprep.subr.bf16.mxu1 %v7115_v57 }
 0x42c   : > { %6191 = vmatpush3.bf16.msra.mxu0 %v7069_v38 }
 0x42d   : > { %6192 = vmatprep.subr.bf16.mxu0 %v7070_v40 }
 0x42e   : > { %6238 = vmatpush3.bf16.msra.mxu1 %v7083_v63 }
 0x42f   : > { %6239 = vmatprep.subr.bf16.mxu1 %v7115_v57 }
 0x430   : > { %6193 = vmatpush3.bf16.msra.mxu0 %v7071_v41 }
 0x431   : > { %6194 = vmatprep.subr.bf16.mxu0 %v7072_v43 }
 0x432   : > { %6240 = vmatpush3.bf16.msra.mxu1 %v7084_v0 }
 0x433   : > { %6241 = vmatprep.subr.bf16.mxu1 %v7115_v57  ;;  %v6142_v57 = vld [vmem:[%s8181_s8] ss:$0 sm:$0xff] }
 0x434   : > { %6195 = vmatpush3.bf16.msra.mxu0 %v7073_v44 }
 0x435   : > { %6196 = vmatprep.subr.bf16.mxu0 %v7074_v28 }
 0x436   : > { %6242 = vmatpush3.bf16.msra.mxu1 %v7085_v1 }
 0x438   : > { %6197 = vmatpush3.bf16.msra.mxu0 %v7075_v48 }
 0x439   : > { %6198 = vmatprep.subr.bf16.mxu0 %v7076_v50 }
 0x43c   : > { %6199 = vmatpush3.bf16.msra.mxu0 %v7077_v52 }
 0x43d   : > { %6200 = vmatprep.subr.bf16.mxu0 %v7078_v54 }
 0x440   : > { %6201 = vmatpush3.bf16.msra.mxu0 %v7079_v56 }
 0x441   : > { %6202 = vmatprep.subr.bf16.mxu0 %v7080_v58 }
 0x444   : > { %6203 = vmatpush3.bf16.msra.mxu0 %v7081_v60 }
 0x447   : > { %5441 = vmatmul.mubr.bf16.vlgmr.msra.gmra.mrb[4].mxu0 %v5005_v61 }
 0x4fa   : > { %v5170_v2 = vpop.f32.mrb[0].mxu0 }
 0x4fb   : > { %v6233_v3 = vpop.f32.mrb[1].mxu0  ;;  %v6182_v4 = vpop.f32.mrb[0].mxu1 }
 0x4fc   : > { %v5173_v6 = vpop.f32.mrb[2].mxu0  ;;  %v6183_v7 = vpop.f32.mrb[1].mxu1 }
 0x4fd   : > { %v6234_v8 = vpop.f32.mrb[3].mxu0  ;;  %v6184_v9 = vadd.f32 %v6183_v7, %v6182_v4  ;;  %v6185_v10 = vpop.f32.mrb[2].mxu1 }
 0x4fe   : > { %v6186_v11 = vpop.f32.mrb[3].mxu1 }
 0x4ff   : > { %v5403_v12 = vadd.f32 %v6184_v9, %v5170_v2 }
 0x51a   : > { %v6204_v17 = vpop.f32.mrb[4].mxu0 }
 0x51b   : > { %v6205_v18 = vpop.f32.mrb[5].mxu0 }
 0x51c   : > { %v6206_v19 = vadd.f32 %v6205_v18, %v6204_v17  ;;  %v6207_v20 = vpop.f32.mrb[6].mxu0 }
 0x51d   : > { %v6208_v21 = vpop.f32.mrb[7].mxu0 }
 0x51e   : > { %v5443_v22 = vadd.f32 %v6206_v19, %v5403_v12 }
 0x520   : > { %v5455_v23 = vadd.f32 %v6142_v57, %v5443_v22 }
 0x522   : > { %v5456_v13 = vmax.f32 %v5455_v23, 0.0 }
 0x524   : > { %v5457_v14 = vpack.c.bf16 %v5456_v13, %v5456_v13 }
 0x526   : > { %6244 = vmatmul.mubr.msk.bf16.vlgmr.msra.gmra.mrb[4].mxu1 %vm5497_vm1, %v5457_v14 }
 0x5f9   : > { %v5535_v24 = vpop.f32.mrb[4].mxu1 }
 0x5fa   : > { %v5536_v25 = vadd.f32 %v6143_v16, %v5535_v24  ;;  %v6245_v26 = vpop.f32.mrb[5].mxu1 }
 0x5fb   : > { %v5538_v27 = vpop.f32.mrb[6].mxu1 }
 0x5fc   : > { %v6246_v30 = vpop.f32.mrb[7].mxu1  ;;  %v5544_v31 = vsel %vm5543_vm2, %v5536_v25, -1e+30 }
 0x5fd   : > { %5546 = vmax.xlane.f32.xlu0 %v5544_v31  ;;  %5545 = vst [vmem:[%s8185_s12] sm:$0xff] %v5544_v31 }
 0x68a   : > { %v5547_v32 = vpop.xlane.xlu0 %5546 }
 0x68b   : > { %v5548_v33 = vsub.f32 %v5544_v31, %v5547_v32 }
 0x68d   : > { %v5549_v34 = vmul.f32 1.442695, %v5548_v33 }
 0x68f   : > { %7086 = vpow2.f32 %v5549_v34 }
 0x699   : > { %v7087_v5 = vpop.eup %7086 }
 0x69a   : > { %5551 = vadd.xlane.f32.xlu0 %v7087_v5 }
 0x727   : > { %v5552_v35 = vpop.xlane.xlu0 %5551 }
 0x728   : > { %7088 = vrcp.f32 %v5552_v35 }
 0x732   : > { %v7089_v36 = vpop.eup %7088 }
 0x733   : > { %v5554_v37 = vmul.f32 %v7089_v36, %v7087_v5 }
 0x735   : > { %5555 = vst [vmem:[%s8184_s11] sm:$0xff] %v5554_v37 }
 0x736 PF: > { %p20_p4 = scmp.ge.s32.totalorder %s7201_s25, 22   ;;  %s8186_s21 = smov %s7108_s22 }
 0x737   : > { %s8187_s22 = smov %s7212_s30  ;;  %s8188_s23 = smov %s7201_s25 }
 0x738   :  { %22 = sbr.rel (!%p20_p4) target bundleno = 2 (0x2), region = 153 }

</bundles_post_ra>
